<compile_context>
chip_gen: v6e
topology: v6e:2x2x1
jax: 0.10.0
libtpu: 0.0.40
codegen_flags: <defaults>
</compile_context>

<pallas_src>
import functools

import jax
import jax.numpy as jnp
from jax.experimental import pallas as pl
from jax.experimental.pallas import tpu as pltpu


SWIN_FEATURE_CHANNELS = (96, 192, 384, 768)


# ----------------------------------------------------------------------------
# Pallas kernel: fused projection of two feature streams (concat-free 1x1 conv)
#   o[:, :] = Wx @ x + Wy @ y + b     (bf16 MXU operands, f32 accumulate,
#                                      f32 bias add, bf16 store, NCHW layout)
# ----------------------------------------------------------------------------
def _fused_project_kernel(x_ref, y_ref, wx_ref, wy_ref, b_ref, o_ref):
    # f32 activations come straight from HBM; the bf16 cast happens here on the
    # otherwise-idle VPU, so there is no separate XLA cast pass over HBM.
    x = x_ref[0].astype(jnp.bfloat16)          # (Cx, t_hw)
    y = y_ref[0].astype(jnp.bfloat16)          # (Cy, t_hw)
    acc = jnp.dot(wx_ref[...], x, preferred_element_type=jnp.float32)
    acc = acc + jnp.dot(wy_ref[...], y, preferred_element_type=jnp.float32)
    acc = acc + b_ref[...]                     # (Cout, 1) f32, broadcast over lanes
    o_ref[0] = acc.astype(o_ref.dtype)         # single bf16 store, already NCHW


def fused_project(x3d, y3d, wx, wy, bias, *, hw_tile=1024,
                  out_dtype=jnp.bfloat16):
    """Fused concat-free 1x1 conv over two channels-first feature streams.

    x3d: (N, Cx, HW) f32   y3d: (N, Cy, HW) f32
    wx:  (Cout, Cx) bf16   wy:  (Cout, Cy) bf16   bias: (Cout, 1) f32
    returns (N, Cout, HW) in out_dtype (default bf16).
    """
    n, cx, hw = x3d.shape
    _, cy, _ = y3d.shape
    cout = wx.shape[0]
    assert hw_tile % 128 == 0, "spatial tile must keep stores lane-dense"

    # Full spatial extent when small (always a legal block), otherwise a
    # multiple-of-128 tile so the spatial (lane) dim of every block is dense.
    t_hw = hw if hw <= hw_tile else hw_tile
    grid = (n, pl.cdiv(hw, t_hw))

    out_itemsize = jnp.dtype(out_dtype).itemsize
    cost = pl.CostEstimate(
        flops=2 * n * hw * (cx + cy) * cout,
        transcendentals=0,
        bytes_accessed=(
            x3d.size * x3d.dtype.itemsize
            + y3d.size * y3d.dtype.itemsize
            + wx.size * wx.dtype.itemsize
            + wy.size * wy.dtype.itemsize
            + bias.size * bias.dtype.itemsize
            + n * cout * hw * out_itemsize
        ),
    )

    return pl.pallas_call(
        _fused_project_kernel,
        out_shape=jax.ShapeDtypeStruct((n, cout, hw), out_dtype),
        grid=grid,
        in_specs=[
            pl.BlockSpec((1, cx, t_hw), lambda b, j: (b, 0, j)),
            pl.BlockSpec((1, cy, t_hw), lambda b, j: (b, 0, j)),
            # Constant block index -> weights/bias stay VMEM-resident.
            pl.BlockSpec((cout, cx), lambda b, j: (0, 0)),
            pl.BlockSpec((cout, cy), lambda b, j: (0, 0)),
            pl.BlockSpec((cout, 1), lambda b, j: (0, 0)),
        ],
        out_specs=pl.BlockSpec((1, cout, t_hw), lambda b, j: (b, 0, j)),
        compiler_params=pltpu.CompilerParams(
            # Both axes are independent -> megacore-shard on v7x; >=2 steps
            # even at tiny shapes (batch axis).
            dimension_semantics=("parallel", "parallel"),
            # Big enough for hw_tile=1024 at level 4 (~23 MiB of blocks),
            # still well under v7x's 64 MiB per-TC VMEM.
            vmem_limit_bytes=48 * 1024 * 1024,
        ),
        cost_estimate=cost,
    )(x3d, y3d, wx, wy, bias)


# ----------------------------------------------------------------------------
# Parameter construction (mirrors VOSNet.__init__ for the 'swin_tiny' branch:
# project{1..4} = Conv2d(2*C_l -> C_l, 1, 1), weight ~ N(0, 0.01^2)).
# ----------------------------------------------------------------------------
def init_vosnet_params(key):
    params = {}
    for idx, c in enumerate(SWIN_FEATURE_CHANNELS, start=1):
        kw, kb, key = jax.random.split(key, 3)
        cin, cout = 2 * c, c
        bound = 1.0 / (cin ** 0.5)  # PyTorch Conv2d default bias init range
        params[f"project{idx}"] = {
            "weight": 0.01 * jax.random.normal(kw, (cout, cin), jnp.float32),
            "bias": jax.random.uniform(
                kb, (cout,), jnp.float32, minval=-bound, maxval=bound
            ),
        }
    return params


def prepare_projection_params(params, compute_dtype=jnp.bfloat16):
    """One-time transform of the Conv2d weights into kernel-ready form:
    keep the PyTorch (Cout, Cin) layout, split along Cin into the two halves
    (concat-free fusion), cast weights to the MXU compute dtype; bias stays
    f32 as a (Cout, 1) column so it broadcasts over the spatial (lane) dim.
    No Cout padding: the output block is channels-on-sublanes, so padding
    would only add HBM writeback on a memory-bound kernel."""
    prepped = {}
    for name, p in params.items():
        w = p["weight"]  # (Cout, Cin)
        b = p["bias"]    # (Cout,)
        cout, cin = w.shape
        cx = cin // 2
        prepped[name] = {
            "wx": w[:, :cx].astype(compute_dtype),
            "wy": w[:, cx:].astype(compute_dtype),
            "bias": b.reshape(cout, 1).astype(jnp.float32),
        }
    return prepped


# ----------------------------------------------------------------------------
# Backbone stub (channels-first, like the real swin_tiny feature pyramid).
# TODO(synk): the real backbone is a pretrained swin_tiny loaded from a .pth
# checkpoint (no source / weights available); replaced with a deterministic
# strided average-pool + fixed channel-lift feature pyramid with the correct
# swin_tiny channel counts and /4,/8,/16,/32 strides, emitted in NCHW so the
# projection hot path needs no layout changes at all.
# ----------------------------------------------------------------------------
def make_backbone_lifts(key, in_ch=3):
    lifts = []
    for c in SWIN_FEATURE_CHANNELS:
        key, sub = jax.random.split(key)
        lifts.append(0.1 * jax.random.normal(sub, (in_ch, c), jnp.float32))
    return lifts


def stub_backbone(img_nchw, lift_ws):
    N, C, H, W = img_nchw.shape
    feats = []
    for stride, w in zip((4, 8, 16, 32), lift_ws):
        h, wd = H // stride, W // stride
        pooled = img_nchw.reshape(N, C, h, stride, wd, stride).mean(axis=(3, 5))
        feats.append(jnp.einsum("nchw,cd->ndhw", pooled, w))  # NCHW feature
    return feats


# ----------------------------------------------------------------------------
# VOSNet forward.
# ----------------------------------------------------------------------------
def vosnet_forward(proj_params, backbone_x_lifts, backbone_y_lifts, x, y):
    output_x = stub_backbone(x, backbone_x_lifts)  # list of NCHW features
    output_y = stub_backbone(y, backbone_y_lifts)

    fuses = []
    for lvl in range(4):
        fx, fy = output_x[lvl], output_y[lvl]
        n, c, h, w = fx.shape
        p = proj_params[f"project{lvl + 1}"]
        fuse = fused_project(
            fx.reshape(n, c, h * w),   # free reshape (spatial dims contiguous)
            fy.reshape(n, c, h * w),
            p["wx"], p["wy"], p["bias"],
        )
        # Kernel output is already (n, Cout, h*w) in NCHW order with no channel
        # padding -> the reshape below is free; no slice / transpose HBM pass.
        fuses.append(fuse.reshape(n, -1, h, w))

    # TODO(synk): mask2former (lib.MaskFormerModel) and decode_head
    # (lib.SegFormerHead) are external modules with no source; the fused
    # feature pyramid fed to mask2former is returned instead.
    return tuple(fuses)


# ----------------------------------------------------------------------------
# Main
# ----------------------------------------------------------------------------
if __name__ == "__main__":
    key = jax.random.PRNGKey(0)
    k_params, k_bx, k_by, k_x, k_y = jax.random.split(key, 5)

    params = init_vosnet_params(k_params)
    proj_params = prepare_projection_params(params)
    lifts_x = make_backbone_lifts(k_bx)
    lifts_y = make_backbone_lifts(k_by)

    # Small images; swin_tiny-style pyramid strides require H,W % 32 == 0.
    x = jax.random.normal(k_x, (2, 3, 64, 64), jnp.float32)
    y = jax.random.normal(k_y, (2, 3, 64, 64), jnp.float32)

    fwd = jax.jit(
        functools.partial(vosnet_forward, proj_params, lifts_x, lifts_y)
    )
    out = fwd(x, y)
    out = jax.block_until_ready(out)

    # Sanity: Pallas fused projection vs pure-JAX reference (same bf16-rounded
    # operands, f32 accumulation + f32 bias; the only extra error is the final
    # bf16 store of the kernel output -> ~0.4% relative tolerance).
    ox = stub_backbone(x, lifts_x)
    oy = stub_backbone(y, lifts_y)
    for lvl in range(4):
        p = params[f"project{lvl + 1}"]
        w = p["weight"].astype(jnp.bfloat16).astype(jnp.float32)
        cxh = w.shape[1] // 2
        fx = ox[lvl].astype(jnp.bfloat16).astype(jnp.float32)
        fy = oy[lvl].astype(jnp.bfloat16).astype(jnp.float32)
        ref = (
            jnp.einsum("nchw,oc->nohw", fx, w[:, :cxh])
            + jnp.einsum("nchw,oc->nohw", fy, w[:, cxh:])
            + p["bias"][None, :, None, None]
        )
        got = out[lvl].astype(jnp.float32)
        assert jnp.allclose(got, ref, atol=1e-4, rtol=1e-2), \
            f"mismatch at level {lvl + 1}"

    expected_shapes = [(2, 96, 16, 16), (2, 192, 8, 8), (2, 384, 4, 4),
                       (2, 768, 2, 2)]
    assert [tuple(o.shape) for o in out] == expected_shapes

    print("KERNEL_OK")
</pallas_src>

<mosaic_0001>
module attributes {stable_mosaic.version = 11 : i64} {
  func.func @_fused_project_kernel(%arg0: i32, %arg1: i32, %arg2: memref<1x96x256xf32, #tpu.memory_space<vmem>>, %arg3: memref<1x96x256xf32, #tpu.memory_space<vmem>>, %arg4: memref<96x96xbf16, #tpu.memory_space<vmem>>, %arg5: memref<96x96xbf16, #tpu.memory_space<vmem>>, %arg6: memref<96x1xf32, #tpu.memory_space<vmem>>, %arg7: memref<1x96x256xbf16, #tpu.memory_space<vmem>>) attributes {dimension_semantics = [#tpu.dimension_semantics<parallel>, #tpu.dimension_semantics<parallel>], iteration_bounds = array<i64: 2, 1>, scalar_prefetch = 0 : i64, scratch_operands = 0 : i64, tpu.core_type = #tpu.core_type<tc>, window_params = [{transform_indices = @transform_0, window_bounds = array<i64: 1, 96, 256>}, {transform_indices = @transform_1, window_bounds = array<i64: 1, 96, 256>}, {pipeline_mode = #tpu.pipeline_mode<synchronous>, transform_indices = @transform_2, window_bounds = array<i64: 96, 96>}, {pipeline_mode = #tpu.pipeline_mode<synchronous>, transform_indices = @transform_3, window_bounds = array<i64: 96, 96>}, {pipeline_mode = #tpu.pipeline_mode<synchronous>, transform_indices = @transform_4, window_bounds = array<i64: 96, 1>}, {transform_indices = @transform_5, window_bounds = array<i64: 1, 96, 256>}]} {
    %c0 = arith.constant 0 : index
    %c0_0 = arith.constant 0 : index
    %c0_1 = arith.constant 0 : index
    %0 = vector.load %arg2[%c0, %c0_0, %c0_1] : memref<1x96x256xf32, #tpu.memory_space<vmem>>, vector<1x96x256xf32>
    %1 = vector.shape_cast %0 : vector<1x96x256xf32> to vector<96x256xf32>
    %2 = arith.truncf %1 : vector<96x256xf32> to vector<96x256xbf16>
    %c0_2 = arith.constant 0 : index
    %c0_3 = arith.constant 0 : index
    %c0_4 = arith.constant 0 : index
    %3 = vector.load %arg3[%c0_2, %c0_3, %c0_4] : memref<1x96x256xf32, #tpu.memory_space<vmem>>, vector<1x96x256xf32>
    %4 = vector.shape_cast %3 : vector<1x96x256xf32> to vector<96x256xf32>
    %5 = arith.truncf %4 : vector<96x256xf32> to vector<96x256xbf16>
    %c0_5 = arith.constant 0 : index
    %c0_6 = arith.constant 0 : index
    %6 = vector.load %arg4[%c0_5, %c0_6] : memref<96x96xbf16, #tpu.memory_space<vmem>>, vector<96x96xbf16>
    %cst = arith.constant dense<0.000000e+00> : vector<96x256xf32>
    %7 = tpu.matmul %6, %2, %cst {dimension_numbers = #tpu.dot_dimension_numbers<[1], [0], [0], [1], [0, 0, 1, 1], [], []>} : vector<96x96xbf16>, vector<96x256xbf16>, vector<96x256xf32> -> vector<96x256xf32>
    %c0_7 = arith.constant 0 : index
    %c0_8 = arith.constant 0 : index
    %8 = vector.load %arg5[%c0_7, %c0_8] : memref<96x96xbf16, #tpu.memory_space<vmem>>, vector<96x96xbf16>
    %cst_9 = arith.constant dense<0.000000e+00> : vector<96x256xf32>
    %9 = tpu.matmul %8, %5, %cst_9 {dimension_numbers = #tpu.dot_dimension_numbers<[1], [0], [0], [1], [0, 0, 1, 1], [], []>} : vector<96x96xbf16>, vector<96x256xbf16>, vector<96x256xf32> -> vector<96x256xf32>
    %10 = arith.addf %7, %9 : vector<96x256xf32>
    %c0_10 = arith.constant 0 : index
    %c0_11 = arith.constant 0 : index
    %11 = vector.load %arg6[%c0_10, %c0_11] : memref<96x1xf32, #tpu.memory_space<vmem>>, vector<96x1xf32>
    %12 = vector.broadcast %11 : vector<96x1xf32> to vector<96x256xf32>
    %13 = arith.addf %10, %12 : vector<96x256xf32>
    %14 = arith.truncf %13 : vector<96x256xf32> to vector<96x256xbf16>
    %c0_12 = arith.constant 0 : index
    %c0_13 = arith.constant 0 : index
    %c0_14 = arith.constant 0 : index
    %15 = vector.load %arg7[%c0_12, %c0_13, %c0_14] : memref<1x96x256xbf16, #tpu.memory_space<vmem>>, vector<1x96x256xbf16>
    %16 = vector.shape_cast %15 : vector<1x96x256xbf16> to vector<96x256xbf16>
    %17 = vector.shape_cast %14 : vector<96x256xbf16> to vector<1x96x256xbf16>
    tpu.vector_store %arg7[%c0_12, %c0_13, %c0_14], %17 {strides = array<i32>} : memref<1x96x256xbf16, #tpu.memory_space<vmem>>, vector<1x96x256xbf16>,
    return
  }
  func.func @transform_0(%arg0: i32, %arg1: i32) -> (i32, i32, i32) {
    %c0_i32 = arith.constant 0 : i32
    %c0_i32_0 = arith.constant 0 : i32
    return %arg0, %c0_i32, %arg1 : i32, i32, i32
  }
  func.func @transform_1(%arg0: i32, %arg1: i32) -> (i32, i32, i32) {
    %c0_i32 = arith.constant 0 : i32
    %c0_i32_0 = arith.constant 0 : i32
    return %arg0, %c0_i32, %arg1 : i32, i32, i32
  }
  func.func @transform_2(%arg0: i32, %arg1: i32) -> (i32, i32) {
    %c0_i32 = arith.constant 0 : i32
    %c0_i32_0 = arith.constant 0 : i32
    %c0_i32_1 = arith.constant 0 : i32
    return %c0_i32, %c0_i32_0 : i32, i32
  }
  func.func @transform_3(%arg0: i32, %arg1: i32) -> (i32, i32) {
    %c0_i32 = arith.constant 0 : i32
    %c0_i32_0 = arith.constant 0 : i32
    %c0_i32_1 = arith.constant 0 : i32
    return %c0_i32, %c0_i32_0 : i32, i32
  }
  func.func @transform_4(%arg0: i32, %arg1: i32) -> (i32, i32) {
    %c0_i32 = arith.constant 0 : i32
    %c0_i32_0 = arith.constant 0 : i32
    %c0_i32_1 = arith.constant 0 : i32
    return %c0_i32, %c0_i32_0 : i32, i32
  }
  func.func @transform_5(%arg0: i32, %arg1: i32) -> (i32, i32, i32) {
    %c0_i32 = arith.constant 0 : i32
    %c0_i32_0 = arith.constant 0 : i32
    return %arg0, %c0_i32, %arg1 : i32, i32, i32
  }
}

module attributes {stable_mosaic.version = 11 : i64} {
  func.func @_fused_project_kernel(%arg0: i32, %arg1: i32, %arg2: memref<1x192x64xf32, #tpu.memory_space<vmem>>, %arg3: memref<1x192x64xf32, #tpu.memory_space<vmem>>, %arg4: memref<192x192xbf16, #tpu.memory_space<vmem>>, %arg5: memref<192x192xbf16, #tpu.memory_space<vmem>>, %arg6: memref<192x1xf32, #tpu.memory_space<vmem>>, %arg7: memref<1x192x64xbf16, #tpu.memory_space<vmem>>) attributes {dimension_semantics = [#tpu.dimension_semantics<parallel>, #tpu.dimension_semantics<parallel>], iteration_bounds = array<i64: 2, 1>, scalar_prefetch = 0 : i64, scratch_operands = 0 : i64, tpu.core_type = #tpu.core_type<tc>, window_params = [{transform_indices = @transform_0, window_bounds = array<i64: 1, 192, 64>}, {transform_indices = @transform_1, window_bounds = array<i64: 1, 192, 64>}, {pipeline_mode = #tpu.pipeline_mode<synchronous>, transform_indices = @transform_2, window_bounds = array<i64: 192, 192>}, {pipeline_mode = #tpu.pipeline_mode<synchronous>, transform_indices = @transform_3, window_bounds = array<i64: 192, 192>}, {pipeline_mode = #tpu.pipeline_mode<synchronous>, transform_indices = @transform_4, window_bounds = array<i64: 192, 1>}, {transform_indices = @transform_5, window_bounds = array<i64: 1, 192, 64>}]} {
    %c0 = arith.constant 0 : index
    %c0_0 = arith.constant 0 : index
    %c0_1 = arith.constant 0 : index
    %0 = vector.load %arg2[%c0, %c0_0, %c0_1] : memref<1x192x64xf32, #tpu.memory_space<vmem>>, vector<1x192x64xf32>
    %1 = vector.shape_cast %0 : vector<1x192x64xf32> to vector<192x64xf32>
    %2 = arith.truncf %1 : vector<192x64xf32> to vector<192x64xbf16>
    %c0_2 = arith.constant 0 : index
    %c0_3 = arith.constant 0 : index
    %c0_4 = arith.constant 0 : index
    %3 = vector.load %arg3[%c0_2, %c0_3, %c0_4] : memref<1x192x64xf32, #tpu.memory_space<vmem>>, vector<1x192x64xf32>
    %4 = vector.shape_cast %3 : vector<1x192x64xf32> to vector<192x64xf32>
    %5 = arith.truncf %4 : vector<192x64xf32> to vector<192x64xbf16>
    %c0_5 = arith.constant 0 : index
    %c0_6 = arith.constant 0 : index
    %6 = vector.load %arg4[%c0_5, %c0_6] : memref<192x192xbf16, #tpu.memory_space<vmem>>, vector<192x192xbf16>
    %cst = arith.constant dense<0.000000e+00> : vector<192x64xf32>
    %7 = tpu.matmul %6, %2, %cst {dimension_numbers = #tpu.dot_dimension_numbers<[1], [0], [0], [1], [0, 0, 1, 1], [], []>} : vector<192x192xbf16>, vector<192x64xbf16>, vector<192x64xf32> -> vector<192x64xf32>
    %c0_7 = arith.constant 0 : index
    %c0_8 = arith.constant 0 : index
    %8 = vector.load %arg5[%c0_7, %c0_8] : memref<192x192xbf16, #tpu.memory_space<vmem>>, vector<192x192xbf16>
    %cst_9 = arith.constant dense<0.000000e+00> : vector<192x64xf32>
    %9 = tpu.matmul %8, %5, %cst_9 {dimension_numbers = #tpu.dot_dimension_numbers<[1], [0], [0], [1], [0, 0, 1, 1], [], []>} : vector<192x192xbf16>, vector<192x64xbf16>, vector<192x64xf32> -> vector<192x64xf32>
    %10 = arith.addf %7, %9 : vector<192x64xf32>
    %c0_10 = arith.constant 0 : index
    %c0_11 = arith.constant 0 : index
    %11 = vector.load %arg6[%c0_10, %c0_11] : memref<192x1xf32, #tpu.memory_space<vmem>>, vector<192x1xf32>
    %12 = vector.broadcast %11 : vector<192x1xf32> to vector<192x64xf32>
    %13 = arith.addf %10, %12 : vector<192x64xf32>
    %14 = arith.truncf %13 : vector<192x64xf32> to vector<192x64xbf16>
    %c0_12 = arith.constant 0 : index
    %c0_13 = arith.constant 0 : index
    %c0_14 = arith.constant 0 : index
    %15 = vector.load %arg7[%c0_12, %c0_13, %c0_14] : memref<1x192x64xbf16, #tpu.memory_space<vmem>>, vector<1x192x64xbf16>
    %16 = vector.shape_cast %15 : vector<1x192x64xbf16> to vector<192x64xbf16>
    %17 = vector.shape_cast %14 : vector<192x64xbf16> to vector<1x192x64xbf16>
    tpu.vector_store %arg7[%c0_12, %c0_13, %c0_14], %17 {strides = array<i32>} : memref<1x192x64xbf16, #tpu.memory_space<vmem>>, vector<1x192x64xbf16>,
    return
  }
  func.func @transform_0(%arg0: i32, %arg1: i32) -> (i32, i32, i32) {
    %c0_i32 = arith.constant 0 : i32
    %c0_i32_0 = arith.constant 0 : i32
    return %arg0, %c0_i32, %arg1 : i32, i32, i32
  }
  func.func @transform_1(%arg0: i32, %arg1: i32) -> (i32, i32, i32) {
    %c0_i32 = arith.constant 0 : i32
    %c0_i32_0 = arith.constant 0 : i32
    return %arg0, %c0_i32, %arg1 : i32, i32, i32
  }
  func.func @transform_2(%arg0: i32, %arg1: i32) -> (i32, i32) {
    %c0_i32 = arith.constant 0 : i32
    %c0_i32_0 = arith.constant 0 : i32
    %c0_i32_1 = arith.constant 0 : i32
    return %c0_i32, %c0_i32_0 : i32, i32
  }
  func.func @transform_3(%arg0: i32, %arg1: i32) -> (i32, i32) {
    %c0_i32 = arith.constant 0 : i32
    %c0_i32_0 = arith.constant 0 : i32
    %c0_i32_1 = arith.constant 0 : i32
    return %c0_i32, %c0_i32_0 : i32, i32
  }
  func.func @transform_4(%arg0: i32, %arg1: i32) -> (i32, i32) {
    %c0_i32 = arith.constant 0 : i32
    %c0_i32_0 = arith.constant 0 : i32
    %c0_i32_1 = arith.constant 0 : i32
    return %c0_i32, %c0_i32_0 : i32, i32
  }
  func.func @transform_5(%arg0: i32, %arg1: i32) -> (i32, i32, i32) {
    %c0_i32 = arith.constant 0 : i32
    %c0_i32_0 = arith.constant 0 : i32
    return %arg0, %c0_i32, %arg1 : i32, i32, i32
  }
}

module attributes {stable_mosaic.version = 11 : i64} {
  func.func @_fused_project_kernel(%arg0: i32, %arg1: i32, %arg2: memref<1x768x4xf32, #tpu.memory_space<vmem>>, %arg3: memref<1x768x4xf32, #tpu.memory_space<vmem>>, %arg4: memref<768x768xbf16, #tpu.memory_space<vmem>>, %arg5: memref<768x768xbf16, #tpu.memory_space<vmem>>, %arg6: memref<768x1xf32, #tpu.memory_space<vmem>>, %arg7: memref<1x768x4xbf16, #tpu.memory_space<vmem>>) attributes {dimension_semantics = [#tpu.dimension_semantics<parallel>, #tpu.dimension_semantics<parallel>], iteration_bounds = array<i64: 2, 1>, scalar_prefetch = 0 : i64, scratch_operands = 0 : i64, tpu.core_type = #tpu.core_type<tc>, window_params = [{transform_indices = @transform_0, window_bounds = array<i64: 1, 768, 4>}, {transform_indices = @transform_1, window_bounds = array<i64: 1, 768, 4>}, {pipeline_mode = #tpu.pipeline_mode<synchronous>, transform_indices = @transform_2, window_bounds = array<i64: 768, 768>}, {pipeline_mode = #tpu.pipeline_mode<synchronous>, transform_indices = @transform_3, window_bounds = array<i64: 768, 768>}, {pipeline_mode = #tpu.pipeline_mode<synchronous>, transform_indices = @transform_4, window_bounds = array<i64: 768, 1>}, {transform_indices = @transform_5, window_bounds = array<i64: 1, 768, 4>}]} {
    %c0 = arith.constant 0 : index
    %c0_0 = arith.constant 0 : index
    %c0_1 = arith.constant 0 : index
    %0 = vector.load %arg2[%c0, %c0_0, %c0_1] : memref<1x768x4xf32, #tpu.memory_space<vmem>>, vector<1x768x4xf32>
    %1 = vector.shape_cast %0 : vector<1x768x4xf32> to vector<768x4xf32>
    %2 = arith.truncf %1 : vector<768x4xf32> to vector<768x4xbf16>
    %c0_2 = arith.constant 0 : index
    %c0_3 = arith.constant 0 : index
    %c0_4 = arith.constant 0 : index
    %3 = vector.load %arg3[%c0_2, %c0_3, %c0_4] : memref<1x768x4xf32, #tpu.memory_space<vmem>>, vector<1x768x4xf32>
    %4 = vector.shape_cast %3 : vector<1x768x4xf32> to vector<768x4xf32>
    %5 = arith.truncf %4 : vector<768x4xf32> to vector<768x4xbf16>
    %c0_5 = arith.constant 0 : index
    %c0_6 = arith.constant 0 : index
    %6 = vector.load %arg4[%c0_5, %c0_6] : memref<768x768xbf16, #tpu.memory_space<vmem>>, vector<768x768xbf16>
    %cst = arith.constant dense<0.000000e+00> : vector<768x4xf32>
    %7 = tpu.matmul %6, %2, %cst {dimension_numbers = #tpu.dot_dimension_numbers<[1], [0], [0], [1], [0, 0, 1, 1], [], []>} : vector<768x768xbf16>, vector<768x4xbf16>, vector<768x4xf32> -> vector<768x4xf32>
    %c0_7 = arith.constant 0 : index
    %c0_8 = arith.constant 0 : index
    %8 = vector.load %arg5[%c0_7, %c0_8] : memref<768x768xbf16, #tpu.memory_space<vmem>>, vector<768x768xbf16>
    %cst_9 = arith.constant dense<0.000000e+00> : vector<768x4xf32>
    %9 = tpu.matmul %8, %5, %cst_9 {dimension_numbers = #tpu.dot_dimension_numbers<[1], [0], [0], [1], [0, 0, 1, 1], [], []>} : vector<768x768xbf16>, vector<768x4xbf16>, vector<768x4xf32> -> vector<768x4xf32>
    %10 = arith.addf %7, %9 : vector<768x4xf32>
    %c0_10 = arith.constant 0 : index
    %c0_11 = arith.constant 0 : index
    %11 = vector.load %arg6[%c0_10, %c0_11] : memref<768x1xf32, #tpu.memory_space<vmem>>, vector<768x1xf32>
    %12 = vector.broadcast %11 : vector<768x1xf32> to vector<768x4xf32>
    %13 = arith.addf %10, %12 : vector<768x4xf32>
    %14 = arith.truncf %13 : vector<768x4xf32> to vector<768x4xbf16>
    %c0_12 = arith.constant 0 : index
    %c0_13 = arith.constant 0 : index
    %c0_14 = arith.constant 0 : index
    %15 = vector.load %arg7[%c0_12, %c0_13, %c0_14] : memref<1x768x4xbf16, #tpu.memory_space<vmem>>, vector<1x768x4xbf16>
    %16 = vector.shape_cast %15 : vector<1x768x4xbf16> to vector<768x4xbf16>
    %17 = vector.shape_cast %14 : vector<768x4xbf16> to vector<1x768x4xbf16>
    tpu.vector_store %arg7[%c0_12, %c0_13, %c0_14], %17 {strides = array<i32>} : memref<1x768x4xbf16, #tpu.memory_space<vmem>>, vector<1x768x4xbf16>,
    return
  }
  func.func @transform_0(%arg0: i32, %arg1: i32) -> (i32, i32, i32) {
    %c0_i32 = arith.constant 0 : i32
    %c0_i32_0 = arith.constant 0 : i32
    return %arg0, %c0_i32, %arg1 : i32, i32, i32
  }
  func.func @transform_1(%arg0: i32, %arg1: i32) -> (i32, i32, i32) {
    %c0_i32 = arith.constant 0 : i32
    %c0_i32_0 = arith.constant 0 : i32
    return %arg0, %c0_i32, %arg1 : i32, i32, i32
  }
  func.func @transform_2(%arg0: i32, %arg1: i32) -> (i32, i32) {
    %c0_i32 = arith.constant 0 : i32
    %c0_i32_0 = arith.constant 0 : i32
    %c0_i32_1 = arith.constant 0 : i32
    return %c0_i32, %c0_i32_0 : i32, i32
  }
  func.func @transform_3(%arg0: i32, %arg1: i32) -> (i32, i32) {
    %c0_i32 = arith.constant 0 : i32
    %c0_i32_0 = arith.constant 0 : i32
    %c0_i32_1 = arith.constant 0 : i32
    return %c0_i32, %c0_i32_0 : i32, i32
  }
  func.func @transform_4(%arg0: i32, %arg1: i32) -> (i32, i32) {
    %c0_i32 = arith.constant 0 : i32
    %c0_i32_0 = arith.constant 0 : i32
    %c0_i32_1 = arith.constant 0 : i32
    return %c0_i32, %c0_i32_0 : i32, i32
  }
  func.func @transform_5(%arg0: i32, %arg1: i32) -> (i32, i32, i32) {
    %c0_i32 = arith.constant 0 : i32
    %c0_i32_0 = arith.constant 0 : i32
    return %arg0, %c0_i32, %arg1 : i32, i32, i32
  }
}

module attributes {stable_mosaic.version = 11 : i64} {
  func.func @_fused_project_kernel(%arg0: i32, %arg1: i32, %arg2: memref<1x384x16xf32, #tpu.memory_space<vmem>>, %arg3: memref<1x384x16xf32, #tpu.memory_space<vmem>>, %arg4: memref<384x384xbf16, #tpu.memory_space<vmem>>, %arg5: memref<384x384xbf16, #tpu.memory_space<vmem>>, %arg6: memref<384x1xf32, #tpu.memory_space<vmem>>, %arg7: memref<1x384x16xbf16, #tpu.memory_space<vmem>>) attributes {dimension_semantics = [#tpu.dimension_semantics<parallel>, #tpu.dimension_semantics<parallel>], iteration_bounds = array<i64: 2, 1>, scalar_prefetch = 0 : i64, scratch_operands = 0 : i64, tpu.core_type = #tpu.core_type<tc>, window_params = [{transform_indices = @transform_0, window_bounds = array<i64: 1, 384, 16>}, {transform_indices = @transform_1, window_bounds = array<i64: 1, 384, 16>}, {pipeline_mode = #tpu.pipeline_mode<synchronous>, transform_indices = @transform_2, window_bounds = array<i64: 384, 384>}, {pipeline_mode = #tpu.pipeline_mode<synchronous>, transform_indices = @transform_3, window_bounds = array<i64: 384, 384>}, {pipeline_mode = #tpu.pipeline_mode<synchronous>, transform_indices = @transform_4, window_bounds = array<i64: 384, 1>}, {transform_indices = @transform_5, window_bounds = array<i64: 1, 384, 16>}]} {
    %c0 = arith.constant 0 : index
    %c0_0 = arith.constant 0 : index
    %c0_1 = arith.constant 0 : index
    %0 = vector.load %arg2[%c0, %c0_0, %c0_1] : memref<1x384x16xf32, #tpu.memory_space<vmem>>, vector<1x384x16xf32>
    %1 = vector.shape_cast %0 : vector<1x384x16xf32> to vector<384x16xf32>
    %2 = arith.truncf %1 : vector<384x16xf32> to vector<384x16xbf16>
    %c0_2 = arith.constant 0 : index
    %c0_3 = arith.constant 0 : index
    %c0_4 = arith.constant 0 : index
    %3 = vector.load %arg3[%c0_2, %c0_3, %c0_4] : memref<1x384x16xf32, #tpu.memory_space<vmem>>, vector<1x384x16xf32>
    %4 = vector.shape_cast %3 : vector<1x384x16xf32> to vector<384x16xf32>
    %5 = arith.truncf %4 : vector<384x16xf32> to vector<384x16xbf16>
    %c0_5 = arith.constant 0 : index
    %c0_6 = arith.constant 0 : index
    %6 = vector.load %arg4[%c0_5, %c0_6] : memref<384x384xbf16, #tpu.memory_space<vmem>>, vector<384x384xbf16>
    %cst = arith.constant dense<0.000000e+00> : vector<384x16xf32>
    %7 = tpu.matmul %6, %2, %cst {dimension_numbers = #tpu.dot_dimension_numbers<[1], [0], [0], [1], [0, 0, 1, 1], [], []>} : vector<384x384xbf16>, vector<384x16xbf16>, vector<384x16xf32> -> vector<384x16xf32>
    %c0_7 = arith.constant 0 : index
    %c0_8 = arith.constant 0 : index
    %8 = vector.load %arg5[%c0_7, %c0_8] : memref<384x384xbf16, #tpu.memory_space<vmem>>, vector<384x384xbf16>
    %cst_9 = arith.constant dense<0.000000e+00> : vector<384x16xf32>
    %9 = tpu.matmul %8, %5, %cst_9 {dimension_numbers = #tpu.dot_dimension_numbers<[1], [0], [0], [1], [0, 0, 1, 1], [], []>} : vector<384x384xbf16>, vector<384x16xbf16>, vector<384x16xf32> -> vector<384x16xf32>
    %10 = arith.addf %7, %9 : vector<384x16xf32>
    %c0_10 = arith.constant 0 : index
    %c0_11 = arith.constant 0 : index
    %11 = vector.load %arg6[%c0_10, %c0_11] : memref<384x1xf32, #tpu.memory_space<vmem>>, vector<384x1xf32>
    %12 = vector.broadcast %11 : vector<384x1xf32> to vector<384x16xf32>
    %13 = arith.addf %10, %12 : vector<384x16xf32>
    %14 = arith.truncf %13 : vector<384x16xf32> to vector<384x16xbf16>
    %c0_12 = arith.constant 0 : index
    %c0_13 = arith.constant 0 : index
    %c0_14 = arith.constant 0 : index
    %15 = vector.load %arg7[%c0_12, %c0_13, %c0_14] : memref<1x384x16xbf16, #tpu.memory_space<vmem>>, vector<1x384x16xbf16>
    %16 = vector.shape_cast %15 : vector<1x384x16xbf16> to vector<384x16xbf16>
    %17 = vector.shape_cast %14 : vector<384x16xbf16> to vector<1x384x16xbf16>
    tpu.vector_store %arg7[%c0_12, %c0_13, %c0_14], %17 {strides = array<i32>} : memref<1x384x16xbf16, #tpu.memory_space<vmem>>, vector<1x384x16xbf16>,
    return
  }
  func.func @transform_0(%arg0: i32, %arg1: i32) -> (i32, i32, i32) {
    %c0_i32 = arith.constant 0 : i32
    %c0_i32_0 = arith.constant 0 : i32
    return %arg0, %c0_i32, %arg1 : i32, i32, i32
  }
  func.func @transform_1(%arg0: i32, %arg1: i32) -> (i32, i32, i32) {
    %c0_i32 = arith.constant 0 : i32
    %c0_i32_0 = arith.constant 0 : i32
    return %arg0, %c0_i32, %arg1 : i32, i32, i32
  }
  func.func @transform_2(%arg0: i32, %arg1: i32) -> (i32, i32) {
    %c0_i32 = arith.constant 0 : i32
    %c0_i32_0 = arith.constant 0 : i32
    %c0_i32_1 = arith.constant 0 : i32
    return %c0_i32, %c0_i32_0 : i32, i32
  }
  func.func @transform_3(%arg0: i32, %arg1: i32) -> (i32, i32) {
    %c0_i32 = arith.constant 0 : i32
    %c0_i32_0 = arith.constant 0 : i32
    %c0_i32_1 = arith.constant 0 : i32
    return %c0_i32, %c0_i32_0 : i32, i32
  }
  func.func @transform_4(%arg0: i32, %arg1: i32) -> (i32, i32) {
    %c0_i32 = arith.constant 0 : i32
    %c0_i32_0 = arith.constant 0 : i32
    %c0_i32_1 = arith.constant 0 : i32
    return %c0_i32, %c0_i32_0 : i32, i32
  }
  func.func @transform_5(%arg0: i32, %arg1: i32) -> (i32, i32, i32) {
    %c0_i32 = arith.constant 0 : i32
    %c0_i32_0 = arith.constant 0 : i32
    return %arg0, %c0_i32, %arg1 : i32, i32, i32
  }
}

</mosaic_0001>

<bundles_post_ra>
// kernel: vosnet_forward.4
= control target key start
LH: loop header
LB: loop body
LE: loop exit
PB: predicated region body
PF: predicated region fallthrough
CT: control target
= control target key end

     0   :  { %s1119_s18 = smov 0   ;;  %s1121_s19 = smov 0   ;;  %s1323_s0 = inlined_call_operand.vmem [shape: f32[2,96,256], index: 0, kind: input, shape index: {}]   ;;  %s1324_s1 = inlined_call_operand.vmem [shape: f32[2,96,256], index: 1, kind: input, shape index: {}]   ;;  %s1325_s2 = inlined_call_operand.vmem [shape: bf16[96,96], index: 2, kind: input, shape index: {}]   ;;  %s1326_s3 = inlined_call_operand.vmem [shape: bf16[96,96], index: 3, kind: input, shape index: {}]   ;;  %s1327_s4 = inlined_call_operand.vmem [shape: f32[96,1], index: 4, kind: input, shape index: {}]   ;;  %s1328_s5 = inlined_call_operand.vmem [shape: bf16[2,96,256], index: 5, kind: output, shape index: {}]  }
   0x1   :  { %s1123_s20 = smov 0  }
   0x2 LB: > { %s27_s21 = sadd.s32 1, %s1082_s19  ;;  %p969_p0 = scmp.ge.s32.totalorder %s1086_s20, 1  ;;  %s1086_s20 = sphi %s1123_s20, %s15_s20   ;;  %s1082_s19 = sphi %s1121_s19, %s1330_s19   ;;  %s1078_s18 = sphi %s1119_s18, %s1329_s18  }
   0x3   : > { %p29_p1 = scmp.ge.s32.totalorder %s27_s21, 2  ;;  %p225_p2 = scmp.lt.s32.totalorder %s1086_s20, 3 }
   0x5   : > { %s1332_s21 = smov (%p29_p1, %s27_s21), 0  ;;  %p226_p3 = pnand %p969_p0, %p225_p2 }
   0x6   : > { %p271_p4 = scmp.lt.s32.totalorder (!%p226_p3), %s1078_s18, 1 }
   0x7   : > { %229 = sbr.rel (%p226_p3) target bundleno = 290 (0x122), region = 40 }
   0xc   : > { %v1088_v0 = vmov 0   ;;  %s1334_s18 = smov (!%p271_p4, %s1078_s18), 1  ;;  %vm427_vm0 = vcmask 785408  }
   0xd   : > { %478 = vmatprep.mubr.bf16.mxu0 %v1088_v0  ;;  %619 = vmatprep.mubr.bf16.mxu1 %v1088_v0  ;;  %s1023_s22 = smul.u32 192, %s1334_s18 }
   0xe   : > { %1050 = vset.pattern.permute.xlu0 %v1088_v0  ;;  %1051 = vset.pattern.permute.xlu1 %v1088_v0  ;;  %s1024_s10 = smul.u32 96, %s1334_s18 }
   0xf   : > { %s1147_s25 = scalar_lea.vmem %s1324_s1, %s1023_s22  ;;  %s1152_s28 = scalar_lea.vmem %s1323_s0, %s1023_s22 }
  0x10   : > { %v358_v1 = vld [vmem:[%s1147_s25 + $0xa8] sm:$0xff]  ;;  %v360_v2 = vld [vmem:[%s1147_s25 + $0xb8] sm:$0xff]  ;;  %v357_v6 = vld [vmem:[%s1147_s25 + $0xa0] sm:$0xff]  ;;  %s1300_s13 = scalar_lea.vmem %s1328_s5, %s1024_s10 }
  0x11   : > { %v322_v3 = vld [vmem:[%s1152_s28 + $0xa8] sm:$0xff]  ;;  %v372_v4 = vpack.c.bf16 %v360_v2, %v358_v1  ;;  %v324_v5 = vld [vmem:[%s1152_s28 + $0xb8] sm:$0xff]  ;;  %v359_v7 = vld [vmem:[%s1147_s25 + $0xb0] sm:$0xff] }
  0x12   : > { %v336_v8 = vpack.c.bf16 %v324_v5, %v322_v3  ;;  %v371_v9 = vpack.c.bf16 %v359_v7, %v357_v6  ;;  %v321_v10 = vld [vmem:[%s1152_s28 + $0xa0] sm:$0xff]  ;;  %v323_v11 = vld [vmem:[%s1152_s28 + $0xb0] sm:$0xff]  ;;  %v354_v12 = vld [vmem:[%s1147_s25 + $0x88] sm:$0xff] }
  0x13   : > { %450 = vmatprep.subr.bf16.mxu0 %v372_v4  ;;  %v335_v13 = vpack.c.bf16 %v323_v11, %v321_v10  ;;  %v356_v14 = vld [vmem:[%s1147_s25 + $0x98] sm:$0xff]  ;;  %v318_v15 = vld [vmem:[%s1152_s28 + $0x88] sm:$0xff]  ;;  %v353_v19 = vld [vmem:[%s1147_s25 + $0x80] sm:$0xff] }
  0x14   : > { %v320_v16 = vld [vmem:[%s1152_s28 + $0x98] sm:$0xff]  ;;  %591 = vmatprep.subr.bf16.mxu1 %v336_v8  ;;  %451 = vmatpush1.bf16.msra.mxu0 %v371_v9  ;;  %v370_v17 = vpack.c.bf16 %v356_v14, %v354_v12  ;;  %v355_v20 = vld [vmem:[%s1147_s25 + $0x90] sm:$0xff]  ;;  %v317_v21 = vld [vmem:[%s1152_s28 + $0x80] sm:$0xff] }
  0x15   : > { %v334_v18 = vpack.c.bf16 %v320_v16, %v318_v15  ;;  %592 = vmatpush1.bf16.msra.mxu1 %v335_v13  ;;  %v369_v22 = vpack.c.bf16 %v355_v20, %v353_v19  ;;  %v319_v23 = vld [vmem:[%s1152_s28 + $0x90] sm:$0xff]  ;;  %v350_v24 = vld [vmem:[%s1147_s25 + $0x68] sm:$0xff]  ;;  %v352_v25 = vld [vmem:[%s1147_s25 + $0x78] sm:$0xff] }
  0x16   : > { %452 = vmatprep.subr.bf16.mxu0 %v370_v17  ;;  %v333_v26 = vpack.c.bf16 %v319_v23, %v317_v21  ;;  %v368_v27 = vpack.c.bf16 %v352_v25, %v350_v24  ;;  %v314_v28 = vld [vmem:[%s1152_s28 + $0x68] sm:$0xff]  ;;  %v316_v29 = vld [vmem:[%s1152_s28 + $0x78] sm:$0xff]  ;;  %v349_v30 = vld [vmem:[%s1147_s25 + $0x60] sm:$0xff] }
  0x17   : > { %593 = vmatprep.subr.bf16.mxu1 %v334_v18  ;;  %v332_v31 = vpack.c.bf16 %v316_v29, %v314_v28  ;;  %v351_v32 = vld [vmem:[%s1147_s25 + $0x70] sm:$0xff]  ;;  %v313_v33 = vld [vmem:[%s1152_s28 + $0x60] sm:$0xff]  ;;  %v346_v36 = vld [vmem:[%s1147_s25 + $0x48] sm:$0xff] }
  0x18   : > { %v315_v34 = vld [vmem:[%s1152_s28 + $0x70] sm:$0xff]  ;;  %453 = vmatpush1.bf16.msra.mxu0 %v369_v22  ;;  %v367_v35 = vpack.c.bf16 %v351_v32, %v349_v30  ;;  %v348_v37 = vld [vmem:[%s1147_s25 + $0x58] sm:$0xff]  ;;  %v310_v38 = vld [vmem:[%s1152_s28 + $0x48] sm:$0xff] }
  0x19   : > { %594 = vmatpush1.bf16.msra.mxu1 %v333_v26  ;;  %454 = vmatprep.subr.bf16.mxu0 %v368_v27  ;;  %v331_v39 = vpack.c.bf16 %v315_v34, %v313_v33  ;;  %v366_v40 = vpack.c.bf16 %v348_v37, %v346_v36  ;;  %v312_v41 = vld [vmem:[%s1152_s28 + $0x58] sm:$0xff]  ;;  %v345_v42 = vld [vmem:[%s1147_s25 + $0x40] sm:$0xff]  ;;  %v347_v43 = vld [vmem:[%s1147_s25 + $0x50] sm:$0xff] }
  0x1a   : > { %595 = vmatprep.subr.bf16.mxu1 %v332_v31  ;;  %v330_v44 = vpack.c.bf16 %v312_v41, %v310_v38  ;;  %v309_v45 = vld [vmem:[%s1152_s28 + $0x40] sm:$0xff]  ;;  %v311_v46 = vld [vmem:[%s1152_s28 + $0x50] sm:$0xff]  ;;  %v342_v47 = vld [vmem:[%s1147_s25 + $0x28] sm:$0xff]  ;;  %v365_v51 = vpack.c.bf16 %v347_v43, %v345_v42 }
  0x1b   : > { %v344_v48 = vld [vmem:[%s1147_s25 + $0x38] sm:$0xff]  ;;  %v306_v49 = vld [vmem:[%s1152_s28 + $0x28] sm:$0xff]  ;;  %v329_v52 = vpack.c.bf16 %v311_v46, %v309_v45  ;;  %v341_v54 = vld [vmem:[%s1147_s25 + $0x20] sm:$0xff] }
  0x1c   : > { %v308_v50 = vld [vmem:[%s1152_s28 + $0x38] sm:$0xff]  ;;  %455 = vmatpush1.bf16.msra.mxu0 %v367_v35  ;;  %v364_v53 = vpack.c.bf16 %v344_v48, %v342_v47  ;;  %v343_v55 = vld [vmem:[%s1147_s25 + $0x30] sm:$0xff]  ;;  %v305_v56 = vld [vmem:[%s1152_s28 + $0x20] sm:$0xff] }
  0x1d   : > { %596 = vmatpush1.bf16.msra.mxu1 %v331_v39  ;;  %456 = vmatprep.subr.bf16.mxu0 %v366_v40  ;;  %v328_v57 = vpack.c.bf16 %v308_v50, %v306_v49  ;;  %v307_v58 = vld [vmem:[%s1152_s28 + $0x30] sm:$0xff]  ;;  %v338_v59 = vld [vmem:[%s1147_s25 + $0x8] sm:$0xff]  ;;  %v340_v60 = vld [vmem:[%s1147_s25 + $0x18] sm:$0xff]  ;;  %v363_v1 = vpack.c.bf16 %v343_v55, %v341_v54 }
  0x1e   : > { %597 = vmatprep.subr.bf16.mxu1 %v330_v44  ;;  %v302_v61 = vld [vmem:[%s1152_s28 + $0x8] sm:$0xff]  ;;  %v304_v62 = vld [vmem:[%s1152_s28 + $0x18] sm:$0xff]  ;;  %v337_v63 = vld [vmem:[%s1147_s25] sm:$0xff]  ;;  %v327_v3 = vpack.c.bf16 %v307_v58, %v305_v56  ;;  %v362_v4 = vpack.c.bf16 %v340_v60, %v338_v59 }
  0x1f   : > { %v339_v2 = vld [vmem:[%s1147_s25 + $0x10] sm:$0xff]  ;;  %v301_v5 = vld [vmem:[%s1152_s28] sm:$0xff]  ;;  %v326_v6 = vpack.c.bf16 %v304_v62, %v302_v61  ;;  %v681_v13 = vld [vmem:[%s1327_s4 + $0x8] sm:$0xff] }
  0x20   : > { %457 = vmatpush1.bf16.msra.mxu0 %v365_v51  ;;  %v303_v7 = vld [vmem:[%s1152_s28 + $0x10] sm:$0xff]  ;;  %v361_v8 = vpack.c.bf16 %v339_v2, %v337_v63  ;;  %v680_v10 = vld [vmem:[%s1327_s4] sm:$0xff]  ;;  %v683_v15 = vld [vmem:[%s1327_s4 + $0x18] sm:$0xff] }
  0x21   : > { %598 = vmatpush1.bf16.msra.mxu1 %v329_v52  ;;  %458 = vmatprep.subr.bf16.mxu0 %v364_v53  ;;  %v325_v9 = vpack.c.bf16 %v303_v7, %v301_v5  ;;  %v682_v11 = vld [vmem:[%s1327_s4 + $0x10] sm:$0xff]  ;;  %v1052_v12 = vld [vmem:[%s1326_s3] sm:$0xff]   ;;  %v685_v17 = vld [vmem:[%s1327_s4 + $0x28] sm:$0xff] }
  0x22   : > { %599 = vmatprep.subr.bf16.mxu1 %v328_v57  ;;  %694 = vperm.xlu0 %1050, %v680_v10   ;;  %v1053_v14 = vld [vmem:[%s1325_s2] sm:$0xff]   ;;  %v1054_v18 = vld [vmem:[%s1326_s3 + $0x8] sm:$0xff]   ;;  %v686_v19 = vld [vmem:[%s1327_s4 + $0x30] sm:$0xff] }
  0x23   : > { %704 = vperm.xlu1 %1051, %v682_v11   ;;  %v684_v16 = vld [vmem:[%s1327_s4 + $0x20] sm:$0xff]  ;;  %v1055_v20 = vld [vmem:[%s1325_s2 + $0x8] sm:$0xff]   ;;  %v687_v21 = vld [vmem:[%s1327_s4 + $0x38] sm:$0xff] }
  0x24   : > { %459 = vmatpush1.bf16.msra.mxu0 %v363_v1  ;;  %v688_v22 = vld [vmem:[%s1327_s4 + $0x40] sm:$0xff]  ;;  %v689_v23 = vld [vmem:[%s1327_s4 + $0x48] sm:$0xff]  ;;  %v1056_v24 = vld [vmem:[%s1326_s3 + $0x10] sm:$0xff]  }
  0x25   : > { %600 = vmatpush1.bf16.msra.mxu1 %v327_v3  ;;  %460 = vmatprep.subr.bf16.mxu0 %v362_v4  ;;  %v690_v25 = vld [vmem:[%s1327_s4 + $0x50] sm:$0xff]  ;;  %v691_v27 = vld [vmem:[%s1327_s4 + $0x58] sm:$0xff]  ;;  %v1060_v30 = vld [vmem:[%s1326_s3 + $0x20] sm:$0xff]  }
  0x26   : > { %601 = vmatprep.subr.bf16.mxu1 %v326_v6  ;;  %699 = vperm.xlu0 %1050, %v681_v13   ;;  %v1057_v26 = vld [vmem:[%s1325_s2 + $0x10] sm:$0xff]   ;;  %v1058_v28 = vld [vmem:[%s1326_s3 + $0x18] sm:$0xff]   ;;  %v1061_v31 = vld [vmem:[%s1325_s2 + $0x20] sm:$0xff]  }
  0x27   : > { %709 = vperm.xlu1 %1051, %v683_v15   ;;  %v1059_v29 = vld [vmem:[%s1325_s2 + $0x18] sm:$0xff]   ;;  %v1062_v32 = vld [vmem:[%s1326_s3 + $0x28] sm:$0xff]  }
  0x28   : > { %461 = vmatpush1.bf16.msra.mxu0 %v361_v8  ;;  %v1063_v33 = vld [vmem:[%s1325_s2 + $0x28] sm:$0xff]  }
  0x29   : > { %602 = vmatpush1.bf16.msra.mxu1 %v325_v9 }
  0x2a   : > { %714 = vperm.xlu0 %1050, %v684_v16  }
  0x2b   : > { %979 = vmatmul.mubr.msk.bf16.vlgmr.msra.gmra.mxu0 %vm427_vm0, %v1052_v12  ;;  %719 = vperm.xlu1 %1051, %v685_v17  }
  0x2c   : > { %991 = vmatmul.mubr.msk.bf16.vlgmr.msra.gmra.mxu1 %vm427_vm0, %v1053_v14  ;;  %488 = vmatprep.mubr.bf16.mxu0 %v1088_v0 }
  0x2d   : > { %629 = vmatprep.mubr.bf16.mxu1 %v1088_v0 }
  0x2e   : > { %724 = vperm.xlu0 %1050, %v686_v19  }
  0x2f   : > { %729 = vperm.xlu1 %1051, %v687_v21  }
  0x32   : > { %734 = vperm.xlu0 %1050, %v688_v22  }
  0x33   : > { %980 = vmatmul.mubr.msk.bf16.gmra.mxu0 %vm427_vm0, %v1054_v18  ;;  %739 = vperm.xlu1 %1051, %v689_v23  }
  0x34   : > { %992 = vmatmul.mubr.msk.bf16.gmra.mxu1 %vm427_vm0, %v1055_v20  ;;  %498 = vmatprep.mubr.bf16.mxu0 %v1088_v0 }
  0x35   : > { %639 = vmatprep.mubr.bf16.mxu1 %v1088_v0 }
  0x36   : > { %744 = vperm.xlu0 %1050, %v690_v25  }
  0x37   : > { %749 = vperm.xlu1 %1051, %v691_v27  }
  0x3b   : > { %981 = vmatmul.mubr.msk.bf16.gmra.mxu0 %vm427_vm0, %v1056_v24 }
  0x3c   : > { %993 = vmatmul.mubr.msk.bf16.gmra.mxu1 %vm427_vm0, %v1057_v26  ;;  %508 = vmatprep.mubr.bf16.mxu0 %v1088_v0 }
  0x3d   : > { %649 = vmatprep.mubr.bf16.mxu1 %v1088_v0 }
  0x43   : > { %982 = vmatmul.mubr.msk.bf16.gmra.mxu0 %vm427_vm0, %v1058_v28 }
  0x44   : > { %994 = vmatmul.mubr.msk.bf16.gmra.mxu1 %vm427_vm0, %v1059_v29  ;;  %518 = vmatprep.mubr.bf16.mxu0 %v1088_v0 }
  0x45   : > { %659 = vmatprep.mubr.bf16.mxu1 %v1088_v0 }
  0x4b   : > { %983 = vmatmul.mubr.msk.bf16.gmra.mxu0 %vm427_vm0, %v1060_v30 }
  0x4c   : > { %995 = vmatmul.mubr.msk.bf16.gmra.mxu1 %vm427_vm0, %v1061_v31  ;;  %528 = vmatprep.mubr.bf16.mxu0 %v1088_v0 }
  0x4d   : > { %669 = vmatprep.mubr.bf16.mxu1 %v1088_v0 }
  0x53   : > { %984 = vmatmul.mubr.msk.bf16.gmra.mxu0 %vm427_vm0, %v1062_v32 }
  0x54   : > { %996 = vmatmul.mubr.msk.bf16.gmra.mxu1 %vm427_vm0, %v1063_v33 }
  0x9d   : > { %v695_v36 = vpop.permute.xlu0 %694 }
  0x9e   : > { %v705_v56 = vpop.permute.xlu1 %704 }
  0xa1   : > { %v700_v46 = vpop.permute.xlu0 %699 }
  0xa2   : > { %v710_v7 = vpop.permute.xlu1 %709 }
  0xa5   : > { %v715_v17 = vpop.permute.xlu0 %714 }
  0xa6   : > { %v720_v27 = vpop.permute.xlu1 %719 }
  0xeb   : > { %v480_v34 = vpop.f32.mrf.mxu0 }
  0xec   : > { %v621_v35 = vpop.f32.mrf.mxu1 }
  0xed   : > { %v622_v37 = vadd.f32 %v621_v35, %v480_v34  ;;  %v482_v38 = vpop.f32.mrf.mxu0 }
  0xee   : > { %v623_v39 = vpop.f32.mrf.mxu1 }
  0xef   : > { %v624_v0 = vadd.f32 %v623_v39, %v482_v38  ;;  %v484_v40 = vpop.f32.mrf.mxu0  ;;  %v752_v42 = vadd.f32 %v695_v36, %v622_v37  ;;  %v725_v37 = vpop.permute.xlu0 %724 }
  0xf0   : > { %v625_v41 = vpop.f32.mrf.mxu1 }
  0xf1   : > { %v753_v43 = vadd.f32 %v695_v36, %v624_v0  ;;  %v626_v44 = vadd.f32 %v625_v41, %v484_v40  ;;  %v486_v45 = vpop.f32.mrf.mxu0 }
  0xf2   : > { %v627_v47 = vpop.f32.mrf.mxu1 }
  0xf3   : > { %v1011_v48 = vpack.c.bf16 %v753_v43, %v752_v42  ;;  %v628_v49 = vadd.f32 %v627_v47, %v486_v45  ;;  %v490_v50 = vpop.f32.mrf.mxu0  ;;  %v754_v52 = vadd.f32 %v700_v46, %v626_v44 }
  0xf4   : > { %v631_v51 = vpop.f32.mrf.mxu1 }
  0xf5   : > { %848 = vst [vmem:[%s1300_s13] sm:$0xff] %v1011_v48  ;;  %v755_v53 = vadd.f32 %v700_v46, %v628_v49  ;;  %v632_v54 = vadd.f32 %v631_v51, %v490_v50  ;;  %v492_v55 = vpop.f32.mrf.mxu0  ;;  %v730_v46 = vpop.permute.xlu1 %729 }
  0xf6   : > { %v633_v57 = vpop.f32.mrf.mxu1 }
  0xf7   : > { %v1012_v58 = vpack.c.bf16 %v755_v53, %v754_v52  ;;  %v634_v59 = vadd.f32 %v633_v57, %v492_v55  ;;  %v494_v60 = vpop.f32.mrf.mxu0  ;;  %v756_v62 = vadd.f32 %v705_v56, %v632_v54 }
  0xf8   : > { %v635_v61 = vpop.f32.mrf.mxu1 }
  0xf9   : > { %849 = vst [vmem:[%s1300_s13 + $0x8] sm:$0xff] %v1012_v58  ;;  %v757_v63 = vadd.f32 %v705_v56, %v634_v59  ;;  %v636_v1 = vadd.f32 %v635_v61, %v494_v60  ;;  %v496_v2 = vpop.f32.mrf.mxu0  ;;  %v735_v56 = vpop.permute.xlu0 %734 }
  0xfa   : > { %v637_v3 = vpop.f32.mrf.mxu1 }
  0xfb   : > { %v1013_v4 = vpack.c.bf16 %v757_v63, %v756_v62  ;;  %v638_v5 = vadd.f32 %v637_v3, %v496_v2  ;;  %v500_v6 = vpop.f32.mrf.mxu0  ;;  %v758_v9 = vadd.f32 %v710_v7, %v636_v1  ;;  %v740_v3 = vpop.permute.xlu1 %739 }
  0xfc   : > { %v641_v8 = vpop.f32.mrf.mxu1 }
  0xfd   : > { %850 = vst [vmem:[%s1300_s13 + $0x10] sm:$0xff] %v1013_v4  ;;  %v759_v10 = vadd.f32 %v710_v7, %v638_v5  ;;  %v642_v11 = vadd.f32 %v641_v8, %v500_v6  ;;  %v502_v12 = vpop.f32.mrf.mxu0 }
  0xfe   : > { %v643_v13 = vpop.f32.mrf.mxu1 }
  0xff   : > { %v1014_v14 = vpack.c.bf16 %v759_v10, %v758_v9  ;;  %v644_v15 = vadd.f32 %v643_v13, %v502_v12  ;;  %v504_v16 = vpop.f32.mrf.mxu0  ;;  %v760_v19 = vadd.f32 %v715_v17, %v642_v11  ;;  %v745_v13 = vpop.permute.xlu0 %744 }
 0x100   : > { %v645_v18 = vpop.f32.mrf.mxu1 }
 0x101   : > { %851 = vst [vmem:[%s1300_s13 + $0x18] sm:$0xff] %v1014_v14  ;;  %v761_v20 = vadd.f32 %v715_v17, %v644_v15  ;;  %v646_v21 = vadd.f32 %v645_v18, %v504_v16  ;;  %v506_v22 = vpop.f32.mrf.mxu0 }
 0x102   : > { %v647_v23 = vpop.f32.mrf.mxu1 }
 0x103   : > { %v1015_v24 = vpack.c.bf16 %v761_v20, %v760_v19  ;;  %v648_v25 = vadd.f32 %v647_v23, %v506_v22  ;;  %v510_v26 = vpop.f32.mrf.mxu0  ;;  %v762_v29 = vadd.f32 %v720_v27, %v646_v21  ;;  %v750_v22 = vpop.permute.xlu1 %749 }
 0x104   : > { %v651_v28 = vpop.f32.mrf.mxu1 }
 0x105   : > { %852 = vst [vmem:[%s1300_s13 + $0x20] sm:$0xff] %v1015_v24  ;;  %v763_v30 = vadd.f32 %v720_v27, %v648_v25  ;;  %v652_v31 = vadd.f32 %v651_v28, %v510_v26  ;;  %v512_v32 = vpop.f32.mrf.mxu0 }
 0x106   : > { %v653_v33 = vpop.f32.mrf.mxu1 }
 0x107   : > { %v1016_v34 = vpack.c.bf16 %v763_v30, %v762_v29  ;;  %v654_v35 = vadd.f32 %v653_v33, %v512_v32  ;;  %v514_v36 = vpop.f32.mrf.mxu0  ;;  %v764_v39 = vadd.f32 %v725_v37, %v652_v31 }
 0x108   : > { %v655_v38 = vpop.f32.mrf.mxu1 }
 0x109   : > { %853 = vst [vmem:[%s1300_s13 + $0x28] sm:$0xff] %v1016_v34  ;;  %v765_v0 = vadd.f32 %v725_v37, %v654_v35  ;;  %v656_v40 = vadd.f32 %v655_v38, %v514_v36  ;;  %v516_v41 = vpop.f32.mrf.mxu0 }
 0x10a   : > { %v657_v42 = vpop.f32.mrf.mxu1 }
 0x10b   : > { %v1017_v43 = vpack.c.bf16 %v765_v0, %v764_v39  ;;  %v658_v44 = vadd.f32 %v657_v42, %v516_v41  ;;  %v520_v45 = vpop.f32.mrf.mxu0  ;;  %v766_v48 = vadd.f32 %v730_v46, %v656_v40 }
 0x10c   : > { %v661_v47 = vpop.f32.mrf.mxu1 }
 0x10d   : > { %854 = vst [vmem:[%s1300_s13 + $0x30] sm:$0xff] %v1017_v43  ;;  %v767_v49 = vadd.f32 %v730_v46, %v658_v44  ;;  %v662_v50 = vadd.f32 %v661_v47, %v520_v45  ;;  %v522_v51 = vpop.f32.mrf.mxu0 }
 0x10e   : > { %v663_v52 = vpop.f32.mrf.mxu1 }
 0x10f   : > { %v1018_v53 = vpack.c.bf16 %v767_v49, %v766_v48  ;;  %v664_v54 = vadd.f32 %v663_v52, %v522_v51  ;;  %v524_v55 = vpop.f32.mrf.mxu0  ;;  %v768_v58 = vadd.f32 %v735_v56, %v662_v50 }
 0x110   : > { %v665_v57 = vpop.f32.mrf.mxu1 }
 0x111   : > { %855 = vst [vmem:[%s1300_s13 + $0x38] sm:$0xff] %v1018_v53  ;;  %v769_v59 = vadd.f32 %v735_v56, %v664_v54  ;;  %v666_v60 = vadd.f32 %v665_v57, %v524_v55  ;;  %v526_v61 = vpop.f32.mrf.mxu0 }
 0x112   : > { %v667_v62 = vpop.f32.mrf.mxu1 }
 0x113   : > { %v1019_v63 = vpack.c.bf16 %v769_v59, %v768_v58  ;;  %v668_v1 = vadd.f32 %v667_v62, %v526_v61  ;;  %v530_v2 = vpop.f32.mrf.mxu0  ;;  %v770_v5 = vadd.f32 %v740_v3, %v666_v60 }
 0x114   : > { %v671_v4 = vpop.f32.mrf.mxu1 }
 0x115   : > { %856 = vst [vmem:[%s1300_s13 + $0x40] sm:$0xff] %v1019_v63  ;;  %v771_v6 = vadd.f32 %v740_v3, %v668_v1  ;;  %v672_v7 = vadd.f32 %v671_v4, %v530_v2  ;;  %v532_v8 = vpop.f32.mrf.mxu0 }
 0x116   : > { %v673_v9 = vpop.f32.mrf.mxu1 }
 0x117   : > { %v1020_v10 = vpack.c.bf16 %v771_v6, %v770_v5  ;;  %v674_v11 = vadd.f32 %v673_v9, %v532_v8  ;;  %v534_v12 = vpop.f32.mrf.mxu0  ;;  %v772_v15 = vadd.f32 %v745_v13, %v672_v7 }
 0x118   : > { %v675_v14 = vpop.f32.mrf.mxu1 }
 0x119   : > { %857 = vst [vmem:[%s1300_s13 + $0x48] sm:$0xff] %v1020_v10  ;;  %v773_v16 = vadd.f32 %v745_v13, %v674_v11  ;;  %v676_v17 = vadd.f32 %v675_v14, %v534_v12  ;;  %v536_v18 = vpop.f32.mrf.mxu0 }
 0x11a   : > { %v677_v19 = vpop.f32.mrf.mxu1 }
 0x11b   : > { %v1021_v20 = vpack.c.bf16 %v773_v16, %v772_v15  ;;  %v678_v21 = vadd.f32 %v677_v19, %v536_v18  ;;  %v774_v23 = vadd.f32 %v750_v22, %v676_v17 }
 0x11d   : > { %858 = vst [vmem:[%s1300_s13 + $0x50] sm:$0xff] %v1021_v20  ;;  %v775_v24 = vadd.f32 %v750_v22, %v678_v21 }
 0x11f   : > { %v1022_v25 = vpack.c.bf16 %v775_v24, %v774_v23 }
 0x121   : > { %859 = vst [vmem:[%s1300_s13 + $0x58] sm:$0xff] %v1022_v25 }
 0x122 PF: > { %s15_s20 = sadd.s32 1, %s1086_s20   ;;  %s1329_s18 = smov %s1082_s19 }
 0x123   : > { %p12_p5 = scmp.ge.s32.totalorder %s15_s20, 4   ;;  %s1330_s19 = smov %s1332_s21 }
 0x125   :  { %14 = sbr.rel (!%p12_p5) target bundleno = 2 (0x2), region = 73 }

// kernel: vosnet_forward.5
= control target key start
LH: loop header
LB: loop body
LE: loop exit
PB: predicated region body
PF: predicated region fallthrough
CT: control target
= control target key end

     0   :  { %s1631_s18 = smov 0   ;;  %s1633_s19 = smov 0   ;;  %s2039_s0 = inlined_call_operand.vmem [shape: f32[2,192,64], index: 0, kind: input, shape index: {}]   ;;  %s2040_s1 = inlined_call_operand.vmem [shape: f32[2,192,64], index: 1, kind: input, shape index: {}]   ;;  %s2041_s2 = inlined_call_operand.vmem [shape: bf16[192,192], index: 2, kind: input, shape index: {}]   ;;  %s2042_s3 = inlined_call_operand.vmem [shape: bf16[192,192], index: 3, kind: input, shape index: {}]   ;;  %s2043_s4 = inlined_call_operand.vmem [shape: f32[192,1], index: 4, kind: input, shape index: {}]   ;;  %s2044_s5 = inlined_call_operand.vmem [shape: bf16[2,192,64], index: 5, kind: output, shape index: {}]  }
   0x1   :  { %s1635_s20 = smov 0  }
   0x2 LB: > { %s27_s21 = sadd.s32 1, %s1594_s19  ;;  %p1349_p0 = scmp.ge.s32.totalorder %s1598_s20, 1  ;;  %s1598_s20 = sphi %s1635_s20, %s15_s20   ;;  %s1594_s19 = sphi %s1633_s19, %s2046_s19   ;;  %s1590_s18 = sphi %s1631_s18, %s2045_s18  }
   0x3   : > { %p29_p1 = scmp.ge.s32.totalorder %s27_s21, 2  ;;  %p221_p2 = scmp.lt.s32.totalorder %s1598_s20, 3 }
   0x5   : > { %s2048_s21 = smov (%p29_p1, %s27_s21), 0  ;;  %p222_p3 = pnand %p1349_p0, %p221_p2 }
   0x6   : > { %p263_p4 = scmp.lt.s32.totalorder (!%p222_p3), %s1590_s18, 1 }
   0x7   : > { %225 = sbr.rel (%p222_p3) target bundleno = 359 (0x167), region = 40 }
   0xc   : > { %v1600_v0 = vmov 0   ;;  %v1506_v1 = vld [vmem:[%s2042_s3 + $0x4] ss:$8 sps:$4 sm:$0xff]   ;;  %vm516_vm0 = vcmask 523264   ;;  %s2050_s18 = smov (!%p263_p4, %s1590_s18), 1  ;;  %vm1219_vm1 = vcmask 519168  }
   0xd   : > { %553 = vmatprep.subr.bf16.mxu0 %v1600_v0  ;;  %826 = vmatprep.subr.bf16.mxu1 %v1600_v0  ;;  %v1509_v2 = vld [vmem:[%s2041_s2 + $0x4] ss:$8 sps:$4 sm:$0xff]   ;;  %s1475_s26 = smul.u32 192, %s2050_s18 }
   0xe   : > { %1502 = vset.pattern.permute.xlu0 %v1600_v0  ;;  %1503 = vset.pattern.permute.xlu1 %v1600_v0  ;;  %v955_v61 = vld [vmem:[%s2043_s4] sm:$0xff] }
   0xf   : > { %1377 = vmatprep.mubr.msk.bf16.mxu0 %vm516_vm0, %v1506_v1  ;;  %1413 = vmatprep.mubr.msk.bf16.mxu1 %vm516_vm0, %v1509_v2  ;;  %s1667_s29 = scalar_lea.vmem %s2040_s1, %s1475_s26  ;;  %s1672_s7 = scalar_lea.vmem %s2039_s0, %s1475_s26 }
  0x10   : > { %v338_v3 = vld [vmem:[%s1667_s29 + $0x70] sm:$0xff]  ;;  %v339_v4 = vld [vmem:[%s1667_s29 + $0x78] sm:$0xff]  ;;  %v336_v8 = vld [vmem:[%s1667_s29 + $0x60] sm:$0xff]  ;;  %981 = vperm.xlu0 %1502, %v955_v61   ;;  %s1476_s26 = smul.u32 96, %s2050_s18 }
  0x11   : > { %v302_v5 = vld [vmem:[%s1672_s7 + $0x70] sm:$0xff]  ;;  %v355_v6 = vpack.c.bf16 %v339_v4, %v338_v3  ;;  %v303_v7 = vld [vmem:[%s1672_s7 + $0x78] sm:$0xff]  ;;  %v337_v9 = vld [vmem:[%s1667_s29 + $0x68] sm:$0xff] }
  0x12   : > { %v319_v10 = vpack.c.bf16 %v303_v7, %v302_v5  ;;  %v300_v11 = vld [vmem:[%s1672_s7 + $0x60] sm:$0xff]  ;;  %v301_v12 = vld [vmem:[%s1672_s7 + $0x68] sm:$0xff]  ;;  %v354_v13 = vpack.c.bf16 %v337_v9, %v336_v8  ;;  %v334_v15 = vld [vmem:[%s1667_s29 + $0x50] sm:$0xff] }
  0x13   : > { %554 = vmatpush1.bf16.msra.mxu0 %v355_v6  ;;  %v318_v14 = vpack.c.bf16 %v301_v12, %v300_v11  ;;  %v335_v16 = vld [vmem:[%s1667_s29 + $0x58] sm:$0xff]  ;;  %v298_v17 = vld [vmem:[%s1672_s7 + $0x50] sm:$0xff]  ;;  %v332_v21 = vld [vmem:[%s1667_s29 + $0x40] sm:$0xff] }
  0x14   : > { %827 = vmatpush1.bf16.msra.mxu1 %v319_v10  ;;  %555 = vmatprep.subr.bf16.mxu0 %v1600_v0  ;;  %v299_v18 = vld [vmem:[%s1672_s7 + $0x58] sm:$0xff]  ;;  %v353_v19 = vpack.c.bf16 %v335_v16, %v334_v15  ;;  %v333_v22 = vld [vmem:[%s1667_s29 + $0x48] sm:$0xff]  ;;  %v296_v23 = vld [vmem:[%s1672_s7 + $0x40] sm:$0xff] }
  0x15   : > { %828 = vmatprep.subr.bf16.mxu1 %v1600_v0  ;;  %v317_v20 = vpack.c.bf16 %v299_v18, %v298_v17  ;;  %v297_v24 = vld [vmem:[%s1672_s7 + $0x48] sm:$0xff]  ;;  %v352_v25 = vpack.c.bf16 %v333_v22, %v332_v21  ;;  %v330_v27 = vld [vmem:[%s1667_s29 + $0x30] sm:$0xff]  ;;  %v331_v28 = vld [vmem:[%s1667_s29 + $0x38] sm:$0xff] }
  0x16   : > { %v316_v26 = vpack.c.bf16 %v297_v24, %v296_v23  ;;  %v294_v29 = vld [vmem:[%s1672_s7 + $0x30] sm:$0xff]  ;;  %v295_v30 = vld [vmem:[%s1672_s7 + $0x38] sm:$0xff]  ;;  %v351_v31 = vpack.c.bf16 %v331_v28, %v330_v27  ;;  %v328_v33 = vld [vmem:[%s1667_s29 + $0x20] sm:$0xff] }
  0x17   : > { %556 = vmatpush1.bf16.msra.mxu0 %v354_v13  ;;  %v315_v32 = vpack.c.bf16 %v295_v30, %v294_v29  ;;  %v329_v34 = vld [vmem:[%s1667_s29 + $0x28] sm:$0xff]  ;;  %v292_v35 = vld [vmem:[%s1672_s7 + $0x20] sm:$0xff]  ;;  %v326_v38 = vld [vmem:[%s1667_s29 + $0x10] sm:$0xff] }
  0x18   : > { %829 = vmatpush1.bf16.msra.mxu1 %v318_v14  ;;  %557 = vmatprep.subr.bf16.mxu0 %v1600_v0  ;;  %v293_v36 = vld [vmem:[%s1672_s7 + $0x28] sm:$0xff]  ;;  %v350_v37 = vpack.c.bf16 %v329_v34, %v328_v33  ;;  %v327_v40 = vld [vmem:[%s1667_s29 + $0x18] sm:$0xff]  ;;  %v290_v41 = vld [vmem:[%s1672_s7 + $0x10] sm:$0xff] }
  0x19   : > { %830 = vmatprep.subr.bf16.mxu1 %v1600_v0  ;;  %v314_v39 = vpack.c.bf16 %v293_v36, %v292_v35  ;;  %v291_v42 = vld [vmem:[%s1672_s7 + $0x18] sm:$0xff]  ;;  %v349_v43 = vpack.c.bf16 %v327_v40, %v326_v38  ;;  %v324_v45 = vld [vmem:[%s1667_s29] sm:$0xff]  ;;  %v325_v46 = vld [vmem:[%s1667_s29 + $0x8] sm:$0xff] }
  0x1a   : > { %v313_v44 = vpack.c.bf16 %v291_v42, %v290_v41  ;;  %v288_v47 = vld [vmem:[%s1672_s7] sm:$0xff]  ;;  %v289_v48 = vld [vmem:[%s1672_s7 + $0x8] sm:$0xff]  ;;  %v348_v49 = vpack.c.bf16 %v325_v46, %v324_v45  ;;  %v346_v50 = vld [vmem:[%s1667_s29 + $0xb0] sm:$0xff] }
  0x1b   : > { %558 = vmatpush1.bf16.msra.mxu0 %v353_v19  ;;  %v312_v51 = vpack.c.bf16 %v289_v48, %v288_v47  ;;  %v347_v52 = vld [vmem:[%s1667_s29 + $0xb8] sm:$0xff]  ;;  %v310_v53 = vld [vmem:[%s1672_s7 + $0xb0] sm:$0xff]  ;;  %v344_v56 = vld [vmem:[%s1667_s29 + $0xa0] sm:$0xff] }
  0x1c   : > { %831 = vmatpush1.bf16.msra.mxu1 %v317_v20  ;;  %559 = vmatprep.subr.bf16.mxu0 %v1600_v0  ;;  %v311_v54 = vld [vmem:[%s1672_s7 + $0xb8] sm:$0xff]  ;;  %v359_v55 = vpack.c.bf16 %v347_v52, %v346_v50  ;;  %v345_v58 = vld [vmem:[%s1667_s29 + $0xa8] sm:$0xff]  ;;  %v308_v59 = vld [vmem:[%s1672_s7 + $0xa0] sm:$0xff] }
  0x1d   : > { %832 = vmatprep.subr.bf16.mxu1 %v1600_v0  ;;  %v323_v57 = vpack.c.bf16 %v311_v54, %v310_v53  ;;  %v309_v60 = vld [vmem:[%s1672_s7 + $0xa8] sm:$0xff]  ;;  %v358_v62 = vpack.c.bf16 %v345_v58, %v344_v56  ;;  %v342_v63 = vld [vmem:[%s1667_s29 + $0x90] sm:$0xff]  ;;  %v343_v1 = vld [vmem:[%s1667_s29 + $0x98] sm:$0xff] }
  0x1e   : > { %v322_v2 = vpack.c.bf16 %v309_v60, %v308_v59  ;;  %v306_v3 = vld [vmem:[%s1672_s7 + $0x90] sm:$0xff]  ;;  %v956_v5 = vld [vmem:[%s2043_s4 + $0x8] sm:$0xff]  ;;  %v307_v6 = vld [vmem:[%s1672_s7 + $0x98] sm:$0xff]  ;;  %v357_v8 = vpack.c.bf16 %v343_v1, %v342_v63 }
  0x1f   : > { %560 = vmatpush1.bf16.msra.mxu0 %v352_v25  ;;  %v957_v4 = vld [vmem:[%s2043_s4 + $0x10] sm:$0xff]  ;;  %986 = vperm.xlu0 %1502, %v956_v5   ;;  %v958_v7 = vld [vmem:[%s2043_s4 + $0x18] sm:$0xff]  ;;  %v340_v9 = vld [vmem:[%s1667_s29 + $0x80] sm:$0xff]  ;;  %v321_v10 = vpack.c.bf16 %v307_v6, %v306_v3 }
  0x20   : > { %833 = vmatpush1.bf16.msra.mxu1 %v316_v26  ;;  %561 = vmatprep.subr.bf16.mxu0 %v1600_v0  ;;  %v341_v11 = vld [vmem:[%s1667_s29 + $0x88] sm:$0xff]  ;;  %v304_v12 = vld [vmem:[%s1672_s7 + $0x80] sm:$0xff]  ;;  %v961_v17 = vld [vmem:[%s2043_s4 + $0x30] sm:$0xff]  ;;  %s1980_s29 = scalar_lea.vmem %s2044_s5, %s1476_s26 }
  0x21   : > { %834 = vmatprep.subr.bf16.mxu1 %v1600_v0  ;;  %991 = vperm.xlu1 %1503, %v957_v4   ;;  %v959_v13 = vld [vmem:[%s2043_s4 + $0x20] sm:$0xff]  ;;  %v305_v14 = vld [vmem:[%s1672_s7 + $0x88] sm:$0xff]  ;;  %v356_v16 = vpack.c.bf16 %v341_v11, %v340_v9  ;;  %v962_v20 = vld [vmem:[%s2043_s4 + $0x38] sm:$0xff] }
  0x22   : > { %v960_v15 = vld [vmem:[%s2043_s4 + $0x28] sm:$0xff]  ;;  %v320_v18 = vpack.c.bf16 %v305_v14, %v304_v12  ;;  %v1510_v22 = vld [vmem:[%s2042_s3 + $0x14] ss:$8 sps:$4 sm:$0xff]   ;;  %v1514_v26 = vld [vmem:[%s2042_s3 + $0x10] ss:$8 sps:$4 sm:$0xff]  }
  0x23   : > { %562 = vmatpush1.bf16.msra.mxu0 %v351_v31  ;;  %1001 = vperm.xlu0 %1502, %v959_v13   ;;  %v1504_v19 = vld [vmem:[%s2042_s3] ss:$8 sps:$4 sm:$0xff]   ;;  %v1512_v23 = vld [vmem:[%s2041_s2 + $0x14] ss:$8 sps:$4 sm:$0xff]   ;;  %v1515_v28 = vld [vmem:[%s2041_s2 + $0x10] ss:$8 sps:$4 sm:$0xff]  }
  0x24   : > { %835 = vmatpush1.bf16.msra.mxu1 %v315_v32  ;;  %563 = vmatprep.subr.bf16.mxu0 %v1600_v0  ;;  %v1507_v21 = vld [vmem:[%s2041_s2] ss:$8 sps:$4 sm:$0xff]   ;;  %v965_v25 = vld [vmem:[%s2043_s4 + $0x50] sm:$0xff]  ;;  %v966_v27 = vld [vmem:[%s2043_s4 + $0x58] sm:$0xff] }
  0x25   : > { %836 = vmatprep.subr.bf16.mxu1 %v1600_v0  ;;  %996 = vperm.xlu1 %1503, %v958_v7   ;;  %v964_v24 = vld [vmem:[%s2043_s4 + $0x48] sm:$0xff]  ;;  %v967_v30 = vld [vmem:[%s2043_s4 + $0x60] sm:$0xff]  ;;  %v969_v33 = vld [vmem:[%s2043_s4 + $0x70] sm:$0xff] }
  0x26   : > { %v1516_v29 = vld [vmem:[%s2042_s3 + $0x24] ss:$8 sps:$4 sm:$0xff]   ;;  %v1520_v34 = vld [vmem:[%s2042_s3 + $0x20] ss:$8 sps:$4 sm:$0xff]   ;;  %v970_v35 = vld [vmem:[%s2043_s4 + $0x78] sm:$0xff] }
  0x27   : > { %564 = vmatpush1.bf16.msra.mxu0 %v350_v37  ;;  %1011 = vperm.xlu0 %1502, %v961_v17   ;;  %v1518_v31 = vld [vmem:[%s2041_s2 + $0x24] ss:$8 sps:$4 sm:$0xff]   ;;  %v1521_v36 = vld [vmem:[%s2041_s2 + $0x20] ss:$8 sps:$4 sm:$0xff]   ;;  %v1522_v37 = vld [vmem:[%s2042_s3 + $0x34] ss:$8 sps:$4 sm:$0xff]  }
  0x28   : > { %837 = vmatpush1.bf16.msra.mxu1 %v314_v39  ;;  %565 = vmatprep.subr.bf16.mxu0 %v1600_v0  ;;  %v968_v32 = vld [vmem:[%s2043_s4 + $0x68] sm:$0xff]  ;;  %v971_v38 = vld [vmem:[%s2043_s4 + $0x80] sm:$0xff]  ;;  %v1524_v39 = vld [vmem:[%s2041_s2 + $0x34] ss:$8 sps:$4 sm:$0xff]  }
  0x29   : > { %838 = vmatprep.subr.bf16.mxu1 %v1600_v0  ;;  %1006 = vperm.xlu1 %1503, %v960_v15   ;;  %v972_v40 = vld [vmem:[%s2043_s4 + $0x88] sm:$0xff]  ;;  %v973_v41 = vld [vmem:[%s2043_s4 + $0x90] sm:$0xff]  ;;  %v975_v46 = vld [vmem:[%s2043_s4 + $0xa0] sm:$0xff] }
  0x2a   : > { %v1526_v42 = vld [vmem:[%s2042_s3 + $0x30] ss:$8 sps:$4 sm:$0xff]   ;;  %v1528_v45 = vld [vmem:[%s2042_s3 + $0x44] ss:$8 sps:$4 sm:$0xff]   ;;  %v1532_v50 = vld [vmem:[%s2042_s3 + $0x40] ss:$8 sps:$4 sm:$0xff]  }
  0x2b   : > { %566 = vmatpush1.bf16.msra.mxu0 %v349_v43  ;;  %v974_v43 = vld [vmem:[%s2043_s4 + $0x98] sm:$0xff]  ;;  %v1530_v47 = vld [vmem:[%s2041_s2 + $0x44] ss:$8 sps:$4 sm:$0xff]   ;;  %v1533_v52 = vld [vmem:[%s2041_s2 + $0x40] ss:$8 sps:$4 sm:$0xff]  }
  0x2c   : > { %839 = vmatpush1.bf16.msra.mxu1 %v313_v44  ;;  %567 = vmatprep.subr.bf16.mxu0 %v1600_v0  ;;  %v1527_v44 = vld [vmem:[%s2041_s2 + $0x30] ss:$8 sps:$4 sm:$0xff]   ;;  %v976_v48 = vld [vmem:[%s2043_s4 + $0xa8] sm:$0xff]  ;;  %v1534_v53 = vld [vmem:[%s2042_s3 + $0x54] ss:$8 sps:$4 sm:$0xff]  }
  0x2d   : > { %840 = vmatprep.subr.bf16.mxu1 %v1600_v0  ;;  %1016 = vperm.xlu1 %1503, %v962_v20   ;;  %v1536_v54 = vld [vmem:[%s2041_s2 + $0x54] ss:$8 sps:$4 sm:$0xff]   ;;  %v1539_v56 = vld [vmem:[%s2041_s2 + $0x50] ss:$8 sps:$4 sm:$0xff]   ;;  %v1542_v58 = vld [vmem:[%s2041_s2 + $0x64] ss:$8 sps:$4 sm:$0xff]  }
  0x2e   : > { %v1544_v59 = vld [vmem:[%s2042_s3 + $0x60] ss:$8 sps:$4 sm:$0xff]   ;;  %v1546_v61 = vld [vmem:[%s2042_s3 + $0x74] ss:$8 sps:$4 sm:$0xff]   ;;  %v1550_v63 = vld [vmem:[%s2042_s3 + $0x70] ss:$8 sps:$4 sm:$0xff]  }
  0x2f   : > { %568 = vmatpush1.bf16.msra.mxu0 %v348_v49  ;;  %v977_v49 = vld [vmem:[%s2043_s4 + $0xb0] sm:$0xff]  ;;  %v1545_v60 = vld [vmem:[%s2041_s2 + $0x60] ss:$8 sps:$4 sm:$0xff]   ;;  %v1554_v3 = vld [vmem:[%s2041_s2 + $0x84] ss:$8 sps:$4 sm:$0xff]  }
  0x30   : > { %841 = vmatpush1.bf16.msra.mxu1 %v312_v51  ;;  %577 = vmatprep.subr.bf16.mxu0 %v1600_v0  ;;  %v978_v51 = vld [vmem:[%s2043_s4 + $0xb8] sm:$0xff]  ;;  %v1556_v4 = vld [vmem:[%s2042_s3 + $0x80] ss:$8 sps:$4 sm:$0xff]   ;;  %v1566_v11 = vld [vmem:[%s2041_s2 + $0xa4] ss:$8 sps:$4 sm:$0xff]  }
  0x31   : > { %850 = vmatprep.subr.bf16.mxu1 %v1600_v0  ;;  %1026 = vperm.xlu1 %1503, %v964_v24   ;;  %v1551_v1 = vld [vmem:[%s2041_s2 + $0x70] ss:$8 sps:$4 sm:$0xff]   ;;  %v1557_v5 = vld [vmem:[%s2041_s2 + $0x80] ss:$8 sps:$4 sm:$0xff]   ;;  %v1558_v6 = vld [vmem:[%s2042_s3 + $0x94] ss:$8 sps:$4 sm:$0xff]  }
  0x32   : > { %v1560_v7 = vld [vmem:[%s2041_s2 + $0x94] ss:$8 sps:$4 sm:$0xff]   ;;  %v1563_v9 = vld [vmem:[%s2041_s2 + $0x90] ss:$8 sps:$4 sm:$0xff]   ;;  %v1568_v12 = vld [vmem:[%s2042_s3 + $0xa0] ss:$8 sps:$4 sm:$0xff]  }
  0x33   : > { %578 = vmatpush2.bf16.msra.mxu0 %v359_v55  ;;  %v1538_v55 = vld [vmem:[%s2042_s3 + $0x50] ss:$8 sps:$4 sm:$0xff]   ;;  %v1569_v13 = vld [vmem:[%s2041_s2 + $0xa0] ss:$8 sps:$4 sm:$0xff]   ;;  %v1570_v14 = vld [vmem:[%s2042_s3 + $0xb4] ss:$8 sps:$4 sm:$0xff]  }
  0x34   : > { %851 = vmatpush2.bf16.msra.mxu1 %v323_v57  ;;  %579 = vmatprep.subr.bf16.mxu0 %v1600_v0  ;;  %v1540_v57 = vld [vmem:[%s2042_s3 + $0x64] ss:$8 sps:$4 sm:$0xff]   ;;  %v1572_v15 = vld [vmem:[%s2041_s2 + $0xb4] ss:$8 sps:$4 sm:$0xff]   ;;  %v1575_v17 = vld [vmem:[%s2041_s2 + $0xb0] ss:$8 sps:$4 sm:$0xff]  }
  0x35   : > { %852 = vmatprep.subr.bf16.mxu1 %v1600_v0  ;;  %1036 = vperm.xlu1 %1503, %v966_v27  }
  0x37   : > { %580 = vmatpush2.bf16.msra.mxu0 %v358_v62  ;;  %v1548_v62 = vld [vmem:[%s2041_s2 + $0x74] ss:$8 sps:$4 sm:$0xff]  }
  0x38   : > { %853 = vmatpush2.bf16.msra.mxu1 %v322_v2  ;;  %581 = vmatprep.subr.bf16.mxu0 %v1600_v0  ;;  %v1552_v2 = vld [vmem:[%s2042_s3 + $0x84] ss:$8 sps:$4 sm:$0xff]  }
  0x39   : > { %854 = vmatprep.subr.bf16.mxu1 %v1600_v0  ;;  %1046 = vperm.xlu1 %1503, %v968_v32  }
  0x3b   : > { %582 = vmatpush2.bf16.msra.mxu0 %v357_v8  ;;  %v1562_v8 = vld [vmem:[%s2042_s3 + $0x90] ss:$8 sps:$4 sm:$0xff]  }
  0x3c   : > { %855 = vmatpush2.bf16.msra.mxu1 %v321_v10  ;;  %583 = vmatprep.subr.bf16.mxu0 %v1600_v0  ;;  %v1564_v10 = vld [vmem:[%s2042_s3 + $0xa4] ss:$8 sps:$4 sm:$0xff]  }
  0x3d   : > { %856 = vmatprep.subr.bf16.mxu1 %v1600_v0  ;;  %v963_v0 = vld [vmem:[%s2043_s4 + $0x40] sm:$0xff]  ;;  %1056 = vperm.xlu1 %1503, %v970_v35  }
  0x3e   : > { %1021 = vperm.xlu0 %1502, %v963_v0  }
  0x3f   : > { %584 = vmatpush2.bf16.msra.mxu0 %v356_v16  ;;  %v1574_v16 = vld [vmem:[%s2042_s3 + $0xb0] ss:$8 sps:$4 sm:$0xff]  }
  0x40   : > { %857 = vmatpush2.bf16.msra.mxu1 %v320_v18 }
  0x41   : > { %1066 = vperm.xlu1 %1503, %v972_v40  }
  0x42   : > { %586 = vmatmul.mubr.bf16.vlgmr.msra.gmra.mxu0 %v1504_v19  ;;  %1031 = vperm.xlu0 %1502, %v965_v25  }
  0x43   : > { %859 = vmatmul.mubr.bf16.vlgmr.msra.gmra.mxu1 %v1507_v21  ;;  %1378 = vmatprep.mubr.msk.bf16.mxu0 %vm516_vm0, %v1510_v22 }
  0x44   : > { %1414 = vmatprep.mubr.msk.bf16.mxu1 %vm516_vm0, %v1512_v23 }
  0x45   : > { %1076 = vperm.xlu1 %1503, %v974_v43  }
  0x46   : > { %1041 = vperm.xlu0 %1502, %v967_v30  }
  0x49   : > { %1086 = vperm.xlu1 %1503, %v976_v48  }
  0x4a   : > { %594 = vmatmul.mubr.bf16.gmra.mxu0 %v1514_v26  ;;  %1051 = vperm.xlu0 %1502, %v969_v33  }
  0x4b   : > { %867 = vmatmul.mubr.bf16.gmra.mxu1 %v1515_v28  ;;  %1379 = vmatprep.mubr.msk.bf16.mxu0 %vm516_vm0, %v1516_v29 }
  0x4c   : > { %1415 = vmatprep.mubr.msk.bf16.mxu1 %vm516_vm0, %v1518_v31 }
  0x4d   : > { %1096 = vperm.xlu1 %1503, %v978_v51  }
  0x4e   : > { %1061 = vperm.xlu0 %1502, %v971_v38  }
  0x52   : > { %602 = vmatmul.mubr.bf16.gmra.mxu0 %v1520_v34  ;;  %1071 = vperm.xlu0 %1502, %v973_v41  }
  0x53   : > { %875 = vmatmul.mubr.bf16.gmra.mxu1 %v1521_v36  ;;  %1380 = vmatprep.mubr.msk.bf16.mxu0 %vm516_vm0, %v1522_v37 }
  0x54   : > { %1416 = vmatprep.mubr.msk.bf16.mxu1 %vm516_vm0, %v1524_v39 }
  0x56   : > { %1081 = vperm.xlu0 %1502, %v975_v46  }
  0x5a   : > { %610 = vmatmul.mubr.bf16.gmra.mxu0 %v1526_v42  ;;  %1091 = vperm.xlu0 %1502, %v977_v49  }
  0x5b   : > { %883 = vmatmul.mubr.bf16.gmra.mxu1 %v1527_v44  ;;  %1381 = vmatprep.mubr.msk.bf16.mxu0 %vm516_vm0, %v1528_v45 }
  0x5c   : > { %1417 = vmatprep.mubr.msk.bf16.mxu1 %vm516_vm0, %v1530_v47 }
  0x62   : > { %618 = vmatmul.mubr.bf16.gmra.mxu0 %v1532_v50 }
  0x63   : > { %891 = vmatmul.mubr.bf16.gmra.mxu1 %v1533_v52  ;;  %1382 = vmatprep.mubr.msk.bf16.mxu0 %vm516_vm0, %v1534_v53 }
  0x64   : > { %1418 = vmatprep.mubr.msk.bf16.mxu1 %vm516_vm0, %v1536_v54 }
  0x6a   : > { %626 = vmatmul.mubr.bf16.gmra.mxu0 %v1538_v55 }
  0x6b   : > { %899 = vmatmul.mubr.bf16.gmra.mxu1 %v1539_v56  ;;  %1383 = vmatprep.mubr.msk.bf16.mxu0 %vm516_vm0, %v1540_v57 }
  0x6c   : > { %1419 = vmatprep.mubr.msk.bf16.mxu1 %vm516_vm0, %v1542_v58 }
  0x72   : > { %634 = vmatmul.mubr.bf16.gmra.mxu0 %v1544_v59 }
  0x73   : > { %907 = vmatmul.mubr.bf16.gmra.mxu1 %v1545_v60  ;;  %1384 = vmatprep.mubr.msk.bf16.mxu0 %vm516_vm0, %v1546_v61 }
  0x74   : > { %1420 = vmatprep.mubr.msk.bf16.mxu1 %vm516_vm0, %v1548_v62 }
  0x7a   : > { %642 = vmatmul.mubr.bf16.gmra.mxu0 %v1550_v63 }
  0x7b   : > { %915 = vmatmul.mubr.bf16.gmra.mxu1 %v1551_v1  ;;  %1385 = vmatprep.mubr.msk.bf16.mxu0 %vm516_vm0, %v1552_v2 }
  0x7c   : > { %1421 = vmatprep.mubr.msk.bf16.mxu1 %vm516_vm0, %v1554_v3 }
  0x82   : > { %650 = vmatmul.mubr.bf16.gmra.mxu0 %v1556_v4 }
  0x83   : > { %923 = vmatmul.mubr.bf16.gmra.mxu1 %v1557_v5  ;;  %1386 = vmatprep.mubr.msk.bf16.mxu0 %vm516_vm0, %v1558_v6 }
  0x84   : > { %1422 = vmatprep.mubr.msk.bf16.mxu1 %vm516_vm0, %v1560_v7 }
  0x8a   : > { %658 = vmatmul.mubr.bf16.gmra.mxu0 %v1562_v8 }
  0x8b   : > { %931 = vmatmul.mubr.bf16.gmra.mxu1 %v1563_v9  ;;  %1387 = vmatprep.mubr.msk.bf16.mxu0 %vm516_vm0, %v1564_v10  ;;  %v982_v18 = vpop.permute.xlu0 %981 }
  0x8c   : > { %1423 = vmatprep.mubr.msk.bf16.mxu1 %vm516_vm0, %v1566_v11 }
  0x92   : > { %666 = vmatmul.mubr.bf16.gmra.mxu0 %v1568_v12 }
  0x93   : > { %939 = vmatmul.mubr.bf16.gmra.mxu1 %v1569_v13  ;;  %1388 = vmatprep.mubr.msk.bf16.mxu0 %vm516_vm0, %v1570_v14 }
  0x94   : > { %1424 = vmatprep.mubr.msk.bf16.mxu1 %vm516_vm0, %v1572_v15 }
  0x9a   : > { %674 = vmatmul.mubr.bf16.gmra.mxu0 %v1574_v16  ;;  %v987_v26 = vpop.permute.xlu0 %986 }
  0x9b   : > { %947 = vmatmul.mubr.bf16.gmra.mxu1 %v1575_v17 }
  0x9c   : > { %v992_v33 = vpop.permute.xlu1 %991 }
  0x9e   : > { %v1002_v53 = vpop.permute.xlu0 %1001 }
  0xa0   : > { %v997_v45 = vpop.permute.xlu1 %996 }
  0xa2   : > { %v1012_v6 = vpop.permute.xlu0 %1011 }
  0xa4   : > { %v1007_v61 = vpop.permute.xlu1 %1006 }
  0xa8   : > { %v1017_v14 = vpop.permute.xlu1 %1016 }
 0x102   : > { %v587_v19 = vpop.f32.mrf.mxu0 }
 0x103   : > { %v860_v20 = vpop.f32.mrf.mxu1 }
 0x104   : > { %v861_v21 = vadd.f32 %v860_v20, %v587_v19  ;;  %v589_v22 = vpop.f32.mrf.mxu0 }
 0x105   : > { %v862_v0 = vpop.f32.mrf.mxu1  ;;  %v1022_v22 = vpop.permute.xlu0 %1021 }
 0x106   : > { %v1099_v23 = vadd.f32 %v982_v18, %v861_v21  ;;  %v590_v24 = vpop.f32.mrf.mxu0 }
 0x107   : > { %v863_v25 = vpop.f32.mrf.mxu1 }
 0x108   : > { %v1451_v27 = vpack.c.bf16 %v1099_v23, %v1099_v23  ;;  %v864_v28 = vadd.f32 %v863_v25, %v590_v24  ;;  %v592_v29 = vpop.f32.mrf.mxu0 }
 0x109   : > { %v865_v30 = vpop.f32.mrf.mxu1  ;;  %v1027_v29 = vpop.permute.xlu1 %1026 }
 0x10a   : > { %1220 = vst.msk [vmem:[%s1980_s29] sm:$0xf] %vm1219_vm1, %v1451_v27  ;;  %v1100_v31 = vadd.f32 %v987_v26, %v864_v28  ;;  %v595_v32 = vpop.f32.mrf.mxu0 }
 0x10b   : > { %v868_v34 = vpop.f32.mrf.mxu1 }
 0x10c   : > { %v1452_v35 = vpack.c.bf16 %v1100_v31, %v1100_v31  ;;  %v869_v36 = vadd.f32 %v868_v34, %v595_v32  ;;  %v597_v37 = vpop.f32.mrf.mxu0 }
 0x10d   : > { %v870_v38 = vpop.f32.mrf.mxu1  ;;  %v1032_v37 = vpop.permute.xlu0 %1031 }
 0x10e   : > { %1221 = vst.msk [vmem:[%s1980_s29 + $0x4] sm:$0xf] %vm1219_vm1, %v1452_v35  ;;  %v1101_v39 = vadd.f32 %v992_v33, %v869_v36  ;;  %v598_v40 = vpop.f32.mrf.mxu0 }
 0x10f   : > { %v871_v41 = vpop.f32.mrf.mxu1 }
 0x110   : > { %v1453_v42 = vpack.c.bf16 %v1101_v39, %v1101_v39  ;;  %v872_v43 = vadd.f32 %v871_v41, %v598_v40  ;;  %v600_v44 = vpop.f32.mrf.mxu0 }
 0x111   : > { %v873_v46 = vpop.f32.mrf.mxu1 }
 0x112   : > { %1222 = vst.msk [vmem:[%s1980_s29 + $0x8] sm:$0xf] %vm1219_vm1, %v1453_v42  ;;  %v1102_v47 = vadd.f32 %v997_v45, %v872_v43  ;;  %v603_v48 = vpop.f32.mrf.mxu0  ;;  %v1037_v45 = vpop.permute.xlu1 %1036 }
 0x113   : > { %v876_v49 = vpop.f32.mrf.mxu1 }
 0x114   : > { %v1454_v50 = vpack.c.bf16 %v1102_v47, %v1102_v47  ;;  %v877_v51 = vadd.f32 %v876_v49, %v603_v48  ;;  %v605_v52 = vpop.f32.mrf.mxu0 }
 0x115   : > { %v878_v54 = vpop.f32.mrf.mxu1 }
 0x116   : > { %1223 = vst.msk [vmem:[%s1980_s29 + $0xc] sm:$0xf] %vm1219_vm1, %v1454_v50  ;;  %v1103_v55 = vadd.f32 %v1002_v53, %v877_v51  ;;  %v606_v56 = vpop.f32.mrf.mxu0  ;;  %v1042_v53 = vpop.permute.xlu0 %1041 }
 0x117   : > { %v879_v57 = vpop.f32.mrf.mxu1 }
 0x118   : > { %v1455_v58 = vpack.c.bf16 %v1103_v55, %v1103_v55  ;;  %v880_v59 = vadd.f32 %v879_v57, %v606_v56  ;;  %v608_v60 = vpop.f32.mrf.mxu0 }
 0x119   : > { %v881_v62 = vpop.f32.mrf.mxu1 }
 0x11a   : > { %1224 = vst.msk [vmem:[%s1980_s29 + $0x10] sm:$0xf] %vm1219_vm1, %v1455_v58  ;;  %v1104_v63 = vadd.f32 %v1007_v61, %v880_v59  ;;  %v611_v1 = vpop.f32.mrf.mxu0  ;;  %v1047_v61 = vpop.permute.xlu1 %1046 }
 0x11b   : > { %v884_v2 = vpop.f32.mrf.mxu1 }
 0x11c   : > { %v1456_v3 = vpack.c.bf16 %v1104_v63, %v1104_v63  ;;  %v885_v4 = vadd.f32 %v884_v2, %v611_v1  ;;  %v613_v5 = vpop.f32.mrf.mxu0 }
 0x11d   : > { %v886_v7 = vpop.f32.mrf.mxu1 }
 0x11e   : > { %1225 = vst.msk [vmem:[%s1980_s29 + $0x14] sm:$0xf] %vm1219_vm1, %v1456_v3  ;;  %v1105_v8 = vadd.f32 %v1012_v6, %v885_v4  ;;  %v614_v9 = vpop.f32.mrf.mxu0  ;;  %v1052_v6 = vpop.permute.xlu0 %1051 }
 0x11f   : > { %v887_v10 = vpop.f32.mrf.mxu1 }
 0x120   : > { %v1457_v11 = vpack.c.bf16 %v1105_v8, %v1105_v8  ;;  %v888_v12 = vadd.f32 %v887_v10, %v614_v9  ;;  %v616_v13 = vpop.f32.mrf.mxu0 }
 0x121   : > { %v889_v15 = vpop.f32.mrf.mxu1 }
 0x122   : > { %1226 = vst.msk [vmem:[%s1980_s29 + $0x18] sm:$0xf] %vm1219_vm1, %v1457_v11  ;;  %v1106_v16 = vadd.f32 %v1017_v14, %v888_v12  ;;  %v619_v17 = vpop.f32.mrf.mxu0  ;;  %v1057_v14 = vpop.permute.xlu1 %1056 }
 0x123   : > { %v892_v18 = vpop.f32.mrf.mxu1 }
 0x124   : > { %v1458_v19 = vpack.c.bf16 %v1106_v16, %v1106_v16  ;;  %v893_v20 = vadd.f32 %v892_v18, %v619_v17  ;;  %v621_v21 = vpop.f32.mrf.mxu0 }
 0x125   : > { %v894_v0 = vpop.f32.mrf.mxu1 }
 0x126   : > { %1227 = vst.msk [vmem:[%s1980_s29 + $0x1c] sm:$0xf] %vm1219_vm1, %v1458_v19  ;;  %v1107_v23 = vadd.f32 %v1022_v22, %v893_v20  ;;  %v622_v24 = vpop.f32.mrf.mxu0  ;;  %v1062_v22 = vpop.permute.xlu0 %1061 }
 0x127   : > { %v895_v25 = vpop.f32.mrf.mxu1 }
 0x128   : > { %v1459_v26 = vpack.c.bf16 %v1107_v23, %v1107_v23  ;;  %v896_v27 = vadd.f32 %v895_v25, %v622_v24  ;;  %v624_v28 = vpop.f32.mrf.mxu0 }
 0x129   : > { %v897_v30 = vpop.f32.mrf.mxu1 }
 0x12a   : > { %1228 = vst.msk [vmem:[%s1980_s29 + $0x20] sm:$0xf] %vm1219_vm1, %v1459_v26  ;;  %v1108_v31 = vadd.f32 %v1027_v29, %v896_v27  ;;  %v627_v32 = vpop.f32.mrf.mxu0  ;;  %v1067_v29 = vpop.permute.xlu1 %1066 }
 0x12b   : > { %v900_v33 = vpop.f32.mrf.mxu1 }
 0x12c   : > { %v1460_v34 = vpack.c.bf16 %v1108_v31, %v1108_v31  ;;  %v901_v35 = vadd.f32 %v900_v33, %v627_v32  ;;  %v629_v36 = vpop.f32.mrf.mxu0 }
 0x12d   : > { %v902_v38 = vpop.f32.mrf.mxu1 }
 0x12e   : > { %1229 = vst.msk [vmem:[%s1980_s29 + $0x24] sm:$0xf] %vm1219_vm1, %v1460_v34  ;;  %v1109_v39 = vadd.f32 %v1032_v37, %v901_v35  ;;  %v630_v40 = vpop.f32.mrf.mxu0  ;;  %v1072_v37 = vpop.permute.xlu0 %1071 }
 0x12f   : > { %v903_v41 = vpop.f32.mrf.mxu1 }
 0x130   : > { %v1461_v42 = vpack.c.bf16 %v1109_v39, %v1109_v39  ;;  %v904_v43 = vadd.f32 %v903_v41, %v630_v40  ;;  %v632_v44 = vpop.f32.mrf.mxu0 }
 0x131   : > { %v905_v46 = vpop.f32.mrf.mxu1 }
 0x132   : > { %1230 = vst.msk [vmem:[%s1980_s29 + $0x28] sm:$0xf] %vm1219_vm1, %v1461_v42  ;;  %v1110_v47 = vadd.f32 %v1037_v45, %v904_v43  ;;  %v635_v48 = vpop.f32.mrf.mxu0  ;;  %v1077_v45 = vpop.permute.xlu1 %1076 }
 0x133   : > { %v908_v49 = vpop.f32.mrf.mxu1 }
 0x134   : > { %v1462_v50 = vpack.c.bf16 %v1110_v47, %v1110_v47  ;;  %v909_v51 = vadd.f32 %v908_v49, %v635_v48  ;;  %v637_v52 = vpop.f32.mrf.mxu0 }
 0x135   : > { %v910_v54 = vpop.f32.mrf.mxu1 }
 0x136   : > { %1231 = vst.msk [vmem:[%s1980_s29 + $0x2c] sm:$0xf] %vm1219_vm1, %v1462_v50  ;;  %v1111_v55 = vadd.f32 %v1042_v53, %v909_v51  ;;  %v638_v56 = vpop.f32.mrf.mxu0  ;;  %v1082_v53 = vpop.permute.xlu0 %1081 }
 0x137   : > { %v911_v57 = vpop.f32.mrf.mxu1 }
 0x138   : > { %v1463_v58 = vpack.c.bf16 %v1111_v55, %v1111_v55  ;;  %v912_v59 = vadd.f32 %v911_v57, %v638_v56  ;;  %v640_v60 = vpop.f32.mrf.mxu0 }
 0x139   : > { %v913_v62 = vpop.f32.mrf.mxu1 }
 0x13a   : > { %1232 = vst.msk [vmem:[%s1980_s29 + $0x30] sm:$0xf] %vm1219_vm1, %v1463_v58  ;;  %v1112_v63 = vadd.f32 %v1047_v61, %v912_v59  ;;  %v643_v1 = vpop.f32.mrf.mxu0  ;;  %v1087_v61 = vpop.permute.xlu1 %1086 }
 0x13b   : > { %v916_v2 = vpop.f32.mrf.mxu1 }
 0x13c   : > { %v1464_v3 = vpack.c.bf16 %v1112_v63, %v1112_v63  ;;  %v917_v4 = vadd.f32 %v916_v2, %v643_v1  ;;  %v645_v5 = vpop.f32.mrf.mxu0 }
 0x13d   : > { %v918_v7 = vpop.f32.mrf.mxu1 }
 0x13e   : > { %1233 = vst.msk [vmem:[%s1980_s29 + $0x34] sm:$0xf] %vm1219_vm1, %v1464_v3  ;;  %v1113_v8 = vadd.f32 %v1052_v6, %v917_v4  ;;  %v646_v9 = vpop.f32.mrf.mxu0  ;;  %v1092_v6 = vpop.permute.xlu0 %1091 }
 0x13f   : > { %v919_v10 = vpop.f32.mrf.mxu1 }
 0x140   : > { %v1465_v11 = vpack.c.bf16 %v1113_v8, %v1113_v8  ;;  %v920_v12 = vadd.f32 %v919_v10, %v646_v9  ;;  %v648_v13 = vpop.f32.mrf.mxu0 }
 0x141   : > { %v921_v15 = vpop.f32.mrf.mxu1 }
 0x142   : > { %1234 = vst.msk [vmem:[%s1980_s29 + $0x38] sm:$0xf] %vm1219_vm1, %v1465_v11  ;;  %v1114_v16 = vadd.f32 %v1057_v14, %v920_v12  ;;  %v651_v17 = vpop.f32.mrf.mxu0  ;;  %v1097_v14 = vpop.permute.xlu1 %1096 }
 0x143   : > { %v924_v18 = vpop.f32.mrf.mxu1 }
 0x144   : > { %v1466_v19 = vpack.c.bf16 %v1114_v16, %v1114_v16  ;;  %v925_v20 = vadd.f32 %v924_v18, %v651_v17  ;;  %v653_v21 = vpop.f32.mrf.mxu0 }
 0x145   : > { %v926_v0 = vpop.f32.mrf.mxu1 }
 0x146   : > { %1235 = vst.msk [vmem:[%s1980_s29 + $0x3c] sm:$0xf] %vm1219_vm1, %v1466_v19  ;;  %v1115_v23 = vadd.f32 %v1062_v22, %v925_v20  ;;  %v654_v24 = vpop.f32.mrf.mxu0 }
 0x147   : > { %v927_v25 = vpop.f32.mrf.mxu1 }
 0x148   : > { %v1467_v26 = vpack.c.bf16 %v1115_v23, %v1115_v23  ;;  %v928_v27 = vadd.f32 %v927_v25, %v654_v24  ;;  %v656_v28 = vpop.f32.mrf.mxu0 }
 0x149   : > { %v929_v30 = vpop.f32.mrf.mxu1 }
 0x14a   : > { %1236 = vst.msk [vmem:[%s1980_s29 + $0x40] sm:$0xf] %vm1219_vm1, %v1467_v26  ;;  %v1116_v31 = vadd.f32 %v1067_v29, %v928_v27  ;;  %v659_v32 = vpop.f32.mrf.mxu0 }
 0x14b   : > { %v932_v33 = vpop.f32.mrf.mxu1 }
 0x14c   : > { %v1468_v34 = vpack.c.bf16 %v1116_v31, %v1116_v31  ;;  %v933_v35 = vadd.f32 %v932_v33, %v659_v32  ;;  %v661_v36 = vpop.f32.mrf.mxu0 }
 0x14d   : > { %v934_v38 = vpop.f32.mrf.mxu1 }
 0x14e   : > { %1237 = vst.msk [vmem:[%s1980_s29 + $0x44] sm:$0xf] %vm1219_vm1, %v1468_v34  ;;  %v1117_v39 = vadd.f32 %v1072_v37, %v933_v35  ;;  %v662_v40 = vpop.f32.mrf.mxu0 }
 0x14f   : > { %v935_v41 = vpop.f32.mrf.mxu1 }
 0x150   : > { %v1469_v42 = vpack.c.bf16 %v1117_v39, %v1117_v39  ;;  %v936_v43 = vadd.f32 %v935_v41, %v662_v40  ;;  %v664_v44 = vpop.f32.mrf.mxu0 }
 0x151   : > { %v937_v46 = vpop.f32.mrf.mxu1 }
 0x152   : > { %1238 = vst.msk [vmem:[%s1980_s29 + $0x48] sm:$0xf] %vm1219_vm1, %v1469_v42  ;;  %v1118_v47 = vadd.f32 %v1077_v45, %v936_v43  ;;  %v667_v48 = vpop.f32.mrf.mxu0 }
 0x153   : > { %v940_v49 = vpop.f32.mrf.mxu1 }
 0x154   : > { %v1470_v50 = vpack.c.bf16 %v1118_v47, %v1118_v47  ;;  %v941_v51 = vadd.f32 %v940_v49, %v667_v48  ;;  %v669_v52 = vpop.f32.mrf.mxu0 }
 0x155   : > { %v942_v54 = vpop.f32.mrf.mxu1 }
 0x156   : > { %1239 = vst.msk [vmem:[%s1980_s29 + $0x4c] sm:$0xf] %vm1219_vm1, %v1470_v50  ;;  %v1119_v55 = vadd.f32 %v1082_v53, %v941_v51  ;;  %v670_v56 = vpop.f32.mrf.mxu0 }
 0x157   : > { %v943_v57 = vpop.f32.mrf.mxu1 }
 0x158   : > { %v1471_v58 = vpack.c.bf16 %v1119_v55, %v1119_v55  ;;  %v944_v59 = vadd.f32 %v943_v57, %v670_v56  ;;  %v672_v60 = vpop.f32.mrf.mxu0 }
 0x159   : > { %v945_v62 = vpop.f32.mrf.mxu1 }
 0x15a   : > { %1240 = vst.msk [vmem:[%s1980_s29 + $0x50] sm:$0xf] %vm1219_vm1, %v1471_v58  ;;  %v1120_v63 = vadd.f32 %v1087_v61, %v944_v59  ;;  %v675_v1 = vpop.f32.mrf.mxu0 }
 0x15b   : > { %v948_v2 = vpop.f32.mrf.mxu1 }
 0x15c   : > { %v1472_v3 = vpack.c.bf16 %v1120_v63, %v1120_v63  ;;  %v949_v4 = vadd.f32 %v948_v2, %v675_v1  ;;  %v677_v5 = vpop.f32.mrf.mxu0 }
 0x15d   : > { %v950_v7 = vpop.f32.mrf.mxu1 }
 0x15e   : > { %1241 = vst.msk [vmem:[%s1980_s29 + $0x54] sm:$0xf] %vm1219_vm1, %v1472_v3  ;;  %v1121_v8 = vadd.f32 %v1092_v6, %v949_v4  ;;  %v678_v9 = vpop.f32.mrf.mxu0 }
 0x15f   : > { %v951_v10 = vpop.f32.mrf.mxu1 }
 0x160   : > { %v1473_v11 = vpack.c.bf16 %v1121_v8, %v1121_v8  ;;  %v952_v12 = vadd.f32 %v951_v10, %v678_v9  ;;  %v680_v13 = vpop.f32.mrf.mxu0 }
 0x161   : > { %v953_v15 = vpop.f32.mrf.mxu1 }
 0x162   : > { %1242 = vst.msk [vmem:[%s1980_s29 + $0x58] sm:$0xf] %vm1219_vm1, %v1473_v11  ;;  %v1122_v16 = vadd.f32 %v1097_v14, %v952_v12 }
 0x164   : > { %v1474_v17 = vpack.c.bf16 %v1122_v16, %v1122_v16 }
 0x166   : > { %1243 = vst.msk [vmem:[%s1980_s29 + $0x5c] sm:$0xf] %vm1219_vm1, %v1474_v17 }
 0x167 PF: > { %s15_s20 = sadd.s32 1, %s1598_s20   ;;  %s2045_s18 = smov %s1594_s19 }
 0x168   : > { %p12_p5 = scmp.ge.s32.totalorder %s15_s20, 4   ;;  %s2046_s19 = smov %s2048_s21 }
 0x16a   :  { %14 = sbr.rel (!%p12_p5) target bundleno = 2 (0x2), region = 73 }

// kernel: vosnet_forward.6
= control target key start
LH: loop header
LB: loop body
LE: loop exit
PB: predicated region body
PF: predicated region fallthrough
CT: control target
= control target key end

     0   :  { %s3704_s18 = smov 0   ;;  %s3706_s19 = smov 0   ;;  %s5168_s0 = inlined_call_operand.vmem [shape: f32[2,384,16], index: 0, kind: input, shape index: {}]   ;;  %s5169_s1 = inlined_call_operand.vmem [shape: f32[2,384,16], index: 1, kind: input, shape index: {}]   ;;  %s5170_s2 = inlined_call_operand.vmem [shape: bf16[384,384], index: 2, kind: input, shape index: {}]   ;;  %s5171_s3 = inlined_call_operand.vmem [shape: bf16[384,384], index: 3, kind: input, shape index: {}]   ;;  %s5172_s4 = inlined_call_operand.vmem [shape: f32[384,1], index: 4, kind: input, shape index: {}]   ;;  %s5173_s5 = inlined_call_operand.vmem [shape: bf16[2,384,16], index: 5, kind: output, shape index: {}]  }
   0x1   :  { %s3708_s20 = smov 0  }
   0x2 LB: > { %s27_s21 = sadd.s32 1, %s3667_s19  ;;  %p2974_p0 = scmp.ge.s32.totalorder %s3671_s20, 1  ;;  %s3671_s20 = sphi %s3708_s20, %s15_s20   ;;  %s3667_s19 = sphi %s3706_s19, %s5253_s19   ;;  %s3663_s18 = sphi %s3704_s18, %s5252_s18  }
   0x3   : > { %p29_p1 = scmp.ge.s32.totalorder %s27_s21, 2  ;;  %p221_p2 = scmp.lt.s32.totalorder %s3671_s20, 3 }
   0x5   : > { %s5255_s21 = smov (%p29_p1, %s27_s21), 0  ;;  %p222_p3 = pnand %p2974_p0, %p221_p2 }
   0x7   : > { %225 = sbr.rel (%p222_p3) target bundleno = 556 (0x22c), region = 40 }
   0xc   : > { %p263_p4 = scmp.lt.s32.totalorder %s3663_s18, 1  ;;  %v3673_v0 = vmov 0   ;;  %v3457_v1 = vld [vmem:[%s5171_s3 + $0x8] ss:$12 sps:$4 sm:$0xff]   ;;  %v3467_v42 = vld [vmem:[%s5171_s3 + $0x4] ss:$12 sps:$4 sm:$0xff]  }
   0xd   : > { %1008 = vmatprep.subr.bf16.mxu0 %v3673_v0  ;;  %3456 = vset.pattern.permute.xlu1 %v3673_v0  ;;  %v3458_v54 = vld [vmem:[%s5171_s3 + $0x20] ss:$12 sps:$4 sm:$0xff]   ;;  %v3459_v60 = vld [vmem:[%s5171_s3 + $0x38] ss:$12 sps:$4 sm:$0xff]   ;;  %vm2820_vm0 = vcmask 125952  }
   0xe   : > { %s5257_s18 = smov (!%p263_p4, %s3663_s18), 1  ;;  %3455 = vset.pattern.permute.xlu0 %v3673_v0  ;;  %3300 = vmatprep.mubr.bf16.mxu1 %v3457_v1 }
   0xf   : > { %s3428_s24 = smul.u32 384, %s5257_s18  ;;  %1040 = vmatprep.mubr.bf16.mxu0 %v3467_v42 }
  0x10   : > { %s3429_s13 = smul.u32 192, %s5257_s18 }
  0x11   : > { %s3736_s27 = scalar_lea.vmem %s5169_s1, %s3428_s24  ;;  %s3784_s7 = scalar_lea.vmem %s5168_s0, %s3428_s24 }
  0x12   : > { %v374_v2 = vld [vmem:[%s3736_s27 + $0x70] sm:$0xff]  ;;  %v375_v3 = vld [vmem:[%s3736_s27 + $0x78] sm:$0xff]  ;;  %v372_v7 = vld [vmem:[%s3736_s27 + $0x60] sm:$0xff]  ;;  %s4858_s16 = scalar_lea.vmem %s5173_s5, %s3429_s13 }
  0x13   : > { %v406_v4 = vld [vmem:[%s3736_s27 + $0x170] sm:$0xff]  ;;  %v415_v5 = vpack.c.bf16 %v375_v3, %v374_v2  ;;  %v407_v6 = vld [vmem:[%s3736_s27 + $0x178] sm:$0xff]  ;;  %v373_v8 = vld [vmem:[%s3736_s27 + $0x68] sm:$0xff] }
  0x14   : > { %v431_v9 = vpack.c.bf16 %v407_v6, %v406_v4  ;;  %v404_v10 = vld [vmem:[%s3736_s27 + $0x160] sm:$0xff]  ;;  %v405_v11 = vld [vmem:[%s3736_s27 + $0x168] sm:$0xff]  ;;  %v414_v12 = vpack.c.bf16 %v373_v8, %v372_v7  ;;  %v402_v14 = vld [vmem:[%s3736_s27 + $0x150] sm:$0xff] }
  0x15   : > { %1009 = vmatpush1.bf16.msra.mxu0 %v415_v5  ;;  %v430_v13 = vpack.c.bf16 %v405_v11, %v404_v10  ;;  %v403_v15 = vld [vmem:[%s3736_s27 + $0x158] sm:$0xff]  ;;  %v370_v16 = vld [vmem:[%s3736_s27 + $0x50] sm:$0xff]  ;;  %v400_v20 = vld [vmem:[%s3736_s27 + $0x140] sm:$0xff] }
  0x16   : > { %3284 = vmatprep.subr.bf16.mxu1 %v431_v9  ;;  %1010 = vmatprep.subr.bf16.mxu0 %v3673_v0  ;;  %v371_v17 = vld [vmem:[%s3736_s27 + $0x58] sm:$0xff]  ;;  %v429_v18 = vpack.c.bf16 %v403_v15, %v402_v14  ;;  %v401_v21 = vld [vmem:[%s3736_s27 + $0x148] sm:$0xff]  ;;  %v368_v22 = vld [vmem:[%s3736_s27 + $0x40] sm:$0xff] }
  0x17   : > { %3285 = vmatpush3.bf16.msra.mxu1 %v431_v9  ;;  %v413_v19 = vpack.c.bf16 %v371_v17, %v370_v16  ;;  %v369_v23 = vld [vmem:[%s3736_s27 + $0x48] sm:$0xff]  ;;  %v428_v24 = vpack.c.bf16 %v401_v21, %v400_v20  ;;  %v398_v26 = vld [vmem:[%s3736_s27 + $0x130] sm:$0xff]  ;;  %v399_v27 = vld [vmem:[%s3736_s27 + $0x138] sm:$0xff] }
  0x18   : > { %3286 = vmatprep.subr.bf16.mxu1 %v430_v13  ;;  %v412_v25 = vpack.c.bf16 %v369_v23, %v368_v22  ;;  %v366_v28 = vld [vmem:[%s3736_s27 + $0x30] sm:$0xff]  ;;  %v367_v29 = vld [vmem:[%s3736_s27 + $0x38] sm:$0xff]  ;;  %v427_v30 = vpack.c.bf16 %v399_v27, %v398_v26  ;;  %v396_v32 = vld [vmem:[%s3736_s27 + $0x120] sm:$0xff] }
  0x19   : > { %1011 = vmatpush1.bf16.msra.mxu0 %v414_v12  ;;  %v411_v31 = vpack.c.bf16 %v367_v29, %v366_v28  ;;  %v397_v33 = vld [vmem:[%s3736_s27 + $0x128] sm:$0xff]  ;;  %v364_v34 = vld [vmem:[%s3736_s27 + $0x20] sm:$0xff]  ;;  %v394_v37 = vld [vmem:[%s3736_s27 + $0x110] sm:$0xff] }
  0x1a   : > { %1012 = vmatprep.subr.bf16.mxu0 %v3673_v0  ;;  %v365_v35 = vld [vmem:[%s3736_s27 + $0x28] sm:$0xff]  ;;  %v426_v36 = vpack.c.bf16 %v397_v33, %v396_v32  ;;  %v395_v39 = vld [vmem:[%s3736_s27 + $0x118] sm:$0xff]  ;;  %v362_v40 = vld [vmem:[%s3736_s27 + $0x10] sm:$0xff] }
  0x1b   : > { %3287 = vmatpush3.bf16.msra.mxu1 %v430_v13  ;;  %v410_v38 = vpack.c.bf16 %v365_v35, %v364_v34  ;;  %v363_v41 = vld [vmem:[%s3736_s27 + $0x18] sm:$0xff]  ;;  %v425_v43 = vpack.c.bf16 %v395_v39, %v394_v37  ;;  %v392_v45 = vld [vmem:[%s3736_s27 + $0x100] sm:$0xff]  ;;  %v393_v46 = vld [vmem:[%s3736_s27 + $0x108] sm:$0xff] }
  0x1c   : > { %3288 = vmatprep.subr.bf16.mxu1 %v429_v18  ;;  %v409_v44 = vpack.c.bf16 %v363_v41, %v362_v40  ;;  %v360_v47 = vld [vmem:[%s3736_s27] sm:$0xff]  ;;  %v361_v48 = vld [vmem:[%s3736_s27 + $0x8] sm:$0xff]  ;;  %v424_v49 = vpack.c.bf16 %v393_v46, %v392_v45  ;;  %v390_v51 = vld [vmem:[%s3736_s27 + $0xf0] sm:$0xff] }
  0x1d   : > { %1013 = vmatpush1.bf16.msra.mxu0 %v413_v19  ;;  %v408_v50 = vpack.c.bf16 %v361_v48, %v360_v47  ;;  %v391_v52 = vld [vmem:[%s3736_s27 + $0xf8] sm:$0xff]  ;;  %v302_v53 = vld [vmem:[%s3784_s7 + $0x70] sm:$0xff]  ;;  %v388_v57 = vld [vmem:[%s3736_s27 + $0xe0] sm:$0xff] }
  0x1e   : > { %1014 = vmatprep.subr.bf16.mxu0 %v3673_v0  ;;  %v303_v55 = vld [vmem:[%s3784_s7 + $0x78] sm:$0xff]  ;;  %v423_v56 = vpack.c.bf16 %v391_v52, %v390_v51  ;;  %v389_v58 = vld [vmem:[%s3736_s27 + $0xe8] sm:$0xff]  ;;  %v300_v61 = vld [vmem:[%s3784_s7 + $0x60] sm:$0xff] }
  0x1f   : > { %3289 = vmatpush3.bf16.msra.mxu1 %v429_v18  ;;  %v343_v59 = vpack.c.bf16 %v303_v55, %v302_v53  ;;  %v301_v62 = vld [vmem:[%s3784_s7 + $0x68] sm:$0xff]  ;;  %v422_v63 = vpack.c.bf16 %v389_v58, %v388_v57  ;;  %v386_v1 = vld [vmem:[%s3736_s27 + $0xd0] sm:$0xff]  ;;  %v387_v2 = vld [vmem:[%s3736_s27 + $0xd8] sm:$0xff] }
  0x20   : > { %3290 = vmatprep.subr.bf16.mxu1 %v428_v24  ;;  %v342_v3 = vpack.c.bf16 %v301_v62, %v300_v61  ;;  %v298_v4 = vld [vmem:[%s3784_s7 + $0x50] sm:$0xff]  ;;  %v299_v5 = vld [vmem:[%s3784_s7 + $0x58] sm:$0xff]  ;;  %v421_v6 = vpack.c.bf16 %v387_v2, %v386_v1  ;;  %v384_v8 = vld [vmem:[%s3736_s27 + $0xc0] sm:$0xff] }
  0x21   : > { %1015 = vmatpush1.bf16.msra.mxu0 %v412_v25  ;;  %v3460_v7 = vld [vmem:[%s5171_s3 + $0x50] ss:$12 sps:$4 sm:$0xff]   ;;  %v385_v9 = vld [vmem:[%s3736_s27 + $0xc8] sm:$0xff]  ;;  %v341_v10 = vpack.c.bf16 %v299_v5, %v298_v4  ;;  %v296_v12 = vld [vmem:[%s3784_s7 + $0x40] sm:$0xff] }
  0x22   : > { %1016 = vmatprep.subr.bf16.mxu0 %v3673_v0  ;;  %v3461_v11 = vld [vmem:[%s5171_s3 + $0x68] ss:$12 sps:$4 sm:$0xff]   ;;  %v420_v14 = vpack.c.bf16 %v385_v9, %v384_v8  ;;  %v383_v16 = vld [vmem:[%s3736_s27 + $0xb8] sm:$0xff]  ;;  %v3462_v21 = vld [vmem:[%s5171_s3 + $0x80] ss:$12 sps:$4 sm:$0xff]  }
  0x23   : > { %3291 = vmatpush3.bf16.msra.mxu1 %v428_v24  ;;  %v297_v13 = vld [vmem:[%s3784_s7 + $0x48] sm:$0xff]  ;;  %v382_v15 = vld [vmem:[%s3736_s27 + $0xb0] sm:$0xff]  ;;  %v295_v19 = vld [vmem:[%s3784_s7 + $0x38] sm:$0xff] }
  0x24   : > { %3292 = vmatprep.subr.bf16.mxu1 %v427_v30  ;;  %v340_v17 = vpack.c.bf16 %v297_v13, %v296_v12  ;;  %v294_v18 = vld [vmem:[%s3784_s7 + $0x30] sm:$0xff]  ;;  %v419_v20 = vpack.c.bf16 %v383_v16, %v382_v15  ;;  %v380_v22 = vld [vmem:[%s3736_s27 + $0xa0] sm:$0xff]  ;;  %v381_v23 = vld [vmem:[%s3736_s27 + $0xa8] sm:$0xff] }
  0x25   : > { %1017 = vmatpush1.bf16.msra.mxu0 %v411_v31  ;;  %v3463_v24 = vld [vmem:[%s5171_s3 + $0x98] ss:$12 sps:$4 sm:$0xff]   ;;  %v339_v25 = vpack.c.bf16 %v295_v19, %v294_v18  ;;  %v293_v27 = vld [vmem:[%s3784_s7 + $0x28] sm:$0xff]  ;;  %v418_v28 = vpack.c.bf16 %v381_v23, %v380_v22  ;;  %v378_v29 = vld [vmem:[%s3736_s27 + $0x90] sm:$0xff] }
  0x26   : > { %1018 = vmatprep.subr.bf16.mxu0 %v3673_v0  ;;  %v292_v26 = vld [vmem:[%s3784_s7 + $0x20] sm:$0xff]  ;;  %v290_v32 = vld [vmem:[%s3784_s7 + $0x10] sm:$0xff]  ;;  %v291_v35 = vld [vmem:[%s3784_s7 + $0x18] sm:$0xff] }
  0x27   : > { %3293 = vmatpush3.bf16.msra.mxu1 %v427_v30  ;;  %v379_v30 = vld [vmem:[%s3736_s27 + $0x98] sm:$0xff]  ;;  %v338_v31 = vpack.c.bf16 %v293_v27, %v292_v26  ;;  %v376_v34 = vld [vmem:[%s3736_s27 + $0x80] sm:$0xff]  ;;  %v377_v37 = vld [vmem:[%s3736_s27 + $0x88] sm:$0xff]  ;;  %v337_v41 = vpack.c.bf16 %v291_v35, %v290_v32 }
  0x28   : > { %3294 = vmatprep.subr.bf16.mxu1 %v426_v36  ;;  %v3464_v33 = vld [vmem:[%s5171_s3 + $0xb0] ss:$12 sps:$4 sm:$0xff]   ;;  %v288_v42 = vld [vmem:[%s3784_s7] sm:$0xff]  ;;  %v329_v2 = vld [vmem:[%s3784_s7 + $0x148] sm:$0xff] }
  0x29   : > { %1019 = vmatpush1.bf16.msra.mxu0 %v410_v38  ;;  %v3468_v38 = vld [vmem:[%s5171_s3 + $0xc8] ss:$12 sps:$4 sm:$0xff]   ;;  %v335_v40 = vld [vmem:[%s3784_s7 + $0x178] sm:$0xff]  ;;  %v3465_v45 = vld [vmem:[%s5171_s3] ss:$12 sps:$4 sm:$0xff]  }
  0x2a   : > { %1020 = vmatprep.subr.bf16.mxu0 %v3673_v0  ;;  %v334_v39 = vld [vmem:[%s3784_s7 + $0x170] sm:$0xff]  ;;  %v332_v48 = vld [vmem:[%s3784_s7 + $0x160] sm:$0xff]  ;;  %v319_v52 = vld [vmem:[%s3784_s7 + $0xf8] sm:$0xff] }
  0x2b   : > { %3295 = vmatpush3.bf16.msra.mxu1 %v426_v36  ;;  %v417_v36 = vpack.c.bf16 %v379_v30, %v378_v29  ;;  %v3863_v46 = vpack.c.bf16 %v335_v40, %v334_v39  ;;  %v318_v51 = vld [vmem:[%s3784_s7 + $0xf0] sm:$0xff]  ;;  %v3470_v53 = vld [vmem:[%s5171_s3 + $0x1c] ss:$12 sps:$4 sm:$0xff]   ;;  %v3472_v61 = vld [vmem:[%s5171_s3 + $0x18] ss:$12 sps:$4 sm:$0xff]  }
  0x2c   : > { %3296 = vmatprep.subr.bf16.mxu1 %v425_v43  ;;  %v351_v57 = vpack.c.bf16 %v319_v52, %v318_v51  ;;  %v331_v58 = vld [vmem:[%s3784_s7 + $0x158] sm:$0xff]  ;;  %v314_v4 = vld [vmem:[%s3784_s7 + $0xd0] sm:$0xff]  ;;  %v312_v8 = vld [vmem:[%s3784_s7 + $0xc0] sm:$0xff] }
  0x2d   : > { %1021 = vmatpush1.bf16.msra.mxu0 %v409_v44  ;;  %v416_v44 = vpack.c.bf16 %v377_v37, %v376_v34  ;;  %v315_v5 = vld [vmem:[%s3784_s7 + $0xd8] sm:$0xff]  ;;  %v313_v13 = vld [vmem:[%s3784_s7 + $0xc8] sm:$0xff]  ;;  %v308_v26 = vld [vmem:[%s3784_s7 + $0xa0] sm:$0xff] }
  0x2e   : > { %1022 = vmatprep.subr.bf16.mxu0 %v3673_v0  ;;  %v327_v12 = vld [vmem:[%s3784_s7 + $0x138] sm:$0xff]  ;;  %v348_v16 = vpack.c.bf16 %v313_v13, %v312_v8  ;;  %v3479_v22 = vld [vmem:[%s5171_s3 + $0x140] ss:$12 sps:$4 sm:$0xff]   ;;  %v306_v30 = vld [vmem:[%s3784_s7 + $0x90] sm:$0xff] }
  0x2f   : > { %3297 = vmatpush3.bf16.msra.mxu1 %v425_v43  ;;  %v289_v43 = vld [vmem:[%s3784_s7 + $0x8] sm:$0xff]  ;;  %v3477_v15 = vld [vmem:[%s5171_s3 + $0x30] ss:$12 sps:$4 sm:$0xff]   ;;  %v3495_v51 = vld [vmem:[%s5171_s3 + $0x94] ss:$12 sps:$4 sm:$0xff]  }
  0x30   : > { %3298 = vmatprep.subr.bf16.mxu1 %v424_v49  ;;  %v336_v47 = vpack.c.bf16 %v289_v43, %v288_v42  ;;  %v311_v18 = vld [vmem:[%s3784_s7 + $0xb8] sm:$0xff]  ;;  %v309_v27 = vld [vmem:[%s3784_s7 + $0xa8] sm:$0xff]  ;;  %v322_v34 = vld [vmem:[%s3784_s7 + $0x110] sm:$0xff] }
  0x31   : > { %1023 = vmatpush1.bf16.msra.mxu0 %v408_v50  ;;  %v3469_v50 = vld [vmem:[%s5171_s3 + $0xe0] ss:$12 sps:$4 sm:$0xff]   ;;  %v346_v29 = vpack.c.bf16 %v309_v27, %v308_v26  ;;  %v3484_v32 = vld [vmem:[%s5171_s3 + $0x170] ss:$12 sps:$4 sm:$0xff]   ;;  %v3513_v27 = vld [vmem:[%s5171_s3 + $0xd8] ss:$12 sps:$4 sm:$0xff]  }
  0x32   : > { %1024 = vmatprep.subr.bf16.mxu0 %v3673_v0  ;;  %v3480_v19 = vld [vmem:[%s5171_s3 + $0x4c] ss:$12 sps:$4 sm:$0xff]   ;;  %v2294_v42 = vld [vmem:[%s5172_s4 + $0x10] sm:$0xff]  ;;  %v2292_v43 = vld [vmem:[%s5172_s4] sm:$0xff] }
  0x33   : > { %3299 = vmatpush3.bf16.msra.mxu1 %v424_v49  ;;  %v333_v49 = vld [vmem:[%s3784_s7 + $0x168] sm:$0xff]  ;;  %v323_v35 = vld [vmem:[%s3784_s7 + $0x118] sm:$0xff]  ;;  %2352 = vperm.xlu1 %3456, %v2294_v42   ;;  %v2302_v8 = vld [vmem:[%s5172_s4 + $0x50] sm:$0xff] }
  0x34   : > { %1842 = vmatprep.subr.bf16.mxu1 %v3673_v0  ;;  %v3880_v55 = vpack.c.bf16 %v333_v49, %v332_v48  ;;  %v3966_v39 = vpack.c.bf16 %v323_v35, %v322_v34  ;;  %v305_v40 = vld [vmem:[%s3784_s7 + $0x88] sm:$0xff]  ;;  %2342 = vperm.xlu0 %3455, %v2292_v43   ;;  %v3493_v48 = vld [vmem:[%s5171_s3 + $0x1b8] ss:$12 sps:$4 sm:$0xff]   ;;  %v3494_v52 = vld [vmem:[%s5171_s3 + $0x1d0] ss:$12 sps:$4 sm:$0xff]  }
  0x35   : > { %1025 = vmatpush2.bf16.msra.mxu0 %v423_v56  ;;  %v330_v56 = vld [vmem:[%s3784_s7 + $0x150] sm:$0xff]  ;;  %v3492_v49 = vld [vmem:[%s5171_s3 + $0x78] ss:$12 sps:$4 sm:$0xff]  }
  0x36   : > { %3301 = vmatmul.mubr.bf16.vlgmr.msra.gmra.mxu1 %v3458_v54  ;;  %1026 = vmatprep.subr.bf16.mxu0 %v3673_v0  ;;  %v3473_v54 = vld [vmem:[%s5171_s3 + $0xf8] ss:$12 sps:$4 sm:$0xff]   ;;  %v3892_v62 = vpack.c.bf16 %v331_v58, %v330_v56  ;;  %v3498_v56 = vld [vmem:[%s5171_s3 + $0x1e8] ss:$12 sps:$4 sm:$0xff]   ;;  %v3522_v35 = vld [vmem:[%s5170_s2 + $0x30] ss:$12 sps:$4 sm:$0xff]  }
  0x37   : > { %1843 = vmatpush1.bf16.msra.mxu1 %v343_v59  ;;  %3304 = vmatprep.mubr.bf16.mxu1 %v3459_v60  ;;  %v316_v59 = vld [vmem:[%s3784_s7 + $0xe0] sm:$0xff]  ;;  %v317_v60 = vld [vmem:[%s3784_s7 + $0xe8] sm:$0xff]  ;;  %v2310_v26 = vld [vmem:[%s5172_s4 + $0x90] sm:$0xff] }
  0x38   : > { %1844 = vmatprep.subr.bf16.mxu1 %v3673_v0  ;;  %v350_v1 = vpack.c.bf16 %v317_v60, %v316_v59  ;;  %v320_v58 = vld [vmem:[%s3784_s7 + $0x100] sm:$0xff]  ;;  %v321_v59 = vld [vmem:[%s3784_s7 + $0x108] sm:$0xff]  ;;  %v2299_v60 = vld [vmem:[%s5172_s4 + $0x38] sm:$0xff] }
  0x39   : > { %1027 = vmatpush2.bf16.msra.mxu0 %v422_v63  ;;  %v328_v63 = vld [vmem:[%s3784_s7 + $0x140] sm:$0xff]  ;;  %v3523_v34 = vld [vmem:[%s5171_s3 + $0x10c] ss:$12 sps:$4 sm:$0xff]   ;;  %v3528_v42 = vld [vmem:[%s5170_s2 + $0x48] ss:$12 sps:$4 sm:$0xff]  }
  0x3a   : > { %1028 = vmatprep.subr.bf16.mxu0 %v3673_v0  ;;  %v3911_v9 = vpack.c.bf16 %v329_v2, %v328_v63  ;;  %v4027_v63 = vpack.c.bf16 %v321_v59, %v320_v58  ;;  %v3499_v2 = vld [vmem:[%s5171_s3 + $0x200] ss:$12 sps:$4 sm:$0xff]   ;;  %v3532_v43 = vld [vmem:[%s5170_s2 + $0x64] ss:$12 sps:$4 sm:$0xff]  }
  0x3b   : > { %1845 = vmatpush1.bf16.msra.mxu1 %v342_v3  ;;  %v3474_v3 = vld [vmem:[%s5171_s3 + $0x110] ss:$12 sps:$4 sm:$0xff]   ;;  %v2304_v13 = vld [vmem:[%s5172_s4 + $0x60] sm:$0xff] }
  0x3c   : > { %1846 = vmatprep.subr.bf16.mxu1 %v3673_v0  ;;  %v3544_v58 = vld [vmem:[%s5170_s2 + $0x94] ss:$12 sps:$4 sm:$0xff]  }
  0x3d   : > { %1029 = vmatpush2.bf16.msra.mxu0 %v421_v6  ;;  %v3475_v6 = vld [vmem:[%s5171_s3 + $0x34] ss:$12 sps:$4 sm:$0xff]  }
  0x3e   : > { %3305 = vmatmul.mubr.bf16.gmra.mxu1 %v3460_v7  ;;  %1030 = vmatprep.subr.bf16.mxu0 %v3673_v0  ;;  %v3478_v7 = vld [vmem:[%s5171_s3 + $0x128] ss:$12 sps:$4 sm:$0xff]   ;;  %v2328_v59 = vld [vmem:[%s5172_s4 + $0x120] sm:$0xff] }
  0x3f   : > { %1847 = vmatpush1.bf16.msra.mxu1 %v341_v10  ;;  %3308 = vmatprep.mubr.bf16.mxu1 %v3461_v11  ;;  %v349_v10 = vpack.c.bf16 %v315_v5, %v314_v4  ;;  %v326_v11 = vld [vmem:[%s3784_s7 + $0x130] sm:$0xff]  ;;  %v2300_v4 = vld [vmem:[%s5172_s4 + $0x40] sm:$0xff] }
  0x40   : > { %1848 = vmatprep.subr.bf16.mxu1 %v3673_v0  ;;  %v3503_v5 = vld [vmem:[%s5171_s3 + $0x218] ss:$12 sps:$4 sm:$0xff]  }
  0x41   : > { %1031 = vmatpush2.bf16.msra.mxu0 %v420_v14  ;;  %v3919_v14 = vpack.c.bf16 %v327_v12, %v326_v11  ;;  %v3504_v11 = vld [vmem:[%s5171_s3 + $0x230] ss:$12 sps:$4 sm:$0xff]   ;;  %v2305_v12 = vld [vmem:[%s5172_s4 + $0x68] sm:$0xff] }
  0x42   : > { %1032 = vmatprep.subr.bf16.mxu0 %v3673_v0 }
  0x43   : > { %1849 = vmatpush1.bf16.msra.mxu1 %v340_v17  ;;  %v310_v17 = vld [vmem:[%s3784_s7 + $0xb0] sm:$0xff] }
  0x44   : > { %1850 = vmatprep.subr.bf16.mxu1 %v3673_v0 }
  0x45   : > { %1033 = vmatpush2.bf16.msra.mxu0 %v419_v20  ;;  %v324_v20 = vld [vmem:[%s3784_s7 + $0x120] sm:$0xff] }
  0x46   : > { %3309 = vmatmul.mubr.bf16.gmra.mxu1 %v3462_v21  ;;  %1034 = vmatprep.subr.bf16.mxu0 %v3673_v0  ;;  %v325_v21 = vld [vmem:[%s3784_s7 + $0x128] sm:$0xff] }
  0x47   : > { %3312 = vmatprep.mubr.bf16.mxu1 %v3463_v24  ;;  %1851 = vmatpush1.bf16.msra.mxu1 %v339_v25  ;;  %v3937_v23 = vpack.c.bf16 %v325_v21, %v324_v20  ;;  %v3483_v24 = vld [vmem:[%s5171_s3 + $0x158] ss:$12 sps:$4 sm:$0xff]   ;;  %v347_v25 = vpack.c.bf16 %v311_v18, %v310_v17  ;;  %v2306_v18 = vld [vmem:[%s5172_s4 + $0x70] sm:$0xff]  ;;  %v3508_v20 = vld [vmem:[%s5170_s2] ss:$12 sps:$4 sm:$0xff]  }
  0x48   : > { %1852 = vmatprep.subr.bf16.mxu1 %v3673_v0  ;;  %v2307_v17 = vld [vmem:[%s5172_s4 + $0x78] sm:$0xff]  ;;  %v2309_v21 = vld [vmem:[%s5172_s4 + $0x88] sm:$0xff] }
  0x49   : > { %1035 = vmatpush2.bf16.msra.mxu0 %v418_v28  ;;  %v3482_v28 = vld [vmem:[%s5171_s3 + $0x48] ss:$12 sps:$4 sm:$0xff]  }
  0x4a   : > { %1036 = vmatprep.subr.bf16.mxu0 %v3673_v0 }
  0x4b   : > { %1853 = vmatpush1.bf16.msra.mxu1 %v338_v31  ;;  %v307_v31 = vld [vmem:[%s3784_s7 + $0x98] sm:$0xff] }
  0x4c   : > { %1854 = vmatprep.subr.bf16.mxu1 %v3673_v0  ;;  %v345_v37 = vpack.c.bf16 %v307_v31, %v306_v30  ;;  %v3520_v30 = vld [vmem:[%s5170_s2 + $0x34] ss:$12 sps:$4 sm:$0xff]  }
  0x4d   : > { %1037 = vmatpush2.bf16.msra.mxu0 %v417_v36  ;;  %v3488_v36 = vld [vmem:[%s5171_s3 + $0x188] ss:$12 sps:$4 sm:$0xff]   ;;  %v2312_v31 = vld [vmem:[%s5172_s4 + $0xa0] sm:$0xff] }
  0x4e   : > { %3313 = vmatmul.mubr.bf16.gmra.mxu1 %v3464_v33  ;;  %1038 = vmatprep.subr.bf16.mxu0 %v3673_v0  ;;  %v3485_v33 = vld [vmem:[%s5171_s3 + $0x64] ss:$12 sps:$4 sm:$0xff]  }
  0x4f   : > { %3316 = vmatprep.mubr.bf16.mxu1 %v3468_v38  ;;  %1855 = vmatpush1.bf16.msra.mxu1 %v337_v41  ;;  %v304_v38 = vld [vmem:[%s3784_s7 + $0x80] sm:$0xff] }
  0x50   : > { %1856 = vmatprep.subr.bf16.mxu1 %v3673_v0  ;;  %v3487_v41 = vld [vmem:[%s5171_s3 + $0x60] ss:$12 sps:$4 sm:$0xff]  }
  0x51   : > { %1039 = vmatpush2.bf16.msra.mxu0 %v416_v44  ;;  %v3490_v44 = vld [vmem:[%s5171_s3 + $0x7c] ss:$12 sps:$4 sm:$0xff]  }
  0x52   : > { %3348 = vmatprep.subr.bf16.mxu0 %v3863_v46 }
  0x53   : > { %1857 = vmatpush1.bf16.msra.mxu1 %v336_v47  ;;  %v3489_v47 = vld [vmem:[%s5171_s3 + $0x1a0] ss:$12 sps:$4 sm:$0xff]  }
  0x54   : > { %1041 = vmatmul.mubr.bf16.vlgmr.msra.gmra.mxu0 %v3465_v45  ;;  %1858 = vmatprep.subr.bf16.mxu1 %v3673_v0  ;;  %v344_v45 = vpack.c.bf16 %v305_v40, %v304_v38  ;;  %v2319_v38 = vld [vmem:[%s5172_s4 + $0xd8] sm:$0xff]  ;;  %v3525_v40 = vld [vmem:[%s5171_s3 + $0x108] ss:$12 sps:$4 sm:$0xff]  }
  0x55   : > { %3349 = vmatpush3.bf16.msra.mxu0 %v3863_v46  ;;  %1048 = vmatprep.mubr.bf16.mxu0 %v3470_v53  ;;  %v2297_v53 = vld [vmem:[%s5172_s4 + $0x28] sm:$0xff] }
  0x56   : > { %3317 = vmatmul.mubr.bf16.gmra.mxu1 %v3469_v50  ;;  %3350 = vmatprep.subr.bf16.mxu0 %v3880_v55  ;;  %v2293_v50 = vld [vmem:[%s5172_s4 + $0x8] sm:$0xff] }
  0x57   : > { %3320 = vmatprep.mubr.bf16.mxu1 %v3473_v54  ;;  %1859 = vmatpush2.bf16.msra.mxu1 %v351_v57  ;;  %v2296_v54 = vld [vmem:[%s5172_s4 + $0x20] sm:$0xff]  ;;  %v3497_v57 = vld [vmem:[%s5171_s3 + $0x90] ss:$12 sps:$4 sm:$0xff]  }
  0x58   : > { %1860 = vmatprep.subr.bf16.mxu1 %v3673_v0  ;;  %2347 = vperm.xlu0 %3455, %v2293_v50   ;;  %v2324_v50 = vld [vmem:[%s5172_s4 + $0x100] sm:$0xff] }
  0x59   : > { %3351 = vmatpush3.bf16.msra.mxu0 %v3880_v55 }
  0x5a   : > { %3352 = vmatprep.subr.bf16.mxu0 %v3892_v62 }
  0x5b   : > { %1861 = vmatpush2.bf16.msra.mxu1 %v350_v1  ;;  %v2298_v1 = vld [vmem:[%s5172_s4 + $0x30] sm:$0xff] }
  0x5c   : > { %1049 = vmatmul.mubr.bf16.gmra.mxu0 %v3472_v61  ;;  %1862 = vmatprep.subr.bf16.mxu1 %v3673_v0  ;;  %v3500_v61 = vld [vmem:[%s5171_s3 + $0xac] ss:$12 sps:$4 sm:$0xff]  }
  0x5d   : > { %1056 = vmatprep.mubr.bf16.mxu0 %v3475_v6  ;;  %3353 = vmatpush3.bf16.msra.mxu0 %v3892_v62  ;;  %v3502_v6 = vld [vmem:[%s5171_s3 + $0xa8] ss:$12 sps:$4 sm:$0xff]  }
  0x5e   : > { %3321 = vmatmul.mubr.bf16.gmra.mxu1 %v3474_v3  ;;  %3354 = vmatprep.subr.bf16.mxu0 %v3911_v9  ;;  %v2301_v3 = vld [vmem:[%s5172_s4 + $0x48] sm:$0xff] }
  0x5f   : > { %3324 = vmatprep.mubr.bf16.mxu1 %v3478_v7  ;;  %1863 = vmatpush2.bf16.msra.mxu1 %v349_v10  ;;  %v2303_v7 = vld [vmem:[%s5172_s4 + $0x58] sm:$0xff]  ;;  %v3505_v10 = vld [vmem:[%s5171_s3 + $0xc4] ss:$12 sps:$4 sm:$0xff]  }
  0x60   : > { %1864 = vmatprep.subr.bf16.mxu1 %v3673_v0  ;;  %2362 = vperm.xlu0 %3455, %v2296_v54   ;;  %v3541_v54 = vld [vmem:[%s5171_s3 + $0x154] ss:$12 sps:$4 sm:$0xff]  }
  0x61   : > { %3355 = vmatpush3.bf16.msra.mxu0 %v3911_v9 }
  0x62   : > { %3356 = vmatprep.subr.bf16.mxu0 %v3919_v14 }
  0x63   : > { %1865 = vmatpush2.bf16.msra.mxu1 %v348_v16  ;;  %v3507_v16 = vld [vmem:[%s5171_s3 + $0xc0] ss:$12 sps:$4 sm:$0xff]  }
  0x64   : > { %1057 = vmatmul.mubr.bf16.gmra.mxu0 %v3477_v15  ;;  %1866 = vmatprep.subr.bf16.mxu1 %v3673_v0  ;;  %v3510_v15 = vld [vmem:[%s5170_s2 + $0x4] ss:$12 sps:$4 sm:$0xff]  }
  0x65   : > { %1064 = vmatprep.mubr.bf16.mxu0 %v3480_v19  ;;  %3357 = vmatpush3.bf16.msra.mxu0 %v3919_v14  ;;  %v3511_v19 = vld [vmem:[%s5171_s3 + $0xdc] ss:$12 sps:$4 sm:$0xff]  }
  0x66   : > { %3325 = vmatmul.mubr.bf16.gmra.mxu1 %v3479_v22  ;;  %3358 = vmatprep.subr.bf16.mxu0 %v3937_v23  ;;  %v2308_v22 = vld [vmem:[%s5172_s4 + $0x80] sm:$0xff] }
  0x67   : > { %3328 = vmatprep.mubr.bf16.mxu1 %v3483_v24  ;;  %1867 = vmatpush2.bf16.msra.mxu1 %v347_v25  ;;  %v3514_v24 = vld [vmem:[%s5170_s2 + $0x1c] ss:$12 sps:$4 sm:$0xff]  }
  0x68   : > { %1868 = vmatprep.subr.bf16.mxu1 %v3673_v0  ;;  %2372 = vperm.xlu0 %3455, %v2298_v1   ;;  %v2311_v25 = vld [vmem:[%s5172_s4 + $0x98] sm:$0xff] }
  0x69   : > { %3359 = vmatpush3.bf16.msra.mxu0 %v3937_v23  ;;  %v3547_v1 = vld [vmem:[%s5171_s3 + $0x16c] ss:$12 sps:$4 sm:$0xff]  }
  0x6a   : > { %3360 = vmatprep.subr.bf16.mxu0 %v3966_v39 }
  0x6b   : > { %1869 = vmatpush2.bf16.msra.mxu1 %v346_v29  ;;  %v3516_v29 = vld [vmem:[%s5170_s2 + $0x18] ss:$12 sps:$4 sm:$0xff]  }
  0x6c   : > { %1065 = vmatmul.mubr.bf16.gmra.mxu0 %v3482_v28  ;;  %1870 = vmatprep.subr.bf16.mxu1 %v3673_v0  ;;  %v3517_v28 = vld [vmem:[%s5171_s3 + $0xf4] ss:$12 sps:$4 sm:$0xff]  }
  0x6d   : > { %1072 = vmatprep.mubr.bf16.mxu0 %v3485_v33  ;;  %3361 = vmatpush3.bf16.msra.mxu0 %v3966_v39  ;;  %v3519_v33 = vld [vmem:[%s5171_s3 + $0xf0] ss:$12 sps:$4 sm:$0xff]  }
  0x6e   : > { %3329 = vmatmul.mubr.bf16.gmra.mxu1 %v3484_v32  ;;  %3362 = vmatprep.subr.bf16.mxu0 %v4027_v63  ;;  %v2315_v32 = vld [vmem:[%s5172_s4 + $0xb8] sm:$0xff] }
  0x6f   : > { %3332 = vmatprep.mubr.bf16.mxu1 %v3488_v36  ;;  %1871 = vmatpush2.bf16.msra.mxu1 %v345_v37  ;;  %v3526_v36 = vld [vmem:[%s5170_s2 + $0x4c] ss:$12 sps:$4 sm:$0xff]   ;;  %v2316_v37 = vld [vmem:[%s5172_s4 + $0xc0] sm:$0xff] }
  0x70   : > { %1872 = vmatprep.subr.bf16.mxu1 %v3673_v0  ;;  %v2295_v0 = vld [vmem:[%s5172_s4 + $0x18] sm:$0xff]  ;;  %2382 = vperm.xlu0 %3455, %v2300_v4  }
  0x71   : > { %2357 = vperm.xlu1 %3456, %v2295_v0   ;;  %3363 = vmatpush3.bf16.msra.mxu0 %v4027_v63  ;;  %v3538_v0 = vld [vmem:[%s5170_s2 + $0x7c] ss:$12 sps:$4 sm:$0xff]   ;;  %v3550_v4 = vld [vmem:[%s5170_s2 + $0xac] ss:$12 sps:$4 sm:$0xff]  }
  0x73   : > { %1873 = vmatpush2.bf16.msra.mxu1 %v344_v45  ;;  %v2323_v45 = vld [vmem:[%s5172_s4 + $0xf8] sm:$0xff] }
  0x74   : > { %1073 = vmatmul.mubr.bf16.gmra.mxu0 %v3487_v41  ;;  %3412 = vmatprep.subr.bf16.mxu1 %v3863_v46  ;;  %v3529_v41 = vld [vmem:[%s5171_s3 + $0x124] ss:$12 sps:$4 sm:$0xff]  }
  0x75   : > { %1080 = vmatprep.mubr.bf16.mxu0 %v3490_v44  ;;  %2367 = vperm.xlu1 %3456, %v2297_v53   ;;  %v2320_v44 = vld [vmem:[%s5172_s4 + $0xe0] sm:$0xff] }
  0x76   : > { %3333 = vmatmul.mubr.bf16.gmra.mxu1 %v3489_v47  ;;  %2392 = vperm.xlu0 %3455, %v2302_v8   ;;  %v3531_v47 = vld [vmem:[%s5171_s3 + $0x120] ss:$12 sps:$4 sm:$0xff]   ;;  %v3537_v53 = vld [vmem:[%s5171_s3 + $0x138] ss:$12 sps:$4 sm:$0xff]   ;;  %v3549_v8 = vld [vmem:[%s5171_s3 + $0x168] ss:$12 sps:$4 sm:$0xff]  }
  0x77   : > { %3336 = vmatprep.mubr.bf16.mxu1 %v3493_v48  ;;  %v3535_v48 = vld [vmem:[%s5171_s3 + $0x13c] ss:$12 sps:$4 sm:$0xff]  }
  0x79   : > { %2377 = vperm.xlu1 %3456, %v2299_v60   ;;  %v2331_v60 = vld [vmem:[%s5172_s4 + $0x138] sm:$0xff] }
  0x7a   : > { %2402 = vperm.xlu0 %3455, %v2304_v13   ;;  %v3556_v13 = vld [vmem:[%s5170_s2 + $0xc4] ss:$12 sps:$4 sm:$0xff]  }
  0x7c   : > { %1081 = vmatmul.mubr.bf16.gmra.mxu0 %v3492_v49  ;;  %v3534_v49 = vld [vmem:[%s5170_s2 + $0x60] ss:$12 sps:$4 sm:$0xff]  }
  0x7d   : > { %1088 = vmatprep.mubr.bf16.mxu0 %v3495_v51  ;;  %2387 = vperm.xlu1 %3456, %v2301_v3   ;;  %v2327_v51 = vld [vmem:[%s5172_s4 + $0x118] sm:$0xff]  ;;  %v2333_v3 = vld [vmem:[%s5172_s4 + $0x148] sm:$0xff] }
  0x7e   : > { %3337 = vmatmul.mubr.bf16.gmra.mxu1 %v3494_v52  ;;  %2412 = vperm.xlu0 %3455, %v2306_v18   ;;  %v2326_v52 = vld [vmem:[%s5172_s4 + $0x110] sm:$0xff]  ;;  %v3555_v18 = vld [vmem:[%s5171_s3 + $0x180] ss:$12 sps:$4 sm:$0xff]  }
  0x7f   : > { %3340 = vmatprep.mubr.bf16.mxu1 %v3498_v56  ;;  %v3540_v56 = vld [vmem:[%s5170_s2 + $0x78] ss:$12 sps:$4 sm:$0xff]  }
  0x81   : > { %2397 = vperm.xlu1 %3456, %v2303_v7   ;;  %v2334_v7 = vld [vmem:[%s5172_s4 + $0x150] sm:$0xff] }
  0x82   : > { %2422 = vperm.xlu0 %3455, %v2308_v22   ;;  %v3561_v22 = vld [vmem:[%s5171_s3 + $0x198] ss:$12 sps:$4 sm:$0xff]  }
  0x84   : > { %1089 = vmatmul.mubr.bf16.gmra.mxu0 %v3497_v57  ;;  %v2329_v57 = vld [vmem:[%s5172_s4 + $0x128] sm:$0xff] }
  0x85   : > { %1096 = vmatprep.mubr.bf16.mxu0 %v3500_v61  ;;  %2407 = vperm.xlu1 %3456, %v2305_v12   ;;  %v2330_v61 = vld [vmem:[%s5172_s4 + $0x130] sm:$0xff]  ;;  %v2337_v12 = vld [vmem:[%s5172_s4 + $0x168] sm:$0xff] }
  0x86   : > { %3341 = vmatmul.mubr.bf16.gmra.mxu1 %v3499_v2  ;;  %2432 = vperm.xlu0 %3455, %v2310_v26   ;;  %v3546_v2 = vld [vmem:[%s5170_s2 + $0x90] ss:$12 sps:$4 sm:$0xff]   ;;  %v3568_v26 = vld [vmem:[%s5170_s2 + $0xf4] ss:$12 sps:$4 sm:$0xff]  }
  0x87   : > { %3344 = vmatprep.mubr.bf16.mxu1 %v3503_v5  ;;  %v2332_v5 = vld [vmem:[%s5172_s4 + $0x140] sm:$0xff] }
  0x89   : > { %2417 = vperm.xlu1 %3456, %v2307_v17   ;;  %v2338_v17 = vld [vmem:[%s5172_s4 + $0x170] sm:$0xff] }
  0x8a   : > { %2442 = vperm.xlu0 %3455, %v2312_v31   ;;  %v3577_v31 = vld [vmem:[%s5171_s3 + $0x1e4] ss:$12 sps:$4 sm:$0xff]  }
  0x8c   : > { %1097 = vmatmul.mubr.bf16.gmra.mxu0 %v3502_v6  ;;  %v2335_v6 = vld [vmem:[%s5172_s4 + $0x158] sm:$0xff] }
  0x8d   : > { %1104 = vmatprep.mubr.bf16.mxu0 %v3505_v10  ;;  %2427 = vperm.xlu1 %3456, %v2309_v21   ;;  %v3553_v10 = vld [vmem:[%s5171_s3 + $0x184] ss:$12 sps:$4 sm:$0xff]   ;;  %v3562_v21 = vld [vmem:[%s5170_s2 + $0xdc] ss:$12 sps:$4 sm:$0xff]  }
  0x8e   : > { %3345 = vmatmul.mubr.bf16.gmra.mxu1 %v3504_v11  ;;  %v3552_v11 = vld [vmem:[%s5170_s2 + $0xa8] ss:$12 sps:$4 sm:$0xff]  }
  0x8f   : > { %1874 = vmatprep.mubr.bf16.mxu1 %v3510_v15  ;;  %v2336_v15 = vld [vmem:[%s5172_s4 + $0x160] sm:$0xff] }
  0x91   : > { %2437 = vperm.xlu1 %3456, %v2311_v25   ;;  %v3564_v25 = vld [vmem:[%s5170_s2 + $0xd8] ss:$12 sps:$4 sm:$0xff]  }
  0x94   : > { %1105 = vmatmul.mubr.bf16.gmra.mxu0 %v3507_v16  ;;  %v2339_v16 = vld [vmem:[%s5172_s4 + $0x178] sm:$0xff] }
  0x95   : > { %1112 = vmatprep.mubr.bf16.mxu0 %v3511_v19  ;;  %v3559_v19 = vld [vmem:[%s5171_s3 + $0x19c] ss:$12 sps:$4 sm:$0xff]  }
  0x96   : > { %1875 = vmatmul.mubr.bf16.vlgmr.msra.gmra.mxu1 %v3508_v20  ;;  %v3558_v20 = vld [vmem:[%s5170_s2 + $0xc0] ss:$12 sps:$4 sm:$0xff]  }
  0x97   : > { %3420 = vmatpush3.bf16.msra.mxu1 %v3863_v46  ;;  %1882 = vmatprep.mubr.bf16.mxu1 %v3514_v24  ;;  %v2313_v46 = vld [vmem:[%s5172_s4 + $0xa8] sm:$0xff]  ;;  %v3565_v24 = vld [vmem:[%s5171_s3 + $0x1b4] ss:$12 sps:$4 sm:$0xff]  }
  0x98   : > { %3413 = vmatprep.subr.bf16.mxu1 %v3880_v55  ;;  %2447 = vperm.xlu1 %3456, %v2313_v46   ;;  %v3574_v46 = vld [vmem:[%s5170_s2 + $0x10c] ss:$12 sps:$4 sm:$0xff]  }
  0x9b   : > { %3421 = vmatpush3.bf16.msra.mxu1 %v3880_v55  ;;  %v2314_v55 = vld [vmem:[%s5172_s4 + $0xb0] sm:$0xff] }
  0x9c   : > { %1113 = vmatmul.mubr.bf16.gmra.mxu0 %v3513_v27  ;;  %3414 = vmatprep.subr.bf16.mxu1 %v3892_v62  ;;  %v3567_v27 = vld [vmem:[%s5171_s3 + $0x1b0] ss:$12 sps:$4 sm:$0xff]  }
  0x9d   : > { %1120 = vmatprep.mubr.bf16.mxu0 %v3517_v28  ;;  %2457 = vperm.xlu1 %3456, %v2315_v32   ;;  %v3571_v28 = vld [vmem:[%s5171_s3 + $0x1cc] ss:$12 sps:$4 sm:$0xff]   ;;  %v3576_v32 = vld [vmem:[%s5170_s2 + $0x108] ss:$12 sps:$4 sm:$0xff]  }
  0x9e   : > { %1883 = vmatmul.mubr.bf16.gmra.mxu1 %v3516_v29  ;;  %2452 = vperm.xlu0 %3455, %v2314_v55   ;;  %v3570_v29 = vld [vmem:[%s5170_s2 + $0xf0] ss:$12 sps:$4 sm:$0xff]  }
  0x9f   : > { %1890 = vmatprep.mubr.bf16.mxu1 %v3520_v30  ;;  %3422 = vmatpush3.bf16.msra.mxu1 %v3892_v62  ;;  %v2317_v62 = vld [vmem:[%s5172_s4 + $0xc8] sm:$0xff]  ;;  %v3580_v55 = vld [vmem:[%s5170_s2 + $0x124] ss:$12 sps:$4 sm:$0xff]  }
  0xa0   : > { %3415 = vmatprep.subr.bf16.mxu1 %v3911_v9  ;;  %v3573_v30 = vld [vmem:[%s5171_s3 + $0x1c8] ss:$12 sps:$4 sm:$0xff]  }
  0xa1   : > { %2467 = vperm.xlu1 %3456, %v2317_v62   ;;  %v3586_v62 = vld [vmem:[%s5170_s2 + $0x13c] ss:$12 sps:$4 sm:$0xff]  }
  0xa2   : > { %2462 = vperm.xlu0 %3455, %v2316_v37  }
  0xa3   : > { %3423 = vmatpush3.bf16.msra.mxu1 %v3911_v9  ;;  %v2318_v9 = vld [vmem:[%s5172_s4 + $0xd0] sm:$0xff] }
  0xa4   : > { %1121 = vmatmul.mubr.bf16.gmra.mxu0 %v3519_v33  ;;  %3416 = vmatprep.subr.bf16.mxu1 %v3919_v14  ;;  %v3579_v33 = vld [vmem:[%s5171_s3 + $0x1e0] ss:$12 sps:$4 sm:$0xff]  }
  0xa5   : > { %1128 = vmatprep.mubr.bf16.mxu0 %v3523_v34  ;;  %2477 = vperm.xlu1 %3456, %v2319_v38   ;;  %v3583_v34 = vld [vmem:[%s5171_s3 + $0x1fc] ss:$12 sps:$4 sm:$0xff]   ;;  %v3585_v38 = vld [vmem:[%s5171_s3 + $0x1f8] ss:$12 sps:$4 sm:$0xff]  }
  0xa6   : > { %1891 = vmatmul.mubr.bf16.gmra.mxu1 %v3522_v35  ;;  %2472 = vperm.xlu0 %3455, %v2318_v9   ;;  %v3582_v35 = vld [vmem:[%s5170_s2 + $0x120] ss:$12 sps:$4 sm:$0xff]  }
  0xa7   : > { %1898 = vmatprep.mubr.bf16.mxu1 %v3526_v36  ;;  %3424 = vmatpush3.bf16.msra.mxu1 %v3919_v14  ;;  %v2321_v14 = vld [vmem:[%s5172_s4 + $0xe8] sm:$0xff]  ;;  %v3589_v9 = vld [vmem:[%s5171_s3 + $0x214] ss:$12 sps:$4 sm:$0xff]  }
  0xa8   : > { %3417 = vmatprep.subr.bf16.mxu1 %v3937_v23 }
  0xa9   : > { %2487 = vperm.xlu1 %3456, %v2321_v14  }
  0xaa   : > { %2482 = vperm.xlu0 %3455, %v2320_v44  }
  0xab   : > { %3425 = vmatpush3.bf16.msra.mxu1 %v3937_v23  ;;  %v2322_v23 = vld [vmem:[%s5172_s4 + $0xf0] sm:$0xff] }
  0xac   : > { %1129 = vmatmul.mubr.bf16.gmra.mxu0 %v3525_v40  ;;  %3418 = vmatprep.subr.bf16.mxu1 %v3966_v39 }
  0xad   : > { %1136 = vmatprep.mubr.bf16.mxu0 %v3529_v41  ;;  %2497 = vperm.xlu1 %3456, %v2323_v45   ;;  %v3588_v41 = vld [vmem:[%s5170_s2 + $0x138] ss:$12 sps:$4 sm:$0xff]   ;;  %v3591_v45 = vld [vmem:[%s5171_s3 + $0x210] ss:$12 sps:$4 sm:$0xff]  }
  0xae   : > { %1899 = vmatmul.mubr.bf16.gmra.mxu1 %v3528_v42  ;;  %2492 = vperm.xlu0 %3455, %v2322_v23   ;;  %v3592_v42 = vld [vmem:[%s5170_s2 + $0x154] ss:$12 sps:$4 sm:$0xff]   ;;  %v3595_v23 = vld [vmem:[%s5171_s3 + $0x22c] ss:$12 sps:$4 sm:$0xff]  }
  0xaf   : > { %1906 = vmatprep.mubr.bf16.mxu1 %v3532_v43  ;;  %3426 = vmatpush3.bf16.msra.mxu1 %v3966_v39  ;;  %v2325_v39 = vld [vmem:[%s5172_s4 + $0x108] sm:$0xff] }
  0xb0   : > { %3419 = vmatprep.subr.bf16.mxu1 %v4027_v63 }
  0xb1   : > { %2507 = vperm.xlu1 %3456, %v2325_v39  }
  0xb2   : > { %2502 = vperm.xlu0 %3455, %v2324_v50  }
  0xb3   : > { %3427 = vmatpush3.bf16.msra.mxu1 %v4027_v63  ;;  %v3543_v63 = vld [vmem:[%s5171_s3 + $0x150] ss:$12 sps:$4 sm:$0xff]  }
  0xb4   : > { %1137 = vmatmul.mubr.bf16.gmra.mxu0 %v3531_v47 }
  0xb5   : > { %1144 = vmatprep.mubr.bf16.mxu0 %v3535_v48  ;;  %2517 = vperm.xlu1 %3456, %v2327_v51   ;;  %v3594_v48 = vld [vmem:[%s5170_s2 + $0x150] ss:$12 sps:$4 sm:$0xff]   ;;  %v3597_v51 = vld [vmem:[%s5171_s3 + $0x228] ss:$12 sps:$4 sm:$0xff]  }
  0xb6   : > { %1907 = vmatmul.mubr.bf16.gmra.mxu1 %v3534_v49  ;;  %2512 = vperm.xlu0 %3455, %v2326_v52   ;;  %v3598_v49 = vld [vmem:[%s5170_s2 + $0x16c] ss:$12 sps:$4 sm:$0xff]   ;;  %v3601_v52 = vld [vmem:[%s5170_s2 + $0x8] ss:$12 sps:$4 sm:$0xff]  }
  0xb7   : > { %1914 = vmatprep.mubr.bf16.mxu1 %v3538_v0 }
  0xb9   : > { %2527 = vperm.xlu1 %3456, %v2329_v57  }
  0xba   : > { %2522 = vperm.xlu0 %3455, %v2328_v59  }
  0xbc   : > { %1145 = vmatmul.mubr.bf16.gmra.mxu0 %v3537_v53 }
  0xbd   : > { %1152 = vmatprep.mubr.bf16.mxu0 %v3541_v54  ;;  %2537 = vperm.xlu1 %3456, %v2331_v60   ;;  %v3600_v54 = vld [vmem:[%s5170_s2 + $0x168] ss:$12 sps:$4 sm:$0xff]   ;;  %v3605_v60 = vld [vmem:[%s5170_s2 + $0x20] ss:$12 sps:$4 sm:$0xff]  }
  0xbe   : > { %1915 = vmatmul.mubr.bf16.gmra.mxu1 %v3540_v56  ;;  %2532 = vperm.xlu0 %3455, %v2330_v61   ;;  %v3604_v56 = vld [vmem:[%s5170_s2 + $0x184] ss:$12 sps:$4 sm:$0xff]  }
  0xbf   : > { %1922 = vmatprep.mubr.bf16.mxu1 %v3544_v58  ;;  %v3606_v61 = vld [vmem:[%s5170_s2 + $0x38] ss:$12 sps:$4 sm:$0xff]  }
  0xc1   : > { %2547 = vperm.xlu1 %3456, %v2333_v3  }
  0xc2   : > { %2542 = vperm.xlu0 %3455, %v2332_v5  }
  0xc4   : > { %1153 = vmatmul.mubr.bf16.gmra.mxu0 %v3543_v63 }
  0xc5   : > { %1160 = vmatprep.mubr.bf16.mxu0 %v3547_v1  ;;  %2557 = vperm.xlu1 %3456, %v2335_v6   ;;  %v3602_v1 = vld [vmem:[%s5170_s2 + $0x180] ss:$12 sps:$4 sm:$0xff]  }
  0xc6   : > { %1923 = vmatmul.mubr.bf16.gmra.mxu1 %v3546_v2  ;;  %2552 = vperm.xlu0 %3455, %v2334_v7   ;;  %v3609_v2 = vld [vmem:[%s5170_s2 + $0x19c] ss:$12 sps:$4 sm:$0xff]  }
  0xc7   : > { %1930 = vmatprep.mubr.bf16.mxu1 %v3550_v4 }
  0xc9   : > { %2567 = vperm.xlu1 %3456, %v2337_v12  }
  0xca   : > { %2562 = vperm.xlu0 %3455, %v2336_v15  }
  0xcc   : > { %1161 = vmatmul.mubr.bf16.gmra.mxu0 %v3549_v8 }
  0xcd   : > { %1168 = vmatprep.mubr.bf16.mxu0 %v3553_v10  ;;  %2577 = vperm.xlu1 %3456, %v2339_v16  }
  0xce   : > { %1931 = vmatmul.mubr.bf16.gmra.mxu1 %v3552_v11  ;;  %2572 = vperm.xlu0 %3455, %v2338_v17   ;;  %v3610_v11 = vld [vmem:[%s5170_s2 + $0x50] ss:$12 sps:$4 sm:$0xff]   ;;  %v3607_v17 = vld [vmem:[%s5170_s2 + $0x198] ss:$12 sps:$4 sm:$0xff]  }
  0xcf   : > { %1938 = vmatprep.mubr.bf16.mxu1 %v3556_v13  ;;  %v3611_v13 = vld [vmem:[%s5170_s2 + $0x68] ss:$12 sps:$4 sm:$0xff]  }
  0xd4   : > { %1169 = vmatmul.mubr.bf16.gmra.mxu0 %v3555_v18  ;;  %v3614_v18 = vld [vmem:[%s5170_s2 + $0x1b4] ss:$12 sps:$4 sm:$0xff]  }
  0xd5   : > { %1176 = vmatprep.mubr.bf16.mxu0 %v3559_v19 }
  0xd6   : > { %1939 = vmatmul.mubr.bf16.gmra.mxu1 %v3558_v20 }
  0xd7   : > { %1946 = vmatprep.mubr.bf16.mxu1 %v3562_v21 }
  0xdc   : > { %1177 = vmatmul.mubr.bf16.gmra.mxu0 %v3561_v22 }
  0xdd   : > { %1184 = vmatprep.mubr.bf16.mxu0 %v3565_v24 }
  0xde   : > { %1947 = vmatmul.mubr.bf16.gmra.mxu1 %v3564_v25 }
  0xdf   : > { %1954 = vmatprep.mubr.bf16.mxu1 %v3568_v26 }
  0xe4   : > { %1185 = vmatmul.mubr.bf16.gmra.mxu0 %v3567_v27  ;;  %v3615_v27 = vld [vmem:[%s5170_s2 + $0x80] ss:$12 sps:$4 sm:$0xff]  }
  0xe5   : > { %1192 = vmatprep.mubr.bf16.mxu0 %v3571_v28 }
  0xe6   : > { %1955 = vmatmul.mubr.bf16.gmra.mxu1 %v3570_v29  ;;  %v3616_v29 = vld [vmem:[%s5170_s2 + $0x98] ss:$12 sps:$4 sm:$0xff]  }
  0xe7   : > { %1962 = vmatprep.mubr.bf16.mxu1 %v3574_v46 }
  0xec   : > { %1193 = vmatmul.mubr.bf16.gmra.mxu0 %v3573_v30 }
  0xed   : > { %1200 = vmatprep.mubr.bf16.mxu0 %v3577_v31  ;;  %v3612_v31 = vld [vmem:[%s5170_s2 + $0x1b0] ss:$12 sps:$4 sm:$0xff]  }
  0xee   : > { %1963 = vmatmul.mubr.bf16.gmra.mxu1 %v3576_v32  ;;  %v3619_v32 = vld [vmem:[%s5170_s2 + $0x1cc] ss:$12 sps:$4 sm:$0xff]  }
  0xef   : > { %1970 = vmatprep.mubr.bf16.mxu1 %v3580_v55 }
  0xf4   : > { %1201 = vmatmul.mubr.bf16.gmra.mxu0 %v3579_v33 }
  0xf5   : > { %1208 = vmatprep.mubr.bf16.mxu0 %v3583_v34 }
  0xf6   : > { %v4343_v36 = vpop.f32.mrf.mxu1  ;;  %1971 = vmatmul.mubr.bf16.gmra.mxu1 %v3582_v35 }
  0xf7   : > { %1978 = vmatprep.mubr.bf16.mxu1 %v3586_v62 }
  0xf8   : > { %v1267_v37 = vpop.f32.mrf.mxu1 }
  0xfa   : > { %v4351_v40 = vpop.f32.mrf.mxu1 }
  0xfc   : > { %v1270_v14 = vpop.f32.mrf.mxu1  ;;  %1209 = vmatmul.mubr.bf16.gmra.mxu0 %v3585_v38  ;;  %v3620_v38 = vld [vmem:[%s5170_s2 + $0xb0] ss:$12 sps:$4 sm:$0xff]  }
  0xfd   : > { %1216 = vmatprep.mubr.bf16.mxu0 %v3589_v9 }
  0xfe   : > { %v4359_v43 = vpop.f32.mrf.mxu1  ;;  %1979 = vmatmul.mubr.bf16.gmra.mxu1 %v3588_v41 }
  0xff   : > { %1986 = vmatprep.mubr.bf16.mxu1 %v3592_v42 }
 0x100   : > { %v4361_v44 = vpop.f32.mrf.mxu1 }
 0x102   : > { %v4369_v47 = vpop.f32.mrf.mxu1 }
 0x104   : > { %v4377_v39 = vpop.f32.mrf.mxu1  ;;  %1217 = vmatmul.mubr.bf16.gmra.mxu0 %v3591_v45 }
 0x105   : > { %1224 = vmatprep.mubr.bf16.mxu0 %v3595_v23 }
 0x106   : > { %v4379_v0 = vpop.f32.mrf.mxu1  ;;  %1987 = vmatmul.mubr.bf16.gmra.mxu1 %v3594_v48 }
 0x107   : > { %1994 = vmatprep.mubr.bf16.mxu1 %v3598_v49 }
 0x108   : > { %v4381_v50 = vpop.f32.mrf.mxu1 }
 0x10a   : > { %v4389_v53 = vpop.f32.mrf.mxu1 }
 0x10c   : > { %v4397_v57 = vpop.f32.mrf.mxu1  ;;  %1225 = vmatmul.mubr.bf16.gmra.mxu0 %v3597_v51 }
 0x10d   : > { %3364 = vmatprep.mubr.bf16.mxu0 %v3601_v52 }
 0x10e   : > { %v4399_v58 = vpop.f32.mrf.mxu1  ;;  %1995 = vmatmul.mubr.bf16.gmra.mxu1 %v3600_v54  ;;  %v3625_v54 = vld [vmem:[%s5170_s2 + $0xe0] ss:$12 sps:$4 sm:$0xff]  }
 0x10f   : > { %2002 = vmatprep.mubr.bf16.mxu1 %v3604_v56 }
 0x110   : > { %v4401_v59 = vpop.f32.mrf.mxu1 }
 0x112   : > { %v4409_v63 = vpop.f32.mrf.mxu1 }
 0x114   : > { %v4417_v3 = vpop.f32.mrf.mxu1  ;;  %v1042_v4 = vpop.f32.mrf.mxu0  ;;  %3365 = vmatmul.mubr.bf16.vlgmr.msra.gmra.mxu0 %v3605_v60 }
 0x115   : > { %v4419_v5 = vadd.f32 %v1267_v37, %v1042_v4  ;;  %3368 = vmatprep.mubr.bf16.mxu0 %v3606_v61 }
 0x116   : > { %v4421_v6 = vpop.f32.mrf.mxu1  ;;  %2003 = vmatmul.mubr.bf16.gmra.mxu1 %v3602_v1  ;;  %v1044_v7 = vpop.f32.mrf.mxu0  ;;  %v3622_v1 = vld [vmem:[%s5170_s2 + $0x1e0] ss:$12 sps:$4 sm:$0xff]  }
 0x117   : > { %2010 = vmatprep.mubr.bf16.mxu1 %v3609_v2  ;;  %v3629_v2 = vld [vmem:[%s5170_s2 + $0x1fc] ss:$12 sps:$4 sm:$0xff]  }
 0x118   : > { %v4423_v8 = vpop.f32.mrf.mxu1  ;;  %v1045_v10 = vpop.f32.mrf.mxu0 }
 0x119   : > { %v4428_v12 = vadd.f32 %v1270_v14, %v1045_v10  ;;  %v3617_v14 = vld [vmem:[%s5170_s2 + $0x1c8] ss:$12 sps:$4 sm:$0xff]  }
 0x11a   : > { %v4433_v15 = vpop.f32.mrf.mxu1  ;;  %v1047_v16 = vpop.f32.mrf.mxu0 }
 0x11c   : > { %v4441_v19 = vpop.f32.mrf.mxu1  ;;  %v1050_v20 = vpop.f32.mrf.mxu0  ;;  %3369 = vmatmul.mubr.bf16.gmra.mxu0 %v3610_v11 }
 0x11d   : > { %v4444_v21 = vadd.f32 %v4343_v36, %v1050_v20  ;;  %3372 = vmatprep.mubr.bf16.mxu0 %v3611_v13 }
 0x11e   : > { %v4446_v22 = vpop.f32.mrf.mxu1  ;;  %2011 = vmatmul.mubr.bf16.gmra.mxu1 %v3607_v17  ;;  %v1052_v24 = vpop.f32.mrf.mxu0  ;;  %v3630_v17 = vld [vmem:[%s5170_s2 + $0x110] ss:$12 sps:$4 sm:$0xff]  }
 0x11f   : > { %2018 = vmatprep.mubr.bf16.mxu1 %v3614_v18 }
 0x120   : > { %v4448_v25 = vpop.f32.mrf.mxu1  ;;  %v1053_v26 = vpop.f32.mrf.mxu0 }
 0x121   : > { %v4454_v28 = vadd.f32 %v4351_v40, %v1053_v26  ;;  %v3621_v40 = vld [vmem:[%s5170_s2 + $0xc8] ss:$12 sps:$4 sm:$0xff]   ;;  %v3627_v26 = vld [vmem:[%s5170_s2 + $0x1f8] ss:$12 sps:$4 sm:$0xff]  }
 0x122   : > { %v4459_v46 = vpop.f32.mrf.mxu1  ;;  %v1055_v30 = vpop.f32.mrf.mxu0 }
 0x124   : > { %v4467_v55 = vpop.f32.mrf.mxu1  ;;  %v1058_v33 = vpop.f32.mrf.mxu0  ;;  %3373 = vmatmul.mubr.bf16.gmra.mxu0 %v3615_v27  ;;  %v3634_v27 = vld [vmem:[%s5170_s2 + $0x214] ss:$12 sps:$4 sm:$0xff]  }
 0x125   : > { %v4470_v34 = vadd.f32 %v4361_v44, %v1058_v33  ;;  %3376 = vmatprep.mubr.bf16.mxu0 %v3616_v29  ;;  %v3624_v44 = vld [vmem:[%s5170_s2 + $0x1e4] ss:$12 sps:$4 sm:$0xff]  }
 0x126   : > { %v4472_v35 = vpop.f32.mrf.mxu1  ;;  %2019 = vmatmul.mubr.bf16.gmra.mxu1 %v3612_v31  ;;  %v1060_v62 = vpop.f32.mrf.mxu0 }
 0x127   : > { %2026 = vmatprep.mubr.bf16.mxu1 %v3619_v32 }
 0x128   : > { %v4474_v36 = vpop.f32.mrf.mxu1  ;;  %v1061_v37 = vpop.f32.mrf.mxu0 }
 0x129   : > { %v4480_v9 = vadd.f32 %v4377_v39, %v1061_v37  ;;  %v3635_v37 = vld [vmem:[%s5170_s2 + $0x140] ss:$12 sps:$4 sm:$0xff]  }
 0x12a   : > { %v4485_v41 = vpop.f32.mrf.mxu1  ;;  %v1063_v42 = vpop.f32.mrf.mxu0 }
 0x12c   : > { %v4493_v45 = vpop.f32.mrf.mxu1  ;;  %v1066_v23 = vpop.f32.mrf.mxu0  ;;  %3377 = vmatmul.mubr.bf16.gmra.mxu0 %v3620_v38 }
 0x12d   : > { %v4496_v48 = vadd.f32 %v4359_v43, %v1066_v23  ;;  %3380 = vmatprep.mubr.bf16.mxu0 %v3621_v40  ;;  %v3626_v43 = vld [vmem:[%s5170_s2 + $0xf8] ss:$12 sps:$4 sm:$0xff]  }
 0x12e   : > { %v4498_v49 = vpop.f32.mrf.mxu1  ;;  %2027 = vmatmul.mubr.bf16.gmra.mxu1 %v3617_v14  ;;  %v1068_v39 = vpop.f32.mrf.mxu0  ;;  %v3632_v14 = vld [vmem:[%s5170_s2 + $0x210] ss:$12 sps:$4 sm:$0xff]  }
 0x12f   : > { %2034 = vmatprep.mubr.bf16.mxu1 %v3624_v44  ;;  %v3639_v44 = vld [vmem:[%s5170_s2 + $0x22c] ss:$12 sps:$4 sm:$0xff]  }
 0x130   : > { %v4500_v51 = vpop.f32.mrf.mxu1  ;;  %v1069_v52 = vpop.f32.mrf.mxu0 }
 0x131   : > { %v4506_v56 = vadd.f32 %v4369_v47, %v1069_v52 }
 0x132   : > { %v4511_v60 = vpop.f32.mrf.mxu1  ;;  %v1071_v61 = vpop.f32.mrf.mxu0 }
 0x133   : > { %5174 = vst [vmem:[#allocation2_spill] sm:$0xff] %v4511_v60 }
 0x134   : > { %v4519_v4 = vpop.f32.mrf.mxu1  ;;  %v1074_v7 = vpop.f32.mrf.mxu0  ;;  %3381 = vmatmul.mubr.bf16.gmra.mxu0 %v3625_v54 }
 0x135   : > { %v4522_v47 = vadd.f32 %v4381_v50, %v1074_v7  ;;  %3384 = vmatprep.mubr.bf16.mxu0 %v3626_v43  ;;  %v3631_v50 = vld [vmem:[%s5170_s2 + $0x128] ss:$12 sps:$4 sm:$0xff]  }
 0x136   : > { %v4524_v10 = vpop.f32.mrf.mxu1  ;;  %2035 = vmatmul.mubr.bf16.gmra.mxu1 %v3622_v1  ;;  %v1076_v11 = vpop.f32.mrf.mxu0  ;;  %v3640_v1 = vld [vmem:[%s5170_s2 + $0x170] ss:$12 sps:$4 sm:$0xff]  }
 0x137   : > { %5175 = vst [vmem:[#allocation3_spill] sm:$0xff] %v4524_v10  ;;  %2042 = vmatprep.mubr.bf16.mxu1 %v3629_v2 }
 0x138   : > { %v4526_v13 = vpop.f32.mrf.mxu1  ;;  %v1077_v16 = vpop.f32.mrf.mxu0 }
 0x139   : > { %5176 = vst [vmem:[#allocation4_spill] sm:$0xff] %v4526_v13  ;;  %v4532_v18 = vadd.f32 %v4397_v57, %v1077_v16  ;;  %v3637_v16 = vld [vmem:[%s5170_s2 + $0x228] ss:$12 sps:$4 sm:$0xff]  }
 0x13a   : > { %v4537_v20 = vpop.f32.mrf.mxu1  ;;  %v1079_v24 = vpop.f32.mrf.mxu0 }
 0x13b   : > { %5177 = vst [vmem:[#allocation5_spill] sm:$0xff] %v4537_v20 }
 0x13c   : > { %v4545_v29 = vpop.f32.mrf.mxu1  ;;  %v1082_v30 = vpop.f32.mrf.mxu0  ;;  %3385 = vmatmul.mubr.bf16.gmra.mxu0 %v3630_v17  ;;  %v3643_v17 = vld [vmem:[%s5170_s2 + $0x1e8] ss:$12 sps:$4 sm:$0xff]  }
 0x13d   : > { %5178 = vst [vmem:[#allocation6_spill] sm:$0xff] %v4545_v29  ;;  %v4548_v57 = vadd.f32 %v4379_v0, %v1082_v30  ;;  %3388 = vmatprep.mubr.bf16.mxu0 %v3631_v50  ;;  %v3636_v0 = vld [vmem:[%s5170_s2 + $0x158] ss:$12 sps:$4 sm:$0xff]  }
 0x13e   : > { %v4550_v31 = vpop.f32.mrf.mxu1  ;;  %2043 = vmatmul.mubr.bf16.gmra.mxu1 %v3627_v26  ;;  %v1084_v32 = vpop.f32.mrf.mxu0 }
 0x13f   : > { %5179 = vst [vmem:[#allocation7_spill] sm:$0xff] %v4550_v31  ;;  %2050 = vmatprep.mubr.bf16.mxu1 %v3634_v27 }
 0x140   : > { %v4552_v33 = vpop.f32.mrf.mxu1  ;;  %v1085_v62 = vpop.f32.mrf.mxu0 }
 0x141   : > { %5180 = vst [vmem:[#allocation8_spill] sm:$0xff] %v4552_v33  ;;  %v4558_v38 = vadd.f32 %v4389_v53, %v1085_v62  ;;  %v3642_v62 = vld [vmem:[%s5170_s2 + $0x1a0] ss:$12 sps:$4 sm:$0xff]  }
 0x142   : > { %v4563_v40 = vpop.f32.mrf.mxu1  ;;  %v1087_v42 = vpop.f32.mrf.mxu0 }
 0x143   : > { %5181 = vst [vmem:[#allocation9_spill] sm:$0xff] %v4563_v40 }
 0x144   : > { %v4571_v23 = vpop.f32.mrf.mxu1  ;;  %v1090_v39 = vpop.f32.mrf.mxu0  ;;  %3389 = vmatmul.mubr.bf16.gmra.mxu0 %v3635_v37 }
 0x145   : > { %5182 = vst [vmem:[#allocation10_spill] sm:$0xff] %v4571_v23  ;;  %v4574_v53 = vadd.f32 %v4401_v59, %v1090_v39  ;;  %3392 = vmatprep.mubr.bf16.mxu0 %v3636_v0  ;;  %v3641_v59 = vld [vmem:[%s5170_s2 + $0x188] ss:$12 sps:$4 sm:$0xff]  }
 0x146   : > { %v4576_v52 = vpop.f32.mrf.mxu1  ;;  %2051 = vmatmul.mubr.bf16.gmra.mxu1 %v3632_v14  ;;  %v1092_v54 = vpop.f32.mrf.mxu0  ;;  %v3644_v14 = vld [vmem:[%s5170_s2 + $0x200] ss:$12 sps:$4 sm:$0xff]  }
 0x147   : > { %5183 = vst [vmem:[#allocation11_spill] sm:$0xff] %v4576_v52  ;;  %2058 = vmatprep.mubr.bf16.mxu1 %v3639_v44  ;;  %v3647_v44 = vld [vmem:[%s5170_s2 + $0x218] ss:$12 sps:$4 sm:$0xff]  }
 0x148   : > { %v4578_v43 = vpop.f32.mrf.mxu1  ;;  %v1093_v61 = vpop.f32.mrf.mxu0 }
 0x149   : > { %5184 = vst [vmem:[#allocation12_spill] sm:$0xff] %v4578_v43  ;;  %v4584_v2 = vadd.f32 %v4417_v3, %v1093_v61 }
 0x14a   : > { %v4589_v7 = vpop.f32.mrf.mxu1  ;;  %v1095_v11 = vpop.f32.mrf.mxu0 }
 0x14b   : > { %5185 = vst [vmem:[#allocation13_spill] sm:$0xff] %v4589_v7 }
 0x14c   : > { %v4597_v50 = vpop.f32.mrf.mxu1  ;;  %v1098_v24 = vpop.f32.mrf.mxu0  ;;  %3393 = vmatmul.mubr.bf16.gmra.mxu0 %v3640_v1 }
 0x14d   : > { %5186 = vst [vmem:[#allocation14_spill] sm:$0xff] %v4597_v50  ;;  %v4600_v3 = vadd.f32 %v4399_v58, %v1098_v24  ;;  %3396 = vmatprep.mubr.bf16.mxu0 %v3641_v59  ;;  %v3645_v58 = vld [vmem:[%s5170_s2 + $0x1b8] ss:$12 sps:$4 sm:$0xff]  }
 0x14e   : > { %v4602_v26 = vpop.f32.mrf.mxu1  ;;  %2059 = vmatmul.mubr.bf16.gmra.mxu1 %v3637_v16  ;;  %v1100_v27 = vpop.f32.mrf.mxu0 }
 0x14f   : > { %5187 = vst [vmem:[#allocation15_spill] sm:$0xff] %v4602_v26  ;;  %3404 = vmatprep.mubr.bf16.mxu1 %v3643_v17  ;;  %v3646_v17 = vld [vmem:[%s5170_s2 + $0x1d0] ss:$12 sps:$4 sm:$0xff]  }
 0x150   : > { %v4604_v30 = vpop.f32.mrf.mxu1  ;;  %v1101_v32 = vpop.f32.mrf.mxu0 }
 0x151   : > { %5188 = vst [vmem:[#allocation16_spill] sm:$0xff] %v4604_v30  ;;  %v4610_v37 = vadd.f32 %v4409_v63, %v1101_v32  ;;  %v3648_v32 = vld [vmem:[%s5170_s2 + $0x230] ss:$12 sps:$4 sm:$0xff]  }
 0x152   : > { %v4615_v0 = vpop.f32.mrf.mxu1  ;;  %v1103_v42 = vpop.f32.mrf.mxu0 }
 0x153   : > { %5189 = vst [vmem:[#allocation17_spill] sm:$0xff] %v4615_v0 }
 0x154   : > { %v4623_v39 = vpop.f32.mrf.mxu1  ;;  %v1106_v54 = vpop.f32.mrf.mxu0  ;;  %3397 = vmatmul.mubr.bf16.gmra.mxu0 %v3642_v62 }
 0x155   : > { %5190 = vst [vmem:[#allocation18_spill] sm:$0xff] %v4623_v39  ;;  %v4626_v63 = vadd.f32 %v4423_v8, %v1106_v54  ;;  %3400 = vmatprep.mubr.bf16.mxu0 %v3645_v58 }
 0x156   : > { %v1876_v61 = vpop.f32.mrf.mxu1  ;;  %3405 = vmatmul.mubr.bf16.vlgmr.msra.gmra.mxu1 %v3644_v14  ;;  %v1108_v1 = vpop.f32.mrf.mxu0 }
 0x157   : > { %v4629_v59 = vadd.f32 %v1876_v61, %v4419_v5  ;;  %3408 = vmatprep.mubr.bf16.mxu1 %v3647_v44 }
 0x158   : > { %v1878_v11 = vpop.f32.mrf.mxu1  ;;  %v1109_v16 = vpop.f32.mrf.mxu0 }
 0x159   : > { %v4635_v24 = vadd.f32 %v4441_v19, %v1109_v16 }
 0x15a   : > { %v1879_v27 = vpop.f32.mrf.mxu1  ;;  %v1111_v8 = vpop.f32.mrf.mxu0 }
 0x15b   : > { %v4641_v62 = vadd.f32 %v1879_v27, %v4428_v12 }
 0x15c   : > { %v1881_v5 = vpop.f32.mrf.mxu1  ;;  %v4643_v58 = vpop.f32.mrf.mxu0  ;;  %3401 = vmatmul.mubr.bf16.gmra.mxu0 %v3646_v17 }
 0x15e   : > { %v1884_v42 = vpop.f32.mrf.mxu1  ;;  %3409 = vmatmul.mubr.bf16.gmra.mxu1 %v3648_v32  ;;  %v1116_v14 = vpop.f32.mrf.mxu0 }
 0x15f   : > { %v4646_v44 = vadd.f32 %v1884_v42, %v4444_v21 }
 0x160   : > { %v1886_v19 = vpop.f32.mrf.mxu1  ;;  %v4648_v54 = vpop.f32.mrf.mxu0 }
 0x162   : > { %v1887_v61 = vpop.f32.mrf.mxu1  ;;  %v1119_v1 = vpop.f32.mrf.mxu0 }
 0x163   : > { %v4651_v11 = vadd.f32 %v1887_v61, %v4454_v28 }
 0x164   : > { %v1889_v12 = vpop.f32.mrf.mxu1  ;;  %v4653_v16 = vpop.f32.mrf.mxu0 }
 0x166   : > { %v1892_v27 = vpop.f32.mrf.mxu1  ;;  %v1124_v8 = vpop.f32.mrf.mxu0 }
 0x167   : > { %v4656_v17 = vadd.f32 %v1892_v27, %v4470_v34 }
 0x168   : > { %v1894_v32 = vpop.f32.mrf.mxu1  ;;  %v4658_v5 = vpop.f32.mrf.mxu0 }
 0x16a   : > { %v1895_v21 = vpop.f32.mrf.mxu1  ;;  %v1127_v42 = vpop.f32.mrf.mxu0 }
 0x16b   : > { %v4661_v14 = vadd.f32 %v1895_v21, %v4480_v9 }
 0x16c   : > { %v1897_v19 = vpop.f32.mrf.mxu1  ;;  %v4663_v1 = vpop.f32.mrf.mxu0 }
 0x16e   : > { %v1900_v28 = vpop.f32.mrf.mxu1  ;;  %v1132_v61 = vpop.f32.mrf.mxu0 }
 0x16f   : > { %v4666_v12 = vadd.f32 %v1900_v28, %v4496_v48 }
 0x170   : > { %v1902_v8 = vpop.f32.mrf.mxu1  ;;  %v4668_v0 = vpop.f32.mrf.mxu0 }
 0x172   : > { %v1903_v34 = vpop.f32.mrf.mxu1  ;;  %v1135_v27 = vpop.f32.mrf.mxu0 }
 0x173   : > { %v4671_v32 = vadd.f32 %v1903_v34, %v4506_v56 }
 0x174   : > { %v1905_v42 = vpop.f32.mrf.mxu1  ;;  %v4673_v26 = vpop.f32.mrf.mxu0 }
 0x176   : > { %v1908_v9 = vpop.f32.mrf.mxu1  ;;  %v1140_v21 = vpop.f32.mrf.mxu0 }
 0x177   : > { %v4676_v19 = vadd.f32 %v1908_v9, %v4522_v47 }
 0x178   : > { %v1910_v61 = vpop.f32.mrf.mxu1  ;;  %v4678_v39 = vpop.f32.mrf.mxu0 }
 0x17a   : > { %v1911_v48 = vpop.f32.mrf.mxu1  ;;  %v1143_v28 = vpop.f32.mrf.mxu0 }
 0x17b   : > { %v4681_v8 = vadd.f32 %v1911_v48, %v4532_v18 }
 0x17c   : > { %v1913_v27 = vpop.f32.mrf.mxu1  ;;  %v4683_v30 = vpop.f32.mrf.mxu0 }
 0x17e   : > { %v1916_v56 = vpop.f32.mrf.mxu1  ;;  %v1148_v34 = vpop.f32.mrf.mxu0 }
 0x17f   : > { %v4686_v42 = vadd.f32 %v1916_v56, %v4548_v57 }
 0x180   : > { %v1918_v21 = vpop.f32.mrf.mxu1  ;;  %v4688_v7 = vpop.f32.mrf.mxu0 }
 0x182   : > { %v1919_v47 = vpop.f32.mrf.mxu1  ;;  %v1151_v9 = vpop.f32.mrf.mxu0 }
 0x183   : > { %v4691_v61 = vadd.f32 %v1919_v47, %v4558_v38 }
 0x184   : > { %v1921_v28 = vpop.f32.mrf.mxu1  ;;  %v4693_v50 = vpop.f32.mrf.mxu0 }
 0x186   : > { %v1924_v18 = vpop.f32.mrf.mxu1  ;;  %v1156_v48 = vpop.f32.mrf.mxu0 }
 0x187   : > { %v4696_v27 = vadd.f32 %v1924_v18, %v4574_v53 }
 0x188   : > { %v1926_v34 = vpop.f32.mrf.mxu1  ;;  %v4698_v43 = vpop.f32.mrf.mxu0 }
 0x18a   : > { %v1927_v57 = vpop.f32.mrf.mxu1  ;;  %v1159_v56 = vpop.f32.mrf.mxu0 }
 0x18b   : > { %v4701_v21 = vadd.f32 %v1927_v57, %v4584_v2  ;;  %v4715_v2 = vpop.permute.xlu0 %2342 }
 0x18c   : > { %v1929_v9 = vpop.f32.mrf.mxu1  ;;  %v4703_v40 = vpop.f32.mrf.mxu0 }
 0x18e   : > { %v1932_v38 = vpop.f32.mrf.mxu1  ;;  %v1164_v47 = vpop.f32.mrf.mxu0 }
 0x18f   : > { %v4706_v28 = vadd.f32 %v1932_v38, %v4600_v3  ;;  %v4724_v33 = vpop.permute.xlu0 %2347 }
 0x190   : > { %v1934_v48 = vpop.f32.mrf.mxu1  ;;  %v4708_v52 = vpop.f32.mrf.mxu0 }
 0x191   : > { %5191 = vst [vmem:[#allocation19_spill] sm:$0xff] %v4708_v52  ;;  %v4722_v48 = vpop.permute.xlu1 %2352 }
 0x192   : > { %v1935_v53 = vpop.f32.mrf.mxu1  ;;  %v1167_v18 = vpop.f32.mrf.mxu0 }
 0x193   : > { %v4711_v34 = vadd.f32 %v1935_v53, %v4610_v37 }
 0x194   : > { %v1937_v56 = vpop.f32.mrf.mxu1  ;;  %v4713_v31 = vpop.f32.mrf.mxu0 }
 0x195   : > { %5192 = vst [vmem:[#allocation20_spill] sm:$0xff] %v4713_v31 }
 0x196   : > { %v1940_v57 = vpop.f32.mrf.mxu1  ;;  %v1172_v9 = vpop.f32.mrf.mxu0 }
 0x197   : > { %v4718_v47 = vadd.f32 %v1940_v57, %v4626_v63  ;;  %v1340_v9 = vadd.f32 %v4421_v6, %v4643_v58  ;;  %v1348_v58 = vadd.f32 %v4448_v25, %v4653_v16 }
 0x198   : > { %v1942_v3 = vpop.f32.mrf.mxu1  ;;  %v4720_v38 = vpop.f32.mrf.mxu0 }
 0x199   : > { %5193 = vst [vmem:[#allocation21_spill] sm:$0xff] %v4720_v38  ;;  %v4733_v3 = vpop.permute.xlu1 %2357 }
 0x19a   : > { %v1943_v23 = vpop.f32.mrf.mxu1  ;;  %v1175_v18 = vpop.f32.mrf.mxu0 }
 0x19b   : > { %v4727_v37 = vadd.f32 %v1943_v23, %v4635_v24  ;;  %v1343_v18 = vadd.f32 %v4433_v15, %v4648_v54  ;;  %v4741_v23 = vpop.permute.xlu0 %2362 }
 0x19c   : > { %v1945_v53 = vpop.f32.mrf.mxu1  ;;  %v4729_v56 = vpop.f32.mrf.mxu0 }
 0x19d   : > { %5194 = vst [vmem:[#allocation22_spill] sm:$0xff] %v4729_v56 }
 0x19e   : > { %v1948_v63 = vpop.f32.mrf.mxu1  ;;  %v1180_v57 = vpop.f32.mrf.mxu0 }
 0x19f   : > { %v4735_v20 = vadd.f32 %v1948_v63, %v1340_v9  ;;  %v4749_v9 = vpop.permute.xlu1 %2367  ;;  %v4751_v57 = vpop.permute.xlu0 %2372 }
 0x1a0   : > { %v1950_v10 = vpop.f32.mrf.mxu1  ;;  %v4737_v29 = vpop.f32.mrf.mxu0 }
 0x1a1   : > { %5195 = vst [vmem:[#allocation23_spill] sm:$0xff] %v4737_v29 }
 0x1a2   : > { %v1951_v24 = vpop.f32.mrf.mxu1  ;;  %v1183_v53 = vpop.f32.mrf.mxu0 }
 0x1a3   : > { %v4743_v56 = vadd.f32 %v1951_v24, %v1343_v18  ;;  %v1351_v18 = vadd.f32 %v4467_v55, %v4658_v5  ;;  %v4759_v53 = vpop.permute.xlu1 %2377  ;;  %v1359_v5 = vadd.f32 %v4459_v46, %v4668_v0 }
 0x1a4   : > { %v1953_v38 = vpop.f32.mrf.mxu1  ;;  %v4745_v6 = vpop.f32.mrf.mxu0 }
 0x1a5   : > { %5196 = vst [vmem:[#allocation24_spill] sm:$0xff] %v4745_v6 }
 0x1a6   : > { %v1956_v10 = vpop.f32.mrf.mxu1  ;;  %v1188_v63 = vpop.f32.mrf.mxu0 }
 0x1a7   : > { %v4753_v29 = vadd.f32 %v1956_v10, %v1348_v58  ;;  %v1356_v63 = vadd.f32 %v4446_v22, %v4663_v1  ;;  %v4767_v58 = vpop.permute.xlu0 %2382 }
 0x1a8   : > { %v1958_v15 = vpop.f32.mrf.mxu1  ;;  %v4755_v54 = vpop.f32.mrf.mxu0 }
 0x1a9   : > { %5197 = vst [vmem:[#allocation25_spill] sm:$0xff] %v4755_v54 }
 0x1aa   : > { %v1959_v38 = vpop.f32.mrf.mxu1  ;;  %v1191_v24 = vpop.f32.mrf.mxu0 }
 0x1ab   : > { %v4761_v6 = vadd.f32 %v1959_v38, %v1351_v18  ;;  %v4775_v18 = vpop.permute.xlu1 %2387 }
 0x1ac   : > { %v1961_v25 = vpop.f32.mrf.mxu1  ;;  %v4763_v16 = vpop.f32.mrf.mxu0 }
 0x1ad   : > { %5198 = vst [vmem:[#allocation26_spill] sm:$0xff] %v4763_v16  ;;  %v4777_v25 = vpop.permute.xlu0 %2392 }
 0x1ae   : > { %v1964_v10 = vpop.f32.mrf.mxu1  ;;  %v1196_v15 = vpop.f32.mrf.mxu0 }
 0x1af   : > { %v4769_v54 = vadd.f32 %v1964_v10, %v1356_v63  ;;  %v1364_v63 = vadd.f32 %v4474_v36, %v4673_v26  ;;  %v4785_v15 = vpop.permute.xlu1 %2397  ;;  %v1372_v26 = vadd.f32 %v4472_v35, %v4683_v30 }
 0x1b0   : > { %v1966_v13 = vpop.f32.mrf.mxu1  ;;  %v4771_v55 = vpop.f32.mrf.mxu0 }
 0x1b1   : > { %5199 = vst [vmem:[#allocation27_spill] sm:$0xff] %v4771_v55 }
 0x1b2   : > { %v1967_v38 = vpop.f32.mrf.mxu1  ;;  %v1199_v24 = vpop.f32.mrf.mxu0 }
 0x1b3   : > { %v4779_v16 = vadd.f32 %v1967_v38, %v1359_v5  ;;  %v1367_v24 = vadd.f32 %v4493_v45, %v4678_v39  ;;  %v4793_v5 = vpop.permute.xlu0 %2402 }
 0x1b4   : > { %v1969_v22 = vpop.f32.mrf.mxu1  ;;  %v4781_v1 = vpop.f32.mrf.mxu0 }
 0x1b5   : > { %5200 = vst [vmem:[#allocation28_spill] sm:$0xff] %v4781_v1 }
 0x1b6   : > { %v1972_v13 = vpop.f32.mrf.mxu1  ;;  %v1204_v10 = vpop.f32.mrf.mxu0 }
 0x1b7   : > { %v4787_v55 = vadd.f32 %v1972_v13, %v1364_v63  ;;  %v4801_v63 = vpop.permute.xlu1 %2407 }
 0x1b8   : > { %v1974_v46 = vpop.f32.mrf.mxu1  ;;  %v4789_v0 = vpop.f32.mrf.mxu0 }
 0x1b9   : > { %5201 = vst [vmem:[#allocation29_spill] sm:$0xff] %v4789_v0  ;;  %v4803_v46 = vpop.permute.xlu0 %2412 }
 0x1ba   : > { %v1975_v38 = vpop.f32.mrf.mxu1  ;;  %v1207_v22 = vpop.f32.mrf.mxu0 }
 0x1bb   : > { %v4795_v1 = vadd.f32 %v1975_v38, %v1367_v24  ;;  %v1375_v24 = vadd.f32 %v4485_v41, %v4688_v7  ;;  %v4811_v22 = vpop.permute.xlu1 %2417  ;;  %v1383_v7 = vadd.f32 %v4519_v4, %v4698_v43 }
 0x1bc   : > { %v1977_v31 = vpop.f32.mrf.mxu1  ;;  %v4797_v36 = vpop.f32.mrf.mxu0 }
 0x1bd   : > { %5202 = vst [vmem:[#allocation30_spill] sm:$0xff] %v4795_v1  ;;  %5203 = vst [vmem:[#allocation31_spill] sm:$0xff] %v4797_v36 }
 0x1be   : > { %v1980_v13 = vpop.f32.mrf.mxu1  ;;  %v1212_v10 = vpop.f32.mrf.mxu0 }
 0x1bf   : > { %v4805_v0 = vadd.f32 %v1980_v13, %v1372_v26  ;;  %v1380_v10 = vadd.f32 %v4500_v51, %v4693_v50  ;;  %v4819_v26 = vpop.permute.xlu0 %2422 }
 0x1c0   : > { %v1982_v45 = vpop.f32.mrf.mxu1  ;;  %v4807_v39 = vpop.f32.mrf.mxu0 }
 0x1c1   : > { %5204 = vst [vmem:[#allocation32_spill] sm:$0xff] %v4807_v39 }
 0x1c2   : > { %v1983_v31 = vpop.f32.mrf.mxu1  ;;  %v1215_v38 = vpop.f32.mrf.mxu0 }
 0x1c3   : > { %v4813_v36 = vadd.f32 %v1983_v31, %v1375_v24  ;;  %v4827_v24 = vpop.permute.xlu1 %2427 }
 0x1c4   : > { %v1985_v35 = vpop.f32.mrf.mxu1  ;;  %v4815_v30 = vpop.f32.mrf.mxu0 }
 0x1c5   : > { %5205 = vst [vmem:[#allocation33_spill] sm:$0xff] %v4815_v30  ;;  %v4829_v35 = vpop.permute.xlu0 %2432 }
 0x1c6   : > { %v1988_v13 = vpop.f32.mrf.mxu1  ;;  %v1220_v45 = vpop.f32.mrf.mxu0 }
 0x1c7   : > { %v4821_v39 = vadd.f32 %v1988_v13, %v1380_v10  ;;  %v4837_v13 = vpop.permute.xlu1 %2437 }
 0x1c8   : > { %v1990_v60 = vpop.f32.mrf.mxu1  ;;  %v4823_v41 = vpop.f32.mrf.mxu0 }
 0x1c9   : > { %5206 = vst [vmem:[#allocation34_spill] sm:$0xff] %v4821_v39  ;;  %5207 = vst [vmem:[#allocation35_spill] sm:$0xff] %v4823_v41  ;;  %v4841_v4 = vpop.permute.xlu0 %2442 }
 0x1ca   : > { %v1991_v31 = vpop.f32.mrf.mxu1  ;;  %v1223_v38 = vpop.f32.mrf.mxu0 }
 0x1cb   : > { %v4831_v51 = vadd.f32 %v1991_v31, %v1383_v7  ;;  %v4846_v31 = vpop.permute.xlu1 %2447 }
 0x1cc   : > { %v1993_v50 = vpop.f32.mrf.mxu1  ;;  %v4833_v30 = vpop.f32.mrf.mxu0 }
 0x1cd   : > { %5208 = vst [vmem:[#allocation36_spill] sm:$0xff] %v4831_v51  ;;  %5209 = vst [vmem:[#allocation37_spill] sm:$0xff] %v4833_v30  ;;  %v4851_v51 = vpop.permute.xlu0 %2452 }
 0x1ce   : > { %v4835_v10 = vpop.f32.mrf.mxu1  ;;  %v1228_v60 = vpop.f32.mrf.mxu0 }
 0x1d0   : > { %v1998_v45 = vpop.f32.mrf.mxu1  ;;  %v4839_v41 = vpop.f32.mrf.mxu0 }
 0x1d1   : > { %5210 = vst [vmem:[#allocation38_spill] sm:$0xff] %v4839_v41  ;;  %v4870_v1 = vpop.permute.xlu0 %2462 }
 0x1d2   : > { %v4843_v43 = vpop.f32.mrf.mxu1  ;;  %v1231_v38 = vpop.f32.mrf.mxu0 }
 0x1d3   : > { %5211 = vst [vmem:[#allocation39_spill] sm:$0xff] %v4843_v43 }
 0x1d4   : > { %v2001_v39 = vpop.f32.mrf.mxu1  ;;  %v3366_v7 = vpop.f32.mrf.mxu0 }
 0x1d5   : > { %v2110_v50 = vadd.f32 %v3366_v7, %v4646_v44 }
 0x1d6   : > { %v4849_v30 = vpop.f32.mrf.mxu1  ;;  %v2101_v60 = vpop.f32.mrf.mxu0 }
 0x1d7   : > { %5212 = vst [vmem:[#allocation40_spill] sm:$0xff] %v4849_v30  ;;  %v2582_v45 = vadd.f32 %v4722_v48, %v2110_v50  ;;  %v2102_v41 = vadd.f32 %v2101_v60, %v4629_v59  ;;  %v4864_v59 = vpop.permute.xlu1 %2457 }
 0x1d8   : > { %v2006_v39 = vpop.f32.mrf.mxu1  ;;  %v3367_v38 = vpop.f32.mrf.mxu0 }
 0x1d9   : > { %v3174_v44 = vpack.c.bf16 %v2582_v45, %v2582_v45  ;;  %v2580_v7 = vadd.f32 %v4715_v2, %v2102_v41  ;;  %v2113_v30 = vadd.f32 %v3367_v38, %v4651_v11 }
 0x1da   : > { %v4862_v43 = vpop.f32.mrf.mxu1  ;;  %v2104_v48 = vpop.f32.mrf.mxu0 }
 0x1db   : > { %2823 = vst.msk [vmem:[%s4858_s16 + $0x8] sm:$0xf] %vm2820_vm0, %v3174_v44  ;;  %v3172_v50 = vpack.c.bf16 %v2580_v7, %v2580_v7  ;;  %v2583_v60 = vadd.f32 %v4733_v3, %v2113_v30  ;;  %v2105_v52 = vadd.f32 %v2104_v48, %v4641_v62 }
 0x1dc   : > { %v2009_v39 = vpop.f32.mrf.mxu1  ;;  %v3370_v45 = vpop.f32.mrf.mxu0 }
 0x1dd   : > { %2821 = vst.msk [vmem:[%s4858_s16] sm:$0xf] %vm2820_vm0, %v3172_v50  ;;  %v3175_v11 = vpack.c.bf16 %v2583_v60, %v2583_v60  ;;  %v2581_v2 = vadd.f32 %v4724_v33, %v2105_v52  ;;  %v2126_v41 = vadd.f32 %v3370_v45, %v4666_v12  ;;  %v4882_v50 = vpop.permute.xlu1 %2467  ;;  %v4890_v45 = vpop.permute.xlu0 %2472 }
 0x1de   : > { %v4876_v38 = vpop.f32.mrf.mxu1  ;;  %v2117_v44 = vpop.f32.mrf.mxu0 }
 0x1df   : > { %2824 = vst.msk [vmem:[%s4858_s16 + $0xc] sm:$0xf] %vm2820_vm0, %v3175_v11  ;;  %v3173_v3 = vpack.c.bf16 %v2581_v2, %v2581_v2  ;;  %v2586_v62 = vadd.f32 %v4751_v57, %v2126_v41  ;;  %v2118_v30 = vadd.f32 %v2117_v44, %v4656_v17 }
 0x1e0   : > { %v2014_v7 = vpop.f32.mrf.mxu1  ;;  %v3371_v48 = vpop.f32.mrf.mxu0 }
 0x1e1   : > { %2822 = vst.msk [vmem:[%s4858_s16 + $0x4] sm:$0xf] %vm2820_vm0, %v3173_v3  ;;  %v3178_v33 = vpack.c.bf16 %v2586_v62, %v2586_v62  ;;  %v2584_v52 = vadd.f32 %v4741_v23, %v2118_v30  ;;  %v2129_v12 = vadd.f32 %v3371_v48, %v4671_v32  ;;  %v4902_v30 = vpop.permute.xlu1 %2477 }
 0x1e2   : > { %v4888_v60 = vpop.f32.mrf.mxu1  ;;  %v2120_v39 = vpop.f32.mrf.mxu0 }
 0x1e3   : > { %2827 = vst.msk [vmem:[%s4858_s16 + $0x18] sm:$0xf] %vm2820_vm0, %v3178_v33  ;;  %v3176_v17 = vpack.c.bf16 %v2584_v52, %v2584_v52  ;;  %v2587_v57 = vadd.f32 %v4759_v53, %v2129_v12  ;;  %v2121_v11 = vadd.f32 %v2120_v39, %v4661_v14  ;;  %v4908_v52 = vpop.permute.xlu0 %2482 }
 0x1e4   : > { %v2017_v2 = vpop.f32.mrf.mxu1  ;;  %v3374_v41 = vpop.f32.mrf.mxu0 }
 0x1e5   : > { %2825 = vst.msk [vmem:[%s4858_s16 + $0x10] sm:$0xf] %vm2820_vm0, %v3176_v17  ;;  %v3179_v23 = vpack.c.bf16 %v2587_v57, %v2587_v57  ;;  %v2585_v32 = vadd.f32 %v4749_v9, %v2121_v11  ;;  %v2142_v44 = vadd.f32 %v3374_v41, %v4686_v42  ;;  %v4920_v41 = vpop.permute.xlu1 %2487 }
 0x1e6   : > { %v4900_v3 = vpop.f32.mrf.mxu1  ;;  %v2133_v62 = vpop.f32.mrf.mxu0 }
 0x1e7   : > { %2828 = vst.msk [vmem:[%s4858_s16 + $0x1c] sm:$0xf] %vm2820_vm0, %v3179_v23  ;;  %v3177_v53 = vpack.c.bf16 %v2585_v32, %v2585_v32  ;;  %v2590_v14 = vadd.f32 %v4777_v25, %v2142_v44  ;;  %v2134_v7 = vadd.f32 %v2133_v62, %v4676_v19  ;;  %v4928_v62 = vpop.permute.xlu0 %2492 }
 0x1e8   : > { %v2022_v48 = vpop.f32.mrf.mxu1  ;;  %v3375_v33 = vpop.f32.mrf.mxu0 }
 0x1e9   : > { %2826 = vst.msk [vmem:[%s4858_s16 + $0x14] sm:$0xf] %vm2820_vm0, %v3177_v53  ;;  %v3182_v42 = vpack.c.bf16 %v2590_v14, %v2590_v14  ;;  %v2588_v9 = vadd.f32 %v4767_v58, %v2134_v7  ;;  %v2145_v12 = vadd.f32 %v3375_v33, %v4691_v61 }
 0x1ea   : > { %v4914_v39 = vpop.f32.mrf.mxu1  ;;  %v2136_v17 = vpop.f32.mrf.mxu0 }
 0x1eb   : > { %2831 = vst.msk [vmem:[%s4858_s16 + $0x28] sm:$0xf] %vm2820_vm0, %v3182_v42  ;;  %v3180_v25 = vpack.c.bf16 %v2588_v9, %v2588_v9  ;;  %v2591_v19 = vadd.f32 %v4785_v15, %v2145_v12  ;;  %v2137_v57 = vadd.f32 %v2136_v17, %v4681_v8  ;;  %v4940_v9 = vpop.permute.xlu1 %2497 }
 0x1ec   : > { %v2025_v11 = vpop.f32.mrf.mxu1  ;;  %v3378_v2 = vpop.f32.mrf.mxu0 }
 0x1ed   : > { %2829 = vst.msk [vmem:[%s4858_s16 + $0x20] sm:$0xf] %vm2820_vm0, %v3180_v25  ;;  %v3183_v58 = vpack.c.bf16 %v2591_v19, %v2591_v19  ;;  %v2589_v61 = vadd.f32 %v4775_v18, %v2137_v57  ;;  %v2158_v23 = vadd.f32 %v3378_v2, %v4706_v28  ;;  %v4946_v19 = vpop.permute.xlu0 %2502 }
 0x1ee   : > { %v4926_v32 = vpop.f32.mrf.mxu1  ;;  %v2149_v44 = vpop.f32.mrf.mxu0 }
 0x1ef   : > { %2832 = vst.msk [vmem:[%s4858_s16 + $0x2c] sm:$0xf] %vm2820_vm0, %v3183_v58  ;;  %v3181_v8 = vpack.c.bf16 %v2589_v61, %v2589_v61  ;;  %v2594_v15 = vadd.f32 %v4803_v46, %v2158_v23  ;;  %v2150_v53 = vadd.f32 %v2149_v44, %v4696_v27  ;;  %v4958_v44 = vpop.permute.xlu1 %2507 }
 0x1f0   : > { %v2030_v14 = vpop.f32.mrf.mxu1  ;;  %v3379_v7 = vpop.f32.mrf.mxu0 }
 0x1f1   : > { %2830 = vst.msk [vmem:[%s4858_s16 + $0x24] sm:$0xf] %vm2820_vm0, %v3181_v8  ;;  %v3186_v18 = vpack.c.bf16 %v2594_v15, %v2594_v15  ;;  %v2592_v28 = vadd.f32 %v4793_v5, %v2150_v53  ;;  %v2161_v48 = vadd.f32 %v3379_v7, %v4711_v34  ;;  %v4966_v14 = vpop.permute.xlu0 %2512 }
 0x1f2   : > { %v4938_v33 = vpop.f32.mrf.mxu1  ;;  %v2152_v42 = vpop.f32.mrf.mxu0 }
 0x1f3   : > { %2835 = vst.msk [vmem:[%s4858_s16 + $0x38] sm:$0xf] %vm2820_vm0, %v3186_v18  ;;  %v3184_v46 = vpack.c.bf16 %v2592_v28, %v2592_v28  ;;  %v2595_v27 = vadd.f32 %v4811_v22, %v2161_v48  ;;  %v2153_v12 = vadd.f32 %v2152_v42, %v4701_v21 }
 0x1f4   : > { %v2033_v17 = vpop.f32.mrf.mxu1  ;;  %v3382_v25 = vpop.f32.mrf.mxu0 }
 0x1f5   : > { %2833 = vst.msk [vmem:[%s4858_s16 + $0x30] sm:$0xf] %vm2820_vm0, %v3184_v46  ;;  %v3187_v34 = vpack.c.bf16 %v2595_v27, %v2595_v27  ;;  %v2593_v5 = vadd.f32 %v4801_v63, %v2153_v12  ;;  %v2174_v57 = vadd.f32 %v3382_v25, %v4735_v20  ;;  %v4978_v27 = vpop.permute.xlu1 %2517 }
 0x1f6   : > { %v4952_v11 = vpop.f32.mrf.mxu1  ;;  %v2165_v2 = vpop.f32.mrf.mxu0 }
 0x1f7   : > { %2836 = vst.msk [vmem:[%s4858_s16 + $0x3c] sm:$0xf] %vm2820_vm0, %v3187_v34  ;;  %v3185_v22 = vpack.c.bf16 %v2593_v5, %v2593_v5  ;;  %v2598_v21 = vadd.f32 %v4829_v35, %v2174_v57  ;;  %v2166_v58 = vadd.f32 %v2165_v2, %v4718_v47  ;;  %v4984_v34 = vpop.permute.xlu0 %2522 }
 0x1f8   : > { %v2038_v61 = vpop.f32.mrf.mxu1  ;;  %v3383_v23 = vpop.f32.mrf.mxu0 }
 0x1f9   : > { %2834 = vst.msk [vmem:[%s4858_s16 + $0x34] sm:$0xf] %vm2820_vm0, %v3185_v22  ;;  %v3190_v63 = vpack.c.bf16 %v2598_v21, %v2598_v21  ;;  %v2596_v20 = vadd.f32 %v4819_v26, %v2166_v58  ;;  %v2177_v8 = vadd.f32 %v3383_v23, %v4743_v56  ;;  %v4996_v61 = vpop.permute.xlu1 %2527 }
 0x1fa   : > { %v4964_v15 = vpop.f32.mrf.mxu1  ;;  %v2168_v53 = vpop.f32.mrf.mxu0 }
 0x1fb   : > { %2839 = vst.msk [vmem:[%s4858_s16 + $0x48] sm:$0xf] %vm2820_vm0, %v3190_v63  ;;  %v3188_v47 = vpack.c.bf16 %v2596_v20, %v2596_v20  ;;  %v2599_v35 = vadd.f32 %v4837_v13, %v2177_v8  ;;  %v2169_v7 = vadd.f32 %v2168_v53, %v4727_v37  ;;  %v5004_v8 = vpop.permute.xlu0 %2532 }
 0x1fc   : > { %v2041_v18 = vpop.f32.mrf.mxu1  ;;  %v3386_v28 = vpop.f32.mrf.mxu0 }
 0x1fd   : > { %2837 = vst.msk [vmem:[%s4858_s16 + $0x40] sm:$0xf] %vm2820_vm0, %v3188_v47  ;;  %v3191_v26 = vpack.c.bf16 %v2599_v35, %v2599_v35  ;;  %v2597_v56 = vadd.f32 %v4827_v24, %v2169_v7  ;;  %v2190_v48 = vadd.f32 %v3386_v28, %v4769_v54 }
 0x1fe   : > { %v4976_v42 = vpop.f32.mrf.mxu1  ;;  %v2181_v46 = vpop.f32.mrf.mxu0 }
 0x1ff   : > { %2840 = vst.msk [vmem:[%s4858_s16 + $0x4c] sm:$0xf] %vm2820_vm0, %v3191_v26  ;;  %v3189_v13 = vpack.c.bf16 %v2597_v56, %v2597_v56  ;;  %v2602_v37 = vadd.f32 %v4851_v51, %v2190_v48  ;;  %v2182_v12 = vadd.f32 %v2181_v46, %v4753_v29  ;;  %v5018_v56 = vpop.permute.xlu1 %2537 }
 0x200   : > { %v2046_v17 = vpop.f32.mrf.mxu1  ;;  %v3387_v25 = vpop.f32.mrf.mxu0 }
 0x201   : > { %2838 = vst.msk [vmem:[%s4858_s16 + $0x44] sm:$0xf] %vm2820_vm0, %v3189_v13  ;;  %v3194_v54 = vpack.c.bf16 %v2602_v37, %v2602_v37  ;;  %v2600_v24 = vadd.f32 %v4841_v4, %v2182_v12  ;;  %v2193_v5 = vadd.f32 %v3387_v25, %v4779_v16  ;;  %v5215_v37 = vld [vmem:[#allocation2_spill] sm:$0xff]  ;;  %v5027_v12 = vpop.permute.xlu0 %2542 }
 0x202   : > { %v4990_v57 = vpop.f32.mrf.mxu1  ;;  %v2184_v2 = vpop.f32.mrf.mxu0 }
 0x203   : > { %2843 = vst.msk [vmem:[%s4858_s16 + $0x58] sm:$0xf] %vm2820_vm0, %v3194_v54  ;;  %v3192_v51 = vpack.c.bf16 %v2600_v24, %v2600_v24  ;;  %v2603_v29 = vadd.f32 %v4864_v59, %v2193_v5  ;;  %v2185_v22 = vadd.f32 %v2184_v2, %v4761_v6 }
 0x204   : > { %v2049_v21 = vpop.f32.mrf.mxu1  ;;  %v3390_v58 = vpop.f32.mrf.mxu0 }
 0x205   : > { %2841 = vst.msk [vmem:[%s4858_s16 + $0x50] sm:$0xf] %vm2820_vm0, %v3192_v51  ;;  %v3195_v4 = vpack.c.bf16 %v2603_v29, %v2603_v29  ;;  %v2601_v16 = vadd.f32 %v4846_v31, %v2185_v22  ;;  %v2206_v23 = vadd.f32 %v3390_v58, %v4805_v0  ;;  %v1388_v31 = vadd.f32 %v4498_v49, %v4703_v40  ;;  %v5213_v40 = vld [vmem:[#allocation30_spill] sm:$0xff]  ;;  %v5218_v21 = vld [vmem:[#allocation20_spill] sm:$0xff] }
 0x206   : > { %v5002_v63 = vpop.f32.mrf.mxu1  ;;  %v2197_v20 = vpop.f32.mrf.mxu0  ;;  %v5217_v29 = vld [vmem:[#allocation34_spill] sm:$0xff]  ;;  %v5219_v58 = vld [vmem:[#allocation4_spill] sm:$0xff] }
 0x207   : > { %2844 = vst.msk [vmem:[%s4858_s16 + $0x5c] sm:$0xf] %vm2820_vm0, %v3195_v4  ;;  %v3193_v6 = vpack.c.bf16 %v2601_v16, %v2601_v16  ;;  %v2606_v59 = vadd.f32 %v4890_v45, %v2206_v23  ;;  %v2198_v53 = vadd.f32 %v2197_v20, %v4787_v55  ;;  %v1997_v55 = vadd.f32 %v4835_v10, %v1388_v31  ;;  %v5220_v16 = vld [vmem:[#allocation21_spill] sm:$0xff]  ;;  %v5221_v23 = vld [vmem:[#allocation6_spill] sm:$0xff] }
 0x208   : > { %v2054_v47 = vpop.f32.mrf.mxu1  ;;  %v3391_v35 = vpop.f32.mrf.mxu0  ;;  %v1396_v4 = vadd.f32 %v5219_v58, %v5218_v21  ;;  %v5222_v20 = vld [vmem:[#allocation22_spill] sm:$0xff]  ;;  %v5225_v31 = vld [vmem:[#allocation5_spill] sm:$0xff] }
 0x209   : > { %2842 = vst.msk [vmem:[%s4858_s16 + $0x54] sm:$0xf] %vm2820_vm0, %v3193_v6  ;;  %v3198_v0 = vpack.c.bf16 %v2606_v59, %v2606_v59  ;;  %v2604_v7 = vadd.f32 %v4870_v1, %v2198_v53  ;;  %v2209_v18 = vadd.f32 %v3391_v35, %v4813_v36  ;;  %v5214_v1 = vld [vmem:[#allocation19_spill] sm:$0xff]  ;;  %v5236_v21 = vld [vmem:[#allocation9_spill] sm:$0xff] }
 0x20a   : > { %v5016_v28 = vpop.f32.mrf.mxu1  ;;  %v2200_v26 = vpop.f32.mrf.mxu0  ;;  %v1391_v36 = vadd.f32 %v5215_v37, %v5214_v1  ;;  %v5223_v6 = vld [vmem:[#allocation3_spill] sm:$0xff] }
 0x20b   : > { %2847 = vst.msk [vmem:[%s4858_s16 + $0x68] sm:$0xf] %vm2820_vm0, %v3198_v0  ;;  %v3196_v45 = vpack.c.bf16 %v2604_v7, %v2604_v7  ;;  %v2607_v49 = vadd.f32 %v4902_v30, %v2209_v18  ;;  %v2201_v48 = vadd.f32 %v2200_v26, %v5213_v40  ;;  %v5216_v30 = vld [vmem:[#allocation39_spill] sm:$0xff]  ;;  %v1404_v59 = vadd.f32 %v5223_v6, %v5222_v20  ;;  %v5047_v7 = vpop.permute.xlu1 %2547  ;;  %v5228_v40 = vld [vmem:[#allocation25_spill] sm:$0xff] }
 0x20c   : > { %v2057_v46 = vpop.f32.mrf.mxu1  ;;  %v3394_v13 = vpop.f32.mrf.mxu0  ;;  %v2000_v5 = vadd.f32 %v5216_v30, %v1391_v36  ;;  %v5224_v35 = vld [vmem:[#allocation23_spill] sm:$0xff]  ;;  %v5239_v6 = vld [vmem:[#allocation29_spill] sm:$0xff] }
 0x20d   : > { %2845 = vst.msk [vmem:[%s4858_s16 + $0x60] sm:$0xf] %vm2820_vm0, %v3196_v45  ;;  %v3199_v17 = vpack.c.bf16 %v2607_v49, %v2607_v49  ;;  %v2605_v10 = vadd.f32 %v4882_v50, %v2201_v48  ;;  %v2222_v25 = vadd.f32 %v3394_v13, %v1997_v55  ;;  %v1399_v50 = vadd.f32 %v5221_v23, %v5220_v16  ;;  %v5226_v55 = vld [vmem:[#allocation24_spill] sm:$0xff]  ;;  %v5229_v48 = vld [vmem:[#allocation10_spill] sm:$0xff]  ;;  %v5231_v1 = vld [vmem:[#allocation7_spill] sm:$0xff]  ;;  %v2553_v30 = vpop.permute.xlu0 %2552 }
 0x20e   : > { %v5032_v54 = vpop.f32.mrf.mxu1  ;;  %v2213_v24 = vpop.f32.mrf.mxu0  ;;  %v1407_v0 = vadd.f32 %v5225_v31, %v5224_v35  ;;  %v5227_v45 = vld [vmem:[#allocation8_spill] sm:$0xff]  ;;  %v5056_v46 = vadd.f32 %v5229_v48, %v5228_v40  ;;  %v5230_v13 = vld [vmem:[#allocation26_spill] sm:$0xff]  ;;  %v5232_v36 = vld [vmem:[#allocation31_spill] sm:$0xff] }
 0x20f   : > { %2848 = vst.msk [vmem:[%s4858_s16 + $0x6c] sm:$0xf] %vm2820_vm0, %v3199_v17  ;;  %v3197_v2 = vpack.c.bf16 %v2605_v10, %v2605_v10  ;;  %v2610_v51 = vadd.f32 %v4928_v62, %v2222_v25  ;;  %v2214_v22 = vadd.f32 %v2213_v24, %v5217_v29  ;;  %v1412_v49 = vadd.f32 %v5227_v45, %v5226_v55  ;;  %v5233_v17 = vld [vmem:[#allocation11_spill] sm:$0xff]  ;;  %v5237_v16 = vld [vmem:[#allocation28_spill] sm:$0xff]  ;;  %v5243_v45 = vld [vmem:[#allocation13_spill] sm:$0xff] }
 0x210   : > { %v2062_v53 = vpop.f32.mrf.mxu1  ;;  %v3395_v47 = vpop.f32.mrf.mxu0  ;;  %v1420_v37 = vadd.f32 %v5231_v1, %v5230_v13  ;;  %v1436_v10 = vadd.f32 %v5233_v17, %v5232_v36  ;;  %v5238_v23 = vld [vmem:[#allocation12_spill] sm:$0xff]  ;;  %v5244_v48 = vld [vmem:[#allocation33_spill] sm:$0xff]  ;;  %v5246_v36 = vld [vmem:[#allocation35_spill] sm:$0xff] }
 0x211   : > { %2846 = vst.msk [vmem:[%s4858_s16 + $0x64] sm:$0xf] %vm2820_vm0, %v3197_v2  ;;  %v3202_v62 = vpack.c.bf16 %v2610_v51, %v2610_v51  ;;  %v2608_v18 = vadd.f32 %v4908_v52, %v2214_v22  ;;  %v2225_v26 = vadd.f32 %v3395_v47, %v2000_v5  ;;  %v2013_v52 = vadd.f32 %v4876_v38, %v1404_v59  ;;  %v5234_v51 = vld [vmem:[#allocation36_spill] sm:$0xff]  ;;  %v5235_v22 = vld [vmem:[#allocation27_spill] sm:$0xff]  ;;  %v5240_v53 = vld [vmem:[#allocation14_spill] sm:$0xff] }
 0x212   : > { %v5062_v25 = vpop.f32.mrf.mxu1  ;;  %v2216_v24 = vpop.f32.mrf.mxu0  ;;  %v5071_v58 = vadd.f32 %v5236_v21, %v5235_v22  ;;  %v1428_v20 = vadd.f32 %v5238_v23, %v5237_v16  ;;  %v1431_v47 = vadd.f32 %v5240_v53, %v5239_v6  ;;  %v5241_v35 = vld [vmem:[#allocation40_spill] sm:$0xff]  ;;  %v5247_v17 = vld [vmem:[#allocation18_spill] sm:$0xff]  ;;  %v5249_v22 = vld [vmem:[#allocation15_spill] sm:$0xff]  ;;  %v2016_v53 = vadd.f32 %v4888_v60, %v1407_v0 }
 0x213   : > { %2851 = vst.msk [vmem:[%s4858_s16 + $0x78] sm:$0xf] %vm2820_vm0, %v3202_v62  ;;  %v3200_v5 = vpack.c.bf16 %v2608_v18, %v2608_v18  ;;  %v2611_v2 = vadd.f32 %v4940_v9, %v2225_v26  ;;  %v2217_v29 = vadd.f32 %v2216_v24, %v5234_v51  ;;  %v2005_v38 = vadd.f32 %v5241_v35, %v1396_v4  ;;  %v5242_v55 = vld [vmem:[#allocation32_spill] sm:$0xff]  ;;  %v5250_v16 = vld [vmem:[#allocation38_spill] sm:$0xff]  ;;  %v5251_v23 = vld [vmem:[#allocation17_spill] sm:$0xff] }
 0x214   : > { %v2065_v59 = vpop.f32.mrf.mxu1  ;;  %v3398_v31 = vpop.f32.mrf.mxu0  ;;  %v2045_v62 = vadd.f32 %v4976_v42, %v1436_v10  ;;  %v1439_v40 = vadd.f32 %v5243_v45, %v5242_v55  ;;  %v5245_v13 = vld [vmem:[#allocation16_spill] sm:$0xff]  ;;  %v5088_v24 = vadd.f32 %v5247_v17, %v5246_v36  ;;  %v2037_v4 = vadd.f32 %v4952_v11, %v1428_v20 }
 0x215   : > { %2849 = vst.msk [vmem:[%s4858_s16 + $0x70] sm:$0xf] %vm2820_vm0, %v3200_v5  ;;  %v3203_v9 = vpack.c.bf16 %v2611_v2, %v2611_v2  ;;  %v2609_v18 = vadd.f32 %v4920_v41, %v2217_v29  ;;  %v2238_v26 = vadd.f32 %v3398_v31, %v2013_v52  ;;  %v1444_v1 = vadd.f32 %v5245_v13, %v5244_v48  ;;  %v2558_v5 = vpop.permute.xlu1 %2557  ;;  %v5248_v29 = vld [vmem:[#allocation37_spill] sm:$0xff]  ;;  %v5100_v59 = vpop.permute.xlu0 %2562 }
 0x216   : > { %v3406_v42 = vpop.f32.mrf.mxu1  ;;  %v2229_v10 = vpop.f32.mrf.mxu0  ;;  %v1452_v21 = vadd.f32 %v5249_v22, %v5248_v29  ;;  %v1455_v6 = vadd.f32 %v5251_v23, %v5250_v16  ;;  %v2048_v11 = vadd.f32 %v4990_v57, %v1439_v40  ;;  %v2040_v60 = vadd.f32 %v4964_v15, %v1431_v47 }
 0x217   : > { %2852 = vst.msk [vmem:[%s4858_s16 + $0x7c] sm:$0xf] %vm2820_vm0, %v3203_v9  ;;  %v3201_v41 = vpack.c.bf16 %v2609_v18, %v2609_v18  ;;  %v2614_v52 = vadd.f32 %v4966_v14, %v2238_v26  ;;  %v2270_v2 = vadd.f32 %v3406_v42, %v2045_v62  ;;  %v2230_v51 = vadd.f32 %v2229_v10, %v2005_v38 }
 0x218   : > { %v2261_v20 = vpop.f32.mrf.mxu1  ;;  %v3399_v35 = vpop.f32.mrf.mxu0  ;;  %v2008_v9 = vadd.f32 %v4862_v43, %v1399_v50  ;;  %v2029_v18 = vadd.f32 %v4926_v32, %v1420_v37  ;;  %v2061_v43 = vadd.f32 %v5032_v54, %v1452_v21  ;;  %v2053_v54 = vadd.f32 %v5002_v63, %v1444_v1 }
 0x219   : > { %2850 = vst.msk [vmem:[%s4858_s16 + $0x74] sm:$0xf] %vm2820_vm0, %v3201_v41  ;;  %v3206_v14 = vpack.c.bf16 %v2614_v52, %v2614_v52  ;;  %v2622_v31 = vadd.f32 %v2553_v30, %v2270_v2  ;;  %v2612_v38 = vadd.f32 %v4946_v19, %v2230_v51  ;;  %v2262_v62 = vadd.f32 %v2261_v20, %v2037_v4  ;;  %v2568_v47 = vpop.permute.xlu1 %2567  ;;  %v2573_v42 = vpop.permute.xlu0 %2572 }
 0x21a   : > { %v2241_v0 = vadd.f32 %v3399_v35, %v2016_v53  ;;  %v3407_v57 = vpop.f32.mrf.mxu1  ;;  %v2232_v26 = vpop.f32.mrf.mxu0  ;;  %v2021_v19 = vadd.f32 %v4900_v3, %v1412_v49  ;;  %v2024_v3 = vadd.f32 %v4914_v39, %v5056_v46  ;;  %v2032_v39 = vadd.f32 %v4938_v33, %v5071_v58 }
 0x21b   : > { %2855 = vst.msk [vmem:[%s4858_s16 + $0x88] sm:$0xf] %vm2820_vm0, %v3206_v14  ;;  %v3214_v55 = vpack.c.bf16 %v2622_v31, %v2622_v31  ;;  %v3204_v45 = vpack.c.bf16 %v2612_v38, %v2612_v38  ;;  %v2620_v30 = vadd.f32 %v5027_v12, %v2262_v62  ;;  %v2273_v40 = vadd.f32 %v3407_v57, %v2048_v11 }
 0x21c   : > { %v2615_v32 = vadd.f32 %v4978_v27, %v2241_v0  ;;  %v2233_v50 = vadd.f32 %v2232_v26, %v2008_v9  ;;  %v2264_v15 = vpop.f32.mrf.mxu1  ;;  %v3402_v37 = vpop.f32.mrf.mxu0  ;;  %v2064_v63 = vadd.f32 %v5062_v25, %v1455_v6  ;;  %v2056_v22 = vadd.f32 %v5016_v28, %v5088_v24 }
 0x21d   : > { %2863 = vst.msk [vmem:[%s4858_s16 + $0xa8] sm:$0xf] %vm2820_vm0, %v3214_v55  ;;  %2853 = vst.msk [vmem:[%s4858_s16 + $0x80] sm:$0xf] %vm2820_vm0, %v3204_v45  ;;  %v3212_v48 = vpack.c.bf16 %v2620_v30, %v2620_v30  ;;  %v2623_v13 = vadd.f32 %v2558_v5, %v2273_v40  ;;  %v2265_v36 = vadd.f32 %v2264_v15, %v2040_v60  ;;  %v2578_v28 = vpop.permute.xlu1 %2577 }
 0x21e   : > { %v2254_v12 = vadd.f32 %v3402_v37, %v2029_v18  ;;  %v3207_v27 = vpack.c.bf16 %v2615_v32, %v2615_v32  ;;  %v2613_v49 = vadd.f32 %v4958_v44, %v2233_v50  ;;  %v3410_v17 = vpop.f32.mrf.mxu1  ;;  %v2245_v4 = vpop.f32.mrf.mxu0 }
 0x21f   : > { %2861 = vst.msk [vmem:[%s4858_s16 + $0xa0] sm:$0xf] %vm2820_vm0, %v3212_v48  ;;  %v3215_v10 = vpack.c.bf16 %v2623_v13, %v2623_v13  ;;  %v2621_v5 = vadd.f32 %v5047_v7, %v2265_v36  ;;  %v2286_v52 = vadd.f32 %v3410_v17, %v2061_v43  ;;  %v2246_v46 = vadd.f32 %v2245_v4, %v2021_v19 }
 0x220   : > { %v2618_v41 = vadd.f32 %v5004_v8, %v2254_v12  ;;  %2856 = vst.msk [vmem:[%s4858_s16 + $0x8c] sm:$0xf] %vm2820_vm0, %v3207_v27  ;;  %v3205_v44 = vpack.c.bf16 %v2613_v49, %v2613_v49  ;;  %v2277_v1 = vpop.f32.mrf.mxu1  ;;  %v3403_v2 = vpop.f32.mrf.mxu0 }
 0x221   : > { %2864 = vst.msk [vmem:[%s4858_s16 + $0xac] sm:$0xf] %vm2820_vm0, %v3215_v10  ;;  %v3213_v7 = vpack.c.bf16 %v2621_v5, %v2621_v5  ;;  %v2626_v29 = vadd.f32 %v2573_v42, %v2286_v52  ;;  %v2278_v8 = vadd.f32 %v2277_v1, %v2053_v54  ;;  %v2616_v33 = vadd.f32 %v4984_v34, %v2246_v46 }
 0x222   : > { %v3210_v51 = vpack.c.bf16 %v2618_v41, %v2618_v41  ;;  %2854 = vst.msk [vmem:[%s4858_s16 + $0x84] sm:$0xf] %vm2820_vm0, %v3205_v44  ;;  %v2257_v25 = vadd.f32 %v3403_v2, %v2032_v39  ;;  %v3411_v58 = vpop.f32.mrf.mxu1  ;;  %v2248_v21 = vpop.f32.mrf.mxu0 }
 0x223   : > { %2862 = vst.msk [vmem:[%s4858_s16 + $0xa4] sm:$0xf] %vm2820_vm0, %v3213_v7  ;;  %v3218_v16 = vpack.c.bf16 %v2626_v29, %v2626_v29  ;;  %v2624_v23 = vadd.f32 %v5100_v59, %v2278_v8  ;;  %v2289_v6 = vadd.f32 %v3411_v58, %v2064_v63  ;;  %v2249_v53 = vadd.f32 %v2248_v21, %v2024_v3 }
 0x224   : > { %2859 = vst.msk [vmem:[%s4858_s16 + $0x98] sm:$0xf] %vm2820_vm0, %v3210_v51  ;;  %v3208_v24 = vpack.c.bf16 %v2616_v33, %v2616_v33  ;;  %v2619_v34 = vadd.f32 %v5018_v56, %v2257_v25  ;;  %v2280_v11 = vpop.f32.mrf.mxu1 }
 0x225   : > { %2867 = vst.msk [vmem:[%s4858_s16 + $0xb8] sm:$0xf] %vm2820_vm0, %v3218_v16  ;;  %v3216_v20 = vpack.c.bf16 %v2624_v23, %v2624_v23  ;;  %v2627_v35 = vadd.f32 %v2578_v28, %v2289_v6  ;;  %v2617_v14 = vadd.f32 %v4996_v61, %v2249_v53  ;;  %v2281_v31 = vadd.f32 %v2280_v11, %v2056_v22 }
 0x226   : > { %2857 = vst.msk [vmem:[%s4858_s16 + $0x90] sm:$0xf] %vm2820_vm0, %v3208_v24  ;;  %v3211_v59 = vpack.c.bf16 %v2619_v34, %v2619_v34 }
 0x227   : > { %2865 = vst.msk [vmem:[%s4858_s16 + $0xb0] sm:$0xf] %vm2820_vm0, %v3216_v20  ;;  %v3219_v38 = vpack.c.bf16 %v2627_v35, %v2627_v35  ;;  %v3209_v62 = vpack.c.bf16 %v2617_v14, %v2617_v14  ;;  %v2625_v9 = vadd.f32 %v2568_v47, %v2281_v31 }
 0x228   : > { %2860 = vst.msk [vmem:[%s4858_s16 + $0x9c] sm:$0xf] %vm2820_vm0, %v3211_v59 }
 0x229   : > { %2868 = vst.msk [vmem:[%s4858_s16 + $0xbc] sm:$0xf] %vm2820_vm0, %v3219_v38  ;;  %2858 = vst.msk [vmem:[%s4858_s16 + $0x94] sm:$0xf] %vm2820_vm0, %v3209_v62  ;;  %v3217_v56 = vpack.c.bf16 %v2625_v9, %v2625_v9 }
 0x22b   : > { %2866 = vst.msk [vmem:[%s4858_s16 + $0xb4] sm:$0xf] %vm2820_vm0, %v3217_v56 }
 0x22c PF: > { %s15_s20 = sadd.s32 1, %s3671_s20   ;;  %s5252_s18 = smov %s3667_s19 }
 0x22d   : > { %p12_p5 = scmp.ge.s32.totalorder %s15_s20, 4   ;;  %s5253_s19 = smov %s5255_s21 }
 0x22f   :  { %14 = sbr.rel (!%p12_p5) target bundleno = 2 (0x2), region = 73 }

// kernel: vosnet_forward.7
= control target key start
LH: loop header
LB: loop body
LE: loop exit
PB: predicated region body
PF: predicated region fallthrough
CT: control target
= control target key end

     0   :  { %s9514_s18 = smov 0   ;;  %s9516_s19 = smov 0   ;;  %s12638_s0 = inlined_call_operand.vmem [shape: f32[2,768,4], index: 0, kind: input, shape index: {}]   ;;  %s12639_s1 = inlined_call_operand.vmem [shape: f32[2,768,4], index: 1, kind: input, shape index: {}]   ;;  %s12640_s2 = inlined_call_operand.vmem [shape: bf16[768,768], index: 2, kind: input, shape index: {}]   ;;  %s12641_s3 = inlined_call_operand.vmem [shape: bf16[768,768], index: 3, kind: input, shape index: {}]   ;;  %s12642_s4 = inlined_call_operand.vmem [shape: f32[768,1], index: 4, kind: input, shape index: {}]   ;;  %s12643_s5 = inlined_call_operand.vmem [shape: bf16[2,768,4], index: 5, kind: output, shape index: {}]  }
   0x1   :  { %s9518_s20 = smov 0  }
   0x2 LB: > { %s27_s21 = sadd.s32 1, %s9477_s19  ;;  %p7792_p0 = scmp.ge.s32.totalorder %s9481_s20, 1  ;;  %s9481_s20 = sphi %s9518_s20, %s15_s20   ;;  %s9477_s19 = sphi %s9516_s19, %s12848_s19   ;;  %s9473_s18 = sphi %s9514_s18, %s12847_s18  }
   0x3   : > { %p29_p1 = scmp.ge.s32.totalorder %s27_s21, 2  ;;  %p221_p2 = scmp.lt.s32.totalorder %s9481_s20, 3 }
   0x5   : > { %s12850_s21 = smov (%p29_p1, %s27_s21), 0  ;;  %p222_p3 = pnand %p7792_p0, %p221_p2 }
   0x7   : > { %225 = sbr.rel (%p222_p3) target bundleno = 1434 (0x59a), region = 40 }
   0xc   : > { %p263_p4 = scmp.lt.s32.totalorder %s9473_s18, 1  ;;  %v12644_v0 = vmov 0   ;;  %v8597_v1 = vld [vmem:[%s12641_s3 + $0x4] ss:$24 sps:$4 sm:$0xff]   ;;  %vm7590_vm0 = vcmask 27648  }
   0xd   : > { %2592 = vmatprep.subr.bf16.mxu0 %v12644_v0  ;;  %3009 = vmatprep.subr.bf16.mxu1 %v12644_v0  ;;  %v8600_v2 = vld [vmem:[%s12641_s3 + $0xc] ss:$24 sps:$4 sm:$0xff]  }
   0xe   : > { %s12852_s18 = smov (!%p263_p4, %s9473_s18), 1  ;;  %8593 = vset.pattern.permute.xlu0 %v12644_v0  ;;  %8594 = vset.pattern.permute.xlu1 %v12644_v0 }
   0xf   : > { %2624 = vmatprep.mubr.bf16.mxu0 %v8597_v1  ;;  %s8566_s26 = smul.u32 768, %s12852_s18  ;;  %3041 = vmatprep.mubr.bf16.mxu1 %v8600_v2 }
  0x10   : > { %s8567_s14 = smul.u32 384, %s12852_s18 }
  0x11   : > { %s9550_s29 = scalar_lea.vmem %s12639_s1, %s8566_s26  ;;  %s9646_s7 = scalar_lea.vmem %s12638_s0, %s8566_s26 }
  0x12   : > { %v446_v3 = vld [vmem:[%s9550_s29 + $0x70] sm:$0xff]  ;;  %v447_v4 = vld [vmem:[%s9550_s29 + $0x78] sm:$0xff]  ;;  %v444_v8 = vld [vmem:[%s9550_s29 + $0x60] sm:$0xff]  ;;  %s12080_s26 = scalar_lea.vmem %s12643_s5, %s8567_s14 }
  0x13   : > { %v478_v5 = vld [vmem:[%s9550_s29 + $0x170] sm:$0xff]  ;;  %v535_v6 = vpack.c.bf16 %v447_v4, %v446_v3  ;;  %v479_v7 = vld [vmem:[%s9550_s29 + $0x178] sm:$0xff]  ;;  %v445_v9 = vld [vmem:[%s9550_s29 + $0x68] sm:$0xff] }
  0x14   : > { %v551_v10 = vpack.c.bf16 %v479_v7, %v478_v5  ;;  %v476_v11 = vld [vmem:[%s9550_s29 + $0x160] sm:$0xff]  ;;  %v477_v12 = vld [vmem:[%s9550_s29 + $0x168] sm:$0xff]  ;;  %v534_v13 = vpack.c.bf16 %v445_v9, %v444_v8  ;;  %v442_v15 = vld [vmem:[%s9550_s29 + $0x50] sm:$0xff] }
  0x15   : > { %2593 = vmatpush1.bf16.msra.mxu0 %v535_v6  ;;  %v550_v14 = vpack.c.bf16 %v477_v12, %v476_v11  ;;  %v443_v16 = vld [vmem:[%s9550_s29 + $0x58] sm:$0xff]  ;;  %v474_v17 = vld [vmem:[%s9550_s29 + $0x150] sm:$0xff]  ;;  %v440_v21 = vld [vmem:[%s9550_s29 + $0x40] sm:$0xff] }
  0x16   : > { %3010 = vmatpush1.bf16.msra.mxu1 %v551_v10  ;;  %2594 = vmatprep.subr.bf16.mxu0 %v12644_v0  ;;  %v475_v18 = vld [vmem:[%s9550_s29 + $0x158] sm:$0xff]  ;;  %v533_v19 = vpack.c.bf16 %v443_v16, %v442_v15  ;;  %v441_v22 = vld [vmem:[%s9550_s29 + $0x48] sm:$0xff]  ;;  %v472_v23 = vld [vmem:[%s9550_s29 + $0x140] sm:$0xff] }
  0x17   : > { %3011 = vmatprep.subr.bf16.mxu1 %v12644_v0  ;;  %v549_v20 = vpack.c.bf16 %v475_v18, %v474_v17  ;;  %v473_v24 = vld [vmem:[%s9550_s29 + $0x148] sm:$0xff]  ;;  %v532_v25 = vpack.c.bf16 %v441_v22, %v440_v21  ;;  %v438_v27 = vld [vmem:[%s9550_s29 + $0x30] sm:$0xff]  ;;  %v439_v28 = vld [vmem:[%s9550_s29 + $0x38] sm:$0xff] }
  0x18   : > { %v548_v26 = vpack.c.bf16 %v473_v24, %v472_v23  ;;  %v470_v29 = vld [vmem:[%s9550_s29 + $0x130] sm:$0xff]  ;;  %v471_v30 = vld [vmem:[%s9550_s29 + $0x138] sm:$0xff]  ;;  %v531_v31 = vpack.c.bf16 %v439_v28, %v438_v27  ;;  %v436_v33 = vld [vmem:[%s9550_s29 + $0x20] sm:$0xff] }
  0x19   : > { %2595 = vmatpush1.bf16.msra.mxu0 %v534_v13  ;;  %v547_v32 = vpack.c.bf16 %v471_v30, %v470_v29  ;;  %v437_v34 = vld [vmem:[%s9550_s29 + $0x28] sm:$0xff]  ;;  %v468_v35 = vld [vmem:[%s9550_s29 + $0x120] sm:$0xff]  ;;  %v434_v39 = vld [vmem:[%s9550_s29 + $0x10] sm:$0xff] }
  0x1a   : > { %3012 = vmatpush1.bf16.msra.mxu1 %v550_v14  ;;  %2596 = vmatprep.subr.bf16.mxu0 %v12644_v0  ;;  %v469_v36 = vld [vmem:[%s9550_s29 + $0x128] sm:$0xff]  ;;  %v530_v37 = vpack.c.bf16 %v437_v34, %v436_v33  ;;  %v435_v40 = vld [vmem:[%s9550_s29 + $0x18] sm:$0xff]  ;;  %v466_v41 = vld [vmem:[%s9550_s29 + $0x110] sm:$0xff] }
  0x1b   : > { %3013 = vmatprep.subr.bf16.mxu1 %v12644_v0  ;;  %v546_v38 = vpack.c.bf16 %v469_v36, %v468_v35  ;;  %v467_v42 = vld [vmem:[%s9550_s29 + $0x118] sm:$0xff]  ;;  %v529_v43 = vpack.c.bf16 %v435_v40, %v434_v39  ;;  %v432_v44 = vld [vmem:[%s9550_s29] sm:$0xff]  ;;  %v433_v46 = vld [vmem:[%s9550_s29 + $0x8] sm:$0xff] }
  0x1c   : > { %v545_v45 = vpack.c.bf16 %v467_v42, %v466_v41  ;;  %v464_v47 = vld [vmem:[%s9550_s29 + $0x100] sm:$0xff]  ;;  %v465_v48 = vld [vmem:[%s9550_s29 + $0x108] sm:$0xff]  ;;  %v528_v49 = vpack.c.bf16 %v433_v46, %v432_v44  ;;  %v462_v50 = vld [vmem:[%s9550_s29 + $0xf0] sm:$0xff] }
  0x1d   : > { %2597 = vmatpush1.bf16.msra.mxu0 %v533_v19  ;;  %v544_v51 = vpack.c.bf16 %v465_v48, %v464_v47  ;;  %v463_v52 = vld [vmem:[%s9550_s29 + $0xf8] sm:$0xff]  ;;  %v494_v53 = vld [vmem:[%s9550_s29 + $0x1f0] sm:$0xff]  ;;  %v460_v57 = vld [vmem:[%s9550_s29 + $0xe0] sm:$0xff] }
  0x1e   : > { %3014 = vmatpush1.bf16.msra.mxu1 %v549_v20  ;;  %2598 = vmatprep.subr.bf16.mxu0 %v12644_v0  ;;  %v495_v54 = vld [vmem:[%s9550_s29 + $0x1f8] sm:$0xff]  ;;  %v543_v55 = vpack.c.bf16 %v463_v52, %v462_v50  ;;  %v461_v58 = vld [vmem:[%s9550_s29 + $0xe8] sm:$0xff]  ;;  %v492_v59 = vld [vmem:[%s9550_s29 + $0x1e0] sm:$0xff] }
  0x1f   : > { %3015 = vmatprep.subr.bf16.mxu1 %v12644_v0  ;;  %v559_v56 = vpack.c.bf16 %v495_v54, %v494_v53  ;;  %v493_v60 = vld [vmem:[%s9550_s29 + $0x1e8] sm:$0xff]  ;;  %v542_v61 = vpack.c.bf16 %v461_v58, %v460_v57  ;;  %v458_v63 = vld [vmem:[%s9550_s29 + $0xd0] sm:$0xff]  ;;  %v459_v1 = vld [vmem:[%s9550_s29 + $0xd8] sm:$0xff] }
  0x20   : > { %v558_v62 = vpack.c.bf16 %v493_v60, %v492_v59  ;;  %v490_v2 = vld [vmem:[%s9550_s29 + $0x1d0] sm:$0xff]  ;;  %v491_v3 = vld [vmem:[%s9550_s29 + $0x1d8] sm:$0xff]  ;;  %v541_v4 = vpack.c.bf16 %v459_v1, %v458_v63  ;;  %v456_v5 = vld [vmem:[%s9550_s29 + $0xc0] sm:$0xff] }
  0x21   : > { %2599 = vmatpush1.bf16.msra.mxu0 %v532_v25  ;;  %v557_v6 = vpack.c.bf16 %v491_v3, %v490_v2  ;;  %v457_v7 = vld [vmem:[%s9550_s29 + $0xc8] sm:$0xff]  ;;  %v488_v8 = vld [vmem:[%s9550_s29 + $0x1c0] sm:$0xff]  ;;  %v454_v12 = vld [vmem:[%s9550_s29 + $0xb0] sm:$0xff] }
  0x22   : > { %3016 = vmatpush1.bf16.msra.mxu1 %v548_v26  ;;  %2600 = vmatprep.subr.bf16.mxu0 %v12644_v0  ;;  %v489_v9 = vld [vmem:[%s9550_s29 + $0x1c8] sm:$0xff]  ;;  %v540_v10 = vpack.c.bf16 %v457_v7, %v456_v5  ;;  %v455_v13 = vld [vmem:[%s9550_s29 + $0xb8] sm:$0xff]  ;;  %v486_v14 = vld [vmem:[%s9550_s29 + $0x1b0] sm:$0xff] }
  0x23   : > { %3017 = vmatprep.subr.bf16.mxu1 %v12644_v0  ;;  %v556_v11 = vpack.c.bf16 %v489_v9, %v488_v8  ;;  %v487_v15 = vld [vmem:[%s9550_s29 + $0x1b8] sm:$0xff]  ;;  %v539_v16 = vpack.c.bf16 %v455_v13, %v454_v12  ;;  %v452_v18 = vld [vmem:[%s9550_s29 + $0xa0] sm:$0xff]  ;;  %v453_v19 = vld [vmem:[%s9550_s29 + $0xa8] sm:$0xff] }
  0x24   : > { %v555_v17 = vpack.c.bf16 %v487_v15, %v486_v14  ;;  %v484_v20 = vld [vmem:[%s9550_s29 + $0x1a0] sm:$0xff]  ;;  %v485_v21 = vld [vmem:[%s9550_s29 + $0x1a8] sm:$0xff]  ;;  %v538_v22 = vpack.c.bf16 %v453_v19, %v452_v18  ;;  %v450_v23 = vld [vmem:[%s9550_s29 + $0x90] sm:$0xff] }
  0x25   : > { %2601 = vmatpush1.bf16.msra.mxu0 %v531_v31  ;;  %v554_v24 = vpack.c.bf16 %v485_v21, %v484_v20  ;;  %v451_v25 = vld [vmem:[%s9550_s29 + $0x98] sm:$0xff]  ;;  %v482_v26 = vld [vmem:[%s9550_s29 + $0x190] sm:$0xff]  ;;  %v448_v29 = vld [vmem:[%s9550_s29 + $0x80] sm:$0xff] }
  0x26   : > { %3018 = vmatpush1.bf16.msra.mxu1 %v547_v32  ;;  %2602 = vmatprep.subr.bf16.mxu0 %v12644_v0  ;;  %v483_v27 = vld [vmem:[%s9550_s29 + $0x198] sm:$0xff]  ;;  %v537_v28 = vpack.c.bf16 %v451_v25, %v450_v23  ;;  %v449_v31 = vld [vmem:[%s9550_s29 + $0x88] sm:$0xff]  ;;  %v480_v32 = vld [vmem:[%s9550_s29 + $0x180] sm:$0xff] }
  0x27   : > { %3019 = vmatprep.subr.bf16.mxu1 %v12644_v0  ;;  %v553_v30 = vpack.c.bf16 %v483_v27, %v482_v26  ;;  %v481_v33 = vld [vmem:[%s9550_s29 + $0x188] sm:$0xff]  ;;  %v536_v34 = vpack.c.bf16 %v449_v31, %v448_v29  ;;  %v510_v36 = vld [vmem:[%s9550_s29 + $0x270] sm:$0xff]  ;;  %v303_v39 = vld [vmem:[%s9646_s7 + $0x78] sm:$0xff] }
  0x28   : > { %v552_v35 = vpack.c.bf16 %v481_v33, %v480_v32  ;;  %v8595_v40 = vld [vmem:[%s12641_s3] ss:$24 sps:$4 sm:$0xff]   ;;  %v8603_v44 = vld [vmem:[%s12641_s3 + $0x3c] ss:$24 sps:$4 sm:$0xff]   ;;  %v509_v47 = vld [vmem:[%s9550_s29 + $0x268] sm:$0xff] }
  0x29   : > { %2603 = vmatpush1.bf16.msra.mxu0 %v530_v37  ;;  %v511_v37 = vld [vmem:[%s9550_s29 + $0x278] sm:$0xff]  ;;  %v8598_v41 = vld [vmem:[%s12641_s3 + $0x8] ss:$24 sps:$4 sm:$0xff]   ;;  %v298_v57 = vld [vmem:[%s9646_s7 + $0x50] sm:$0xff] }
  0x2a   : > { %3020 = vmatpush1.bf16.msra.mxu1 %v546_v38  ;;  %2604 = vmatprep.subr.bf16.mxu0 %v12644_v0  ;;  %v302_v38 = vld [vmem:[%s9646_s7 + $0x70] sm:$0xff]  ;;  %v567_v42 = vpack.c.bf16 %v511_v37, %v510_v36  ;;  %v508_v46 = vld [vmem:[%s9550_s29 + $0x260] sm:$0xff]  ;;  %v507_v54 = vld [vmem:[%s9550_s29 + $0x258] sm:$0xff] }
  0x2b   : > { %3021 = vmatprep.subr.bf16.mxu1 %v12644_v0  ;;  %v300_v48 = vld [vmem:[%s9646_s7 + $0x60] sm:$0xff]  ;;  %v566_v50 = vpack.c.bf16 %v509_v47, %v508_v46  ;;  %v8605_v52 = vld [vmem:[%s12641_s3 + $0x30] ss:$24 sps:$4 sm:$0xff]   ;;  %v299_v58 = vld [vmem:[%s9646_s7 + $0x58] sm:$0xff] }
  0x2c   : > { %v8609_v59 = vld [vmem:[%s12641_s3 + $0x6c] ss:$24 sps:$4 sm:$0xff]   ;;  %v389_v1 = vpack.c.bf16 %v299_v58, %v298_v57  ;;  %v502_v3 = vld [vmem:[%s9550_s29 + $0x230] sm:$0xff]  ;;  %v8611_v5 = vld [vmem:[%s12641_s3 + $0x60] ss:$24 sps:$4 sm:$0xff]  }
  0x2d   : > { %2605 = vmatpush1.bf16.msra.mxu0 %v529_v43  ;;  %v8601_v43 = vld [vmem:[%s12641_s3 + $0x34] ss:$24 sps:$4 sm:$0xff]   ;;  %v504_v60 = vld [vmem:[%s9550_s29 + $0x240] sm:$0xff]  ;;  %v295_v8 = vld [vmem:[%s9646_s7 + $0x38] sm:$0xff] }
  0x2e   : > { %3022 = vmatpush1.bf16.msra.mxu1 %v545_v45  ;;  %2606 = vmatprep.subr.bf16.mxu0 %v12644_v0  ;;  %v391_v45 = vpack.c.bf16 %v303_v39, %v302_v38  ;;  %v296_v63 = vld [vmem:[%s9646_s7 + $0x40] sm:$0xff]  ;;  %v297_v2 = vld [vmem:[%s9646_s7 + $0x48] sm:$0xff]  ;;  %v294_v7 = vld [vmem:[%s9646_s7 + $0x30] sm:$0xff] }
  0x2f   : > { %3023 = vmatprep.subr.bf16.mxu1 %v12644_v0  ;;  %v8612_v9 = vld [vmem:[%s12641_s3 + $0x68] ss:$24 sps:$4 sm:$0xff]   ;;  %v8615_v12 = vld [vmem:[%s12641_s3 + $0x9c] ss:$24 sps:$4 sm:$0xff]   ;;  %v8630_v36 = vld [vmem:[%s12641_s3 + $0xf8] ss:$24 sps:$4 sm:$0xff]  }
  0x30   : > { %v500_v13 = vld [vmem:[%s9550_s29 + $0x220] sm:$0xff]  ;;  %v501_v14 = vld [vmem:[%s9550_s29 + $0x228] sm:$0xff]  ;;  %v498_v21 = vld [vmem:[%s9550_s29 + $0x210] sm:$0xff] }
  0x31   : > { %2607 = vmatpush1.bf16.msra.mxu0 %v528_v49  ;;  %v301_v49 = vld [vmem:[%s9646_s7 + $0x68] sm:$0xff]  ;;  %v562_v20 = vpack.c.bf16 %v501_v14, %v500_v13  ;;  %v290_v23 = vld [vmem:[%s9646_s7 + $0x10] sm:$0xff]  ;;  %v8619_v25 = vld [vmem:[%s12641_s3 + $0xc4] ss:$24 sps:$4 sm:$0xff]  }
  0x32   : > { %3024 = vmatpush1.bf16.msra.mxu1 %v544_v51  ;;  %2608 = vmatprep.subr.bf16.mxu0 %v12644_v0  ;;  %v506_v51 = vld [vmem:[%s9550_s29 + $0x250] sm:$0xff]  ;;  %v390_v53 = vpack.c.bf16 %v301_v49, %v300_v48  ;;  %v293_v18 = vld [vmem:[%s9646_s7 + $0x28] sm:$0xff]  ;;  %v291_v27 = vld [vmem:[%s9646_s7 + $0x18] sm:$0xff] }
  0x33   : > { %3025 = vmatprep.subr.bf16.mxu1 %v12644_v0  ;;  %v8617_v19 = vld [vmem:[%s12641_s3 + $0x90] ss:$24 sps:$4 sm:$0xff]   ;;  %v8623_v31 = vld [vmem:[%s12641_s3 + $0xc0] ss:$24 sps:$4 sm:$0xff]   ;;  %v8625_v33 = vld [vmem:[%s12641_s3 + $0xf4] ss:$24 sps:$4 sm:$0xff]  }
  0x34   : > { %v8624_v32 = vld [vmem:[%s12641_s3 + $0xc8] ss:$24 sps:$4 sm:$0xff]   ;;  %v8631_v37 = vld [vmem:[%s12641_s3 + $0x124] ss:$24 sps:$4 sm:$0xff]   ;;  %v8637_v46 = vld [vmem:[%s12641_s3 + $0x154] ss:$24 sps:$4 sm:$0xff]  }
  0x35   : > { %2609 = vmatpush2.bf16.msra.mxu0 %v543_v55  ;;  %v8606_v55 = vld [vmem:[%s12641_s3 + $0x38] ss:$24 sps:$4 sm:$0xff]   ;;  %v8633_v38 = vld [vmem:[%s12641_s3 + $0x12c] ss:$24 sps:$4 sm:$0xff]   ;;  %v8639_v48 = vld [vmem:[%s12641_s3 + $0x15c] ss:$24 sps:$4 sm:$0xff]  }
  0x36   : > { %3026 = vmatpush2.bf16.msra.mxu1 %v559_v56  ;;  %2610 = vmatprep.subr.bf16.mxu0 %v12644_v0  ;;  %v8607_v56 = vld [vmem:[%s12641_s3 + $0x64] ss:$24 sps:$4 sm:$0xff]   ;;  %v8641_v49 = vld [vmem:[%s12641_s3 + $0x150] ss:$24 sps:$4 sm:$0xff]  }
  0x37   : > { %3027 = vmatprep.subr.bf16.mxu1 %v12644_v0  ;;  %v496_v39 = vld [vmem:[%s9550_s29 + $0x200] sm:$0xff]  ;;  %v8653_v57 = vld [vmem:[%s12641_s3 + $0x1b0] ss:$24 sps:$4 sm:$0xff]  }
  0x38   : > { %v526_v58 = vld [vmem:[%s9550_s29 + $0x2f0] sm:$0xff]  ;;  %v524_v13 = vld [vmem:[%s9550_s29 + $0x2e0] sm:$0xff]  ;;  %v525_v14 = vld [vmem:[%s9550_s29 + $0x2e8] sm:$0xff] }
  0x39   : > { %2611 = vmatpush2.bf16.msra.mxu0 %v542_v61  ;;  %v505_v61 = vld [vmem:[%s9550_s29 + $0x248] sm:$0xff] }
  0x3a   : > { %3028 = vmatpush2.bf16.msra.mxu1 %v558_v62  ;;  %2612 = vmatprep.subr.bf16.mxu0 %v12644_v0  ;;  %v565_v62 = vpack.c.bf16 %v507_v54, %v506_v51  ;;  %v8643_v51 = vld [vmem:[%s12641_s3 + $0x184] ss:$24 sps:$4 sm:$0xff]   ;;  %v8648_v54 = vld [vmem:[%s12641_s3 + $0x188] ss:$24 sps:$4 sm:$0xff]  }
  0x3b   : > { %3029 = vmatprep.subr.bf16.mxu1 %v12644_v0 }
  0x3d   : > { %2613 = vmatpush2.bf16.msra.mxu0 %v541_v4  ;;  %v503_v4 = vld [vmem:[%s9550_s29 + $0x238] sm:$0xff] }
  0x3e   : > { %3030 = vmatpush2.bf16.msra.mxu1 %v557_v6  ;;  %2614 = vmatprep.subr.bf16.mxu0 %v12644_v0  ;;  %v564_v6 = vpack.c.bf16 %v505_v61, %v504_v60  ;;  %v563_v15 = vpack.c.bf16 %v503_v4, %v502_v3  ;;  %v8654_v60 = vld [vmem:[%s12641_s3 + $0x1b8] ss:$24 sps:$4 sm:$0xff]   ;;  %v8655_v61 = vld [vmem:[%s12641_s3 + $0x1e4] ss:$24 sps:$4 sm:$0xff]  }
  0x3f   : > { %3031 = vmatprep.subr.bf16.mxu1 %v12644_v0  ;;  %v8657_v3 = vld [vmem:[%s12641_s3 + $0x1ec] ss:$24 sps:$4 sm:$0xff]   ;;  %v8659_v4 = vld [vmem:[%s12641_s3 + $0x1e0] ss:$24 sps:$4 sm:$0xff]  }
  0x41   : > { %2615 = vmatpush2.bf16.msra.mxu0 %v540_v10  ;;  %v8613_v10 = vld [vmem:[%s12641_s3 + $0x94] ss:$24 sps:$4 sm:$0xff]  }
  0x42   : > { %3032 = vmatpush2.bf16.msra.mxu1 %v556_v11  ;;  %2616 = vmatprep.subr.bf16.mxu0 %v12644_v0  ;;  %v388_v11 = vpack.c.bf16 %v297_v2, %v296_v63  ;;  %v318_v63 = vld [vmem:[%s9646_s7 + $0xf0] sm:$0xff] }
  0x43   : > { %3033 = vmatprep.subr.bf16.mxu1 %v12644_v0 }
  0x45   : > { %2617 = vmatpush2.bf16.msra.mxu0 %v539_v16  ;;  %v292_v16 = vld [vmem:[%s9646_s7 + $0x20] sm:$0xff] }
  0x46   : > { %3034 = vmatpush2.bf16.msra.mxu1 %v555_v17  ;;  %2618 = vmatprep.subr.bf16.mxu0 %v12644_v0  ;;  %v387_v17 = vpack.c.bf16 %v295_v8, %v294_v7  ;;  %v386_v26 = vpack.c.bf16 %v293_v18, %v292_v16  ;;  %v8663_v7 = vld [vmem:[%s12641_s3 + $0x21c] ss:$24 sps:$4 sm:$0xff]   ;;  %v8665_v8 = vld [vmem:[%s12641_s3 + $0x210] ss:$24 sps:$4 sm:$0xff]   ;;  %v316_v18 = vld [vmem:[%s9646_s7 + $0xe0] sm:$0xff] }
  0x47   : > { %3035 = vmatprep.subr.bf16.mxu1 %v12644_v0  ;;  %v8673_v16 = vld [vmem:[%s12641_s3 + $0x274] ss:$24 sps:$4 sm:$0xff]  }
  0x49   : > { %2619 = vmatpush2.bf16.msra.mxu0 %v538_v22  ;;  %v499_v22 = vld [vmem:[%s9550_s29 + $0x218] sm:$0xff] }
  0x4a   : > { %3036 = vmatpush2.bf16.msra.mxu1 %v554_v24  ;;  %2620 = vmatprep.subr.bf16.mxu0 %v12644_v0  ;;  %v8618_v24 = vld [vmem:[%s12641_s3 + $0x98] ss:$24 sps:$4 sm:$0xff]   ;;  %v561_v29 = vpack.c.bf16 %v499_v22, %v498_v21  ;;  %v8675_v21 = vld [vmem:[%s12641_s3 + $0x27c] ss:$24 sps:$4 sm:$0xff]  }
  0x4b   : > { %3037 = vmatprep.subr.bf16.mxu1 %v12644_v0  ;;  %v8677_v22 = vld [vmem:[%s12641_s3 + $0x270] ss:$24 sps:$4 sm:$0xff]  }
  0x4d   : > { %2621 = vmatpush2.bf16.msra.mxu0 %v537_v28  ;;  %v8621_v28 = vld [vmem:[%s12641_s3 + $0xcc] ss:$24 sps:$4 sm:$0xff]  }
  0x4e   : > { %3038 = vmatpush2.bf16.msra.mxu1 %v553_v30  ;;  %2622 = vmatprep.subr.bf16.mxu0 %v12644_v0  ;;  %v385_v30 = vpack.c.bf16 %v291_v27, %v290_v23  ;;  %v8678_v23 = vld [vmem:[%s12641_s3 + $0x278] ss:$24 sps:$4 sm:$0xff]   ;;  %v8684_v27 = vld [vmem:[%s12641_s3 + $0x2a8] ss:$24 sps:$4 sm:$0xff]  }
  0x4f   : > { %3039 = vmatprep.subr.bf16.mxu1 %v12644_v0 }
  0x51   : > { %2623 = vmatpush2.bf16.msra.mxu0 %v536_v34  ;;  %v8627_v34 = vld [vmem:[%s12641_s3 + $0xfc] ss:$24 sps:$4 sm:$0xff]  }
  0x52   : > { %3040 = vmatpush2.bf16.msra.mxu1 %v552_v35  ;;  %3426 = vmatprep.subr.bf16.mxu0 %v12644_v0  ;;  %v8629_v35 = vld [vmem:[%s12641_s3 + $0xf0] ss:$24 sps:$4 sm:$0xff]  }
  0x53   : > { %5283 = vmatprep.subr.bf16.mxu1 %v12644_v0 }
  0x54   : > { %2625 = vmatmul.mubr.bf16.vlgmr.msra.gmra.mxu0 %v8595_v40  ;;  %v497_v40 = vld [vmem:[%s9550_s29 + $0x208] sm:$0xff] }
  0x55   : > { %3042 = vmatmul.mubr.bf16.vlgmr.msra.gmra.mxu1 %v8598_v41  ;;  %3427 = vmatpush1.bf16.msra.mxu0 %v567_v42  ;;  %v288_v41 = vld [vmem:[%s9646_s7] sm:$0xff] }
  0x56   : > { %5284 = vmatpush1.bf16.msra.mxu1 %v391_v45  ;;  %2632 = vmatprep.mubr.bf16.mxu0 %v8601_v43  ;;  %v8635_v42 = vld [vmem:[%s12641_s3 + $0x120] ss:$24 sps:$4 sm:$0xff]   ;;  %v560_v43 = vpack.c.bf16 %v497_v40, %v496_v39  ;;  %v8693_v39 = vld [vmem:[%s12641_s3 + $0x30c] ss:$24 sps:$4 sm:$0xff]  }
  0x57   : > { %3049 = vmatprep.mubr.bf16.mxu1 %v8603_v44  ;;  %3428 = vmatprep.subr.bf16.mxu0 %v12644_v0  ;;  %v289_v44 = vld [vmem:[%s9646_s7 + $0x8] sm:$0xff]  ;;  %v8695_v40 = vld [vmem:[%s12641_s3 + $0x300] ss:$24 sps:$4 sm:$0xff]  }
  0x58   : > { %5285 = vmatprep.subr.bf16.mxu1 %v12644_v0  ;;  %v8636_v45 = vld [vmem:[%s12641_s3 + $0x128] ss:$24 sps:$4 sm:$0xff]   ;;  %v384_v47 = vpack.c.bf16 %v289_v44, %v288_v41 }
  0x59   : > { %3429 = vmatpush1.bf16.msra.mxu0 %v566_v50  ;;  %v8642_v50 = vld [vmem:[%s12641_s3 + $0x158] ss:$24 sps:$4 sm:$0xff]   ;;  %v8696_v41 = vld [vmem:[%s12641_s3 + $0x308] ss:$24 sps:$4 sm:$0xff]  }
  0x5a   : > { %5286 = vmatpush1.bf16.msra.mxu1 %v390_v53  ;;  %3430 = vmatprep.subr.bf16.mxu0 %v12644_v0  ;;  %v8647_v53 = vld [vmem:[%s12641_s3 + $0x180] ss:$24 sps:$4 sm:$0xff]   ;;  %v8701_v44 = vld [vmem:[%s12641_s3 + $0x330] ss:$24 sps:$4 sm:$0xff]  }
  0x5b   : > { %5287 = vmatprep.subr.bf16.mxu1 %v12644_v0 }
  0x5c   : > { %2633 = vmatmul.mubr.bf16.gmra.mxu0 %v8605_v52  ;;  %v8645_v52 = vld [vmem:[%s12641_s3 + $0x18c] ss:$24 sps:$4 sm:$0xff]  }
  0x5d   : > { %3050 = vmatmul.mubr.bf16.gmra.mxu1 %v8606_v55  ;;  %2640 = vmatprep.mubr.bf16.mxu0 %v8607_v56  ;;  %v8649_v55 = vld [vmem:[%s12641_s3 + $0x1b4] ss:$24 sps:$4 sm:$0xff]  }
  0x5e   : > { %3057 = vmatprep.mubr.bf16.mxu1 %v8609_v59  ;;  %3431 = vmatpush1.bf16.msra.mxu0 %v565_v62  ;;  %v8651_v56 = vld [vmem:[%s12641_s3 + $0x1bc] ss:$24 sps:$4 sm:$0xff]  }
  0x5f   : > { %5288 = vmatpush1.bf16.msra.mxu1 %v389_v1  ;;  %3432 = vmatprep.subr.bf16.mxu0 %v12644_v0  ;;  %v527_v59 = vld [vmem:[%s9550_s29 + $0x2f8] sm:$0xff] }
  0x60   : > { %5289 = vmatprep.subr.bf16.mxu1 %v12644_v0  ;;  %v575_v62 = vpack.c.bf16 %v527_v59, %v526_v58  ;;  %v319_v1 = vld [vmem:[%s9646_s7 + $0xf8] sm:$0xff]  ;;  %v8713_v58 = vld [vmem:[%s12641_s3 + $0x390] ss:$24 sps:$4 sm:$0xff]  }
  0x61   : > { %v399_v2 = vpack.c.bf16 %v319_v1, %v318_v63  ;;  %v8714_v59 = vld [vmem:[%s12641_s3 + $0x398] ss:$24 sps:$4 sm:$0xff]   ;;  %v8720_v63 = vld [vmem:[%s12641_s3 + $0x3c8] ss:$24 sps:$4 sm:$0xff]   ;;  %v8721_v1 = vld [vmem:[%s12641_s3 + $0x3f4] ss:$24 sps:$4 sm:$0xff]  }
  0x62   : > { %3433 = vmatpush1.bf16.msra.mxu0 %v564_v6  ;;  %v8661_v6 = vld [vmem:[%s12641_s3 + $0x214] ss:$24 sps:$4 sm:$0xff]  }
  0x63   : > { %5290 = vmatpush1.bf16.msra.mxu1 %v388_v11  ;;  %3434 = vmatprep.subr.bf16.mxu0 %v12644_v0  ;;  %v8669_v11 = vld [vmem:[%s12641_s3 + $0x24c] ss:$24 sps:$4 sm:$0xff]  }
  0x64   : > { %2641 = vmatmul.mubr.bf16.gmra.mxu0 %v8611_v5  ;;  %5291 = vmatprep.subr.bf16.mxu1 %v12644_v0  ;;  %v8660_v5 = vld [vmem:[%s12641_s3 + $0x1e8] ss:$24 sps:$4 sm:$0xff]  }
  0x65   : > { %3058 = vmatmul.mubr.bf16.gmra.mxu1 %v8612_v9  ;;  %2648 = vmatprep.mubr.bf16.mxu0 %v8613_v10  ;;  %v8666_v9 = vld [vmem:[%s12641_s3 + $0x218] ss:$24 sps:$4 sm:$0xff]   ;;  %v8667_v10 = vld [vmem:[%s12641_s3 + $0x244] ss:$24 sps:$4 sm:$0xff]  }
  0x66   : > { %3065 = vmatprep.mubr.bf16.mxu1 %v8615_v12  ;;  %3435 = vmatpush1.bf16.msra.mxu0 %v563_v15  ;;  %v8671_v12 = vld [vmem:[%s12641_s3 + $0x240] ss:$24 sps:$4 sm:$0xff]  }
  0x67   : > { %5292 = vmatpush1.bf16.msra.mxu1 %v387_v17  ;;  %3436 = vmatprep.subr.bf16.mxu0 %v12644_v0  ;;  %v8672_v15 = vld [vmem:[%s12641_s3 + $0x248] ss:$24 sps:$4 sm:$0xff]   ;;  %v574_v17 = vpack.c.bf16 %v525_v14, %v524_v13 }
  0x68   : > { %5293 = vmatprep.subr.bf16.mxu1 %v12644_v0  ;;  %v8731_v13 = vld [vmem:[%s12641_s3 + $0x420] ss:$24 sps:$4 sm:$0xff]  }
  0x69   : > { %v8732_v14 = vld [vmem:[%s12641_s3 + $0x428] ss:$24 sps:$4 sm:$0xff]  }
  0x6a   : > { %3437 = vmatpush1.bf16.msra.mxu0 %v562_v20 }
  0x6b   : > { %5294 = vmatpush1.bf16.msra.mxu1 %v386_v26  ;;  %3438 = vmatprep.subr.bf16.mxu0 %v12644_v0  ;;  %v8683_v26 = vld [vmem:[%s12641_s3 + $0x2a0] ss:$24 sps:$4 sm:$0xff]  }
  0x6c   : > { %2649 = vmatmul.mubr.bf16.gmra.mxu0 %v8617_v19  ;;  %5295 = vmatprep.subr.bf16.mxu1 %v12644_v0  ;;  %v317_v19 = vld [vmem:[%s9646_s7 + $0xe8] sm:$0xff] }
  0x6d   : > { %3066 = vmatmul.mubr.bf16.gmra.mxu1 %v8618_v24  ;;  %2656 = vmatprep.mubr.bf16.mxu0 %v8619_v25  ;;  %v398_v20 = vpack.c.bf16 %v317_v19, %v316_v18  ;;  %v8679_v24 = vld [vmem:[%s12641_s3 + $0x2a4] ss:$24 sps:$4 sm:$0xff]   ;;  %v8738_v18 = vld [vmem:[%s12641_s3 + $0x458] ss:$24 sps:$4 sm:$0xff]  }
  0x6e   : > { %3073 = vmatprep.mubr.bf16.mxu1 %v8621_v28  ;;  %3439 = vmatpush1.bf16.msra.mxu0 %v561_v29  ;;  %v8681_v25 = vld [vmem:[%s12641_s3 + $0x2ac] ss:$24 sps:$4 sm:$0xff]   ;;  %v8687_v29 = vld [vmem:[%s12641_s3 + $0x2dc] ss:$24 sps:$4 sm:$0xff]  }
  0x6f   : > { %5296 = vmatpush1.bf16.msra.mxu1 %v385_v30  ;;  %3440 = vmatprep.subr.bf16.mxu0 %v12644_v0  ;;  %v8685_v28 = vld [vmem:[%s12641_s3 + $0x2d4] ss:$24 sps:$4 sm:$0xff]   ;;  %v8689_v30 = vld [vmem:[%s12641_s3 + $0x2d0] ss:$24 sps:$4 sm:$0xff]   ;;  %v8739_v19 = vld [vmem:[%s12641_s3 + $0x484] ss:$24 sps:$4 sm:$0xff]  }
  0x70   : > { %5297 = vmatprep.subr.bf16.mxu1 %v12644_v0 }
  0x72   : > { %3441 = vmatpush1.bf16.msra.mxu0 %v560_v43  ;;  %v8699_v43 = vld [vmem:[%s12641_s3 + $0x33c] ss:$24 sps:$4 sm:$0xff]  }
  0x73   : > { %5298 = vmatpush1.bf16.msra.mxu1 %v384_v47  ;;  %3442 = vmatprep.subr.bf16.mxu0 %v12644_v0  ;;  %v8705_v47 = vld [vmem:[%s12641_s3 + $0x36c] ss:$24 sps:$4 sm:$0xff]  }
  0x74   : > { %2657 = vmatmul.mubr.bf16.gmra.mxu0 %v8623_v31  ;;  %5299 = vmatprep.subr.bf16.mxu1 %v12644_v0  ;;  %v522_v31 = vld [vmem:[%s9550_s29 + $0x2d0] sm:$0xff] }
  0x75   : > { %3074 = vmatmul.mubr.bf16.gmra.mxu1 %v8624_v32  ;;  %2664 = vmatprep.mubr.bf16.mxu0 %v8625_v33  ;;  %v523_v32 = vld [vmem:[%s9550_s29 + $0x2d8] sm:$0xff] }
  0x76   : > { %3081 = vmatprep.mubr.bf16.mxu1 %v8627_v34  ;;  %3443 = vmatpush2.bf16.msra.mxu0 %v575_v62  ;;  %v8690_v33 = vld [vmem:[%s12641_s3 + $0x2d8] ss:$24 sps:$4 sm:$0xff]   ;;  %v8691_v34 = vld [vmem:[%s12641_s3 + $0x304] ss:$24 sps:$4 sm:$0xff]  }
  0x77   : > { %5300 = vmatpush2.bf16.msra.mxu1 %v399_v2  ;;  %3444 = vmatprep.subr.bf16.mxu0 %v12644_v0  ;;  %v8719_v62 = vld [vmem:[%s12641_s3 + $0x3c0] ss:$24 sps:$4 sm:$0xff]   ;;  %v8723_v2 = vld [vmem:[%s12641_s3 + $0x3fc] ss:$24 sps:$4 sm:$0xff]  }
  0x78   : > { %5301 = vmatprep.subr.bf16.mxu1 %v12644_v0 }
  0x7a   : > { %3445 = vmatpush2.bf16.msra.mxu0 %v574_v17  ;;  %v8737_v17 = vld [vmem:[%s12641_s3 + $0x450] ss:$24 sps:$4 sm:$0xff]  }
  0x7b   : > { %5302 = vmatpush2.bf16.msra.mxu1 %v398_v20  ;;  %3446 = vmatprep.subr.bf16.mxu0 %v12644_v0  ;;  %v8741_v20 = vld [vmem:[%s12641_s3 + $0x48c] ss:$24 sps:$4 sm:$0xff]  }
  0x7c   : > { %2665 = vmatmul.mubr.bf16.gmra.mxu0 %v8629_v35  ;;  %5303 = vmatprep.subr.bf16.mxu1 %v12644_v0  ;;  %v573_v35 = vpack.c.bf16 %v523_v32, %v522_v31 }
  0x7d   : > { %3082 = vmatmul.mubr.bf16.gmra.mxu1 %v8630_v36  ;;  %2672 = vmatprep.mubr.bf16.mxu0 %v8631_v37  ;;  %v314_v36 = vld [vmem:[%s9646_s7 + $0xd0] sm:$0xff]  ;;  %v315_v37 = vld [vmem:[%s9646_s7 + $0xd8] sm:$0xff] }
  0x7e   : > { %3089 = vmatprep.mubr.bf16.mxu1 %v8633_v38  ;;  %v397_v38 = vpack.c.bf16 %v315_v37, %v314_v36  ;;  %3447 = vmatpush2.bf16.msra.mxu0 %v573_v35  ;;  %v8749_v35 = vld [vmem:[%s12641_s3 + $0x4b0] ss:$24 sps:$4 sm:$0xff]  }
  0x7f   : > { %3448 = vmatprep.subr.bf16.mxu0 %v12644_v0  ;;  %v8750_v37 = vld [vmem:[%s12641_s3 + $0x4b8] ss:$24 sps:$4 sm:$0xff]  }
  0x80   : > { %5304 = vmatpush2.bf16.msra.mxu1 %v397_v38  ;;  %v8751_v38 = vld [vmem:[%s12641_s3 + $0x4e4] ss:$24 sps:$4 sm:$0xff]  }
  0x81   : > { %5305 = vmatprep.subr.bf16.mxu1 %v12644_v0 }
  0x84   : > { %2673 = vmatmul.mubr.bf16.gmra.mxu0 %v8635_v42  ;;  %v8697_v42 = vld [vmem:[%s12641_s3 + $0x334] ss:$24 sps:$4 sm:$0xff]  }
  0x85   : > { %3090 = vmatmul.mubr.bf16.gmra.mxu1 %v8636_v45  ;;  %2680 = vmatprep.mubr.bf16.mxu0 %v8637_v46  ;;  %v8702_v45 = vld [vmem:[%s12641_s3 + $0x338] ss:$24 sps:$4 sm:$0xff]   ;;  %v8703_v46 = vld [vmem:[%s12641_s3 + $0x364] ss:$24 sps:$4 sm:$0xff]  }
  0x86   : > { %3097 = vmatprep.mubr.bf16.mxu1 %v8639_v48  ;;  %v8707_v48 = vld [vmem:[%s12641_s3 + $0x360] ss:$24 sps:$4 sm:$0xff]  }
  0x8c   : > { %2681 = vmatmul.mubr.bf16.gmra.mxu0 %v8641_v49  ;;  %v520_v49 = vld [vmem:[%s9550_s29 + $0x2c0] sm:$0xff] }
  0x8d   : > { %3098 = vmatmul.mubr.bf16.gmra.mxu1 %v8642_v50  ;;  %2688 = vmatprep.mubr.bf16.mxu0 %v8643_v51  ;;  %v521_v50 = vld [vmem:[%s9550_s29 + $0x2c8] sm:$0xff] }
  0x8e   : > { %3105 = vmatprep.mubr.bf16.mxu1 %v8645_v52  ;;  %v8708_v51 = vld [vmem:[%s12641_s3 + $0x368] ss:$24 sps:$4 sm:$0xff]   ;;  %v8709_v52 = vld [vmem:[%s12641_s3 + $0x394] ss:$24 sps:$4 sm:$0xff]  }
  0x94   : > { %2689 = vmatmul.mubr.bf16.gmra.mxu0 %v8647_v53  ;;  %v572_v53 = vpack.c.bf16 %v521_v50, %v520_v49  ;;  %v8755_v49 = vld [vmem:[%s12641_s3 + $0x4e0] ss:$24 sps:$4 sm:$0xff]  }
  0x95   : > { %3106 = vmatmul.mubr.bf16.gmra.mxu1 %v8648_v54  ;;  %2696 = vmatprep.mubr.bf16.mxu0 %v8649_v55  ;;  %v312_v54 = vld [vmem:[%s9646_s7 + $0xc0] sm:$0xff]  ;;  %v313_v55 = vld [vmem:[%s9646_s7 + $0xc8] sm:$0xff] }
  0x96   : > { %3113 = vmatprep.mubr.bf16.mxu1 %v8651_v56  ;;  %v396_v56 = vpack.c.bf16 %v313_v55, %v312_v54  ;;  %3449 = vmatpush2.bf16.msra.mxu0 %v572_v53 }
  0x97   : > { %3450 = vmatprep.subr.bf16.mxu0 %v12644_v0 }
  0x98   : > { %5306 = vmatpush2.bf16.msra.mxu1 %v396_v56 }
  0x99   : > { %5307 = vmatprep.subr.bf16.mxu1 %v12644_v0 }
  0x9c   : > { %2697 = vmatmul.mubr.bf16.gmra.mxu0 %v8653_v57  ;;  %v8711_v57 = vld [vmem:[%s12641_s3 + $0x39c] ss:$24 sps:$4 sm:$0xff]  }
  0x9d   : > { %3114 = vmatmul.mubr.bf16.gmra.mxu1 %v8654_v60  ;;  %2704 = vmatprep.mubr.bf16.mxu0 %v8655_v61  ;;  %v8715_v60 = vld [vmem:[%s12641_s3 + $0x3c4] ss:$24 sps:$4 sm:$0xff]  }
  0x9e   : > { %3121 = vmatprep.mubr.bf16.mxu1 %v8657_v3  ;;  %v8717_v61 = vld [vmem:[%s12641_s3 + $0x3cc] ss:$24 sps:$4 sm:$0xff]   ;;  %v8725_v3 = vld [vmem:[%s12641_s3 + $0x3f0] ss:$24 sps:$4 sm:$0xff]  }
  0xa4   : > { %2705 = vmatmul.mubr.bf16.gmra.mxu0 %v8659_v4  ;;  %v518_v4 = vld [vmem:[%s9550_s29 + $0x2b0] sm:$0xff] }
  0xa5   : > { %3122 = vmatmul.mubr.bf16.gmra.mxu1 %v8660_v5  ;;  %2712 = vmatprep.mubr.bf16.mxu0 %v8661_v6  ;;  %v519_v5 = vld [vmem:[%s9550_s29 + $0x2b8] sm:$0xff] }
  0xa6   : > { %3129 = vmatprep.mubr.bf16.mxu1 %v8663_v7  ;;  %v8726_v6 = vld [vmem:[%s12641_s3 + $0x3f8] ss:$24 sps:$4 sm:$0xff]   ;;  %v8727_v7 = vld [vmem:[%s12641_s3 + $0x424] ss:$24 sps:$4 sm:$0xff]  }
  0xac   : > { %2713 = vmatmul.mubr.bf16.gmra.mxu0 %v8665_v8  ;;  %v571_v8 = vpack.c.bf16 %v519_v5, %v518_v4  ;;  %v8762_v4 = vld [vmem:[%s12641_s3 + $0x518] ss:$24 sps:$4 sm:$0xff]   ;;  %v8765_v5 = vld [vmem:[%s12641_s3 + $0x544] ss:$24 sps:$4 sm:$0xff]  }
  0xad   : > { %3130 = vmatmul.mubr.bf16.gmra.mxu1 %v8666_v9  ;;  %2720 = vmatprep.mubr.bf16.mxu0 %v8667_v10  ;;  %v310_v9 = vld [vmem:[%s9646_s7 + $0xb0] sm:$0xff]  ;;  %v311_v10 = vld [vmem:[%s9646_s7 + $0xb8] sm:$0xff] }
  0xae   : > { %3137 = vmatprep.mubr.bf16.mxu1 %v8669_v11  ;;  %v395_v11 = vpack.c.bf16 %v311_v10, %v310_v9  ;;  %3451 = vmatpush2.bf16.msra.mxu0 %v571_v8  ;;  %v307_v8 = vld [vmem:[%s9646_s7 + $0x98] sm:$0xff] }
  0xaf   : > { %3452 = vmatprep.subr.bf16.mxu0 %v12644_v0 }
  0xb0   : > { %5308 = vmatpush2.bf16.msra.mxu1 %v395_v11 }
  0xb1   : > { %5309 = vmatprep.subr.bf16.mxu1 %v12644_v0 }
  0xb4   : > { %2721 = vmatmul.mubr.bf16.gmra.mxu0 %v8671_v12  ;;  %v8729_v12 = vld [vmem:[%s12641_s3 + $0x42c] ss:$24 sps:$4 sm:$0xff]  }
  0xb5   : > { %3138 = vmatmul.mubr.bf16.gmra.mxu1 %v8672_v15  ;;  %2728 = vmatprep.mubr.bf16.mxu0 %v8673_v16  ;;  %v8733_v15 = vld [vmem:[%s12641_s3 + $0x454] ss:$24 sps:$4 sm:$0xff]  }
  0xb6   : > { %3145 = vmatprep.mubr.bf16.mxu1 %v8675_v21  ;;  %v8735_v16 = vld [vmem:[%s12641_s3 + $0x45c] ss:$24 sps:$4 sm:$0xff]   ;;  %v8743_v21 = vld [vmem:[%s12641_s3 + $0x480] ss:$24 sps:$4 sm:$0xff]  }
  0xbc   : > { %2729 = vmatmul.mubr.bf16.gmra.mxu0 %v8677_v22  ;;  %v516_v22 = vld [vmem:[%s9550_s29 + $0x2a0] sm:$0xff] }
  0xbd   : > { %3146 = vmatmul.mubr.bf16.gmra.mxu1 %v8678_v23  ;;  %2736 = vmatprep.mubr.bf16.mxu0 %v8679_v24  ;;  %v517_v23 = vld [vmem:[%s9550_s29 + $0x2a8] sm:$0xff] }
  0xbe   : > { %3153 = vmatprep.mubr.bf16.mxu1 %v8681_v25  ;;  %v8744_v24 = vld [vmem:[%s12641_s3 + $0x488] ss:$24 sps:$4 sm:$0xff]   ;;  %v8745_v25 = vld [vmem:[%s12641_s3 + $0x4b4] ss:$24 sps:$4 sm:$0xff]  }
  0xc4   : > { %2737 = vmatmul.mubr.bf16.gmra.mxu0 %v8683_v26  ;;  %v570_v26 = vpack.c.bf16 %v517_v23, %v516_v22  ;;  %v8763_v22 = vld [vmem:[%s12641_s3 + $0x540] ss:$24 sps:$4 sm:$0xff]  }
  0xc5   : > { %3154 = vmatmul.mubr.bf16.gmra.mxu1 %v8684_v27  ;;  %2744 = vmatprep.mubr.bf16.mxu0 %v8685_v28  ;;  %v308_v27 = vld [vmem:[%s9646_s7 + $0xa0] sm:$0xff]  ;;  %v309_v28 = vld [vmem:[%s9646_s7 + $0xa8] sm:$0xff] }
  0xc6   : > { %3161 = vmatprep.mubr.bf16.mxu1 %v8687_v29  ;;  %v394_v29 = vpack.c.bf16 %v309_v28, %v308_v27  ;;  %3453 = vmatpush2.bf16.msra.mxu0 %v570_v26  ;;  %v8774_v28 = vld [vmem:[%s12641_s3 + $0x57c] ss:$24 sps:$4 sm:$0xff]  }
  0xc7   : > { %3454 = vmatprep.subr.bf16.mxu0 %v12644_v0 }
  0xc8   : > { %5310 = vmatpush2.bf16.msra.mxu1 %v394_v29 }
  0xc9   : > { %5311 = vmatprep.subr.bf16.mxu1 %v12644_v0 }
  0xcc   : > { %2745 = vmatmul.mubr.bf16.gmra.mxu0 %v8689_v30  ;;  %v8747_v30 = vld [vmem:[%s12641_s3 + $0x4bc] ss:$24 sps:$4 sm:$0xff]  }
  0xcd   : > { %3162 = vmatmul.mubr.bf16.gmra.mxu1 %v8690_v33  ;;  %2752 = vmatprep.mubr.bf16.mxu0 %v8691_v34 }
  0xce   : > { %3169 = vmatprep.mubr.bf16.mxu1 %v8693_v39 }
  0xd4   : > { %2753 = vmatmul.mubr.bf16.gmra.mxu0 %v8695_v40 }
  0xd5   : > { %3170 = vmatmul.mubr.bf16.gmra.mxu1 %v8696_v41  ;;  %2760 = vmatprep.mubr.bf16.mxu0 %v8697_v42 }
  0xd6   : > { %3177 = vmatprep.mubr.bf16.mxu1 %v8699_v43  ;;  %v8753_v43 = vld [vmem:[%s12641_s3 + $0x4ec] ss:$24 sps:$4 sm:$0xff]  }
  0xdc   : > { %2761 = vmatmul.mubr.bf16.gmra.mxu0 %v8701_v44 }
  0xdd   : > { %3178 = vmatmul.mubr.bf16.gmra.mxu1 %v8702_v45  ;;  %2768 = vmatprep.mubr.bf16.mxu0 %v8703_v46 }
  0xde   : > { %3185 = vmatprep.mubr.bf16.mxu1 %v8705_v47 }
  0xe4   : > { %2769 = vmatmul.mubr.bf16.gmra.mxu0 %v8707_v48 }
  0xe5   : > { %3186 = vmatmul.mubr.bf16.gmra.mxu1 %v8708_v51  ;;  %2776 = vmatprep.mubr.bf16.mxu0 %v8709_v52  ;;  %v8756_v51 = vld [vmem:[%s12641_s3 + $0x4e8] ss:$24 sps:$4 sm:$0xff]   ;;  %v8757_v52 = vld [vmem:[%s12641_s3 + $0x514] ss:$24 sps:$4 sm:$0xff]  }
  0xe6   : > { %3193 = vmatprep.mubr.bf16.mxu1 %v8711_v57  ;;  %v8759_v57 = vld [vmem:[%s12641_s3 + $0x51c] ss:$24 sps:$4 sm:$0xff]  }
  0xec   : > { %2777 = vmatmul.mubr.bf16.gmra.mxu0 %v8713_v58 }
  0xed   : > { %3194 = vmatmul.mubr.bf16.gmra.mxu1 %v8714_v59  ;;  %2784 = vmatprep.mubr.bf16.mxu0 %v8715_v60 }
  0xee   : > { %3201 = vmatprep.mubr.bf16.mxu1 %v8717_v61 }
  0xf4   : > { %2785 = vmatmul.mubr.bf16.gmra.mxu0 %v8719_v62 }
  0xf5   : > { %3202 = vmatmul.mubr.bf16.gmra.mxu1 %v8720_v63  ;;  %2792 = vmatprep.mubr.bf16.mxu0 %v8721_v1  ;;  %v8761_v63 = vld [vmem:[%s12641_s3 + $0x510] ss:$24 sps:$4 sm:$0xff]  }
  0xf6   : > { %3209 = vmatprep.mubr.bf16.mxu1 %v8723_v2  ;;  %v514_v1 = vld [vmem:[%s9550_s29 + $0x290] sm:$0xff]  ;;  %v515_v2 = vld [vmem:[%s9550_s29 + $0x298] sm:$0xff] }
  0xfc   : > { %2793 = vmatmul.mubr.bf16.gmra.mxu0 %v8725_v3 }
  0xfd   : > { %3210 = vmatmul.mubr.bf16.gmra.mxu1 %v8726_v6  ;;  %2800 = vmatprep.mubr.bf16.mxu0 %v8727_v7  ;;  %v569_v6 = vpack.c.bf16 %v515_v2, %v514_v1  ;;  %v306_v7 = vld [vmem:[%s9646_s7 + $0x90] sm:$0xff] }
  0xfe   : > { %3217 = vmatprep.mubr.bf16.mxu1 %v8729_v12  ;;  %v393_v10 = vpack.c.bf16 %v307_v8, %v306_v7  ;;  %v8783_v1 = vld [vmem:[%s12641_s3 + $0x5d4] ss:$24 sps:$4 sm:$0xff]  }
  0xff   : > { %3455 = vmatpush2.bf16.msra.mxu0 %v569_v6 }
 0x100   : > { %5312 = vmatpush2.bf16.msra.mxu1 %v393_v10  ;;  %3456 = vmatprep.subr.bf16.mxu0 %v12644_v0 }
 0x101   : > { %5313 = vmatprep.subr.bf16.mxu1 %v12644_v0 }
 0x104   : > { %2801 = vmatmul.mubr.bf16.gmra.mxu0 %v8731_v13 }
 0x105   : > { %3218 = vmatmul.mubr.bf16.gmra.mxu1 %v8732_v14  ;;  %2808 = vmatprep.mubr.bf16.mxu0 %v8733_v15  ;;  %v8768_v14 = vld [vmem:[%s12641_s3 + $0x54c] ss:$24 sps:$4 sm:$0xff]  }
 0x106   : > { %3225 = vmatprep.mubr.bf16.mxu1 %v8735_v16 }
 0x10c   : > { %2809 = vmatmul.mubr.bf16.gmra.mxu0 %v8737_v17 }
 0x10d   : > { %3226 = vmatmul.mubr.bf16.gmra.mxu1 %v8738_v18  ;;  %2816 = vmatprep.mubr.bf16.mxu0 %v8739_v19 }
 0x10e   : > { %3233 = vmatprep.mubr.bf16.mxu1 %v8741_v20 }
 0x114   : > { %v2626_v31 = vpop.f32.mrf.mxu0  ;;  %2817 = vmatmul.mubr.bf16.gmra.mxu0 %v8743_v21 }
 0x115   : > { %v3043_v32 = vpop.f32.mrf.mxu1  ;;  %3234 = vmatmul.mubr.bf16.gmra.mxu1 %v8744_v24  ;;  %2824 = vmatprep.mubr.bf16.mxu0 %v8745_v25  ;;  %v8766_v24 = vld [vmem:[%s12641_s3 + $0x548] ss:$24 sps:$4 sm:$0xff]   ;;  %v8771_v25 = vld [vmem:[%s12641_s3 + $0x574] ss:$24 sps:$4 sm:$0xff]  }
 0x116   : > { %v10039_v33 = vadd.f32 %v3043_v32, %v2626_v31  ;;  %v2628_v34 = vpop.f32.mrf.mxu0  ;;  %3241 = vmatprep.mubr.bf16.mxu1 %v8747_v30 }
 0x117   : > { %v3045_v36 = vpop.f32.mrf.mxu1 }
 0x118   : > { %v2629_v39 = vpop.f32.mrf.mxu0 }
 0x119   : > { %v3046_v40 = vpop.f32.mrf.mxu1 }
 0x11a   : > { %v10050_v41 = vadd.f32 %v3046_v40, %v2629_v39  ;;  %v2631_v42 = vpop.f32.mrf.mxu0  ;;  %v8772_v39 = vld [vmem:[%s12641_s3 + $0x578] ss:$24 sps:$4 sm:$0xff]   ;;  %v8777_v40 = vld [vmem:[%s12641_s3 + $0x5a4] ss:$24 sps:$4 sm:$0xff]  }
 0x11b   : > { %v3048_v44 = vpop.f32.mrf.mxu1 }
 0x11c   : > { %v2634_v45 = vpop.f32.mrf.mxu0  ;;  %2825 = vmatmul.mubr.bf16.gmra.mxu0 %v8749_v35  ;;  %v8780_v44 = vld [vmem:[%s12641_s3 + $0x5ac] ss:$24 sps:$4 sm:$0xff]  }
 0x11d   : > { %v3051_v46 = vpop.f32.mrf.mxu1  ;;  %3242 = vmatmul.mubr.bf16.gmra.mxu1 %v8750_v37  ;;  %2832 = vmatprep.mubr.bf16.mxu0 %v8751_v38  ;;  %v8769_v37 = vld [vmem:[%s12641_s3 + $0x570] ss:$24 sps:$4 sm:$0xff]  }
 0x11e   : > { %v10055_v47 = vadd.f32 %v3051_v46, %v2634_v45  ;;  %v2636_v48 = vpop.f32.mrf.mxu0  ;;  %3249 = vmatprep.mubr.bf16.mxu1 %v8753_v43 }
 0x11f   : > { %v3053_v50 = vpop.f32.mrf.mxu1 }
 0x120   : > { %v2637_v53 = vpop.f32.mrf.mxu0 }
 0x121   : > { %v3054_v54 = vpop.f32.mrf.mxu1 }
 0x122   : > { %v10066_v55 = vadd.f32 %v3054_v54, %v2637_v53  ;;  %v2639_v56 = vpop.f32.mrf.mxu0 }
 0x123   : > { %v3056_v58 = vpop.f32.mrf.mxu1  ;;  %v304_v56 = vld [vmem:[%s9646_s7 + $0x80] sm:$0xff] }
 0x124   : > { %v2642_v59 = vpop.f32.mrf.mxu0  ;;  %2833 = vmatmul.mubr.bf16.gmra.mxu0 %v8755_v49 }
 0x125   : > { %v3059_v60 = vpop.f32.mrf.mxu1  ;;  %3250 = vmatmul.mubr.bf16.gmra.mxu1 %v8756_v51  ;;  %2840 = vmatprep.mubr.bf16.mxu0 %v8757_v52  ;;  %v512_v51 = vld [vmem:[%s9550_s29 + $0x280] sm:$0xff]  ;;  %v513_v52 = vld [vmem:[%s9550_s29 + $0x288] sm:$0xff] }
 0x126   : > { %v10071_v61 = vadd.f32 %v3059_v60, %v2642_v59  ;;  %v2644_v62 = vpop.f32.mrf.mxu0  ;;  %3257 = vmatprep.mubr.bf16.mxu1 %v8759_v57  ;;  %v568_v54 = vpack.c.bf16 %v513_v52, %v512_v51  ;;  %v305_v57 = vld [vmem:[%s9646_s7 + $0x88] sm:$0xff]  ;;  %v8775_v59 = vld [vmem:[%s12641_s3 + $0x5a0] ss:$24 sps:$4 sm:$0xff]   ;;  %v8801_v52 = vld [vmem:[%s12641_s3 + $0x664] ss:$24 sps:$4 sm:$0xff]  }
 0x127   : > { %v3061_v3 = vpop.f32.mrf.mxu1  ;;  %v392_v60 = vpack.c.bf16 %v305_v57, %v304_v56  ;;  %v8796_v51 = vld [vmem:[%s12641_s3 + $0x638] ss:$24 sps:$4 sm:$0xff]   ;;  %v8804_v56 = vld [vmem:[%s12641_s3 + $0x66c] ss:$24 sps:$4 sm:$0xff]  }
 0x128   : > { %v2645_v9 = vpop.f32.mrf.mxu0  ;;  %3457 = vmatpush2.bf16.msra.mxu0 %v568_v54 }
 0x129   : > { %v3062_v11 = vpop.f32.mrf.mxu1  ;;  %5314 = vmatpush2.bf16.msra.mxu1 %v392_v60  ;;  %5700 = vmatprep.subr.bf16.mxu0 %v12644_v0 }
 0x12a   : > { %v10086_v12 = vadd.f32 %v3062_v11, %v2645_v9  ;;  %v2647_v13 = vpop.f32.mrf.mxu0  ;;  %6117 = vmatprep.subr.bf16.mxu1 %v12644_v0  ;;  %v8894_v0 = vld [vmem:[%s12640_s2 + $0x34] ss:$24 sps:$4 sm:$0xff]  }
 0x12b   : > { %v3064_v15 = vpop.f32.mrf.mxu1  ;;  %v8781_v13 = vld [vmem:[%s12641_s3 + $0x5d0] ss:$24 sps:$4 sm:$0xff]  }
 0x12c   : > { %v2650_v16 = vpop.f32.mrf.mxu0  ;;  %2841 = vmatmul.mubr.bf16.gmra.mxu0 %v8761_v63  ;;  %v8778_v63 = vld [vmem:[%s12641_s3 + $0x5a8] ss:$24 sps:$4 sm:$0xff]   ;;  %v8784_v15 = vld [vmem:[%s12641_s3 + $0x5d8] ss:$24 sps:$4 sm:$0xff]  }
 0x12d   : > { %v3067_v17 = vpop.f32.mrf.mxu1  ;;  %3258 = vmatmul.mubr.bf16.gmra.mxu1 %v8762_v4  ;;  %2848 = vmatprep.mubr.bf16.mxu0 %v8765_v5  ;;  %v8786_v4 = vld [vmem:[%s12641_s3 + $0x5dc] ss:$24 sps:$4 sm:$0xff]  }
 0x12e   : > { %v10093_v18 = vadd.f32 %v3067_v17, %v2650_v16  ;;  %v2652_v19 = vpop.f32.mrf.mxu0  ;;  %3265 = vmatprep.mubr.bf16.mxu1 %v8768_v14  ;;  %v8789_v16 = vld [vmem:[%s12641_s3 + $0x604] ss:$24 sps:$4 sm:$0xff]  }
 0x12f   : > { %v3069_v20 = vpop.f32.mrf.mxu1 }
 0x130   : > { %v2653_v21 = vpop.f32.mrf.mxu0  ;;  %v8792_v20 = vld [vmem:[%s12641_s3 + $0x60c] ss:$24 sps:$4 sm:$0xff]  }
 0x131   : > { %v3070_v23 = vpop.f32.mrf.mxu1 }
 0x132   : > { %v10104_v26 = vadd.f32 %v3070_v23, %v2653_v21  ;;  %v2655_v27 = vpop.f32.mrf.mxu0 }
 0x133   : > { %v3072_v29 = vpop.f32.mrf.mxu1 }
 0x134   : > { %v2658_v30 = vpop.f32.mrf.mxu0  ;;  %2849 = vmatmul.mubr.bf16.gmra.mxu0 %v8763_v22  ;;  %v8787_v29 = vld [vmem:[%s12641_s3 + $0x600] ss:$24 sps:$4 sm:$0xff]  }
 0x135   : > { %v3075_v31 = vpop.f32.mrf.mxu1  ;;  %3266 = vmatmul.mubr.bf16.gmra.mxu1 %v8766_v24  ;;  %2856 = vmatprep.mubr.bf16.mxu0 %v8771_v25 }
 0x136   : > { %v10109_v32 = vadd.f32 %v3075_v31, %v2658_v30  ;;  %v2660_v34 = vpop.f32.mrf.mxu0  ;;  %3273 = vmatprep.mubr.bf16.mxu1 %v8774_v28  ;;  %v8790_v31 = vld [vmem:[%s12641_s3 + $0x608] ss:$24 sps:$4 sm:$0xff]  }
 0x137   : > { %v3077_v35 = vpop.f32.mrf.mxu1  ;;  %v8795_v34 = vld [vmem:[%s12641_s3 + $0x634] ss:$24 sps:$4 sm:$0xff]  }
 0x138   : > { %v2661_v36 = vpop.f32.mrf.mxu0 }
 0x139   : > { %v3078_v38 = vpop.f32.mrf.mxu1 }
 0x13a   : > { %v10120_v42 = vadd.f32 %v3078_v38, %v2661_v36  ;;  %v2663_v43 = vpop.f32.mrf.mxu0 }
 0x13b   : > { %v3080_v45 = vpop.f32.mrf.mxu1 }
 0x13c   : > { %v2666_v46 = vpop.f32.mrf.mxu0  ;;  %2857 = vmatmul.mubr.bf16.gmra.mxu0 %v8769_v37  ;;  %v8798_v37 = vld [vmem:[%s12641_s3 + $0x63c] ss:$24 sps:$4 sm:$0xff]  }
 0x13d   : > { %v3083_v48 = vpop.f32.mrf.mxu1  ;;  %3274 = vmatmul.mubr.bf16.gmra.mxu1 %v8772_v39  ;;  %2864 = vmatprep.mubr.bf16.mxu0 %v8777_v40 }
 0x13e   : > { %v10125_v49 = vadd.f32 %v3083_v48, %v2666_v46  ;;  %v2668_v50 = vpop.f32.mrf.mxu0  ;;  %3281 = vmatprep.mubr.bf16.mxu1 %v8780_v44  ;;  %v8793_v48 = vld [vmem:[%s12641_s3 + $0x630] ss:$24 sps:$4 sm:$0xff]  }
 0x13f   : > { %v3085_v53 = vpop.f32.mrf.mxu1 }
 0x140   : > { %v2669_v58 = vpop.f32.mrf.mxu0 }
 0x141   : > { %v3086_v62 = vpop.f32.mrf.mxu1 }
 0x142   : > { %v10140_v2 = vadd.f32 %v3086_v62, %v2669_v58  ;;  %v2671_v3 = vpop.f32.mrf.mxu0 }
 0x143   : > { %v3088_v5 = vpop.f32.mrf.mxu1  ;;  %v8799_v3 = vld [vmem:[%s12641_s3 + $0x660] ss:$24 sps:$4 sm:$0xff]  }
 0x144   : > { %v2674_v6 = vpop.f32.mrf.mxu0  ;;  %2865 = vmatmul.mubr.bf16.gmra.mxu0 %v8775_v59  ;;  %v8802_v5 = vld [vmem:[%s12641_s3 + $0x668] ss:$24 sps:$4 sm:$0xff]  }
 0x145   : > { %v3091_v7 = vpop.f32.mrf.mxu1  ;;  %3282 = vmatmul.mubr.bf16.gmra.mxu1 %v8778_v63  ;;  %2872 = vmatprep.mubr.bf16.mxu0 %v8783_v1 }
 0x146   : > { %v10147_v8 = vadd.f32 %v3091_v7, %v2674_v6  ;;  %v2676_v9 = vpop.f32.mrf.mxu0  ;;  %3289 = vmatprep.mubr.bf16.mxu1 %v8786_v4  ;;  %v8807_v6 = vld [vmem:[%s12641_s3 + $0x694] ss:$24 sps:$4 sm:$0xff]  }
 0x147   : > { %v3093_v10 = vpop.f32.mrf.mxu1 }
 0x148   : > { %v2677_v11 = vpop.f32.mrf.mxu0  ;;  %v8810_v10 = vld [vmem:[%s12641_s3 + $0x69c] ss:$24 sps:$4 sm:$0xff]  }
 0x149   : > { %v3094_v14 = vpop.f32.mrf.mxu1 }
 0x14a   : > { %v10158_v17 = vadd.f32 %v3094_v14, %v2677_v11  ;;  %v2679_v19 = vpop.f32.mrf.mxu0 }
 0x14b   : > { %v3096_v21 = vpop.f32.mrf.mxu1 }
 0x14c   : > { %v2682_v22 = vpop.f32.mrf.mxu0  ;;  %2873 = vmatmul.mubr.bf16.gmra.mxu0 %v8781_v13  ;;  %v8805_v21 = vld [vmem:[%s12641_s3 + $0x690] ss:$24 sps:$4 sm:$0xff]  }
 0x14d   : > { %v3099_v23 = vpop.f32.mrf.mxu1  ;;  %3290 = vmatmul.mubr.bf16.gmra.mxu1 %v8784_v15  ;;  %2880 = vmatprep.mubr.bf16.mxu0 %v8789_v16 }
 0x14e   : > { %v10163_v24 = vadd.f32 %v3099_v23, %v2682_v22  ;;  %v2684_v25 = vpop.f32.mrf.mxu0  ;;  %3297 = vmatprep.mubr.bf16.mxu1 %v8792_v20  ;;  %v8808_v23 = vld [vmem:[%s12641_s3 + $0x698] ss:$24 sps:$4 sm:$0xff]  }
 0x14f   : > { %v3101_v27 = vpop.f32.mrf.mxu1  ;;  %v8813_v25 = vld [vmem:[%s12641_s3 + $0x6c4] ss:$24 sps:$4 sm:$0xff]  }
 0x150   : > { %v2685_v28 = vpop.f32.mrf.mxu0 }
 0x151   : > { %v3102_v30 = vpop.f32.mrf.mxu1 }
 0x152   : > { %v10174_v35 = vadd.f32 %v3102_v30, %v2685_v28  ;;  %v2687_v36 = vpop.f32.mrf.mxu0 }
 0x153   : > { %v3104_v38 = vpop.f32.mrf.mxu1 }
 0x154   : > { %v2690_v39 = vpop.f32.mrf.mxu0  ;;  %2881 = vmatmul.mubr.bf16.gmra.mxu0 %v8787_v29  ;;  %v8816_v29 = vld [vmem:[%s12641_s3 + $0x6cc] ss:$24 sps:$4 sm:$0xff]  }
 0x155   : > { %v3107_v40 = vpop.f32.mrf.mxu1  ;;  %3298 = vmatmul.mubr.bf16.gmra.mxu1 %v8790_v31  ;;  %2888 = vmatprep.mubr.bf16.mxu0 %v8795_v34 }
 0x156   : > { %v10179_v43 = vadd.f32 %v3107_v40, %v2690_v39  ;;  %v2692_v44 = vpop.f32.mrf.mxu0  ;;  %3305 = vmatprep.mubr.bf16.mxu1 %v8798_v37  ;;  %v8811_v40 = vld [vmem:[%s12641_s3 + $0x6c0] ss:$24 sps:$4 sm:$0xff]  }
 0x157   : > { %v3109_v45 = vpop.f32.mrf.mxu1 }
 0x158   : > { %v2693_v46 = vpop.f32.mrf.mxu0  ;;  %v8814_v45 = vld [vmem:[%s12641_s3 + $0x6c8] ss:$24 sps:$4 sm:$0xff]  }
 0x159   : > { %v3110_v50 = vpop.f32.mrf.mxu1 }
 0x15a   : > { %v10190_v53 = vadd.f32 %v3110_v50, %v2693_v46  ;;  %v2695_v54 = vpop.f32.mrf.mxu0  ;;  %v8819_v46 = vld [vmem:[%s12641_s3 + $0x6f4] ss:$24 sps:$4 sm:$0xff]  }
 0x15b   : > { %v3112_v57 = vpop.f32.mrf.mxu1 }
 0x15c   : > { %v2698_v58 = vpop.f32.mrf.mxu0  ;;  %2889 = vmatmul.mubr.bf16.gmra.mxu0 %v8793_v48 }
 0x15d   : > { %v3115_v59 = vpop.f32.mrf.mxu1  ;;  %3306 = vmatmul.mubr.bf16.gmra.mxu1 %v8796_v51  ;;  %2896 = vmatprep.mubr.bf16.mxu0 %v8801_v52  ;;  %v8822_v51 = vld [vmem:[%s12641_s3 + $0x6fc] ss:$24 sps:$4 sm:$0xff]  }
 0x15e   : > { %v10195_v60 = vadd.f32 %v3115_v59, %v2698_v58  ;;  %v2700_v62 = vpop.f32.mrf.mxu0  ;;  %3313 = vmatprep.mubr.bf16.mxu1 %v8804_v56 }
 0x15f   : > { %v3117_v63 = vpop.f32.mrf.mxu1 }
 0x160   : > { %v2701_v1 = vpop.f32.mrf.mxu0  ;;  %v8817_v63 = vld [vmem:[%s12641_s3 + $0x6f0] ss:$24 sps:$4 sm:$0xff]  }
 0x161   : > { %v3118_v4 = vpop.f32.mrf.mxu1 }
 0x162   : > { %v10206_v7 = vadd.f32 %v3118_v4, %v2701_v1  ;;  %v2703_v9 = vpop.f32.mrf.mxu0  ;;  %v8825_v4 = vld [vmem:[%s12641_s3 + $0x724] ss:$24 sps:$4 sm:$0xff]  }
 0x163   : > { %v3120_v11 = vpop.f32.mrf.mxu1  ;;  %v8828_v9 = vld [vmem:[%s12641_s3 + $0x72c] ss:$24 sps:$4 sm:$0xff]  }
 0x164   : > { %v2706_v13 = vpop.f32.mrf.mxu0  ;;  %2897 = vmatmul.mubr.bf16.gmra.mxu0 %v8799_v3  ;;  %v8820_v3 = vld [vmem:[%s12641_s3 + $0x6f8] ss:$24 sps:$4 sm:$0xff]  }
 0x165   : > { %v3123_v14 = vpop.f32.mrf.mxu1  ;;  %3314 = vmatmul.mubr.bf16.gmra.mxu1 %v8802_v5  ;;  %2904 = vmatprep.mubr.bf16.mxu0 %v8807_v6 }
 0x166   : > { %v10211_v15 = vadd.f32 %v3123_v14, %v2706_v13  ;;  %v2708_v16 = vpop.f32.mrf.mxu0  ;;  %3321 = vmatprep.mubr.bf16.mxu1 %v8810_v10 }
 0x167   : > { %v3125_v19 = vpop.f32.mrf.mxu1 }
 0x168   : > { %v2709_v20 = vpop.f32.mrf.mxu0 }
 0x169   : > { %v3126_v22 = vpop.f32.mrf.mxu1 }
 0x16a   : > { %v10222_v27 = vadd.f32 %v3126_v22, %v2709_v20  ;;  %v2711_v28 = vpop.f32.mrf.mxu0 }
 0x16b   : > { %v3128_v30 = vpop.f32.mrf.mxu1 }
 0x16c   : > { %v2714_v31 = vpop.f32.mrf.mxu0  ;;  %2905 = vmatmul.mubr.bf16.gmra.mxu0 %v8805_v21  ;;  %v8823_v21 = vld [vmem:[%s12641_s3 + $0x720] ss:$24 sps:$4 sm:$0xff]   ;;  %v8834_v30 = vld [vmem:[%s12641_s3 + $0x75c] ss:$24 sps:$4 sm:$0xff]  }
 0x16d   : > { %v3131_v34 = vpop.f32.mrf.mxu1  ;;  %3322 = vmatmul.mubr.bf16.gmra.mxu1 %v8808_v23  ;;  %2912 = vmatprep.mubr.bf16.mxu0 %v8813_v25  ;;  %v8826_v23 = vld [vmem:[%s12641_s3 + $0x728] ss:$24 sps:$4 sm:$0xff]   ;;  %v8831_v25 = vld [vmem:[%s12641_s3 + $0x754] ss:$24 sps:$4 sm:$0xff]  }
 0x16e   : > { %v10227_v36 = vadd.f32 %v3131_v34, %v2714_v31  ;;  %v2716_v37 = vpop.f32.mrf.mxu0  ;;  %3329 = vmatprep.mubr.bf16.mxu1 %v8816_v29 }
 0x16f   : > { %v3133_v38 = vpop.f32.mrf.mxu1 }
 0x170   : > { %v2717_v39 = vpop.f32.mrf.mxu0 }
 0x171   : > { %v3134_v44 = vpop.f32.mrf.mxu1 }
 0x172   : > { %v10238_v48 = vadd.f32 %v3134_v44, %v2717_v39  ;;  %v2719_v50 = vpop.f32.mrf.mxu0 }
 0x173   : > { %v3136_v52 = vpop.f32.mrf.mxu1  ;;  %v8832_v50 = vld [vmem:[%s12641_s3 + $0x758] ss:$24 sps:$4 sm:$0xff]  }
 0x174   : > { %v2722_v54 = vpop.f32.mrf.mxu0  ;;  %2913 = vmatmul.mubr.bf16.gmra.mxu0 %v8811_v40 }
 0x175   : > { %v3139_v56 = vpop.f32.mrf.mxu1  ;;  %3330 = vmatmul.mubr.bf16.gmra.mxu1 %v8814_v45  ;;  %2920 = vmatprep.mubr.bf16.mxu0 %v8819_v46  ;;  %v8829_v45 = vld [vmem:[%s12641_s3 + $0x750] ss:$24 sps:$4 sm:$0xff]  }
 0x176   : > { %v10243_v57 = vadd.f32 %v3139_v56, %v2722_v54  ;;  %v2724_v58 = vpop.f32.mrf.mxu0  ;;  %3337 = vmatprep.mubr.bf16.mxu1 %v8822_v51  ;;  %v8837_v51 = vld [vmem:[%s12641_s3 + $0x784] ss:$24 sps:$4 sm:$0xff]  }
 0x177   : > { %v3141_v59 = vpop.f32.mrf.mxu1  ;;  %v8840_v56 = vld [vmem:[%s12641_s3 + $0x78c] ss:$24 sps:$4 sm:$0xff]  }
 0x178   : > { %v2725_v62 = vpop.f32.mrf.mxu0 }
 0x179   : > { %v3142_v1 = vpop.f32.mrf.mxu1 }
 0x17a   : > { %v10254_v5 = vadd.f32 %v3142_v1, %v2725_v62  ;;  %v2727_v6 = vpop.f32.mrf.mxu0 }
 0x17b   : > { %v3144_v10 = vpop.f32.mrf.mxu1  ;;  %v8835_v6 = vld [vmem:[%s12641_s3 + $0x780] ss:$24 sps:$4 sm:$0xff]  }
 0x17c   : > { %v2730_v11 = vpop.f32.mrf.mxu0  ;;  %2921 = vmatmul.mubr.bf16.gmra.mxu0 %v8817_v63  ;;  %v8838_v10 = vld [vmem:[%s12641_s3 + $0x788] ss:$24 sps:$4 sm:$0xff]  }
 0x17d   : > { %v3147_v13 = vpop.f32.mrf.mxu1  ;;  %3338 = vmatmul.mubr.bf16.gmra.mxu1 %v8820_v3  ;;  %2928 = vmatprep.mubr.bf16.mxu0 %v8825_v4 }
 0x17e   : > { %v10259_v14 = vadd.f32 %v3147_v13, %v2730_v11  ;;  %v2732_v16 = vpop.f32.mrf.mxu0  ;;  %3345 = vmatprep.mubr.bf16.mxu1 %v8828_v9  ;;  %v8843_v11 = vld [vmem:[%s12641_s3 + $0x7b4] ss:$24 sps:$4 sm:$0xff]  }
 0x17f   : > { %v3149_v19 = vpop.f32.mrf.mxu1 }
 0x180   : > { %v2733_v20 = vpop.f32.mrf.mxu0  ;;  %v8846_v19 = vld [vmem:[%s12641_s3 + $0x7bc] ss:$24 sps:$4 sm:$0xff]  }
 0x181   : > { %v3150_v22 = vpop.f32.mrf.mxu1 }
 0x182   : > { %v10270_v28 = vadd.f32 %v3150_v22, %v2733_v20  ;;  %v2735_v29 = vpop.f32.mrf.mxu0 }
 0x183   : > { %v3152_v31 = vpop.f32.mrf.mxu1 }
 0x184   : > { %v2738_v34 = vpop.f32.mrf.mxu0  ;;  %2929 = vmatmul.mubr.bf16.gmra.mxu0 %v8823_v21  ;;  %v8841_v31 = vld [vmem:[%s12641_s3 + $0x7b0] ss:$24 sps:$4 sm:$0xff]  }
 0x185   : > { %v3155_v37 = vpop.f32.mrf.mxu1  ;;  %3346 = vmatmul.mubr.bf16.gmra.mxu1 %v8826_v23  ;;  %2936 = vmatprep.mubr.bf16.mxu0 %v8831_v25 }
 0x186   : > { %v10275_v38 = vadd.f32 %v3155_v37, %v2738_v34  ;;  %v2740_v39 = vpop.f32.mrf.mxu0  ;;  %3353 = vmatprep.mubr.bf16.mxu1 %v8834_v30  ;;  %v8844_v37 = vld [vmem:[%s12641_s3 + $0x7b8] ss:$24 sps:$4 sm:$0xff]  }
 0x187   : > { %v3157_v40 = vpop.f32.mrf.mxu1  ;;  %v8849_v39 = vld [vmem:[%s12641_s3 + $0x7e4] ss:$24 sps:$4 sm:$0xff]  }
 0x188   : > { %v2741_v44 = vpop.f32.mrf.mxu0 }
 0x189   : > { %v3158_v46 = vpop.f32.mrf.mxu1 }
 0x18a   : > { %v10286_v52 = vadd.f32 %v3158_v46, %v2741_v44  ;;  %v2743_v54 = vpop.f32.mrf.mxu0 }
 0x18b   : > { %v3160_v58 = vpop.f32.mrf.mxu1 }
 0x18c   : > { %v2746_v59 = vpop.f32.mrf.mxu0  ;;  %2937 = vmatmul.mubr.bf16.gmra.mxu0 %v8829_v45  ;;  %v8852_v45 = vld [vmem:[%s12641_s3 + $0x7ec] ss:$24 sps:$4 sm:$0xff]  }
 0x18d   : > { %v3163_v62 = vpop.f32.mrf.mxu1  ;;  %3354 = vmatmul.mubr.bf16.gmra.mxu1 %v8832_v50  ;;  %2944 = vmatprep.mubr.bf16.mxu0 %v8837_v51 }
 0x18e   : > { %v10291_v63 = vadd.f32 %v3163_v62, %v2746_v59  ;;  %v2748_v1 = vpop.f32.mrf.mxu0  ;;  %3361 = vmatprep.mubr.bf16.mxu1 %v8840_v56  ;;  %v8847_v62 = vld [vmem:[%s12641_s3 + $0x7e0] ss:$24 sps:$4 sm:$0xff]  }
 0x18f   : > { %v3165_v3 = vpop.f32.mrf.mxu1 }
 0x190   : > { %v2749_v4 = vpop.f32.mrf.mxu0  ;;  %v8850_v3 = vld [vmem:[%s12641_s3 + $0x7e8] ss:$24 sps:$4 sm:$0xff]  }
 0x191   : > { %v3166_v9 = vpop.f32.mrf.mxu1 }
 0x192   : > { %v10302_v13 = vadd.f32 %v3166_v9, %v2749_v4  ;;  %v2751_v16 = vpop.f32.mrf.mxu0  ;;  %v8855_v4 = vld [vmem:[%s12641_s3 + $0x814] ss:$24 sps:$4 sm:$0xff]  }
 0x193   : > { %v3168_v20 = vpop.f32.mrf.mxu1 }
 0x194   : > { %v2754_v21 = vpop.f32.mrf.mxu0  ;;  %2945 = vmatmul.mubr.bf16.gmra.mxu0 %v8835_v6 }
 0x195   : > { %v3171_v22 = vpop.f32.mrf.mxu1  ;;  %3362 = vmatmul.mubr.bf16.gmra.mxu1 %v8838_v10  ;;  %2952 = vmatprep.mubr.bf16.mxu0 %v8843_v11  ;;  %v8858_v10 = vld [vmem:[%s12641_s3 + $0x81c] ss:$24 sps:$4 sm:$0xff]  }
 0x196   : > { %v10307_v23 = vadd.f32 %v3171_v22, %v2754_v21  ;;  %v2756_v25 = vpop.f32.mrf.mxu0  ;;  %3369 = vmatprep.mubr.bf16.mxu1 %v8846_v19 }
 0x197   : > { %v3173_v29 = vpop.f32.mrf.mxu1 }
 0x198   : > { %v2757_v30 = vpop.f32.mrf.mxu0  ;;  %v8853_v29 = vld [vmem:[%s12641_s3 + $0x810] ss:$24 sps:$4 sm:$0xff]  }
 0x199   : > { %v3174_v34 = vpop.f32.mrf.mxu1 }
 0x19a   : > { %v10318_v40 = vadd.f32 %v3174_v34, %v2757_v30  ;;  %v2759_v44 = vpop.f32.mrf.mxu0  ;;  %v8861_v34 = vld [vmem:[%s12641_s3 + $0x844] ss:$24 sps:$4 sm:$0xff]  }
 0x19b   : > { %v3176_v46 = vpop.f32.mrf.mxu1  ;;  %v8864_v44 = vld [vmem:[%s12641_s3 + $0x84c] ss:$24 sps:$4 sm:$0xff]  }
 0x19c   : > { %v2762_v50 = vpop.f32.mrf.mxu0  ;;  %2953 = vmatmul.mubr.bf16.gmra.mxu0 %v8841_v31  ;;  %v8856_v31 = vld [vmem:[%s12641_s3 + $0x818] ss:$24 sps:$4 sm:$0xff]  }
 0x19d   : > { %v3179_v51 = vpop.f32.mrf.mxu1  ;;  %3370 = vmatmul.mubr.bf16.gmra.mxu1 %v8844_v37  ;;  %2960 = vmatprep.mubr.bf16.mxu0 %v8849_v39 }
 0x19e   : > { %v10323_v54 = vadd.f32 %v3179_v51, %v2762_v50  ;;  %v2764_v56 = vpop.f32.mrf.mxu0  ;;  %3377 = vmatprep.mubr.bf16.mxu1 %v8852_v45 }
 0x19f   : > { %v3181_v58 = vpop.f32.mrf.mxu1 }
 0x1a0   : > { %v2765_v59 = vpop.f32.mrf.mxu0 }
 0x1a1   : > { %v3182_v1 = vpop.f32.mrf.mxu1 }
 0x1a2   : > { %v10334_v6 = vadd.f32 %v3182_v1, %v2765_v59  ;;  %v2767_v9 = vpop.f32.mrf.mxu0 }
 0x1a3   : > { %v3184_v11 = vpop.f32.mrf.mxu1 }
 0x1a4   : > { %v2770_v16 = vpop.f32.mrf.mxu0  ;;  %2961 = vmatmul.mubr.bf16.gmra.mxu0 %v8847_v62  ;;  %v8859_v62 = vld [vmem:[%s12641_s3 + $0x840] ss:$24 sps:$4 sm:$0xff]   ;;  %v8870_v11 = vld [vmem:[%s12641_s3 + $0x87c] ss:$24 sps:$4 sm:$0xff]  }
 0x1a5   : > { %v3187_v19 = vpop.f32.mrf.mxu1  ;;  %3378 = vmatmul.mubr.bf16.gmra.mxu1 %v8850_v3  ;;  %2968 = vmatprep.mubr.bf16.mxu0 %v8855_v4  ;;  %v8862_v3 = vld [vmem:[%s12641_s3 + $0x848] ss:$24 sps:$4 sm:$0xff]   ;;  %v8867_v4 = vld [vmem:[%s12641_s3 + $0x874] ss:$24 sps:$4 sm:$0xff]  }
 0x1a6   : > { %v10339_v20 = vadd.f32 %v3187_v19, %v2770_v16  ;;  %v2772_v21 = vpop.f32.mrf.mxu0  ;;  %3385 = vmatprep.mubr.bf16.mxu1 %v8858_v10 }
 0x1a7   : > { %v3189_v22 = vpop.f32.mrf.mxu1 }
 0x1a8   : > { %v2773_v25 = vpop.f32.mrf.mxu0 }
 0x1a9   : > { %v3190_v30 = vpop.f32.mrf.mxu1 }
 0x1aa   : > { %v10350_v37 = vadd.f32 %v3190_v30, %v2773_v25  ;;  %v2775_v39 = vpop.f32.mrf.mxu0 }
 0x1ab   : > { %v3192_v45 = vpop.f32.mrf.mxu1  ;;  %v8868_v39 = vld [vmem:[%s12641_s3 + $0x878] ss:$24 sps:$4 sm:$0xff]  }
 0x1ac   : > { %v2778_v46 = vpop.f32.mrf.mxu0  ;;  %2969 = vmatmul.mubr.bf16.gmra.mxu0 %v8853_v29 }
 0x1ad   : > { %v3195_v50 = vpop.f32.mrf.mxu1  ;;  %3386 = vmatmul.mubr.bf16.gmra.mxu1 %v8856_v31  ;;  %2976 = vmatprep.mubr.bf16.mxu0 %v8861_v34  ;;  %v8865_v31 = vld [vmem:[%s12641_s3 + $0x870] ss:$24 sps:$4 sm:$0xff]  }
 0x1ae   : > { %v10355_v51 = vadd.f32 %v3195_v50, %v2778_v46  ;;  %v2780_v56 = vpop.f32.mrf.mxu0  ;;  %3393 = vmatprep.mubr.bf16.mxu1 %v8864_v44  ;;  %v8873_v44 = vld [vmem:[%s12641_s3 + $0x8a4] ss:$24 sps:$4 sm:$0xff]  }
 0x1af   : > { %v3197_v58 = vpop.f32.mrf.mxu1  ;;  %v8876_v50 = vld [vmem:[%s12641_s3 + $0x8ac] ss:$24 sps:$4 sm:$0xff]  }
 0x1b0   : > { %v2781_v59 = vpop.f32.mrf.mxu0 }
 0x1b1   : > { %v3198_v1 = vpop.f32.mrf.mxu1 }
 0x1b2   : > { %v10366_v9 = vadd.f32 %v3198_v1, %v2781_v59  ;;  %v2783_v10 = vpop.f32.mrf.mxu0 }
 0x1b3   : > { %v3200_v16 = vpop.f32.mrf.mxu1  ;;  %v8871_v10 = vld [vmem:[%s12641_s3 + $0x8a0] ss:$24 sps:$4 sm:$0xff]  }
 0x1b4   : > { %v2786_v19 = vpop.f32.mrf.mxu0  ;;  %2977 = vmatmul.mubr.bf16.gmra.mxu0 %v8859_v62  ;;  %v8874_v16 = vld [vmem:[%s12641_s3 + $0x8a8] ss:$24 sps:$4 sm:$0xff]  }
 0x1b5   : > { %v3203_v21 = vpop.f32.mrf.mxu1  ;;  %3394 = vmatmul.mubr.bf16.gmra.mxu1 %v8862_v3  ;;  %2984 = vmatprep.mubr.bf16.mxu0 %v8867_v4 }
 0x1b6   : > { %v10371_v22 = vadd.f32 %v3203_v21, %v2786_v19  ;;  %v2788_v25 = vpop.f32.mrf.mxu0  ;;  %3401 = vmatprep.mubr.bf16.mxu1 %v8870_v11  ;;  %v8879_v19 = vld [vmem:[%s12641_s3 + $0x8d4] ss:$24 sps:$4 sm:$0xff]  }
 0x1b7   : > { %v3205_v29 = vpop.f32.mrf.mxu1 }
 0x1b8   : > { %v2789_v30 = vpop.f32.mrf.mxu0  ;;  %v8882_v29 = vld [vmem:[%s12641_s3 + $0x8dc] ss:$24 sps:$4 sm:$0xff]  }
 0x1b9   : > { %v3206_v34 = vpop.f32.mrf.mxu1 }
 0x1ba   : > { %v10382_v45 = vadd.f32 %v3206_v34, %v2789_v30  ;;  %v2791_v46 = vpop.f32.mrf.mxu0 }
 0x1bb   : > { %v3208_v56 = vpop.f32.mrf.mxu1 }
 0x1bc   : > { %v2794_v58 = vpop.f32.mrf.mxu0  ;;  %2985 = vmatmul.mubr.bf16.gmra.mxu0 %v8865_v31  ;;  %v8877_v56 = vld [vmem:[%s12641_s3 + $0x8d0] ss:$24 sps:$4 sm:$0xff]  }
 0x1bd   : > { %v3211_v59 = vpop.f32.mrf.mxu1  ;;  %3402 = vmatmul.mubr.bf16.gmra.mxu1 %v8868_v39  ;;  %2992 = vmatprep.mubr.bf16.mxu0 %v8873_v44 }
 0x1be   : > { %v10387_v62 = vadd.f32 %v3211_v59, %v2794_v58  ;;  %v2796_v1 = vpop.f32.mrf.mxu0  ;;  %3409 = vmatprep.mubr.bf16.mxu1 %v8876_v50  ;;  %v8880_v59 = vld [vmem:[%s12641_s3 + $0x8d8] ss:$24 sps:$4 sm:$0xff]  }
 0x1bf   : > { %v3213_v3 = vpop.f32.mrf.mxu1  ;;  %v8885_v1 = vld [vmem:[%s12641_s3 + $0x14] ss:$24 sps:$4 sm:$0xff]  }
 0x1c0   : > { %v2797_v4 = vpop.f32.mrf.mxu0 }
 0x1c1   : > { %v3214_v11 = vpop.f32.mrf.mxu1 }
 0x1c2   : > { %v10398_v21 = vadd.f32 %v3214_v11, %v2797_v4  ;;  %v2799_v25 = vpop.f32.mrf.mxu0 }
 0x1c3   : > { %v3216_v30 = vpop.f32.mrf.mxu1 }
 0x1c4   : > { %12646 = vst [vmem:[#allocation2_spill] sm:$0xff] %v10398_v21  ;;  %v2802_v31 = vpop.f32.mrf.mxu0  ;;  %2993 = vmatmul.mubr.bf16.gmra.mxu0 %v8871_v10  ;;  %v8888_v10 = vld [vmem:[%s12640_s2 + $0x4] ss:$24 sps:$4 sm:$0xff]   ;;  %v334_v30 = vld [vmem:[%s9646_s7 + $0x170] sm:$0xff] }
 0x1c5   : > { %v3219_v34 = vpop.f32.mrf.mxu1  ;;  %3410 = vmatmul.mubr.bf16.gmra.mxu1 %v8874_v16  ;;  %3000 = vmatprep.mubr.bf16.mxu0 %v8879_v19 }
 0x1c6   : > { %v10403_v39 = vadd.f32 %v3219_v34, %v2802_v31  ;;  %v2804_v44 = vpop.f32.mrf.mxu0  ;;  %3417 = vmatprep.mubr.bf16.mxu1 %v8882_v29  ;;  %v335_v31 = vld [vmem:[%s9646_s7 + $0x178] sm:$0xff] }
 0x1c7   : > { %v3221_v46 = vpop.f32.mrf.mxu1  ;;  %v366_v44 = vld [vmem:[%s9646_s7 + $0x270] sm:$0xff] }
 0x1c8   : > { %12647 = vst [vmem:[#allocation3_spill] sm:$0xff] %v10403_v39  ;;  %v2805_v50 = vpop.f32.mrf.mxu0  ;;  %v367_v46 = vld [vmem:[%s9646_s7 + $0x278] sm:$0xff] }
 0x1c9   : > { %v3222_v58 = vpop.f32.mrf.mxu1  ;;  %v331_v39 = vld [vmem:[%s9646_s7 + $0x158] sm:$0xff] }
 0x1ca   : > { %v10414_v3 = vadd.f32 %v3222_v58, %v2805_v50  ;;  %v2807_v4 = vpop.f32.mrf.mxu0 }
 0x1cb   : > { %v3224_v11 = vpop.f32.mrf.mxu1 }
 0x1cc   : > { %12648 = vst [vmem:[#allocation4_spill] sm:$0xff] %v10414_v3  ;;  %v2810_v16 = vpop.f32.mrf.mxu0  ;;  %3001 = vmatmul.mubr.bf16.gmra.mxu0 %v8877_v56  ;;  %v8883_v56 = vld [vmem:[%s12641_s3 + $0x10] ss:$24 sps:$4 sm:$0xff]   ;;  %v423_v11 = vpack.c.bf16 %v367_v46, %v366_v44 }
 0x1cd   : > { %v3227_v19 = vpop.f32.mrf.mxu1  ;;  %3418 = vmatmul.mubr.bf16.gmra.mxu1 %v8880_v59  ;;  %3458 = vmatprep.mubr.bf16.mxu0 %v8885_v1  ;;  %v8886_v59 = vld [vmem:[%s12640_s2] ss:$24 sps:$4 sm:$0xff]   ;;  %v407_v1 = vpack.c.bf16 %v335_v31, %v334_v30  ;;  %v365_v3 = vld [vmem:[%s9646_s7 + $0x268] sm:$0xff] }
 0x1ce   : > { %v10419_v25 = vadd.f32 %v3227_v19, %v2810_v16  ;;  %v2812_v29 = vpop.f32.mrf.mxu0  ;;  %5315 = vmatprep.mubr.bf16.mxu1 %v8888_v10  ;;  %v8891_v16 = vld [vmem:[%s12641_s3 + $0x44] ss:$24 sps:$4 sm:$0xff]  }
 0x1cf   : > { %v3229_v34 = vpop.f32.mrf.mxu1  ;;  %v332_v19 = vld [vmem:[%s9646_s7 + $0x160] sm:$0xff]  ;;  %v333_v29 = vld [vmem:[%s9646_s7 + $0x168] sm:$0xff] }
 0x1d0   : > { %12649 = vst [vmem:[#allocation5_spill] sm:$0xff] %v10419_v25  ;;  %v2813_v50 = vpop.f32.mrf.mxu0  ;;  %v364_v25 = vld [vmem:[%s9646_s7 + $0x260] sm:$0xff]  ;;  %v406_v44 = vpack.c.bf16 %v333_v29, %v332_v19 }
 0x1d1   : > { %v3230_v58 = vpop.f32.mrf.mxu1  ;;  %v8900_v19 = vld [vmem:[%s12640_s2 + $0x64] ss:$24 sps:$4 sm:$0xff]  }
 0x1d2   : > { %v10431_v4 = vadd.f32 %v3230_v58, %v2813_v50  ;;  %v2815_v10 = vpop.f32.mrf.mxu0  ;;  %v422_v58 = vpack.c.bf16 %v365_v3, %v364_v25  ;;  %v8897_v3 = vld [vmem:[%s12641_s3 + $0x74] ss:$24 sps:$4 sm:$0xff]  }
 0x1d3   : > { %v3232_v34 = vpop.f32.mrf.mxu1 }
 0x1d4   : > { %12650 = vst [vmem:[#allocation6_spill] sm:$0xff] %v10431_v4  ;;  %v2818_v30 = vpop.f32.mrf.mxu0  ;;  %3459 = vmatmul.mubr.bf16.vlgmr.msra.gmra.mxu0 %v8883_v56  ;;  %v12652_v34 = vmov 0   ;;  %v330_v4 = vld [vmem:[%s9646_s7 + $0x150] sm:$0xff]  ;;  %v8889_v56 = vld [vmem:[%s12641_s3 + $0x40] ss:$24 sps:$4 sm:$0xff]  }
 0x1d5   : > { %v3235_v31 = vpop.f32.mrf.mxu1  ;;  %5316 = vmatmul.mubr.bf16.vlgmr.msra.gmra.mxu1 %v8886_v59  ;;  %5701 = vmatpush1.bf16.msra.mxu0 %v407_v1  ;;  %v362_v59 = vld [vmem:[%s9646_s7 + $0x250] sm:$0xff]  ;;  %v363_v1 = vld [vmem:[%s9646_s7 + $0x258] sm:$0xff]  ;;  %v405_v29 = vpack.c.bf16 %v331_v39, %v330_v4 }
 0x1d6   : > { %v10443_v46 = vadd.f32 %v3235_v31, %v2818_v30  ;;  %v2820_v50 = vpop.f32.mrf.mxu0  ;;  %6118 = vmatpush1.bf16.msra.mxu1 %v423_v11  ;;  %3466 = vmatprep.mubr.bf16.mxu0 %v8891_v16  ;;  %v421_v31 = vpack.c.bf16 %v363_v1, %v362_v59 }
 0x1d7   : > { %v3237_v10 = vpop.f32.mrf.mxu1  ;;  %5323 = vmatprep.mubr.bf16.mxu1 %v8894_v0  ;;  %5702 = vmatprep.subr.bf16.mxu0 %v12652_v34  ;;  %v8892_v0 = vld [vmem:[%s12640_s2 + $0x30] ss:$24 sps:$4 sm:$0xff]   ;;  %v328_v50 = vld [vmem:[%s9646_s7 + $0x140] sm:$0xff] }
 0x1d8   : > { %12651 = vst [vmem:[#allocation7_spill] sm:$0xff] %v10443_v46  ;;  %v2821_v21 = vpop.f32.mrf.mxu0  ;;  %6119 = vmatprep.subr.bf16.mxu1 %v12652_v34  ;;  %v329_v10 = vld [vmem:[%s9646_s7 + $0x148] sm:$0xff] }
 0x1d9   : > { %v3238_v11 = vpop.f32.mrf.mxu1  ;;  %5703 = vmatpush1.bf16.msra.mxu0 %v406_v44  ;;  %v361_v44 = vld [vmem:[%s9646_s7 + $0x248] sm:$0xff]  ;;  %v404_v4 = vpack.c.bf16 %v329_v10, %v328_v50 }
 0x1da   : > { %v10460_v25 = vadd.f32 %v3238_v11, %v2821_v21  ;;  %v2823_v16 = vpop.f32.mrf.mxu0  ;;  %6120 = vmatpush1.bf16.msra.mxu1 %v422_v58  ;;  %5704 = vmatprep.subr.bf16.mxu0 %v12652_v34  ;;  %v360_v21 = vld [vmem:[%s9646_s7 + $0x240] sm:$0xff] }
 0x1db   : > { %v3240_v30 = vpop.f32.mrf.mxu1  ;;  %6121 = vmatprep.subr.bf16.mxu1 %v12652_v34  ;;  %v420_v1 = vpack.c.bf16 %v361_v44, %v360_v21  ;;  %v327_v16 = vld [vmem:[%s9646_s7 + $0x138] sm:$0xff]  ;;  %v8906_v21 = vld [vmem:[%s12640_s2 + $0x94] ss:$24 sps:$4 sm:$0xff]  }
 0x1dc   : > { %12653 = vst [vmem:[#allocation8_spill] sm:$0xff] %v10460_v25  ;;  %v2826_v46 = vpop.f32.mrf.mxu0  ;;  %3467 = vmatmul.mubr.bf16.gmra.mxu0 %v8889_v56  ;;  %v326_v56 = vld [vmem:[%s9646_s7 + $0x130] sm:$0xff] }
 0x1dd   : > { %v3243_v11 = vpop.f32.mrf.mxu1  ;;  %5324 = vmatmul.mubr.bf16.gmra.mxu1 %v8892_v0  ;;  %3474 = vmatprep.mubr.bf16.mxu0 %v8897_v3  ;;  %v8895_v0 = vld [vmem:[%s12641_s3 + $0x70] ss:$24 sps:$4 sm:$0xff]   ;;  %v359_v3 = vld [vmem:[%s9646_s7 + $0x238] sm:$0xff]  ;;  %v403_v44 = vpack.c.bf16 %v327_v16, %v326_v56 }
 0x1de   : > { %v10471_v58 = vadd.f32 %v3243_v11, %v2826_v46  ;;  %v2828_v39 = vpop.f32.mrf.mxu0  ;;  %5331 = vmatprep.mubr.bf16.mxu1 %v8900_v19  ;;  %5705 = vmatpush1.bf16.msra.mxu0 %v405_v29  ;;  %v358_v46 = vld [vmem:[%s9646_s7 + $0x230] sm:$0xff]  ;;  %v8898_v29 = vld [vmem:[%s12640_s2 + $0x60] ss:$24 sps:$4 sm:$0xff]  }
 0x1df   : > { %v3245_v59 = vpop.f32.mrf.mxu1  ;;  %6122 = vmatpush1.bf16.msra.mxu1 %v421_v31  ;;  %5706 = vmatprep.subr.bf16.mxu0 %v12652_v34  ;;  %v8903_v31 = vld [vmem:[%s12641_s3 + $0xa4] ss:$24 sps:$4 sm:$0xff]   ;;  %v419_v39 = vpack.c.bf16 %v359_v3, %v358_v46  ;;  %v322_v46 = vld [vmem:[%s9646_s7 + $0x110] sm:$0xff] }
 0x1e0   : > { %12654 = vst [vmem:[#allocation9_spill] sm:$0xff] %v10471_v58  ;;  %v2829_v30 = vpop.f32.mrf.mxu0  ;;  %6123 = vmatprep.subr.bf16.mxu1 %v12652_v34  ;;  %v324_v59 = vld [vmem:[%s9646_s7 + $0x120] sm:$0xff]  ;;  %v325_v58 = vld [vmem:[%s9646_s7 + $0x128] sm:$0xff]  ;;  %v323_v3 = vld [vmem:[%s9646_s7 + $0x118] sm:$0xff] }
 0x1e1   : > { %v3246_v19 = vpop.f32.mrf.mxu1  ;;  %v402_v56 = vpack.c.bf16 %v325_v58, %v324_v59  ;;  %v8904_v58 = vld [vmem:[%s12640_s2 + $0x90] ss:$24 sps:$4 sm:$0xff]   ;;  %v8912_v59 = vld [vmem:[%s12640_s2 + $0xc4] ss:$24 sps:$4 sm:$0xff]  }
 0x1e2   : > { %v10488_v50 = vadd.f32 %v3246_v19, %v2829_v30  ;;  %v2831_v10 = vpop.f32.mrf.mxu0  ;;  %5707 = vmatpush1.bf16.msra.mxu0 %v404_v4  ;;  %v356_v30 = vld [vmem:[%s9646_s7 + $0x220] sm:$0xff]  ;;  %v357_v19 = vld [vmem:[%s9646_s7 + $0x228] sm:$0xff] }
 0x1e3   : > { %v3248_v11 = vpop.f32.mrf.mxu1  ;;  %6124 = vmatpush1.bf16.msra.mxu1 %v420_v1  ;;  %5708 = vmatprep.subr.bf16.mxu0 %v12652_v34 }
 0x1e4   : > { %v2834_v25 = vpop.f32.mrf.mxu0  ;;  %3475 = vmatmul.mubr.bf16.gmra.mxu0 %v8895_v0  ;;  %6125 = vmatprep.subr.bf16.mxu1 %v12652_v34  ;;  %v418_v0 = vpack.c.bf16 %v357_v19, %v356_v30  ;;  %v401_v30 = vpack.c.bf16 %v323_v3, %v322_v46  ;;  %v8915_v3 = vld [vmem:[%s12641_s3 + $0x104] ss:$24 sps:$4 sm:$0xff]  }
 0x1e5   : > { %v3251_v10 = vpop.f32.mrf.mxu1  ;;  %5332 = vmatmul.mubr.bf16.gmra.mxu1 %v8898_v29  ;;  %3482 = vmatprep.mubr.bf16.mxu0 %v8903_v31  ;;  %v8901_v29 = vld [vmem:[%s12641_s3 + $0xa0] ss:$24 sps:$4 sm:$0xff]  }
 0x1e6   : > { %v10499_v4 = vadd.f32 %v3251_v10, %v2834_v25  ;;  %v2836_v1 = vpop.f32.mrf.mxu0  ;;  %5339 = vmatprep.mubr.bf16.mxu1 %v8906_v21  ;;  %5709 = vmatpush1.bf16.msra.mxu0 %v403_v44  ;;  %v354_v25 = vld [vmem:[%s9646_s7 + $0x210] sm:$0xff]  ;;  %v355_v31 = vld [vmem:[%s9646_s7 + $0x218] sm:$0xff] }
 0x1e7   : > { %v3253_v16 = vpop.f32.mrf.mxu1  ;;  %6126 = vmatpush1.bf16.msra.mxu1 %v419_v39  ;;  %5710 = vmatprep.subr.bf16.mxu0 %v12652_v34  ;;  %v8909_v21 = vld [vmem:[%s12641_s3 + $0xd4] ss:$24 sps:$4 sm:$0xff]   ;;  %v417_v1 = vpack.c.bf16 %v355_v31, %v354_v25 }
 0x1e8   : > { %12655 = vst [vmem:[#allocation10_spill] sm:$0xff] %v10499_v4  ;;  %v2837_v11 = vpop.f32.mrf.mxu0  ;;  %6127 = vmatprep.subr.bf16.mxu1 %v12652_v34  ;;  %v8918_v31 = vld [vmem:[%s12640_s2 + $0xf4] ss:$24 sps:$4 sm:$0xff]  }
 0x1e9   : > { %v3254_v10 = vpop.f32.mrf.mxu1 }
 0x1ea   : > { %v10516_v44 = vadd.f32 %v3254_v10, %v2837_v11  ;;  %v2839_v39 = vpop.f32.mrf.mxu0  ;;  %5711 = vmatpush1.bf16.msra.mxu0 %v402_v56 }
 0x1eb   : > { %v3256_v19 = vpop.f32.mrf.mxu1  ;;  %6128 = vmatpush1.bf16.msra.mxu1 %v418_v0  ;;  %5712 = vmatprep.subr.bf16.mxu0 %v12652_v34  ;;  %v8907_v0 = vld [vmem:[%s12641_s3 + $0xd0] ss:$24 sps:$4 sm:$0xff]  }
 0x1ec   : > { %v2842_v16 = vpop.f32.mrf.mxu0  ;;  %3483 = vmatmul.mubr.bf16.gmra.mxu0 %v8901_v29  ;;  %6129 = vmatprep.subr.bf16.mxu1 %v12652_v34 }
 0x1ed   : > { %v3259_v4 = vpop.f32.mrf.mxu1  ;;  %5340 = vmatmul.mubr.bf16.gmra.mxu1 %v8904_v58  ;;  %3490 = vmatprep.mubr.bf16.mxu0 %v8909_v21 }
 0x1ee   : > { %v10523_v11 = vadd.f32 %v3259_v4, %v2842_v16  ;;  %v2844_v10 = vpop.f32.mrf.mxu0  ;;  %5347 = vmatprep.mubr.bf16.mxu1 %v8912_v59  ;;  %5713 = vmatpush1.bf16.msra.mxu0 %v401_v30  ;;  %v8910_v4 = vld [vmem:[%s12640_s2 + $0xc0] ss:$24 sps:$4 sm:$0xff]  }
 0x1ef   : > { %v3261_v39 = vpop.f32.mrf.mxu1  ;;  %6130 = vmatpush1.bf16.msra.mxu1 %v417_v1  ;;  %5714 = vmatprep.subr.bf16.mxu0 %v12652_v34  ;;  %v8913_v10 = vld [vmem:[%s12641_s3 + $0x100] ss:$24 sps:$4 sm:$0xff]  }
 0x1f0   : > { %v2845_v56 = vpop.f32.mrf.mxu0  ;;  %6131 = vmatprep.subr.bf16.mxu1 %v12652_v34 }
 0x1f1   : > { %v3262_v46 = vpop.f32.mrf.mxu1 }
 0x1f2   : > { %v10536_v29 = vadd.f32 %v3262_v46, %v2845_v56  ;;  %v2847_v25 = vpop.f32.mrf.mxu0  ;;  %v8916_v56 = vld [vmem:[%s12640_s2 + $0xf0] ss:$24 sps:$4 sm:$0xff]  }
 0x1f3   : > { %v3264_v58 = vpop.f32.mrf.mxu1 }
 0x1f4   : > { %12656 = vst [vmem:[#allocation11_spill] sm:$0xff] %v10536_v29  ;;  %v2850_v21 = vpop.f32.mrf.mxu0  ;;  %3491 = vmatmul.mubr.bf16.gmra.mxu0 %v8907_v0  ;;  %v8921_v0 = vld [vmem:[%s12641_s3 + $0x134] ss:$24 sps:$4 sm:$0xff]  }
 0x1f5   : > { %v3267_v59 = vpop.f32.mrf.mxu1  ;;  %5348 = vmatmul.mubr.bf16.gmra.mxu1 %v8910_v4  ;;  %3498 = vmatprep.mubr.bf16.mxu0 %v8915_v3  ;;  %v8924_v3 = vld [vmem:[%s12640_s2 + $0x124] ss:$24 sps:$4 sm:$0xff]  }
 0x1f6   : > { %v10541_v30 = vadd.f32 %v3267_v59, %v2850_v21  ;;  %v2852_v19 = vpop.f32.mrf.mxu0  ;;  %5355 = vmatprep.mubr.bf16.mxu1 %v8918_v31 }
 0x1f7   : > { %v3269_v1 = vpop.f32.mrf.mxu1  ;;  %v320_v19 = vld [vmem:[%s9646_s7 + $0x100] sm:$0xff] }
 0x1f8   : > { %12657 = vst [vmem:[#allocation12_spill] sm:$0xff] %v10541_v30  ;;  %v2853_v16 = vpop.f32.mrf.mxu0  ;;  %v321_v1 = vld [vmem:[%s9646_s7 + $0x108] sm:$0xff] }
 0x1f9   : > { %v3270_v39 = vpop.f32.mrf.mxu1 }
 0x1fa   : > { %v10552_v46 = vadd.f32 %v3270_v39, %v2853_v16  ;;  %v2855_v4 = vpop.f32.mrf.mxu0  ;;  %v400_v39 = vpack.c.bf16 %v321_v1, %v320_v19 }
 0x1fb   : > { %v3272_v25 = vpop.f32.mrf.mxu1  ;;  %v352_v4 = vld [vmem:[%s9646_s7 + $0x200] sm:$0xff] }
 0x1fc   : > { %12658 = vst [vmem:[#allocation13_spill] sm:$0xff] %v10552_v46  ;;  %v2858_v31 = vpop.f32.mrf.mxu0  ;;  %3499 = vmatmul.mubr.bf16.gmra.mxu0 %v8913_v10  ;;  %v353_v46 = vld [vmem:[%s9646_s7 + $0x208] sm:$0xff] }
 0x1fd   : > { %v3275_v58 = vpop.f32.mrf.mxu1  ;;  %5356 = vmatmul.mubr.bf16.gmra.mxu1 %v8916_v56  ;;  %3506 = vmatprep.mubr.bf16.mxu0 %v8921_v0  ;;  %v8919_v25 = vld [vmem:[%s12641_s3 + $0x130] ss:$24 sps:$4 sm:$0xff]   ;;  %v416_v29 = vpack.c.bf16 %v353_v46, %v352_v4  ;;  %v8922_v56 = vld [vmem:[%s12640_s2 + $0x120] ss:$24 sps:$4 sm:$0xff]   ;;  %v8927_v0 = vld [vmem:[%s12641_s3 + $0x164] ss:$24 sps:$4 sm:$0xff]  }
 0x1fe   : > { %v10557_v21 = vadd.f32 %v3275_v58, %v2858_v31  ;;  %v2860_v59 = vpop.f32.mrf.mxu0  ;;  %5363 = vmatprep.mubr.bf16.mxu1 %v8924_v3  ;;  %5715 = vmatpush1.bf16.msra.mxu0 %v400_v39  ;;  %v8930_v58 = vld [vmem:[%s12640_s2 + $0x154] ss:$24 sps:$4 sm:$0xff]  }
 0x1ff   : > { %v3277_v16 = vpop.f32.mrf.mxu1  ;;  %6132 = vmatpush1.bf16.msra.mxu1 %v416_v29  ;;  %5716 = vmatprep.subr.bf16.mxu0 %v12652_v34  ;;  %v8925_v29 = vld [vmem:[%s12641_s3 + $0x160] ss:$24 sps:$4 sm:$0xff]  }
 0x200   : > { %12659 = vst [vmem:[#allocation14_spill] sm:$0xff] %v10557_v21  ;;  %v2861_v30 = vpop.f32.mrf.mxu0  ;;  %6133 = vmatprep.subr.bf16.mxu1 %v12652_v34 }
 0x201   : > { %v3278_v10 = vpop.f32.mrf.mxu1 }
 0x202   : > { %v10572_v3 = vadd.f32 %v3278_v10, %v2861_v30  ;;  %v2863_v31 = vpop.f32.mrf.mxu0  ;;  %v8928_v10 = vld [vmem:[%s12640_s2 + $0x150] ss:$24 sps:$4 sm:$0xff]  }
 0x203   : > { %v3280_v46 = vpop.f32.mrf.mxu1  ;;  %v8936_v31 = vld [vmem:[%s12640_s2 + $0x184] ss:$24 sps:$4 sm:$0xff]  }
 0x204   : > { %12660 = vst [vmem:[#allocation15_spill] sm:$0xff] %v10572_v3  ;;  %v2866_v59 = vpop.f32.mrf.mxu0  ;;  %3507 = vmatmul.mubr.bf16.gmra.mxu0 %v8919_v25  ;;  %v8933_v25 = vld [vmem:[%s12641_s3 + $0x194] ss:$24 sps:$4 sm:$0xff]   ;;  %v383_v3 = vld [vmem:[%s9646_s7 + $0x2f8] sm:$0xff] }
 0x205   : > { %v3283_v19 = vpop.f32.mrf.mxu1  ;;  %5364 = vmatmul.mubr.bf16.gmra.mxu1 %v8922_v56  ;;  %3514 = vmatprep.mubr.bf16.mxu0 %v8927_v0 }
 0x206   : > { %v10579_v1 = vadd.f32 %v3283_v19, %v2866_v59  ;;  %v2868_v30 = vpop.f32.mrf.mxu0  ;;  %5371 = vmatprep.mubr.bf16.mxu1 %v8930_v58 }
 0x207   : > { %v3285_v16 = vpop.f32.mrf.mxu1 }
 0x208   : > { %12661 = vst [vmem:[#allocation16_spill] sm:$0xff] %v10579_v1  ;;  %v2869_v39 = vpop.f32.mrf.mxu0 }
 0x209   : > { %v3286_v4 = vpop.f32.mrf.mxu1 }
 0x20a   : > { %v10590_v56 = vadd.f32 %v3286_v4, %v2869_v39  ;;  %v2871_v0 = vpop.f32.mrf.mxu0  ;;  %v8931_v39 = vld [vmem:[%s12641_s3 + $0x190] ss:$24 sps:$4 sm:$0xff]  }
 0x20b   : > { %v3288_v58 = vpop.f32.mrf.mxu1  ;;  %v8934_v0 = vld [vmem:[%s12640_s2 + $0x180] ss:$24 sps:$4 sm:$0xff]  }
 0x20c   : > { %12662 = vst [vmem:[#allocation17_spill] sm:$0xff] %v10590_v56  ;;  %v2874_v46 = vpop.f32.mrf.mxu0  ;;  %3515 = vmatmul.mubr.bf16.gmra.mxu0 %v8925_v29  ;;  %v8939_v29 = vld [vmem:[%s12641_s3 + $0x1c4] ss:$24 sps:$4 sm:$0xff]   ;;  %v350_v56 = vld [vmem:[%s9646_s7 + $0x1f0] sm:$0xff] }
 0x20d   : > { %v3291_v59 = vpop.f32.mrf.mxu1  ;;  %5372 = vmatmul.mubr.bf16.gmra.mxu1 %v8928_v10  ;;  %3522 = vmatprep.mubr.bf16.mxu0 %v8933_v25 }
 0x20e   : > { %v10595_v19 = vadd.f32 %v3291_v59, %v2874_v46  ;;  %v2876_v30 = vpop.f32.mrf.mxu0  ;;  %5379 = vmatprep.mubr.bf16.mxu1 %v8936_v31  ;;  %v8942_v31 = vld [vmem:[%s12640_s2 + $0x1b4] ss:$24 sps:$4 sm:$0xff]  }
 0x20f   : > { %v3293_v16 = vpop.f32.mrf.mxu1 }
 0x210   : > { %12663 = vst [vmem:[#allocation18_spill] sm:$0xff] %v10595_v19  ;;  %v2877_v1 = vpop.f32.mrf.mxu0 }
 0x211   : > { %v3294_v4 = vpop.f32.mrf.mxu1 }
 0x212   : > { %v10606_v10 = vadd.f32 %v3294_v4, %v2877_v1  ;;  %v2879_v25 = vpop.f32.mrf.mxu0  ;;  %v351_v1 = vld [vmem:[%s9646_s7 + $0x1f8] sm:$0xff]  ;;  %v382_v4 = vld [vmem:[%s9646_s7 + $0x2f0] sm:$0xff] }
 0x213   : > { %v3296_v58 = vpop.f32.mrf.mxu1 }
 0x214   : > { %12664 = vst [vmem:[#allocation19_spill] sm:$0xff] %v10606_v10  ;;  %v2882_v46 = vpop.f32.mrf.mxu0  ;;  %3523 = vmatmul.mubr.bf16.gmra.mxu0 %v8931_v39  ;;  %v8937_v10 = vld [vmem:[%s12641_s3 + $0x1c0] ss:$24 sps:$4 sm:$0xff]   ;;  %v415_v58 = vpack.c.bf16 %v351_v1, %v350_v56  ;;  %v8940_v39 = vld [vmem:[%s12640_s2 + $0x1b0] ss:$24 sps:$4 sm:$0xff]  }
 0x215   : > { %v3299_v59 = vpop.f32.mrf.mxu1  ;;  %5380 = vmatmul.mubr.bf16.gmra.mxu1 %v8934_v0  ;;  %3530 = vmatprep.mubr.bf16.mxu0 %v8939_v29  ;;  %v8945_v0 = vld [vmem:[%s12641_s3 + $0x1f4] ss:$24 sps:$4 sm:$0xff]  }
 0x216   : > { %v10611_v30 = vadd.f32 %v3299_v59, %v2882_v46  ;;  %v2884_v16 = vpop.f32.mrf.mxu0  ;;  %5387 = vmatprep.mubr.bf16.mxu1 %v8942_v31  ;;  %v8948_v46 = vld [vmem:[%s12640_s2 + $0x1e4] ss:$24 sps:$4 sm:$0xff]   ;;  %5717 = vmatpush2.bf16.msra.mxu0 %v415_v58 }
 0x217   : > { %v3301_v19 = vpop.f32.mrf.mxu1  ;;  %5718 = vmatprep.subr.bf16.mxu0 %v12652_v34 }
 0x218   : > { %12665 = vst [vmem:[#allocation20_spill] sm:$0xff] %v10611_v30  ;;  %v2885_v25 = vpop.f32.mrf.mxu0  ;;  %v431_v19 = vpack.c.bf16 %v383_v3, %v382_v4 }
 0x219   : > { %v3302_v21 = vpop.f32.mrf.mxu1 }
 0x21a   : > { %v10626_v29 = vadd.f32 %v3302_v21, %v2885_v25  ;;  %v2887_v31 = vpop.f32.mrf.mxu0  ;;  %6134 = vmatpush2.bf16.msra.mxu1 %v431_v19  ;;  %v8943_v25 = vld [vmem:[%s12641_s3 + $0x1f0] ss:$24 sps:$4 sm:$0xff]  }
 0x21b   : > { %v3304_v56 = vpop.f32.mrf.mxu1  ;;  %6135 = vmatprep.subr.bf16.mxu1 %v12652_v34  ;;  %v8954_v31 = vld [vmem:[%s12640_s2 + $0x214] ss:$24 sps:$4 sm:$0xff]  }
 0x21c   : > { %12666 = vst [vmem:[#allocation21_spill] sm:$0xff] %v10626_v29  ;;  %v2890_v59 = vpop.f32.mrf.mxu0  ;;  %3531 = vmatmul.mubr.bf16.gmra.mxu0 %v8937_v10  ;;  %v8946_v10 = vld [vmem:[%s12640_s2 + $0x1e0] ss:$24 sps:$4 sm:$0xff]   ;;  %v381_v29 = vld [vmem:[%s9646_s7 + $0x2e8] sm:$0xff] }
 0x21d   : > { %v3307_v16 = vpop.f32.mrf.mxu1  ;;  %5388 = vmatmul.mubr.bf16.gmra.mxu1 %v8940_v39  ;;  %3538 = vmatprep.mubr.bf16.mxu0 %v8945_v0  ;;  %v8951_v39 = vld [vmem:[%s12641_s3 + $0x224] ss:$24 sps:$4 sm:$0xff]  }
 0x21e   : > { %v10633_v3 = vadd.f32 %v3307_v16, %v2890_v59  ;;  %v2892_v21 = vpop.f32.mrf.mxu0  ;;  %5395 = vmatprep.mubr.bf16.mxu1 %v8948_v46 }
 0x21f   : > { %v3309_v1 = vpop.f32.mrf.mxu1 }
 0x220   : > { %12667 = vst [vmem:[#allocation22_spill] sm:$0xff] %v10633_v3  ;;  %v2893_v4 = vpop.f32.mrf.mxu0 }
 0x221   : > { %v3310_v58 = vpop.f32.mrf.mxu1 }
 0x222   : > { %v10644_v0 = vadd.f32 %v3310_v58, %v2893_v4  ;;  %v2895_v19 = vpop.f32.mrf.mxu0  ;;  %v8949_v4 = vld [vmem:[%s12641_s3 + $0x220] ss:$24 sps:$4 sm:$0xff]  }
 0x223   : > { %v3312_v46 = vpop.f32.mrf.mxu1  ;;  %v8952_v19 = vld [vmem:[%s12640_s2 + $0x210] ss:$24 sps:$4 sm:$0xff]  }
 0x224   : > { %12668 = vst [vmem:[#allocation23_spill] sm:$0xff] %v10644_v0  ;;  %v2898_v56 = vpop.f32.mrf.mxu0  ;;  %3539 = vmatmul.mubr.bf16.gmra.mxu0 %v8943_v25  ;;  %v8957_v25 = vld [vmem:[%s12641_s3 + $0x254] ss:$24 sps:$4 sm:$0xff]   ;;  %v348_v0 = vld [vmem:[%s9646_s7 + $0x1e0] sm:$0xff] }
 0x225   : > { %v3315_v59 = vpop.f32.mrf.mxu1  ;;  %5396 = vmatmul.mubr.bf16.gmra.mxu1 %v8946_v10  ;;  %3546 = vmatprep.mubr.bf16.mxu0 %v8951_v39 }
 0x226   : > { %v10649_v16 = vadd.f32 %v3315_v59, %v2898_v56  ;;  %v2900_v21 = vpop.f32.mrf.mxu0  ;;  %5403 = vmatprep.mubr.bf16.mxu1 %v8954_v31  ;;  %v8960_v31 = vld [vmem:[%s12640_s2 + $0x244] ss:$24 sps:$4 sm:$0xff]  }
 0x227   : > { %v3317_v1 = vpop.f32.mrf.mxu1 }
 0x228   : > { %12669 = vst [vmem:[#allocation24_spill] sm:$0xff] %v10649_v16  ;;  %v2901_v3 = vpop.f32.mrf.mxu0 }
 0x229   : > { %v3318_v58 = vpop.f32.mrf.mxu1 }
 0x22a   : > { %v10660_v10 = vadd.f32 %v3318_v58, %v2901_v3  ;;  %v2903_v39 = vpop.f32.mrf.mxu0  ;;  %v349_v3 = vld [vmem:[%s9646_s7 + $0x1e8] sm:$0xff]  ;;  %v380_v58 = vld [vmem:[%s9646_s7 + $0x2e0] sm:$0xff] }
 0x22b   : > { %v3320_v46 = vpop.f32.mrf.mxu1 }
 0x22c   : > { %12670 = vst [vmem:[#allocation25_spill] sm:$0xff] %v10660_v10  ;;  %v2906_v56 = vpop.f32.mrf.mxu0  ;;  %3547 = vmatmul.mubr.bf16.gmra.mxu0 %v8949_v4  ;;  %v8955_v10 = vld [vmem:[%s12641_s3 + $0x250] ss:$24 sps:$4 sm:$0xff]   ;;  %v414_v46 = vpack.c.bf16 %v349_v3, %v348_v0  ;;  %v8958_v4 = vld [vmem:[%s12640_s2 + $0x240] ss:$24 sps:$4 sm:$0xff]  }
 0x22d   : > { %v3323_v59 = vpop.f32.mrf.mxu1  ;;  %5404 = vmatmul.mubr.bf16.gmra.mxu1 %v8952_v19  ;;  %3554 = vmatprep.mubr.bf16.mxu0 %v8957_v25  ;;  %v8963_v19 = vld [vmem:[%s12641_s3 + $0x284] ss:$24 sps:$4 sm:$0xff]  }
 0x22e   : > { %v10665_v21 = vadd.f32 %v3323_v59, %v2906_v56  ;;  %v2908_v1 = vpop.f32.mrf.mxu0  ;;  %5411 = vmatprep.mubr.bf16.mxu1 %v8960_v31  ;;  %v8966_v56 = vld [vmem:[%s12640_s2 + $0x274] ss:$24 sps:$4 sm:$0xff]   ;;  %5719 = vmatpush2.bf16.msra.mxu0 %v414_v46 }
 0x22f   : > { %v3325_v16 = vpop.f32.mrf.mxu1  ;;  %5720 = vmatprep.subr.bf16.mxu0 %v12652_v34 }
 0x230   : > { %12671 = vst [vmem:[#allocation26_spill] sm:$0xff] %v10665_v21  ;;  %v2909_v39 = vpop.f32.mrf.mxu0  ;;  %v430_v16 = vpack.c.bf16 %v381_v29, %v380_v58 }
 0x231   : > { %v3326_v30 = vpop.f32.mrf.mxu1 }
 0x232   : > { %v10680_v25 = vadd.f32 %v3326_v30, %v2909_v39  ;;  %v2911_v31 = vpop.f32.mrf.mxu0  ;;  %6136 = vmatpush2.bf16.msra.mxu1 %v430_v16  ;;  %v8961_v39 = vld [vmem:[%s12641_s3 + $0x280] ss:$24 sps:$4 sm:$0xff]  }
 0x233   : > { %v3328_v0 = vpop.f32.mrf.mxu1  ;;  %6137 = vmatprep.subr.bf16.mxu1 %v12652_v34  ;;  %v8972_v31 = vld [vmem:[%s12640_s2 + $0x2a4] ss:$24 sps:$4 sm:$0xff]  }
 0x234   : > { %12672 = vst [vmem:[#allocation27_spill] sm:$0xff] %v10680_v25  ;;  %v2914_v59 = vpop.f32.mrf.mxu0  ;;  %3555 = vmatmul.mubr.bf16.gmra.mxu0 %v8955_v10  ;;  %v8964_v10 = vld [vmem:[%s12640_s2 + $0x270] ss:$24 sps:$4 sm:$0xff]   ;;  %v379_v25 = vld [vmem:[%s9646_s7 + $0x2d8] sm:$0xff] }
 0x235   : > { %v3331_v1 = vpop.f32.mrf.mxu1  ;;  %5412 = vmatmul.mubr.bf16.gmra.mxu1 %v8958_v4  ;;  %3562 = vmatprep.mubr.bf16.mxu0 %v8963_v19  ;;  %v8969_v4 = vld [vmem:[%s12641_s3 + $0x2b4] ss:$24 sps:$4 sm:$0xff]  }
 0x236   : > { %v10687_v29 = vadd.f32 %v3331_v1, %v2914_v59  ;;  %v2916_v30 = vpop.f32.mrf.mxu0  ;;  %5419 = vmatprep.mubr.bf16.mxu1 %v8966_v56 }
 0x237   : > { %v3333_v3 = vpop.f32.mrf.mxu1 }
 0x238   : > { %12673 = vst [vmem:[#allocation28_spill] sm:$0xff] %v10687_v29  ;;  %v2917_v58 = vpop.f32.mrf.mxu0 }
 0x239   : > { %v3334_v46 = vpop.f32.mrf.mxu1 }
 0x23a   : > { %v10698_v19 = vadd.f32 %v3334_v46, %v2917_v58  ;;  %v2919_v16 = vpop.f32.mrf.mxu0  ;;  %v8967_v58 = vld [vmem:[%s12641_s3 + $0x2b0] ss:$24 sps:$4 sm:$0xff]  }
 0x23b   : > { %v3336_v56 = vpop.f32.mrf.mxu1  ;;  %v8970_v16 = vld [vmem:[%s12640_s2 + $0x2a0] ss:$24 sps:$4 sm:$0xff]  }
 0x23c   : > { %12674 = vst [vmem:[#allocation29_spill] sm:$0xff] %v10698_v19  ;;  %v2922_v0 = vpop.f32.mrf.mxu0  ;;  %3563 = vmatmul.mubr.bf16.gmra.mxu0 %v8961_v39  ;;  %v8975_v39 = vld [vmem:[%s12641_s3 + $0x2e4] ss:$24 sps:$4 sm:$0xff]   ;;  %v346_v19 = vld [vmem:[%s9646_s7 + $0x1d0] sm:$0xff] }
 0x23d   : > { %v3339_v59 = vpop.f32.mrf.mxu1  ;;  %5420 = vmatmul.mubr.bf16.gmra.mxu1 %v8964_v10  ;;  %3570 = vmatprep.mubr.bf16.mxu0 %v8969_v4 }
 0x23e   : > { %v10703_v1 = vadd.f32 %v3339_v59, %v2922_v0  ;;  %v2924_v30 = vpop.f32.mrf.mxu0  ;;  %5427 = vmatprep.mubr.bf16.mxu1 %v8972_v31  ;;  %v8978_v31 = vld [vmem:[%s12640_s2 + $0x2d4] ss:$24 sps:$4 sm:$0xff]  }
 0x23f   : > { %v3341_v3 = vpop.f32.mrf.mxu1 }
 0x240   : > { %12675 = vst [vmem:[#allocation30_spill] sm:$0xff] %v10703_v1  ;;  %v2925_v29 = vpop.f32.mrf.mxu0 }
 0x241   : > { %v3342_v46 = vpop.f32.mrf.mxu1 }
 0x242   : > { %v10714_v10 = vadd.f32 %v3342_v46, %v2925_v29  ;;  %v2927_v4 = vpop.f32.mrf.mxu0  ;;  %v347_v29 = vld [vmem:[%s9646_s7 + $0x1d8] sm:$0xff]  ;;  %v378_v46 = vld [vmem:[%s9646_s7 + $0x2d0] sm:$0xff] }
 0x243   : > { %v3344_v56 = vpop.f32.mrf.mxu1 }
 0x244   : > { %12676 = vst [vmem:[#allocation31_spill] sm:$0xff] %v10714_v10  ;;  %v2930_v0 = vpop.f32.mrf.mxu0  ;;  %3571 = vmatmul.mubr.bf16.gmra.mxu0 %v8967_v58  ;;  %v8973_v10 = vld [vmem:[%s12641_s3 + $0x2e0] ss:$24 sps:$4 sm:$0xff]   ;;  %v413_v56 = vpack.c.bf16 %v347_v29, %v346_v19  ;;  %v8976_v58 = vld [vmem:[%s12640_s2 + $0x2d0] ss:$24 sps:$4 sm:$0xff]  }
 0x245   : > { %v3347_v59 = vpop.f32.mrf.mxu1  ;;  %5428 = vmatmul.mubr.bf16.gmra.mxu1 %v8970_v16  ;;  %3578 = vmatprep.mubr.bf16.mxu0 %v8975_v39  ;;  %v8981_v16 = vld [vmem:[%s12641_s3 + $0x314] ss:$24 sps:$4 sm:$0xff]  }
 0x246   : > { %v10719_v30 = vadd.f32 %v3347_v59, %v2930_v0  ;;  %v2932_v3 = vpop.f32.mrf.mxu0  ;;  %5435 = vmatprep.mubr.bf16.mxu1 %v8978_v31  ;;  %v8984_v0 = vld [vmem:[%s12640_s2 + $0x304] ss:$24 sps:$4 sm:$0xff]   ;;  %5721 = vmatpush2.bf16.msra.mxu0 %v413_v56 }
 0x247   : > { %v3349_v1 = vpop.f32.mrf.mxu1  ;;  %5722 = vmatprep.subr.bf16.mxu0 %v12652_v34 }
 0x248   : > { %12677 = vst [vmem:[#allocation32_spill] sm:$0xff] %v10719_v30  ;;  %v2933_v4 = vpop.f32.mrf.mxu0  ;;  %v429_v1 = vpack.c.bf16 %v379_v25, %v378_v46 }
 0x249   : > { %v3350_v21 = vpop.f32.mrf.mxu1 }
 0x24a   : > { %v10734_v39 = vadd.f32 %v3350_v21, %v2933_v4  ;;  %v2935_v31 = vpop.f32.mrf.mxu0  ;;  %6138 = vmatpush2.bf16.msra.mxu1 %v429_v1  ;;  %v8979_v4 = vld [vmem:[%s12641_s3 + $0x310] ss:$24 sps:$4 sm:$0xff]  }
 0x24b   : > { %v3352_v19 = vpop.f32.mrf.mxu1  ;;  %6139 = vmatprep.subr.bf16.mxu1 %v12652_v34  ;;  %v8990_v31 = vld [vmem:[%s12640_s2 + $0x334] ss:$24 sps:$4 sm:$0xff]  }
 0x24c   : > { %12678 = vst [vmem:[#allocation33_spill] sm:$0xff] %v10734_v39  ;;  %v2938_v59 = vpop.f32.mrf.mxu0  ;;  %3579 = vmatmul.mubr.bf16.gmra.mxu0 %v8973_v10  ;;  %v8982_v10 = vld [vmem:[%s12640_s2 + $0x300] ss:$24 sps:$4 sm:$0xff]   ;;  %v377_v39 = vld [vmem:[%s9646_s7 + $0x2c8] sm:$0xff] }
 0x24d   : > { %v3355_v3 = vpop.f32.mrf.mxu1  ;;  %5436 = vmatmul.mubr.bf16.gmra.mxu1 %v8976_v58  ;;  %3586 = vmatprep.mubr.bf16.mxu0 %v8981_v16  ;;  %v8987_v58 = vld [vmem:[%s12641_s3 + $0x344] ss:$24 sps:$4 sm:$0xff]  }
 0x24e   : > { %v10741_v25 = vadd.f32 %v3355_v3, %v2938_v59  ;;  %v2940_v21 = vpop.f32.mrf.mxu0  ;;  %5443 = vmatprep.mubr.bf16.mxu1 %v8984_v0 }
 0x24f   : > { %v3357_v29 = vpop.f32.mrf.mxu1 }
 0x250   : > { %12679 = vst [vmem:[#allocation34_spill] sm:$0xff] %v10741_v25  ;;  %v2941_v46 = vpop.f32.mrf.mxu0 }
 0x251   : > { %v3358_v56 = vpop.f32.mrf.mxu1 }
 0x252   : > { %v10752_v16 = vadd.f32 %v3358_v56, %v2941_v46  ;;  %v2943_v1 = vpop.f32.mrf.mxu0  ;;  %v8985_v46 = vld [vmem:[%s12641_s3 + $0x340] ss:$24 sps:$4 sm:$0xff]  }
 0x253   : > { %v3360_v0 = vpop.f32.mrf.mxu1  ;;  %v8988_v1 = vld [vmem:[%s12640_s2 + $0x330] ss:$24 sps:$4 sm:$0xff]  }
 0x254   : > { %12680 = vst [vmem:[#allocation35_spill] sm:$0xff] %v10752_v16  ;;  %v2946_v19 = vpop.f32.mrf.mxu0  ;;  %3587 = vmatmul.mubr.bf16.gmra.mxu0 %v8979_v4  ;;  %v8993_v4 = vld [vmem:[%s12641_s3 + $0x374] ss:$24 sps:$4 sm:$0xff]   ;;  %v344_v16 = vld [vmem:[%s9646_s7 + $0x1c0] sm:$0xff] }
 0x255   : > { %v3363_v59 = vpop.f32.mrf.mxu1  ;;  %5444 = vmatmul.mubr.bf16.gmra.mxu1 %v8982_v10  ;;  %3594 = vmatprep.mubr.bf16.mxu0 %v8987_v58 }
 0x256   : > { %v10757_v3 = vadd.f32 %v3363_v59, %v2946_v19  ;;  %v2948_v21 = vpop.f32.mrf.mxu0  ;;  %5451 = vmatprep.mubr.bf16.mxu1 %v8990_v31  ;;  %v8996_v31 = vld [vmem:[%s12640_s2 + $0x364] ss:$24 sps:$4 sm:$0xff]  }
 0x257   : > { %v3365_v29 = vpop.f32.mrf.mxu1 }
 0x258   : > { %12681 = vst [vmem:[#allocation36_spill] sm:$0xff] %v10757_v3  ;;  %v2949_v25 = vpop.f32.mrf.mxu0 }
 0x259   : > { %v3366_v56 = vpop.f32.mrf.mxu1 }
 0x25a   : > { %v10768_v10 = vadd.f32 %v3366_v56, %v2949_v25  ;;  %v2951_v58 = vpop.f32.mrf.mxu0  ;;  %v345_v25 = vld [vmem:[%s9646_s7 + $0x1c8] sm:$0xff]  ;;  %v376_v56 = vld [vmem:[%s9646_s7 + $0x2c0] sm:$0xff] }
 0x25b   : > { %v3368_v0 = vpop.f32.mrf.mxu1 }
 0x25c   : > { %12682 = vst [vmem:[#allocation37_spill] sm:$0xff] %v10768_v10  ;;  %v2954_v19 = vpop.f32.mrf.mxu0  ;;  %3595 = vmatmul.mubr.bf16.gmra.mxu0 %v8985_v46  ;;  %v8991_v10 = vld [vmem:[%s12641_s3 + $0x370] ss:$24 sps:$4 sm:$0xff]   ;;  %v412_v0 = vpack.c.bf16 %v345_v25, %v344_v16  ;;  %v8994_v46 = vld [vmem:[%s12640_s2 + $0x360] ss:$24 sps:$4 sm:$0xff]  }
 0x25d   : > { %v3371_v59 = vpop.f32.mrf.mxu1  ;;  %5452 = vmatmul.mubr.bf16.gmra.mxu1 %v8988_v1  ;;  %3602 = vmatprep.mubr.bf16.mxu0 %v8993_v4  ;;  %v8999_v1 = vld [vmem:[%s12641_s3 + $0x3a4] ss:$24 sps:$4 sm:$0xff]  }
 0x25e   : > { %v10773_v21 = vadd.f32 %v3371_v59, %v2954_v19  ;;  %v2956_v29 = vpop.f32.mrf.mxu0  ;;  %5459 = vmatprep.mubr.bf16.mxu1 %v8996_v31  ;;  %v9002_v19 = vld [vmem:[%s12640_s2 + $0x394] ss:$24 sps:$4 sm:$0xff]   ;;  %5723 = vmatpush2.bf16.msra.mxu0 %v412_v0 }
 0x25f   : > { %v3373_v3 = vpop.f32.mrf.mxu1  ;;  %5724 = vmatprep.subr.bf16.mxu0 %v12652_v34 }
 0x260   : > { %12683 = vst [vmem:[#allocation38_spill] sm:$0xff] %v10773_v21  ;;  %v2957_v58 = vpop.f32.mrf.mxu0  ;;  %v428_v3 = vpack.c.bf16 %v377_v39, %v376_v56 }
 0x261   : > { %v3374_v30 = vpop.f32.mrf.mxu1 }
 0x262   : > { %v10788_v4 = vadd.f32 %v3374_v30, %v2957_v58  ;;  %v2959_v31 = vpop.f32.mrf.mxu0  ;;  %6140 = vmatpush2.bf16.msra.mxu1 %v428_v3  ;;  %v8997_v58 = vld [vmem:[%s12641_s3 + $0x3a0] ss:$24 sps:$4 sm:$0xff]  }
 0x263   : > { %v3376_v16 = vpop.f32.mrf.mxu1  ;;  %6141 = vmatprep.subr.bf16.mxu1 %v12652_v34  ;;  %v9008_v31 = vld [vmem:[%s12640_s2 + $0x3c4] ss:$24 sps:$4 sm:$0xff]  }
 0x264   : > { %12684 = vst [vmem:[#allocation39_spill] sm:$0xff] %v10788_v4  ;;  %v2962_v59 = vpop.f32.mrf.mxu0  ;;  %3603 = vmatmul.mubr.bf16.gmra.mxu0 %v8991_v10  ;;  %v9000_v10 = vld [vmem:[%s12640_s2 + $0x390] ss:$24 sps:$4 sm:$0xff]   ;;  %v375_v4 = vld [vmem:[%s9646_s7 + $0x2b8] sm:$0xff] }
 0x265   : > { %v3379_v29 = vpop.f32.mrf.mxu1  ;;  %5460 = vmatmul.mubr.bf16.gmra.mxu1 %v8994_v46  ;;  %3610 = vmatprep.mubr.bf16.mxu0 %v8999_v1  ;;  %v9005_v46 = vld [vmem:[%s12641_s3 + $0x3d4] ss:$24 sps:$4 sm:$0xff]  }
 0x266   : > { %v10795_v39 = vadd.f32 %v3379_v29, %v2962_v59  ;;  %v2964_v30 = vpop.f32.mrf.mxu0  ;;  %5467 = vmatprep.mubr.bf16.mxu1 %v9002_v19 }
 0x267   : > { %v3381_v25 = vpop.f32.mrf.mxu1 }
 0x268   : > { %12685 = vst [vmem:[#allocation40_spill] sm:$0xff] %v10795_v39  ;;  %v2965_v56 = vpop.f32.mrf.mxu0 }
 0x269   : > { %v3382_v0 = vpop.f32.mrf.mxu1 }
 0x26a   : > { %v10806_v1 = vadd.f32 %v3382_v0, %v2965_v56  ;;  %v2967_v3 = vpop.f32.mrf.mxu0  ;;  %v9003_v56 = vld [vmem:[%s12641_s3 + $0x3d0] ss:$24 sps:$4 sm:$0xff]  }
 0x26b   : > { %v3384_v19 = vpop.f32.mrf.mxu1  ;;  %v9006_v3 = vld [vmem:[%s12640_s2 + $0x3c0] ss:$24 sps:$4 sm:$0xff]  }
 0x26c   : > { %12686 = vst [vmem:[#allocation41_spill] sm:$0xff] %v10806_v1  ;;  %v2970_v16 = vpop.f32.mrf.mxu0  ;;  %3611 = vmatmul.mubr.bf16.gmra.mxu0 %v8997_v58  ;;  %v9011_v58 = vld [vmem:[%s12641_s3 + $0x404] ss:$24 sps:$4 sm:$0xff]   ;;  %v342_v1 = vld [vmem:[%s9646_s7 + $0x1b0] sm:$0xff] }
 0x26d   : > { %v3387_v59 = vpop.f32.mrf.mxu1  ;;  %5468 = vmatmul.mubr.bf16.gmra.mxu1 %v9000_v10  ;;  %3618 = vmatprep.mubr.bf16.mxu0 %v9005_v46 }
 0x26e   : > { %v10811_v29 = vadd.f32 %v3387_v59, %v2970_v16  ;;  %v2972_v30 = vpop.f32.mrf.mxu0  ;;  %5475 = vmatprep.mubr.bf16.mxu1 %v9008_v31  ;;  %v9014_v31 = vld [vmem:[%s12640_s2 + $0x3f4] ss:$24 sps:$4 sm:$0xff]  }
 0x26f   : > { %v3389_v25 = vpop.f32.mrf.mxu1 }
 0x270   : > { %12687 = vst [vmem:[#allocation42_spill] sm:$0xff] %v10811_v29  ;;  %v2973_v39 = vpop.f32.mrf.mxu0 }
 0x271   : > { %v3390_v0 = vpop.f32.mrf.mxu1 }
 0x272   : > { %v10822_v10 = vadd.f32 %v3390_v0, %v2973_v39  ;;  %v2975_v46 = vpop.f32.mrf.mxu0  ;;  %v343_v39 = vld [vmem:[%s9646_s7 + $0x1b8] sm:$0xff]  ;;  %v374_v0 = vld [vmem:[%s9646_s7 + $0x2b0] sm:$0xff] }
 0x273   : > { %v3392_v19 = vpop.f32.mrf.mxu1 }
 0x274   : > { %12688 = vst [vmem:[#allocation43_spill] sm:$0xff] %v10822_v10  ;;  %v2978_v16 = vpop.f32.mrf.mxu0  ;;  %3619 = vmatmul.mubr.bf16.gmra.mxu0 %v9003_v56  ;;  %v9009_v10 = vld [vmem:[%s12641_s3 + $0x400] ss:$24 sps:$4 sm:$0xff]   ;;  %v411_v19 = vpack.c.bf16 %v343_v39, %v342_v1  ;;  %v9012_v56 = vld [vmem:[%s12640_s2 + $0x3f0] ss:$24 sps:$4 sm:$0xff]  }
 0x275   : > { %v3395_v59 = vpop.f32.mrf.mxu1  ;;  %5476 = vmatmul.mubr.bf16.gmra.mxu1 %v9006_v3  ;;  %3626 = vmatprep.mubr.bf16.mxu0 %v9011_v58  ;;  %v9017_v3 = vld [vmem:[%s12641_s3 + $0x434] ss:$24 sps:$4 sm:$0xff]  }
 0x276   : > { %v10827_v30 = vadd.f32 %v3395_v59, %v2978_v16  ;;  %v2980_v25 = vpop.f32.mrf.mxu0  ;;  %5483 = vmatprep.mubr.bf16.mxu1 %v9014_v31  ;;  %v9020_v16 = vld [vmem:[%s12640_s2 + $0x424] ss:$24 sps:$4 sm:$0xff]   ;;  %5725 = vmatpush2.bf16.msra.mxu0 %v411_v19 }
 0x277   : > { %v3397_v29 = vpop.f32.mrf.mxu1  ;;  %5726 = vmatprep.subr.bf16.mxu0 %v12652_v34 }
 0x278   : > { %12689 = vst [vmem:[#allocation44_spill] sm:$0xff] %v10827_v30  ;;  %v2981_v46 = vpop.f32.mrf.mxu0  ;;  %v427_v29 = vpack.c.bf16 %v375_v4, %v374_v0 }
 0x279   : > { %v3398_v21 = vpop.f32.mrf.mxu1 }
 0x27a   : > { %v10842_v58 = vadd.f32 %v3398_v21, %v2981_v46  ;;  %v2983_v31 = vpop.f32.mrf.mxu0  ;;  %6142 = vmatpush2.bf16.msra.mxu1 %v427_v29  ;;  %v9015_v46 = vld [vmem:[%s12641_s3 + $0x430] ss:$24 sps:$4 sm:$0xff]  }
 0x27b   : > { %v3400_v1 = vpop.f32.mrf.mxu1  ;;  %6143 = vmatprep.subr.bf16.mxu1 %v12652_v34  ;;  %v9026_v31 = vld [vmem:[%s12640_s2 + $0x454] ss:$24 sps:$4 sm:$0xff]  }
 0x27c   : > { %12690 = vst [vmem:[#allocation45_spill] sm:$0xff] %v10842_v58  ;;  %v2986_v59 = vpop.f32.mrf.mxu0  ;;  %3627 = vmatmul.mubr.bf16.gmra.mxu0 %v9009_v10  ;;  %v9018_v10 = vld [vmem:[%s12640_s2 + $0x420] ss:$24 sps:$4 sm:$0xff]   ;;  %v373_v58 = vld [vmem:[%s9646_s7 + $0x2a8] sm:$0xff] }
 0x27d   : > { %v3403_v25 = vpop.f32.mrf.mxu1  ;;  %5484 = vmatmul.mubr.bf16.gmra.mxu1 %v9012_v56  ;;  %3634 = vmatprep.mubr.bf16.mxu0 %v9017_v3  ;;  %v9023_v56 = vld [vmem:[%s12641_s3 + $0x464] ss:$24 sps:$4 sm:$0xff]  }
 0x27e   : > { %v10849_v4 = vadd.f32 %v3403_v25, %v2986_v59  ;;  %v2988_v21 = vpop.f32.mrf.mxu0  ;;  %5491 = vmatprep.mubr.bf16.mxu1 %v9020_v16 }
 0x27f   : > { %v3405_v39 = vpop.f32.mrf.mxu1 }
 0x280   : > { %12691 = vst [vmem:[#allocation46_spill] sm:$0xff] %v10849_v4  ;;  %v2989_v0 = vpop.f32.mrf.mxu0 }
 0x281   : > { %v3406_v19 = vpop.f32.mrf.mxu1 }
 0x282   : > { %v10860_v3 = vadd.f32 %v3406_v19, %v2989_v0  ;;  %v2991_v29 = vpop.f32.mrf.mxu0  ;;  %v9021_v0 = vld [vmem:[%s12641_s3 + $0x460] ss:$24 sps:$4 sm:$0xff]  }
 0x283   : > { %v3408_v16 = vpop.f32.mrf.mxu1  ;;  %v9024_v29 = vld [vmem:[%s12640_s2 + $0x450] ss:$24 sps:$4 sm:$0xff]  }
 0x284   : > { %12692 = vst [vmem:[#allocation47_spill] sm:$0xff] %v10860_v3  ;;  %v2994_v1 = vpop.f32.mrf.mxu0  ;;  %3635 = vmatmul.mubr.bf16.gmra.mxu0 %v9015_v46  ;;  %v9029_v46 = vld [vmem:[%s12641_s3 + $0x494] ss:$24 sps:$4 sm:$0xff]   ;;  %v340_v3 = vld [vmem:[%s9646_s7 + $0x1a0] sm:$0xff] }
 0x285   : > { %v3411_v59 = vpop.f32.mrf.mxu1  ;;  %5492 = vmatmul.mubr.bf16.gmra.mxu1 %v9018_v10  ;;  %3642 = vmatprep.mubr.bf16.mxu0 %v9023_v56 }
 0x286   : > { %v10865_v25 = vadd.f32 %v3411_v59, %v2994_v1  ;;  %v2996_v21 = vpop.f32.mrf.mxu0  ;;  %5499 = vmatprep.mubr.bf16.mxu1 %v9026_v31  ;;  %v9032_v31 = vld [vmem:[%s12640_s2 + $0x484] ss:$24 sps:$4 sm:$0xff]  }
 0x287   : > { %v3413_v39 = vpop.f32.mrf.mxu1 }
 0x288   : > { %12693 = vst [vmem:[#allocation48_spill] sm:$0xff] %v10865_v25  ;;  %v2997_v4 = vpop.f32.mrf.mxu0 }
 0x289   : > { %v3414_v19 = vpop.f32.mrf.mxu1 }
 0x28a   : > { %v10876_v10 = vadd.f32 %v3414_v19, %v2997_v4  ;;  %v2999_v56 = vpop.f32.mrf.mxu0  ;;  %v341_v4 = vld [vmem:[%s9646_s7 + $0x1a8] sm:$0xff]  ;;  %v372_v19 = vld [vmem:[%s9646_s7 + $0x2a0] sm:$0xff] }
 0x28b   : > { %v3416_v16 = vpop.f32.mrf.mxu1 }
 0x28c   : > { %12694 = vst [vmem:[#allocation49_spill] sm:$0xff] %v10876_v10  ;;  %v3002_v1 = vpop.f32.mrf.mxu0  ;;  %3643 = vmatmul.mubr.bf16.gmra.mxu0 %v9021_v0  ;;  %v9027_v10 = vld [vmem:[%s12641_s3 + $0x490] ss:$24 sps:$4 sm:$0xff]   ;;  %v410_v16 = vpack.c.bf16 %v341_v4, %v340_v3  ;;  %v9030_v0 = vld [vmem:[%s12640_s2 + $0x480] ss:$24 sps:$4 sm:$0xff]  }
 0x28d   : > { %v3419_v59 = vpop.f32.mrf.mxu1  ;;  %5500 = vmatmul.mubr.bf16.gmra.mxu1 %v9024_v29  ;;  %3650 = vmatprep.mubr.bf16.mxu0 %v9029_v46  ;;  %v9035_v29 = vld [vmem:[%s12641_s3 + $0x4c4] ss:$24 sps:$4 sm:$0xff]  }
 0x28e   : > { %v10881_v21 = vadd.f32 %v3419_v59, %v3002_v1  ;;  %v3004_v39 = vpop.f32.mrf.mxu0  ;;  %5507 = vmatprep.mubr.bf16.mxu1 %v9032_v31  ;;  %v9038_v1 = vld [vmem:[%s12640_s2 + $0x4b4] ss:$24 sps:$4 sm:$0xff]   ;;  %5727 = vmatpush2.bf16.msra.mxu0 %v410_v16  ;;  %v9033_v16 = vld [vmem:[%s12641_s3 + $0x4c0] ss:$24 sps:$4 sm:$0xff]  }
 0x28f   : > { %v3421_v25 = vpop.f32.mrf.mxu1  ;;  %5728 = vmatprep.subr.bf16.mxu0 %v12652_v34 }
 0x290   : > { %v3005_v56 = vpop.f32.mrf.mxu0  ;;  %v426_v25 = vpack.c.bf16 %v373_v58, %v372_v19 }
 0x291   : > { %v3422_v30 = vpop.f32.mrf.mxu1 }
 0x292   : > { %v10896_v46 = vadd.f32 %v3422_v30, %v3005_v56  ;;  %v3007_v31 = vpop.f32.mrf.mxu0  ;;  %6144 = vmatpush2.bf16.msra.mxu1 %v426_v25 }
 0x293   : > { %v3424_v3 = vpop.f32.mrf.mxu1  ;;  %6145 = vmatprep.subr.bf16.mxu1 %v12652_v34  ;;  %v9044_v31 = vld [vmem:[%s12640_s2 + $0x4e4] ss:$24 sps:$4 sm:$0xff]  }
 0x294   : > { %v3460_v59 = vpop.f32.mrf.mxu0  ;;  %3651 = vmatmul.mubr.bf16.gmra.mxu0 %v9027_v10 }
 0x295   : > { %v3461_v39 = vadd.f32 %v3460_v59, %v10039_v33  ;;  %v5317_v4 = vpop.f32.mrf.mxu1  ;;  %5508 = vmatmul.mubr.bf16.gmra.mxu1 %v9030_v0  ;;  %3658 = vmatprep.mubr.bf16.mxu0 %v9035_v29  ;;  %v9036_v33 = vld [vmem:[%s12640_s2 + $0x4b0] ss:$24 sps:$4 sm:$0xff]   ;;  %v9041_v0 = vld [vmem:[%s12641_s3 + $0x4f4] ss:$24 sps:$4 sm:$0xff]  }
 0x296   : > { %v3462_v30 = vpop.f32.mrf.mxu0  ;;  %5515 = vmatprep.mubr.bf16.mxu1 %v9038_v1 }
 0x297   : > { %v10904_v58 = vadd.f32 %v5317_v4, %v3461_v39  ;;  %v5319_v19 = vpop.f32.mrf.mxu1 }
 0x298   : > { %v3463_v56 = vpop.f32.mrf.mxu0 }
 0x299   : > { %v3464_v25 = vadd.f32 %v3463_v56, %v10050_v41  ;;  %v5320_v10 = vpop.f32.mrf.mxu1 }
 0x29a   : > { %v3465_v29 = vpop.f32.mrf.mxu0 }
 0x29b   : > { %v10919_v1 = vadd.f32 %v5320_v10, %v3464_v25  ;;  %v5322_v3 = vpop.f32.mrf.mxu1  ;;  %v9039_v29 = vld [vmem:[%s12641_s3 + $0x4f0] ss:$24 sps:$4 sm:$0xff]  }
 0x29c   : > { %v3468_v59 = vpop.f32.mrf.mxu0  ;;  %3659 = vmatmul.mubr.bf16.gmra.mxu0 %v9033_v16  ;;  %v9047_v16 = vld [vmem:[%s12641_s3 + $0x524] ss:$24 sps:$4 sm:$0xff]  }
 0x29d   : > { %12695 = vst [vmem:[#allocation50_spill] sm:$0xff] %v10919_v1  ;;  %v3469_v41 = vadd.f32 %v3468_v59, %v10055_v47  ;;  %v5325_v39 = vpop.f32.mrf.mxu1  ;;  %5516 = vmatmul.mubr.bf16.gmra.mxu1 %v9036_v33  ;;  %3666 = vmatprep.mubr.bf16.mxu0 %v9041_v0  ;;  %v9042_v47 = vld [vmem:[%s12640_s2 + $0x4e0] ss:$24 sps:$4 sm:$0xff]   ;;  %v9050_v0 = vld [vmem:[%s12640_s2 + $0x514] ss:$24 sps:$4 sm:$0xff]  }
 0x29e   : > { %v3470_v4 = vpop.f32.mrf.mxu0  ;;  %5523 = vmatprep.mubr.bf16.mxu1 %v9044_v31 }
 0x29f   : > { %v10922_v30 = vadd.f32 %v5325_v39, %v3469_v41  ;;  %v5327_v19 = vpop.f32.mrf.mxu1 }
 0x2a0   : > { %v3471_v56 = vpop.f32.mrf.mxu0 }
 0x2a1   : > { %12696 = vst [vmem:[#allocation51_spill] sm:$0xff] %v10922_v30  ;;  %v3472_v25 = vadd.f32 %v3471_v56, %v10066_v55  ;;  %v5328_v10 = vpop.f32.mrf.mxu1  ;;  %v338_v56 = vld [vmem:[%s9646_s7 + $0x190] sm:$0xff] }
 0x2a2   : > { %v3473_v33 = vpop.f32.mrf.mxu0  ;;  %v370_v30 = vld [vmem:[%s9646_s7 + $0x290] sm:$0xff] }
 0x2a3   : > { %v10937_v31 = vadd.f32 %v5328_v10, %v3472_v25  ;;  %v5330_v55 = vpop.f32.mrf.mxu1  ;;  %v339_v33 = vld [vmem:[%s9646_s7 + $0x198] sm:$0xff] }
 0x2a4   : > { %v3476_v3 = vpop.f32.mrf.mxu0  ;;  %3667 = vmatmul.mubr.bf16.gmra.mxu0 %v9039_v29  ;;  %v9045_v25 = vld [vmem:[%s12641_s3 + $0x520] ss:$24 sps:$4 sm:$0xff]   ;;  %v409_v10 = vpack.c.bf16 %v339_v33, %v338_v56 }
 0x2a5   : > { %v3477_v59 = vadd.f32 %v3476_v3, %v10071_v61  ;;  %v5333_v41 = vpop.f32.mrf.mxu1  ;;  %5524 = vmatmul.mubr.bf16.gmra.mxu1 %v9042_v47  ;;  %3674 = vmatprep.mubr.bf16.mxu0 %v9047_v16  ;;  %v371_v29 = vld [vmem:[%s9646_s7 + $0x298] sm:$0xff]  ;;  %v9048_v47 = vld [vmem:[%s12640_s2 + $0x510] ss:$24 sps:$4 sm:$0xff]   ;;  %v9053_v16 = vld [vmem:[%s12641_s3 + $0x554] ss:$24 sps:$4 sm:$0xff]  }
 0x2a6   : > { %v3478_v39 = vpop.f32.mrf.mxu0  ;;  %5531 = vmatprep.mubr.bf16.mxu1 %v9050_v0  ;;  %v425_v0 = vpack.c.bf16 %v371_v29, %v370_v30  ;;  %5729 = vmatpush2.bf16.msra.mxu0 %v409_v10  ;;  %v9051_v29 = vld [vmem:[%s12641_s3 + $0x550] ss:$24 sps:$4 sm:$0xff]  }
 0x2a7   : > { %v10940_v4 = vadd.f32 %v5333_v41, %v3477_v59  ;;  %v5335_v19 = vpop.f32.mrf.mxu1  ;;  %v9056_v59 = vld [vmem:[%s12640_s2 + $0x544] ss:$24 sps:$4 sm:$0xff]   ;;  %5730 = vmatprep.subr.bf16.mxu0 %v12652_v34 }
 0x2a8   : > { %v3479_v1 = vpop.f32.mrf.mxu0  ;;  %6146 = vmatpush2.bf16.msra.mxu1 %v425_v0 }
 0x2a9   : > { %v3480_v61 = vadd.f32 %v3479_v1, %v10086_v12  ;;  %v5336_v55 = vpop.f32.mrf.mxu1  ;;  %6147 = vmatprep.subr.bf16.mxu1 %v12652_v34  ;;  %v9059_v34 = vld [vmem:[%s12641_s3 + $0x584] ss:$24 sps:$4 sm:$0xff]  }
 0x2aa   : > { %v3481_v3 = vpop.f32.mrf.mxu0 }
 0x2ab   : > { %v10959_v41 = vadd.f32 %v5336_v55, %v3480_v61  ;;  %v5338_v39 = vpop.f32.mrf.mxu1 }
 0x2ac   : > { %v3484_v12 = vpop.f32.mrf.mxu0  ;;  %3675 = vmatmul.mubr.bf16.gmra.mxu0 %v9045_v25 }
 0x2ad   : > { %v3485_v1 = vadd.f32 %v3484_v12, %v10093_v18  ;;  %v5341_v19 = vpop.f32.mrf.mxu1  ;;  %5532 = vmatmul.mubr.bf16.gmra.mxu1 %v9048_v47  ;;  %3682 = vmatprep.mubr.bf16.mxu0 %v9053_v16  ;;  %v9054_v18 = vld [vmem:[%s12640_s2 + $0x540] ss:$24 sps:$4 sm:$0xff]   ;;  %v9062_v47 = vld [vmem:[%s12640_s2 + $0x574] ss:$24 sps:$4 sm:$0xff]  }
 0x2ae   : > { %v3486_v30 = vpop.f32.mrf.mxu0  ;;  %5539 = vmatprep.mubr.bf16.mxu1 %v9056_v59 }
 0x2af   : > { %v10964_v56 = vadd.f32 %v5341_v19, %v3485_v1  ;;  %v5343_v33 = vpop.f32.mrf.mxu1  ;;  %v9057_v30 = vld [vmem:[%s12641_s3 + $0x580] ss:$24 sps:$4 sm:$0xff]  }
 0x2b0   : > { %v3487_v10 = vpop.f32.mrf.mxu0 }
 0x2b1   : > { %v3488_v61 = vadd.f32 %v3487_v10, %v10104_v26  ;;  %v5344_v25 = vpop.f32.mrf.mxu1 }
 0x2b2   : > { %v3489_v55 = vpop.f32.mrf.mxu0 }
 0x2b3   : > { %v10979_v16 = vadd.f32 %v5344_v25, %v3488_v61  ;;  %v5346_v0 = vpop.f32.mrf.mxu1  ;;  %v9068_v25 = vld [vmem:[%s12640_s2 + $0x5a4] ss:$24 sps:$4 sm:$0xff]  }
 0x2b4   : > { %v3492_v3 = vpop.f32.mrf.mxu0  ;;  %3683 = vmatmul.mubr.bf16.gmra.mxu0 %v9051_v29  ;;  %v9065_v29 = vld [vmem:[%s12641_s3 + $0x5b4] ss:$24 sps:$4 sm:$0xff]  }
 0x2b5   : > { %v3493_v26 = vadd.f32 %v3492_v3, %v10109_v32  ;;  %v5349_v59 = vpop.f32.mrf.mxu1  ;;  %5540 = vmatmul.mubr.bf16.gmra.mxu1 %v9054_v18  ;;  %3690 = vmatprep.mubr.bf16.mxu0 %v9059_v34  ;;  %v9060_v32 = vld [vmem:[%s12640_s2 + $0x570] ss:$24 sps:$4 sm:$0xff]  }
 0x2b6   : > { %v3494_v39 = vpop.f32.mrf.mxu0  ;;  %5547 = vmatprep.mubr.bf16.mxu1 %v9062_v47 }
 0x2b7   : > { %v10982_v12 = vadd.f32 %v5349_v59, %v3493_v26  ;;  %v5351_v1 = vpop.f32.mrf.mxu1  ;;  %v336_v59 = vld [vmem:[%s9646_s7 + $0x180] sm:$0xff]  ;;  %v337_v39 = vld [vmem:[%s9646_s7 + $0x188] sm:$0xff] }
 0x2b8   : > { %v3495_v19 = vpop.f32.mrf.mxu0  ;;  %v368_v1 = vld [vmem:[%s9646_s7 + $0x280] sm:$0xff] }
 0x2b9   : > { %v3496_v33 = vadd.f32 %v3495_v19, %v10120_v42  ;;  %v5352_v10 = vpop.f32.mrf.mxu1 }
 0x2ba   : > { %v3497_v61 = vpop.f32.mrf.mxu0 }
 0x2bb   : > { %v10997_v18 = vadd.f32 %v5352_v10, %v3496_v33  ;;  %v5354_v42 = vpop.f32.mrf.mxu1  ;;  %v9063_v33 = vld [vmem:[%s12641_s3 + $0x5b0] ss:$24 sps:$4 sm:$0xff]   ;;  %v408_v10 = vpack.c.bf16 %v337_v39, %v336_v59 }
 0x2bc   : > { %v3500_v34 = vpop.f32.mrf.mxu0  ;;  %3691 = vmatmul.mubr.bf16.gmra.mxu0 %v9057_v30  ;;  %v369_v30 = vld [vmem:[%s9646_s7 + $0x288] sm:$0xff] }
 0x2bd   : > { %v3501_v55 = vadd.f32 %v3500_v34, %v10125_v49  ;;  %v5357_v47 = vpop.f32.mrf.mxu1  ;;  %5548 = vmatmul.mubr.bf16.gmra.mxu1 %v9060_v32  ;;  %3698 = vmatprep.mubr.bf16.mxu0 %v9065_v29  ;;  %v9066_v32 = vld [vmem:[%s12640_s2 + $0x5a0] ss:$24 sps:$4 sm:$0xff]   ;;  %v9071_v29 = vld [vmem:[%s12641_s3 + $0x5e4] ss:$24 sps:$4 sm:$0xff]   ;;  %v9074_v34 = vld [vmem:[%s12640_s2 + $0x5d4] ss:$24 sps:$4 sm:$0xff]  }
 0x2be   : > { %v3502_v0 = vpop.f32.mrf.mxu0  ;;  %5555 = vmatprep.mubr.bf16.mxu1 %v9068_v25  ;;  %v424_v25 = vpack.c.bf16 %v369_v30, %v368_v1  ;;  %5731 = vmatpush2.bf16.msra.mxu0 %v408_v10  ;;  %v9069_v10 = vld [vmem:[%s12641_s3 + $0x5e0] ss:$24 sps:$4 sm:$0xff]  }
 0x2bf   : > { %v11000_v3 = vadd.f32 %v5357_v47, %v3501_v55  ;;  %v5359_v26 = vpop.f32.mrf.mxu1 }
 0x2c0   : > { %v3503_v19 = vpop.f32.mrf.mxu0  ;;  %6148 = vmatpush2.bf16.msra.mxu1 %v424_v25 }
 0x2c1   : > { %v3504_v49 = vadd.f32 %v3503_v19, %v10140_v2  ;;  %v5360_v61 = vpop.f32.mrf.mxu1 }
 0x2c2   : > { %v3505_v42 = vpop.f32.mrf.mxu0 }
 0x2c3   : > { %v11019_v55 = vadd.f32 %v5360_v61, %v3504_v49  ;;  %v5362_v47 = vpop.f32.mrf.mxu1 }
 0x2c4   : > { %v3508_v2 = vpop.f32.mrf.mxu0  ;;  %3699 = vmatmul.mubr.bf16.gmra.mxu0 %v9063_v33  ;;  %v9077_v33 = vld [vmem:[%s12641_s3 + $0x614] ss:$24 sps:$4 sm:$0xff]  }
 0x2c5   : > { %v3509_v0 = vadd.f32 %v3508_v2, %v10147_v8  ;;  %v5365_v26 = vpop.f32.mrf.mxu1  ;;  %5556 = vmatmul.mubr.bf16.gmra.mxu1 %v9066_v32  ;;  %3706 = vmatprep.mubr.bf16.mxu0 %v9071_v29  ;;  %v9072_v8 = vld [vmem:[%s12640_s2 + $0x5d0] ss:$24 sps:$4 sm:$0xff]   ;;  %v9080_v32 = vld [vmem:[%s12640_s2 + $0x604] ss:$24 sps:$4 sm:$0xff]  }
 0x2c6   : > { %v3510_v59 = vpop.f32.mrf.mxu0  ;;  %5563 = vmatprep.mubr.bf16.mxu1 %v9074_v34 }
 0x2c7   : > { %v11022_v39 = vadd.f32 %v5365_v26, %v3509_v0  ;;  %v5367_v1 = vpop.f32.mrf.mxu1  ;;  %v9075_v59 = vld [vmem:[%s12641_s3 + $0x610] ss:$24 sps:$4 sm:$0xff]  }
 0x2c8   : > { %v3511_v19 = vpop.f32.mrf.mxu0 }
 0x2c9   : > { %v3512_v30 = vadd.f32 %v3511_v19, %v10158_v17  ;;  %v5368_v49 = vpop.f32.mrf.mxu1 }
 0x2ca   : > { %v3513_v61 = vpop.f32.mrf.mxu0 }
 0x2cb   : > { %v11037_v29 = vadd.f32 %v5368_v49, %v3512_v30  ;;  %v5370_v25 = vpop.f32.mrf.mxu1  ;;  %v9086_v49 = vld [vmem:[%s12640_s2 + $0x634] ss:$24 sps:$4 sm:$0xff]  }
 0x2cc   : > { %v3516_v42 = vpop.f32.mrf.mxu0  ;;  %3707 = vmatmul.mubr.bf16.gmra.mxu0 %v9069_v10  ;;  %v9083_v10 = vld [vmem:[%s12641_s3 + $0x644] ss:$24 sps:$4 sm:$0xff]  }
 0x2cd   : > { %v3517_v17 = vadd.f32 %v3516_v42, %v10163_v24  ;;  %v5373_v34 = vpop.f32.mrf.mxu1  ;;  %5564 = vmatmul.mubr.bf16.gmra.mxu1 %v9072_v8  ;;  %3714 = vmatprep.mubr.bf16.mxu0 %v9077_v33  ;;  %v9078_v24 = vld [vmem:[%s12640_s2 + $0x600] ss:$24 sps:$4 sm:$0xff]  }
 0x2ce   : > { %v3518_v47 = vpop.f32.mrf.mxu0  ;;  %5571 = vmatprep.mubr.bf16.mxu1 %v9080_v32 }
 0x2cf   : > { %v11040_v2 = vadd.f32 %v5373_v34, %v3517_v17  ;;  %v5375_v0 = vpop.f32.mrf.mxu1  ;;  %v9081_v47 = vld [vmem:[%s12641_s3 + $0x640] ss:$24 sps:$4 sm:$0xff]  }
 0x2d0   : > { %v3519_v26 = vpop.f32.mrf.mxu0 }
 0x2d1   : > { %v3520_v1 = vadd.f32 %v3519_v26, %v10174_v35  ;;  %v5376_v19 = vpop.f32.mrf.mxu1 }
 0x2d2   : > { %v3521_v30 = vpop.f32.mrf.mxu0 }
 0x2d3   : > { %v11055_v8 = vadd.f32 %v5376_v19, %v3520_v1  ;;  %v5378_v33 = vpop.f32.mrf.mxu1  ;;  %v9092_v19 = vld [vmem:[%s12640_s2 + $0x664] ss:$24 sps:$4 sm:$0xff]  }
 0x2d4   : > { %v3524_v61 = vpop.f32.mrf.mxu0  ;;  %3715 = vmatmul.mubr.bf16.gmra.mxu0 %v9075_v59  ;;  %v9089_v59 = vld [vmem:[%s12641_s3 + $0x674] ss:$24 sps:$4 sm:$0xff]  }
 0x2d5   : > { %v3525_v35 = vadd.f32 %v3524_v61, %v10179_v43  ;;  %v5381_v32 = vpop.f32.mrf.mxu1  ;;  %5572 = vmatmul.mubr.bf16.gmra.mxu1 %v9078_v24  ;;  %3722 = vmatprep.mubr.bf16.mxu0 %v9083_v10  ;;  %v9084_v43 = vld [vmem:[%s12640_s2 + $0x630] ss:$24 sps:$4 sm:$0xff]  }
 0x2d6   : > { %v3526_v25 = vpop.f32.mrf.mxu0  ;;  %5579 = vmatprep.mubr.bf16.mxu1 %v9086_v49 }
 0x2d7   : > { %v11058_v42 = vadd.f32 %v5381_v32, %v3525_v35  ;;  %v5383_v17 = vpop.f32.mrf.mxu1  ;;  %v9087_v25 = vld [vmem:[%s12641_s3 + $0x670] ss:$24 sps:$4 sm:$0xff]  }
 0x2d8   : > { %v3527_v34 = vpop.f32.mrf.mxu0 }
 0x2d9   : > { %v3528_v0 = vadd.f32 %v3527_v34, %v10190_v53  ;;  %v5384_v26 = vpop.f32.mrf.mxu1 }
 0x2da   : > { %v3529_v1 = vpop.f32.mrf.mxu0 }
 0x2db   : > { %v11073_v24 = vadd.f32 %v5384_v26, %v3528_v0  ;;  %v5386_v10 = vpop.f32.mrf.mxu1  ;;  %v9098_v26 = vld [vmem:[%s12640_s2 + $0x694] ss:$24 sps:$4 sm:$0xff]  }
 0x2dc   : > { %v3532_v30 = vpop.f32.mrf.mxu0  ;;  %3723 = vmatmul.mubr.bf16.gmra.mxu0 %v9081_v47  ;;  %v9095_v47 = vld [vmem:[%s12641_s3 + $0x6a4] ss:$24 sps:$4 sm:$0xff]  }
 0x2dd   : > { %v3533_v53 = vadd.f32 %v3532_v30, %v10195_v60  ;;  %v5389_v49 = vpop.f32.mrf.mxu1  ;;  %5580 = vmatmul.mubr.bf16.gmra.mxu1 %v9084_v43  ;;  %3730 = vmatprep.mubr.bf16.mxu0 %v9089_v59  ;;  %v9090_v60 = vld [vmem:[%s12640_s2 + $0x660] ss:$24 sps:$4 sm:$0xff]  }
 0x2de   : > { %v3534_v33 = vpop.f32.mrf.mxu0  ;;  %5587 = vmatprep.mubr.bf16.mxu1 %v9092_v19 }
 0x2df   : > { %v11076_v61 = vadd.f32 %v5389_v49, %v3533_v53  ;;  %v5391_v35 = vpop.f32.mrf.mxu1  ;;  %v9093_v33 = vld [vmem:[%s12641_s3 + $0x6a0] ss:$24 sps:$4 sm:$0xff]  }
 0x2e0   : > { %v3535_v32 = vpop.f32.mrf.mxu0 }
 0x2e1   : > { %v3536_v17 = vadd.f32 %v3535_v32, %v10206_v7  ;;  %v5392_v34 = vpop.f32.mrf.mxu1 }
 0x2e2   : > { %v3537_v0 = vpop.f32.mrf.mxu0 }
 0x2e3   : > { %v11091_v43 = vadd.f32 %v5392_v34, %v3536_v17  ;;  %v5394_v59 = vpop.f32.mrf.mxu1  ;;  %v9104_v34 = vld [vmem:[%s12640_s2 + $0x6c4] ss:$24 sps:$4 sm:$0xff]  }
 0x2e4   : > { %v3540_v1 = vpop.f32.mrf.mxu0  ;;  %3731 = vmatmul.mubr.bf16.gmra.mxu0 %v9087_v25  ;;  %v9101_v25 = vld [vmem:[%s12641_s3 + $0x6d4] ss:$24 sps:$4 sm:$0xff]  }
 0x2e5   : > { %v3541_v7 = vadd.f32 %v3540_v1, %v10211_v15  ;;  %v5397_v19 = vpop.f32.mrf.mxu1  ;;  %5588 = vmatmul.mubr.bf16.gmra.mxu1 %v9090_v60  ;;  %3738 = vmatprep.mubr.bf16.mxu0 %v9095_v47  ;;  %v9096_v15 = vld [vmem:[%s12640_s2 + $0x690] ss:$24 sps:$4 sm:$0xff]  }
 0x2e6   : > { %v3542_v10 = vpop.f32.mrf.mxu0  ;;  %5595 = vmatprep.mubr.bf16.mxu1 %v9098_v26 }
 0x2e7   : > { %v11094_v30 = vadd.f32 %v5397_v19, %v3541_v7  ;;  %v5399_v53 = vpop.f32.mrf.mxu1  ;;  %v9099_v10 = vld [vmem:[%s12641_s3 + $0x6d0] ss:$24 sps:$4 sm:$0xff]  }
 0x2e8   : > { %v3543_v49 = vpop.f32.mrf.mxu0 }
 0x2e9   : > { %v3544_v35 = vadd.f32 %v3543_v49, %v10222_v27  ;;  %v5400_v32 = vpop.f32.mrf.mxu1 }
 0x2ea   : > { %v3545_v17 = vpop.f32.mrf.mxu0 }
 0x2eb   : > { %v11109_v60 = vadd.f32 %v5400_v32, %v3544_v35  ;;  %v5402_v47 = vpop.f32.mrf.mxu1  ;;  %v9110_v32 = vld [vmem:[%s12640_s2 + $0x6f4] ss:$24 sps:$4 sm:$0xff]  }
 0x2ec   : > { %v3548_v0 = vpop.f32.mrf.mxu0  ;;  %3739 = vmatmul.mubr.bf16.gmra.mxu0 %v9093_v33  ;;  %v9107_v33 = vld [vmem:[%s12641_s3 + $0x704] ss:$24 sps:$4 sm:$0xff]  }
 0x2ed   : > { %v3549_v27 = vadd.f32 %v3548_v0, %v10227_v36  ;;  %v5405_v26 = vpop.f32.mrf.mxu1  ;;  %5596 = vmatmul.mubr.bf16.gmra.mxu1 %v9096_v15  ;;  %3746 = vmatprep.mubr.bf16.mxu0 %v9101_v25  ;;  %v9102_v36 = vld [vmem:[%s12640_s2 + $0x6c0] ss:$24 sps:$4 sm:$0xff]  }
 0x2ee   : > { %v3550_v59 = vpop.f32.mrf.mxu0  ;;  %5603 = vmatprep.mubr.bf16.mxu1 %v9104_v34 }
 0x2ef   : > { %v11112_v1 = vadd.f32 %v5405_v26, %v3549_v27  ;;  %v5407_v7 = vpop.f32.mrf.mxu1  ;;  %v9105_v59 = vld [vmem:[%s12641_s3 + $0x700] ss:$24 sps:$4 sm:$0xff]  }
 0x2f0   : > { %v3551_v19 = vpop.f32.mrf.mxu0 }
 0x2f1   : > { %v3552_v53 = vadd.f32 %v3551_v19, %v10238_v48  ;;  %v5408_v49 = vpop.f32.mrf.mxu1 }
 0x2f2   : > { %v3553_v35 = vpop.f32.mrf.mxu0 }
 0x2f3   : > { %v11127_v15 = vadd.f32 %v5408_v49, %v3552_v53  ;;  %v5410_v25 = vpop.f32.mrf.mxu1  ;;  %v9116_v49 = vld [vmem:[%s12640_s2 + $0x724] ss:$24 sps:$4 sm:$0xff]  }
 0x2f4   : > { %v3556_v17 = vpop.f32.mrf.mxu0  ;;  %3747 = vmatmul.mubr.bf16.gmra.mxu0 %v9099_v10  ;;  %v9113_v10 = vld [vmem:[%s12641_s3 + $0x734] ss:$24 sps:$4 sm:$0xff]  }
 0x2f5   : > { %v3557_v48 = vadd.f32 %v3556_v17, %v10243_v57  ;;  %v5413_v34 = vpop.f32.mrf.mxu1  ;;  %5604 = vmatmul.mubr.bf16.gmra.mxu1 %v9102_v36  ;;  %3754 = vmatprep.mubr.bf16.mxu0 %v9107_v33  ;;  %v9108_v57 = vld [vmem:[%s12640_s2 + $0x6f0] ss:$24 sps:$4 sm:$0xff]  }
 0x2f6   : > { %v3558_v47 = vpop.f32.mrf.mxu0  ;;  %5611 = vmatprep.mubr.bf16.mxu1 %v9110_v32 }
 0x2f7   : > { %v11130_v0 = vadd.f32 %v5413_v34, %v3557_v48  ;;  %v5415_v27 = vpop.f32.mrf.mxu1  ;;  %v9111_v47 = vld [vmem:[%s12641_s3 + $0x730] ss:$24 sps:$4 sm:$0xff]  }
 0x2f8   : > { %v3559_v26 = vpop.f32.mrf.mxu0 }
 0x2f9   : > { %v3560_v7 = vadd.f32 %v3559_v26, %v10254_v5  ;;  %v5416_v19 = vpop.f32.mrf.mxu1 }
 0x2fa   : > { %v3561_v53 = vpop.f32.mrf.mxu0 }
 0x2fb   : > { %v11145_v36 = vadd.f32 %v5416_v19, %v3560_v7  ;;  %v5418_v33 = vpop.f32.mrf.mxu1  ;;  %v9122_v19 = vld [vmem:[%s12640_s2 + $0x754] ss:$24 sps:$4 sm:$0xff]  }
 0x2fc   : > { %v3564_v35 = vpop.f32.mrf.mxu0  ;;  %3755 = vmatmul.mubr.bf16.gmra.mxu0 %v9105_v59  ;;  %v9119_v59 = vld [vmem:[%s12641_s3 + $0x764] ss:$24 sps:$4 sm:$0xff]  }
 0x2fd   : > { %v3565_v5 = vadd.f32 %v3564_v35, %v10259_v14  ;;  %v5421_v32 = vpop.f32.mrf.mxu1  ;;  %5612 = vmatmul.mubr.bf16.gmra.mxu1 %v9108_v57  ;;  %3762 = vmatprep.mubr.bf16.mxu0 %v9113_v10  ;;  %v9114_v14 = vld [vmem:[%s12640_s2 + $0x720] ss:$24 sps:$4 sm:$0xff]  }
 0x2fe   : > { %v3566_v25 = vpop.f32.mrf.mxu0  ;;  %5619 = vmatprep.mubr.bf16.mxu1 %v9116_v49 }
 0x2ff   : > { %v11148_v17 = vadd.f32 %v5421_v32, %v3565_v5  ;;  %v5423_v48 = vpop.f32.mrf.mxu1  ;;  %v9117_v25 = vld [vmem:[%s12641_s3 + $0x760] ss:$24 sps:$4 sm:$0xff]  }
 0x300   : > { %v3567_v34 = vpop.f32.mrf.mxu0 }
 0x301   : > { %v3568_v27 = vadd.f32 %v3567_v34, %v10270_v28  ;;  %v5424_v26 = vpop.f32.mrf.mxu1 }
 0x302   : > { %v3569_v7 = vpop.f32.mrf.mxu0 }
 0x303   : > { %v11163_v57 = vadd.f32 %v5424_v26, %v3568_v27  ;;  %v5426_v10 = vpop.f32.mrf.mxu1  ;;  %v9128_v26 = vld [vmem:[%s12640_s2 + $0x784] ss:$24 sps:$4 sm:$0xff]  }
 0x304   : > { %v3572_v53 = vpop.f32.mrf.mxu0  ;;  %3763 = vmatmul.mubr.bf16.gmra.mxu0 %v9111_v47  ;;  %v9125_v47 = vld [vmem:[%s12641_s3 + $0x794] ss:$24 sps:$4 sm:$0xff]  }
 0x305   : > { %v3573_v28 = vadd.f32 %v3572_v53, %v10275_v38  ;;  %v5429_v49 = vpop.f32.mrf.mxu1  ;;  %5620 = vmatmul.mubr.bf16.gmra.mxu1 %v9114_v14  ;;  %3770 = vmatprep.mubr.bf16.mxu0 %v9119_v59  ;;  %v9120_v38 = vld [vmem:[%s12640_s2 + $0x750] ss:$24 sps:$4 sm:$0xff]  }
 0x306   : > { %v3574_v33 = vpop.f32.mrf.mxu0  ;;  %5627 = vmatprep.mubr.bf16.mxu1 %v9122_v19 }
 0x307   : > { %v11166_v35 = vadd.f32 %v5429_v49, %v3573_v28  ;;  %v5431_v5 = vpop.f32.mrf.mxu1  ;;  %v9123_v33 = vld [vmem:[%s12641_s3 + $0x790] ss:$24 sps:$4 sm:$0xff]  }
 0x308   : > { %v3575_v32 = vpop.f32.mrf.mxu0 }
 0x309   : > { %v3576_v48 = vadd.f32 %v3575_v32, %v10286_v52  ;;  %v5432_v34 = vpop.f32.mrf.mxu1 }
 0x30a   : > { %v3577_v27 = vpop.f32.mrf.mxu0 }
 0x30b   : > { %v11181_v14 = vadd.f32 %v5432_v34, %v3576_v48  ;;  %v5434_v59 = vpop.f32.mrf.mxu1  ;;  %v9134_v34 = vld [vmem:[%s12640_s2 + $0x7b4] ss:$24 sps:$4 sm:$0xff]  }
 0x30c   : > { %v3580_v7 = vpop.f32.mrf.mxu0  ;;  %3771 = vmatmul.mubr.bf16.gmra.mxu0 %v9117_v25  ;;  %v9131_v25 = vld [vmem:[%s12641_s3 + $0x7c4] ss:$24 sps:$4 sm:$0xff]  }
 0x30d   : > { %v3581_v52 = vadd.f32 %v3580_v7, %v10291_v63  ;;  %v5437_v19 = vpop.f32.mrf.mxu1  ;;  %5628 = vmatmul.mubr.bf16.gmra.mxu1 %v9120_v38  ;;  %3778 = vmatprep.mubr.bf16.mxu0 %v9125_v47  ;;  %v9126_v63 = vld [vmem:[%s12640_s2 + $0x780] ss:$24 sps:$4 sm:$0xff]  }
 0x30e   : > { %v3582_v10 = vpop.f32.mrf.mxu0  ;;  %5635 = vmatprep.mubr.bf16.mxu1 %v9128_v26 }
 0x30f   : > { %v11184_v53 = vadd.f32 %v5437_v19, %v3581_v52  ;;  %v5439_v28 = vpop.f32.mrf.mxu1  ;;  %v9129_v10 = vld [vmem:[%s12641_s3 + $0x7c0] ss:$24 sps:$4 sm:$0xff]  }
 0x310   : > { %v3583_v49 = vpop.f32.mrf.mxu0 }
 0x311   : > { %v3584_v5 = vadd.f32 %v3583_v49, %v10302_v13  ;;  %v5440_v32 = vpop.f32.mrf.mxu1 }
 0x312   : > { %v3585_v48 = vpop.f32.mrf.mxu0 }
 0x313   : > { %v11199_v38 = vadd.f32 %v5440_v32, %v3584_v5  ;;  %v5442_v47 = vpop.f32.mrf.mxu1  ;;  %v9140_v32 = vld [vmem:[%s12640_s2 + $0x7e4] ss:$24 sps:$4 sm:$0xff]  }
 0x314   : > { %v3588_v27 = vpop.f32.mrf.mxu0  ;;  %3779 = vmatmul.mubr.bf16.gmra.mxu0 %v9123_v33  ;;  %v9137_v33 = vld [vmem:[%s12641_s3 + $0x7f4] ss:$24 sps:$4 sm:$0xff]   ;;  %v6534_v47 = vld [vmem:[%s12642_s4] sm:$0xff] }
 0x315   : > { %v3589_v13 = vadd.f32 %v3588_v27, %v10307_v23  ;;  %v5445_v26 = vpop.f32.mrf.mxu1  ;;  %5636 = vmatmul.mubr.bf16.gmra.mxu1 %v9126_v63  ;;  %3786 = vmatprep.mubr.bf16.mxu0 %v9131_v25  ;;  %v9132_v23 = vld [vmem:[%s12640_s2 + $0x7b0] ss:$24 sps:$4 sm:$0xff]  }
 0x316   : > { %v3590_v59 = vpop.f32.mrf.mxu0  ;;  %5643 = vmatprep.mubr.bf16.mxu1 %v9134_v34  ;;  %6632 = vperm.xlu0 %8593, %v6534_v47  }
 0x317   : > { %v11202_v7 = vadd.f32 %v5445_v26, %v3589_v13  ;;  %v5447_v52 = vpop.f32.mrf.mxu1 }
 0x318   : > { %v3591_v19 = vpop.f32.mrf.mxu0  ;;  %v9135_v52 = vld [vmem:[%s12641_s3 + $0x7f0] ss:$24 sps:$4 sm:$0xff]  }
 0x319   : > { %v3592_v28 = vadd.f32 %v3591_v19, %v10318_v40  ;;  %v5448_v49 = vpop.f32.mrf.mxu1 }
 0x31a   : > { %v3593_v5 = vpop.f32.mrf.mxu0 }
 0x31b   : > { %v11217_v63 = vadd.f32 %v5448_v49, %v3592_v28  ;;  %v5450_v25 = vpop.f32.mrf.mxu1  ;;  %v9143_v28 = vld [vmem:[%s12641_s3 + $0x824] ss:$24 sps:$4 sm:$0xff]   ;;  %v6535_v49 = vld [vmem:[%s12642_s4 + $0x8] sm:$0xff] }
 0x31c   : > { %v3596_v48 = vpop.f32.mrf.mxu0  ;;  %3787 = vmatmul.mubr.bf16.gmra.mxu0 %v9129_v10  ;;  %v9146_v5 = vld [vmem:[%s12640_s2 + $0x814] ss:$24 sps:$4 sm:$0xff]   ;;  %6637 = vperm.xlu0 %8593, %v6535_v49   ;;  %v6538_v49 = vld [vmem:[%s12642_s4 + $0x20] sm:$0xff] }
 0x31d   : > { %v3597_v40 = vadd.f32 %v3596_v48, %v10323_v54  ;;  %v5453_v34 = vpop.f32.mrf.mxu1  ;;  %5644 = vmatmul.mubr.bf16.gmra.mxu1 %v9132_v23  ;;  %3794 = vmatprep.mubr.bf16.mxu0 %v9137_v33  ;;  %v9138_v54 = vld [vmem:[%s12640_s2 + $0x7e0] ss:$24 sps:$4 sm:$0xff]   ;;  %v6536_v23 = vld [vmem:[%s12642_s4 + $0x10] sm:$0xff] }
 0x31e   : > { %v3598_v27 = vpop.f32.mrf.mxu0  ;;  %5651 = vmatprep.mubr.bf16.mxu1 %v9140_v32  ;;  %6642 = vperm.xlu1 %8594, %v6536_v23  }
 0x31f   : > { %v11223_v13 = vadd.f32 %v5453_v34, %v3597_v40  ;;  %v5455_v26 = vpop.f32.mrf.mxu1  ;;  %v6537_v34 = vld [vmem:[%s12642_s4 + $0x18] sm:$0xff] }
 0x320   : > { %v3599_v59 = vpop.f32.mrf.mxu0  ;;  %6652 = vperm.xlu0 %8593, %v6538_v49   ;;  %v6542_v49 = vld [vmem:[%s12642_s4 + $0x40] sm:$0xff] }
 0x321   : > { %v3600_v19 = vadd.f32 %v3599_v59, %v10334_v6  ;;  %v5456_v10 = vpop.f32.mrf.mxu1 }
 0x322   : > { %v3601_v33 = vpop.f32.mrf.mxu0  ;;  %6647 = vperm.xlu1 %8594, %v6537_v34   ;;  %v6540_v34 = vld [vmem:[%s12642_s4 + $0x30] sm:$0xff] }
 0x323   : > { %v11244_v6 = vadd.f32 %v5456_v10, %v3600_v19  ;;  %v5458_v32 = vpop.f32.mrf.mxu1  ;;  %v9149_v10 = vld [vmem:[%s12641_s3 + $0x854] ss:$24 sps:$4 sm:$0xff]   ;;  %v9152_v33 = vld [vmem:[%s12640_s2 + $0x844] ss:$24 sps:$4 sm:$0xff]  }
 0x324   : > { %v3604_v25 = vpop.f32.mrf.mxu0  ;;  %3795 = vmatmul.mubr.bf16.gmra.mxu0 %v9135_v52  ;;  %v9141_v52 = vld [vmem:[%s12641_s3 + $0x820] ss:$24 sps:$4 sm:$0xff]   ;;  %6662 = vperm.xlu0 %8593, %v6540_v34   ;;  %v6544_v34 = vld [vmem:[%s12642_s4 + $0x50] sm:$0xff] }
 0x325   : > { %v3605_v48 = vadd.f32 %v3604_v25, %v10339_v20  ;;  %v5461_v40 = vpop.f32.mrf.mxu1  ;;  %5652 = vmatmul.mubr.bf16.gmra.mxu1 %v9138_v54  ;;  %3802 = vmatprep.mubr.bf16.mxu0 %v9143_v28  ;;  %v9144_v20 = vld [vmem:[%s12640_s2 + $0x810] ss:$24 sps:$4 sm:$0xff]  }
 0x326   : > { %v3606_v47 = vpop.f32.mrf.mxu0  ;;  %5659 = vmatprep.mubr.bf16.mxu1 %v9146_v5  ;;  %v6539_v28 = vld [vmem:[%s12642_s4 + $0x28] sm:$0xff] }
 0x327   : > { %v11250_v27 = vadd.f32 %v5461_v40, %v3605_v48  ;;  %v5463_v26 = vpop.f32.mrf.mxu1  ;;  %6657 = vperm.xlu1 %8594, %v6539_v28   ;;  %v6541_v40 = vld [vmem:[%s12642_s4 + $0x38] sm:$0xff]  ;;  %v6543_v28 = vld [vmem:[%s12642_s4 + $0x48] sm:$0xff] }
 0x328   : > { %v3607_v59 = vpop.f32.mrf.mxu0  ;;  %6672 = vperm.xlu0 %8593, %v6542_v49   ;;  %v6546_v49 = vld [vmem:[%s12642_s4 + $0x60] sm:$0xff] }
 0x329   : > { %v3608_v54 = vadd.f32 %v3607_v59, %v10350_v37  ;;  %v5464_v19 = vpop.f32.mrf.mxu1 }
 0x32a   : > { %v3609_v23 = vpop.f32.mrf.mxu0 }
 0x32b   : > { %v11271_v37 = vadd.f32 %v5464_v19, %v3608_v54  ;;  %v5466_v5 = vpop.f32.mrf.mxu1  ;;  %6667 = vperm.xlu1 %8594, %v6541_v40   ;;  %v6545_v40 = vld [vmem:[%s12642_s4 + $0x58] sm:$0xff] }
 0x32c   : > { %v3612_v32 = vpop.f32.mrf.mxu0  ;;  %3803 = vmatmul.mubr.bf16.gmra.mxu0 %v9141_v52  ;;  %6682 = vperm.xlu0 %8593, %v6544_v34   ;;  %v6548_v34 = vld [vmem:[%s12642_s4 + $0x70] sm:$0xff] }
 0x32d   : > { %v3613_v25 = vadd.f32 %v3612_v32, %v10355_v51  ;;  %v5469_v48 = vpop.f32.mrf.mxu1  ;;  %5660 = vmatmul.mubr.bf16.gmra.mxu1 %v9144_v20  ;;  %3810 = vmatprep.mubr.bf16.mxu0 %v9149_v10  ;;  %v9147_v51 = vld [vmem:[%s12641_s3 + $0x850] ss:$24 sps:$4 sm:$0xff]   ;;  %v9150_v20 = vld [vmem:[%s12640_s2 + $0x840] ss:$24 sps:$4 sm:$0xff]   ;;  %v9155_v10 = vld [vmem:[%s12641_s3 + $0x884] ss:$24 sps:$4 sm:$0xff]  }
 0x32e   : > { %v3614_v47 = vpop.f32.mrf.mxu0  ;;  %5667 = vmatprep.mubr.bf16.mxu1 %v9152_v33  ;;  %v9158_v33 = vld [vmem:[%s12640_s2 + $0x874] ss:$24 sps:$4 sm:$0xff]  }
 0x32f   : > { %v11280_v26 = vadd.f32 %v5469_v48, %v3613_v25  ;;  %v5471_v59 = vpop.f32.mrf.mxu1  ;;  %6677 = vperm.xlu1 %8594, %v6543_v28   ;;  %v6547_v28 = vld [vmem:[%s12642_s4 + $0x68] sm:$0xff] }
 0x330   : > { %v3615_v52 = vpop.f32.mrf.mxu0  ;;  %6692 = vperm.xlu0 %8593, %v6546_v49   ;;  %v6551_v49 = vld [vmem:[%s12642_s4 + $0x88] sm:$0xff] }
 0x331   : > { %v3616_v54 = vadd.f32 %v3615_v52, %v10366_v9  ;;  %v5472_v19 = vpop.f32.mrf.mxu1 }
 0x332   : > { %v3617_v23 = vpop.f32.mrf.mxu0 }
 0x333   : > { %v11301_v9 = vadd.f32 %v5472_v19, %v3616_v54  ;;  %v5474_v5 = vpop.f32.mrf.mxu1  ;;  %6687 = vperm.xlu1 %8594, %v6545_v40   ;;  %v6549_v40 = vld [vmem:[%s12642_s4 + $0x78] sm:$0xff] }
 0x334   : > { %v3620_v32 = vpop.f32.mrf.mxu0  ;;  %3811 = vmatmul.mubr.bf16.gmra.mxu0 %v9147_v51  ;;  %6702 = vperm.xlu0 %8593, %v6548_v34  }
 0x335   : > { %v3621_v25 = vadd.f32 %v3620_v32, %v10371_v22  ;;  %v5477_v48 = vpop.f32.mrf.mxu1  ;;  %5668 = vmatmul.mubr.bf16.gmra.mxu1 %v9150_v20  ;;  %3818 = vmatprep.mubr.bf16.mxu0 %v9155_v10  ;;  %v9153_v22 = vld [vmem:[%s12641_s3 + $0x880] ss:$24 sps:$4 sm:$0xff]   ;;  %v9156_v20 = vld [vmem:[%s12640_s2 + $0x870] ss:$24 sps:$4 sm:$0xff]   ;;  %v9161_v10 = vld [vmem:[%s12641_s3 + $0x8b4] ss:$24 sps:$4 sm:$0xff]  }
 0x336   : > { %v3622_v47 = vpop.f32.mrf.mxu0  ;;  %5675 = vmatprep.mubr.bf16.mxu1 %v9158_v33  ;;  %v9164_v33 = vld [vmem:[%s12640_s2 + $0x8a4] ss:$24 sps:$4 sm:$0xff]  }
 0x337   : > { %v11310_v59 = vadd.f32 %v5477_v48, %v3621_v25  ;;  %v5479_v52 = vpop.f32.mrf.mxu1  ;;  %6697 = vperm.xlu1 %8594, %v6547_v28   ;;  %v9167_v28 = vld [vmem:[%s12641_s3 + $0x8e4] ss:$24 sps:$4 sm:$0xff]  }
 0x338   : > { %v3623_v51 = vpop.f32.mrf.mxu0 }
 0x339   : > { %v3624_v54 = vadd.f32 %v3623_v51, %v10382_v45  ;;  %v5480_v19 = vpop.f32.mrf.mxu1 }
 0x33a   : > { %v3625_v23 = vpop.f32.mrf.mxu0 }
 0x33b   : > { %v11331_v45 = vadd.f32 %v5480_v19, %v3624_v54  ;;  %v5482_v5 = vpop.f32.mrf.mxu1  ;;  %6707 = vperm.xlu1 %8594, %v6549_v40   ;;  %v12697_v54 = vld [vmem:[#allocation2_spill] sm:$0xff]  ;;  %v12698_v40 = vld [vmem:[#allocation3_spill] sm:$0xff] }
 0x33c   : > { %v3628_v32 = vpop.f32.mrf.mxu0  ;;  %3819 = vmatmul.mubr.bf16.gmra.mxu0 %v9153_v22  ;;  %v6550_v23 = vld [vmem:[%s12642_s4 + $0x80] sm:$0xff]  ;;  %v9170_v5 = vld [vmem:[%s12640_s2 + $0x8d4] ss:$24 sps:$4 sm:$0xff]  }
 0x33d   : > { %v3629_v25 = vadd.f32 %v3628_v32, %v10387_v62  ;;  %v5485_v48 = vpop.f32.mrf.mxu1  ;;  %5676 = vmatmul.mubr.bf16.gmra.mxu1 %v9156_v20  ;;  %3826 = vmatprep.mubr.bf16.mxu0 %v9161_v10  ;;  %v9159_v62 = vld [vmem:[%s12641_s3 + $0x8b0] ss:$24 sps:$4 sm:$0xff]   ;;  %v9162_v20 = vld [vmem:[%s12640_s2 + $0x8a0] ss:$24 sps:$4 sm:$0xff]  }
 0x33e   : > { %v3630_v47 = vpop.f32.mrf.mxu0  ;;  %5683 = vmatprep.mubr.bf16.mxu1 %v9164_v33  ;;  %6712 = vperm.xlu0 %8593, %v6550_v23  }
 0x33f   : > { %v11340_v52 = vadd.f32 %v5485_v48, %v3629_v25  ;;  %v5487_v51 = vpop.f32.mrf.mxu1  ;;  %6717 = vperm.xlu1 %8594, %v6551_v49   ;;  %v12699_v49 = vld [vmem:[#allocation4_spill] sm:$0xff] }
 0x340   : > { %v3631_v22 = vpop.f32.mrf.mxu0  ;;  %v6553_v51 = vld [vmem:[%s12642_s4 + $0x98] sm:$0xff] }
 0x341   : > { %v3632_v19 = vadd.f32 %v3631_v22, %v12697_v54  ;;  %v5488_v10 = vpop.f32.mrf.mxu1  ;;  %v6552_v22 = vld [vmem:[%s12642_s4 + $0x90] sm:$0xff] }
 0x342   : > { %v3633_v33 = vpop.f32.mrf.mxu0  ;;  %6722 = vperm.xlu0 %8593, %v6552_v22  }
 0x343   : > { %v11361_v32 = vadd.f32 %v5488_v10, %v3632_v19  ;;  %v5490_v25 = vpop.f32.mrf.mxu1  ;;  %6727 = vperm.xlu1 %8594, %v6553_v51  }
 0x344   : > { %v3636_v48 = vpop.f32.mrf.mxu0  ;;  %3827 = vmatmul.mubr.bf16.gmra.mxu0 %v9159_v62  ;;  %v6555_v25 = vld [vmem:[%s12642_s4 + $0xa8] sm:$0xff] }
 0x345   : > { %v3637_v34 = vadd.f32 %v3636_v48, %v12698_v40  ;;  %v5493_v47 = vpop.f32.mrf.mxu1  ;;  %5684 = vmatmul.mubr.bf16.gmra.mxu1 %v9162_v20  ;;  %3834 = vmatprep.mubr.bf16.mxu0 %v9167_v28  ;;  %v9165_v20 = vld [vmem:[%s12641_s3 + $0x8e0] ss:$24 sps:$4 sm:$0xff]   ;;  %v9168_v28 = vld [vmem:[%s12640_s2 + $0x8d0] ss:$24 sps:$4 sm:$0xff]  }
 0x346   : > { %v3638_v54 = vpop.f32.mrf.mxu0  ;;  %5691 = vmatprep.mubr.bf16.mxu1 %v9170_v5  ;;  %v9173_v5 = vld [vmem:[%s12640_s2 + $0xc] ss:$24 sps:$4 sm:$0xff]  }
 0x347   : > { %v11370_v19 = vadd.f32 %v5493_v47, %v3637_v34  ;;  %v5495_v10 = vpop.f32.mrf.mxu1  ;;  %v6554_v48 = vld [vmem:[%s12642_s4 + $0xa0] sm:$0xff]  ;;  %v9176_v34 = vld [vmem:[%s12640_s2 + $0x14] ss:$24 sps:$4 sm:$0xff]   ;;  %6737 = vperm.xlu1 %8594, %v6555_v25   ;;  %v12701_v54 = vld [vmem:[#allocation5_spill] sm:$0xff] }
 0x348   : > { %v3639_v62 = vpop.f32.mrf.mxu0  ;;  %6732 = vperm.xlu0 %8593, %v6554_v48   ;;  %v12703_v48 = vld [vmem:[#allocation6_spill] sm:$0xff] }
 0x349   : > { %v3640_v23 = vadd.f32 %v3639_v62, %v12699_v49  ;;  %v5496_v33 = vpop.f32.mrf.mxu1  ;;  %v6557_v49 = vld [vmem:[%s12642_s4 + $0xb8] sm:$0xff] }
 0x34a   : > { %v3641_v40 = vpop.f32.mrf.mxu0 }
 0x34b   : > { %v11391_v47 = vadd.f32 %v5496_v33, %v3640_v23  ;;  %v5498_v51 = vpop.f32.mrf.mxu1  ;;  %v6556_v40 = vld [vmem:[%s12642_s4 + $0xb0] sm:$0xff]  ;;  %6747 = vperm.xlu1 %8594, %v6557_v49   ;;  %v9182_v49 = vld [vmem:[%s12640_s2 + $0x44] ss:$24 sps:$4 sm:$0xff]  }
 0x34c   : > { %v3644_v22 = vpop.f32.mrf.mxu0  ;;  %3835 = vmatmul.mubr.bf16.gmra.mxu0 %v9165_v20  ;;  %6742 = vperm.xlu0 %8593, %v6556_v40  }
 0x34d   : > { %12700 = vst [vmem:[#allocation2_spill] sm:$0xff] %v11391_v47  ;;  %v3645_v10 = vadd.f32 %v3644_v22, %v12701_v54  ;;  %v5501_v62 = vpop.f32.mrf.mxu1  ;;  %5692 = vmatmul.mubr.bf16.gmra.mxu1 %v9168_v28  ;;  %5732 = vmatprep.mubr.bf16.mxu0 %v9173_v5  ;;  %v9171_v28 = vld [vmem:[%s12640_s2 + $0x8] ss:$24 sps:$4 sm:$0xff]   ;;  %v6560_v47 = vld [vmem:[%s12642_s4 + $0xd0] sm:$0xff] }
 0x34e   : > { %v3646_v25 = vpop.f32.mrf.mxu0  ;;  %6149 = vmatprep.mubr.bf16.mxu1 %v9176_v34  ;;  %v9174_v5 = vld [vmem:[%s12640_s2 + $0x10] ss:$24 sps:$4 sm:$0xff]   ;;  %v9179_v34 = vld [vmem:[%s12640_s2 + $0x3c] ss:$24 sps:$4 sm:$0xff]  }
 0x34f   : > { %v11400_v23 = vadd.f32 %v5501_v62, %v3645_v10  ;;  %v5503_v33 = vpop.f32.mrf.mxu1  ;;  %v6559_v54 = vld [vmem:[%s12642_s4 + $0xc8] sm:$0xff]  ;;  %v6558_v10 = vld [vmem:[%s12642_s4 + $0xc0] sm:$0xff] }
 0x350   : > { %v3647_v20 = vpop.f32.mrf.mxu0  ;;  %6757 = vperm.xlu1 %8594, %v6559_v54   ;;  %6752 = vperm.xlu0 %8593, %v6558_v10   ;;  %v12707_v10 = vld [vmem:[#allocation8_spill] sm:$0xff] }
 0x351   : > { %12702 = vst [vmem:[#allocation3_spill] sm:$0xff] %v11400_v23  ;;  %v3648_v51 = vadd.f32 %v3647_v20, %v12703_v48  ;;  %v5504_v22 = vpop.f32.mrf.mxu1  ;;  %v12705_v20 = vld [vmem:[#allocation7_spill] sm:$0xff] }
 0x352   : > { %v3649_v62 = vpop.f32.mrf.mxu0 }
 0x353   : > { %v11421_v40 = vadd.f32 %v5504_v22, %v3648_v51  ;;  %v5506_v25 = vpop.f32.mrf.mxu1  ;;  %v6561_v62 = vld [vmem:[%s12642_s4 + $0xd8] sm:$0xff] }
 0x354   : > { %v3652_v33 = vpop.f32.mrf.mxu0  ;;  %5733 = vmatmul.mubr.bf16.vlgmr.msra.gmra.mxu0 %v9171_v28  ;;  %6767 = vperm.xlu1 %8594, %v6561_v62  }
 0x355   : > { %12704 = vst [vmem:[#allocation4_spill] sm:$0xff] %v11421_v40  ;;  %v3653_v48 = vadd.f32 %v3652_v33, %v12705_v20  ;;  %v5509_v23 = vpop.f32.mrf.mxu1  ;;  %6150 = vmatmul.mubr.bf16.vlgmr.msra.gmra.mxu1 %v9174_v5  ;;  %5740 = vmatprep.mubr.bf16.mxu0 %v9179_v34  ;;  %v9177_v5 = vld [vmem:[%s12640_s2 + $0x38] ss:$24 sps:$4 sm:$0xff]  }
 0x356   : > { %v3654_v54 = vpop.f32.mrf.mxu0  ;;  %6157 = vmatprep.mubr.bf16.mxu1 %v9182_v49  ;;  %6762 = vperm.xlu0 %8593, %v6560_v47   ;;  %v9180_v34 = vld [vmem:[%s12640_s2 + $0x40] ss:$24 sps:$4 sm:$0xff]   ;;  %v9185_v49 = vld [vmem:[%s12640_s2 + $0x6c] ss:$24 sps:$4 sm:$0xff]   ;;  %v6564_v40 = vld [vmem:[%s12642_s4 + $0xf0] sm:$0xff] }
 0x357   : > { %v11430_v51 = vadd.f32 %v5509_v23, %v3653_v48  ;;  %v5511_v22 = vpop.f32.mrf.mxu1  ;;  %v6563_v47 = vld [vmem:[%s12642_s4 + $0xe8] sm:$0xff]  ;;  %v6562_v23 = vld [vmem:[%s12642_s4 + $0xe0] sm:$0xff] }
 0x358   : > { %v3655_v28 = vpop.f32.mrf.mxu0  ;;  %v9188_v48 = vld [vmem:[%s12640_s2 + $0x74] ss:$24 sps:$4 sm:$0xff]   ;;  %6777 = vperm.xlu1 %8594, %v6563_v47  }
 0x359   : > { %12706 = vst [vmem:[#allocation5_spill] sm:$0xff] %v11430_v51  ;;  %v3656_v25 = vadd.f32 %v3655_v28, %v12707_v10  ;;  %v5512_v33 = vpop.f32.mrf.mxu1  ;;  %v12708_v28 = vld [vmem:[#allocation9_spill] sm:$0xff] }
 0x35a   : > { %v3657_v20 = vpop.f32.mrf.mxu0  ;;  %6772 = vperm.xlu0 %8593, %v6562_v23  }
 0x35b   : > { %v11451_v62 = vadd.f32 %v5512_v33, %v3656_v25  ;;  %v5514_v54 = vpop.f32.mrf.mxu1  ;;  %v6565_v20 = vld [vmem:[%s12642_s4 + $0xf8] sm:$0xff] }
 0x35c   : > { %v3660_v22 = vpop.f32.mrf.mxu0  ;;  %5741 = vmatmul.mubr.bf16.gmra.mxu0 %v9177_v5  ;;  %6787 = vperm.xlu1 %8594, %v6565_v20  }
 0x35d   : > { %v3661_v10 = vadd.f32 %v3660_v22, %v12708_v28  ;;  %v5517_v51 = vpop.f32.mrf.mxu1  ;;  %6158 = vmatmul.mubr.bf16.gmra.mxu1 %v9180_v34  ;;  %5748 = vmatprep.mubr.bf16.mxu0 %v9185_v49  ;;  %v9183_v34 = vld [vmem:[%s12640_s2 + $0x68] ss:$24 sps:$4 sm:$0xff]   ;;  %v9194_v28 = vld [vmem:[%s12640_s2 + $0xa4] ss:$24 sps:$4 sm:$0xff]  }
 0x35e   : > { %v3662_v47 = vpop.f32.mrf.mxu0  ;;  %6165 = vmatprep.mubr.bf16.mxu1 %v9188_v48  ;;  %6782 = vperm.xlu0 %8593, %v6564_v40   ;;  %v9186_v49 = vld [vmem:[%s12640_s2 + $0x70] ss:$24 sps:$4 sm:$0xff]   ;;  %v9191_v48 = vld [vmem:[%s12640_s2 + $0x9c] ss:$24 sps:$4 sm:$0xff]  }
 0x35f   : > { %v11460_v25 = vadd.f32 %v5517_v51, %v3661_v10  ;;  %v5519_v33 = vpop.f32.mrf.mxu1  ;;  %v6567_v40 = vld [vmem:[%s12642_s4 + $0x108] sm:$0xff]  ;;  %v6566_v51 = vld [vmem:[%s12642_s4 + $0x100] sm:$0xff] }
 0x360   : > { %v3663_v5 = vpop.f32.mrf.mxu0  ;;  %6797 = vperm.xlu1 %8594, %v6567_v40   ;;  %v12711_v47 = vld [vmem:[#allocation10_spill] sm:$0xff] }
 0x361   : > { %12709 = vst [vmem:[#allocation6_spill] sm:$0xff] %v11460_v25  ;;  %v3664_v23 = vadd.f32 %v3663_v5, %v10488_v50  ;;  %v5520_v54 = vpop.f32.mrf.mxu1  ;;  %v6568_v25 = vld [vmem:[%s12642_s4 + $0x110] sm:$0xff] }
 0x362   : > { %v3665_v22 = vpop.f32.mrf.mxu0  ;;  %6792 = vperm.xlu0 %8593, %v6566_v51  }
 0x363   : > { %v11481_v50 = vadd.f32 %v5520_v54, %v3664_v23  ;;  %v5522_v10 = vpop.f32.mrf.mxu1  ;;  %v6569_v22 = vld [vmem:[%s12642_s4 + $0x118] sm:$0xff] }
 0x364   : > { %v3668_v20 = vpop.f32.mrf.mxu0  ;;  %5749 = vmatmul.mubr.bf16.gmra.mxu0 %v9183_v34  ;;  %6807 = vperm.xlu1 %8594, %v6569_v22  }
 0x365   : > { %12710 = vst [vmem:[#allocation7_spill] sm:$0xff] %v11481_v50  ;;  %v3669_v33 = vadd.f32 %v3668_v20, %v12711_v47  ;;  %v5525_v5 = vpop.f32.mrf.mxu1  ;;  %6166 = vmatmul.mubr.bf16.gmra.mxu1 %v9186_v49  ;;  %5756 = vmatprep.mubr.bf16.mxu0 %v9191_v48  ;;  %v9189_v49 = vld [vmem:[%s12640_s2 + $0x98] ss:$24 sps:$4 sm:$0xff]   ;;  %v6570_v20 = vld [vmem:[%s12642_s4 + $0x120] sm:$0xff] }
 0x366   : > { %v3670_v40 = vpop.f32.mrf.mxu0  ;;  %6173 = vmatprep.mubr.bf16.mxu1 %v9194_v28  ;;  %6802 = vperm.xlu0 %8593, %v6568_v25   ;;  %v9192_v48 = vld [vmem:[%s12640_s2 + $0xa0] ss:$24 sps:$4 sm:$0xff]   ;;  %v9197_v28 = vld [vmem:[%s12640_s2 + $0xcc] ss:$24 sps:$4 sm:$0xff]  }
 0x367   : > { %v11490_v23 = vadd.f32 %v5525_v5, %v3669_v33  ;;  %v5527_v54 = vpop.f32.mrf.mxu1  ;;  %v6571_v25 = vld [vmem:[%s12642_s4 + $0x128] sm:$0xff] }
 0x368   : > { %v3671_v34 = vpop.f32.mrf.mxu0  ;;  %v9200_v33 = vld [vmem:[%s12640_s2 + $0xd4] ss:$24 sps:$4 sm:$0xff]   ;;  %6817 = vperm.xlu1 %8594, %v6571_v25  }
 0x369   : > { %12712 = vst [vmem:[#allocation8_spill] sm:$0xff] %v11490_v23  ;;  %v3672_v51 = vadd.f32 %v3671_v34, %v10516_v44  ;;  %v5528_v10 = vpop.f32.mrf.mxu1  ;;  %v6573_v34 = vld [vmem:[%s12642_s4 + $0x138] sm:$0xff] }
 0x36a   : > { %v3673_v47 = vpop.f32.mrf.mxu0  ;;  %6812 = vperm.xlu0 %8593, %v6570_v20   ;;  %v9285_v23 = vld [vmem:[%s12640_s2 + $0x398] ss:$24 sps:$4 sm:$0xff]  }
 0x36b   : > { %v11511_v44 = vadd.f32 %v5528_v10, %v3672_v51  ;;  %v5530_v5 = vpop.f32.mrf.mxu1  ;;  %v6572_v47 = vld [vmem:[%s12642_s4 + $0x130] sm:$0xff] }
 0x36c   : > { %v3676_v22 = vpop.f32.mrf.mxu0  ;;  %5757 = vmatmul.mubr.bf16.gmra.mxu0 %v9189_v49  ;;  %6827 = vperm.xlu1 %8594, %v6573_v34   ;;  %v9206_v34 = vld [vmem:[%s12640_s2 + $0x104] ss:$24 sps:$4 sm:$0xff]  }
 0x36d   : > { %12713 = vst [vmem:[#allocation9_spill] sm:$0xff] %v11511_v44  ;;  %v3677_v40 = vadd.f32 %v3676_v22, %v10523_v11  ;;  %v5533_v54 = vpop.f32.mrf.mxu1  ;;  %6174 = vmatmul.mubr.bf16.gmra.mxu1 %v9192_v48  ;;  %5764 = vmatprep.mubr.bf16.mxu0 %v9197_v28  ;;  %v9195_v11 = vld [vmem:[%s12640_s2 + $0xc8] ss:$24 sps:$4 sm:$0xff]   ;;  %v6576_v44 = vld [vmem:[%s12642_s4 + $0x150] sm:$0xff] }
 0x36e   : > { %v3678_v25 = vpop.f32.mrf.mxu0  ;;  %6181 = vmatprep.mubr.bf16.mxu1 %v9200_v33  ;;  %6822 = vperm.xlu0 %8593, %v6572_v47   ;;  %v9198_v48 = vld [vmem:[%s12640_s2 + $0xd0] ss:$24 sps:$4 sm:$0xff]   ;;  %v9203_v33 = vld [vmem:[%s12640_s2 + $0xfc] ss:$24 sps:$4 sm:$0xff]  }
 0x36f   : > { %v11520_v51 = vadd.f32 %v5533_v54, %v3677_v40  ;;  %v5535_v10 = vpop.f32.mrf.mxu1  ;;  %v12715_v28 = vld [vmem:[#allocation11_spill] sm:$0xff]  ;;  %v6574_v40 = vld [vmem:[%s12642_s4 + $0x140] sm:$0xff] }
 0x370   : > { %v3679_v49 = vpop.f32.mrf.mxu0  ;;  %v6575_v22 = vld [vmem:[%s12642_s4 + $0x148] sm:$0xff] }
 0x371   : > { %12714 = vst [vmem:[#allocation10_spill] sm:$0xff] %v11520_v51  ;;  %v3680_v20 = vadd.f32 %v3679_v49, %v12715_v28  ;;  %v5536_v5 = vpop.f32.mrf.mxu1  ;;  %6837 = vperm.xlu1 %8594, %v6575_v22   ;;  %v12717_v49 = vld [vmem:[#allocation12_spill] sm:$0xff] }
 0x372   : > { %v3681_v54 = vpop.f32.mrf.mxu0  ;;  %6832 = vperm.xlu0 %8593, %v6574_v40   ;;  %v12719_v40 = vld [vmem:[#allocation13_spill] sm:$0xff] }
 0x373   : > { %v11541_v47 = vadd.f32 %v5536_v5, %v3680_v20  ;;  %v5538_v25 = vpop.f32.mrf.mxu1  ;;  %v6577_v54 = vld [vmem:[%s12642_s4 + $0x158] sm:$0xff] }
 0x374   : > { %v3684_v10 = vpop.f32.mrf.mxu0  ;;  %5765 = vmatmul.mubr.bf16.gmra.mxu0 %v9195_v11 }
 0x375   : > { %12716 = vst [vmem:[#allocation11_spill] sm:$0xff] %v11541_v47  ;;  %v3685_v28 = vadd.f32 %v3684_v10, %v12717_v49  ;;  %v5541_v51 = vpop.f32.mrf.mxu1  ;;  %6182 = vmatmul.mubr.bf16.gmra.mxu1 %v9198_v48  ;;  %5772 = vmatprep.mubr.bf16.mxu0 %v9203_v33  ;;  %v9201_v48 = vld [vmem:[%s12640_s2 + $0xf8] ss:$24 sps:$4 sm:$0xff]  }
 0x376   : > { %v3686_v22 = vpop.f32.mrf.mxu0  ;;  %6189 = vmatprep.mubr.bf16.mxu1 %v9206_v34  ;;  %6847 = vperm.xlu1 %8594, %v6577_v54   ;;  %v9204_v33 = vld [vmem:[%s12640_s2 + $0x100] ss:$24 sps:$4 sm:$0xff]   ;;  %v9209_v34 = vld [vmem:[%s12640_s2 + $0x12c] ss:$24 sps:$4 sm:$0xff]   ;;  %v6580_v47 = vld [vmem:[%s12642_s4 + $0x170] sm:$0xff] }
 0x377   : > { %v11550_v20 = vadd.f32 %v5541_v51, %v3685_v28  ;;  %v5543_v5 = vpop.f32.mrf.mxu1  ;;  %6842 = vperm.xlu0 %8593, %v6576_v44   ;;  %v6579_v44 = vld [vmem:[%s12642_s4 + $0x168] sm:$0xff]  ;;  %v6578_v51 = vld [vmem:[%s12642_s4 + $0x160] sm:$0xff] }
 0x378   : > { %v3687_v11 = vpop.f32.mrf.mxu0  ;;  %v9212_v28 = vld [vmem:[%s12640_s2 + $0x134] ss:$24 sps:$4 sm:$0xff]  }
 0x379   : > { %12718 = vst [vmem:[#allocation12_spill] sm:$0xff] %v11550_v20  ;;  %v3688_v25 = vadd.f32 %v3687_v11, %v12719_v40  ;;  %v5544_v10 = vpop.f32.mrf.mxu1  ;;  %v12721_v11 = vld [vmem:[#allocation14_spill] sm:$0xff] }
 0x37a   : > { %v3689_v49 = vpop.f32.mrf.mxu0  ;;  %6857 = vperm.xlu1 %8594, %v6579_v44  }
 0x37b   : > { %v11571_v54 = vadd.f32 %v5544_v10, %v3688_v25  ;;  %v5546_v22 = vpop.f32.mrf.mxu1  ;;  %6852 = vperm.xlu0 %8593, %v6578_v51   ;;  %v6581_v49 = vld [vmem:[%s12642_s4 + $0x178] sm:$0xff]  ;;  %v12723_v51 = vld [vmem:[#allocation15_spill] sm:$0xff] }
 0x37c   : > { %v3692_v5 = vpop.f32.mrf.mxu0  ;;  %5773 = vmatmul.mubr.bf16.gmra.mxu0 %v9201_v48 }
 0x37d   : > { %12720 = vst [vmem:[#allocation13_spill] sm:$0xff] %v11571_v54  ;;  %v3693_v40 = vadd.f32 %v3692_v5, %v12721_v11  ;;  %v5549_v20 = vpop.f32.mrf.mxu1  ;;  %6190 = vmatmul.mubr.bf16.gmra.mxu1 %v9204_v33  ;;  %5780 = vmatprep.mubr.bf16.mxu0 %v9209_v34  ;;  %v9207_v33 = vld [vmem:[%s12640_s2 + $0x128] ss:$24 sps:$4 sm:$0xff]   ;;  %v6584_v54 = vld [vmem:[%s12642_s4 + $0x190] sm:$0xff] }
 0x37e   : > { %v3694_v44 = vpop.f32.mrf.mxu0  ;;  %6197 = vmatprep.mubr.bf16.mxu1 %v9212_v28  ;;  %6867 = vperm.xlu1 %8594, %v6581_v49   ;;  %v9210_v34 = vld [vmem:[%s12640_s2 + $0x130] ss:$24 sps:$4 sm:$0xff]   ;;  %v9215_v28 = vld [vmem:[%s12640_s2 + $0x15c] ss:$24 sps:$4 sm:$0xff]  }
 0x37f   : > { %v11580_v25 = vadd.f32 %v5549_v20, %v3693_v40  ;;  %v5551_v10 = vpop.f32.mrf.mxu1  ;;  %6862 = vperm.xlu0 %8593, %v6580_v47   ;;  %v6583_v47 = vld [vmem:[%s12642_s4 + $0x188] sm:$0xff]  ;;  %v6582_v20 = vld [vmem:[%s12642_s4 + $0x180] sm:$0xff] }
 0x380   : > { %v3695_v48 = vpop.f32.mrf.mxu0  ;;  %v9218_v40 = vld [vmem:[%s12640_s2 + $0x164] ss:$24 sps:$4 sm:$0xff]  }
 0x381   : > { %12722 = vst [vmem:[#allocation14_spill] sm:$0xff] %v11580_v25  ;;  %v3696_v22 = vadd.f32 %v3695_v48, %v12723_v51  ;;  %v5552_v5 = vpop.f32.mrf.mxu1  ;;  %v12725_v48 = vld [vmem:[#allocation16_spill] sm:$0xff] }
 0x382   : > { %v3697_v11 = vpop.f32.mrf.mxu0  ;;  %6877 = vperm.xlu1 %8594, %v6583_v47  }
 0x383   : > { %v11601_v49 = vadd.f32 %v5552_v5, %v3696_v22  ;;  %v5554_v44 = vpop.f32.mrf.mxu1  ;;  %6872 = vperm.xlu0 %8593, %v6582_v20   ;;  %v6585_v11 = vld [vmem:[%s12642_s4 + $0x198] sm:$0xff] }
 0x384   : > { %v3700_v10 = vpop.f32.mrf.mxu0  ;;  %5781 = vmatmul.mubr.bf16.gmra.mxu0 %v9207_v33  ;;  %v12727_v20 = vld [vmem:[#allocation17_spill] sm:$0xff] }
 0x385   : > { %12724 = vst [vmem:[#allocation15_spill] sm:$0xff] %v11601_v49  ;;  %v3701_v51 = vadd.f32 %v3700_v10, %v12725_v48  ;;  %v5557_v25 = vpop.f32.mrf.mxu1  ;;  %6198 = vmatmul.mubr.bf16.gmra.mxu1 %v9210_v34  ;;  %5788 = vmatprep.mubr.bf16.mxu0 %v9215_v28  ;;  %v9213_v34 = vld [vmem:[%s12640_s2 + $0x158] ss:$24 sps:$4 sm:$0xff]  }
 0x386   : > { %v3702_v47 = vpop.f32.mrf.mxu0  ;;  %6205 = vmatprep.mubr.bf16.mxu1 %v9218_v40  ;;  %6887 = vperm.xlu1 %8594, %v6585_v11   ;;  %v9216_v28 = vld [vmem:[%s12640_s2 + $0x160] ss:$24 sps:$4 sm:$0xff]   ;;  %v9221_v40 = vld [vmem:[%s12640_s2 + $0x18c] ss:$24 sps:$4 sm:$0xff]   ;;  %v6588_v49 = vld [vmem:[%s12642_s4 + $0x1b0] sm:$0xff] }
 0x387   : > { %v11610_v22 = vadd.f32 %v5557_v25, %v3701_v51  ;;  %v5559_v5 = vpop.f32.mrf.mxu1  ;;  %6882 = vperm.xlu0 %8593, %v6584_v54   ;;  %v6587_v54 = vld [vmem:[%s12642_s4 + $0x1a8] sm:$0xff]  ;;  %v6586_v25 = vld [vmem:[%s12642_s4 + $0x1a0] sm:$0xff] }
 0x388   : > { %v3703_v33 = vpop.f32.mrf.mxu0  ;;  %v9224_v51 = vld [vmem:[%s12640_s2 + $0x194] ss:$24 sps:$4 sm:$0xff]  }
 0x389   : > { %12726 = vst [vmem:[#allocation16_spill] sm:$0xff] %v11610_v22  ;;  %v3704_v44 = vadd.f32 %v3703_v33, %v12727_v20  ;;  %v5560_v10 = vpop.f32.mrf.mxu1  ;;  %v12729_v33 = vld [vmem:[#allocation18_spill] sm:$0xff] }
 0x38a   : > { %v3705_v48 = vpop.f32.mrf.mxu0  ;;  %6897 = vperm.xlu1 %8594, %v6587_v54  }
 0x38b   : > { %v11631_v11 = vadd.f32 %v5560_v10, %v3704_v44  ;;  %v5562_v47 = vpop.f32.mrf.mxu1  ;;  %6892 = vperm.xlu0 %8593, %v6586_v25   ;;  %v6589_v48 = vld [vmem:[%s12642_s4 + $0x1b8] sm:$0xff]  ;;  %v12731_v25 = vld [vmem:[#allocation19_spill] sm:$0xff] }
 0x38c   : > { %v3708_v5 = vpop.f32.mrf.mxu0  ;;  %5789 = vmatmul.mubr.bf16.gmra.mxu0 %v9213_v34 }
 0x38d   : > { %12728 = vst [vmem:[#allocation17_spill] sm:$0xff] %v11631_v11  ;;  %v3709_v20 = vadd.f32 %v3708_v5, %v12729_v33  ;;  %v5565_v22 = vpop.f32.mrf.mxu1  ;;  %6206 = vmatmul.mubr.bf16.gmra.mxu1 %v9216_v28  ;;  %5796 = vmatprep.mubr.bf16.mxu0 %v9221_v40  ;;  %v9219_v28 = vld [vmem:[%s12640_s2 + $0x188] ss:$24 sps:$4 sm:$0xff]   ;;  %v6592_v11 = vld [vmem:[%s12642_s4 + $0x1d0] sm:$0xff] }
 0x38e   : > { %v3710_v54 = vpop.f32.mrf.mxu0  ;;  %6213 = vmatprep.mubr.bf16.mxu1 %v9224_v51  ;;  %6907 = vperm.xlu1 %8594, %v6589_v48   ;;  %v9222_v40 = vld [vmem:[%s12640_s2 + $0x190] ss:$24 sps:$4 sm:$0xff]   ;;  %v9227_v51 = vld [vmem:[%s12640_s2 + $0x1bc] ss:$24 sps:$4 sm:$0xff]  }
 0x38f   : > { %v11640_v44 = vadd.f32 %v5565_v22, %v3709_v20  ;;  %v5567_v10 = vpop.f32.mrf.mxu1  ;;  %6902 = vperm.xlu0 %8593, %v6588_v49   ;;  %v6591_v49 = vld [vmem:[%s12642_s4 + $0x1c8] sm:$0xff]  ;;  %v6590_v22 = vld [vmem:[%s12642_s4 + $0x1c0] sm:$0xff] }
 0x390   : > { %v3711_v34 = vpop.f32.mrf.mxu0  ;;  %v9230_v20 = vld [vmem:[%s12640_s2 + $0x1c4] ss:$24 sps:$4 sm:$0xff]  }
 0x391   : > { %12730 = vst [vmem:[#allocation18_spill] sm:$0xff] %v11640_v44  ;;  %v3712_v47 = vadd.f32 %v3711_v34, %v12731_v25  ;;  %v5568_v5 = vpop.f32.mrf.mxu1  ;;  %v12733_v34 = vld [vmem:[#allocation20_spill] sm:$0xff] }
 0x392   : > { %v3713_v33 = vpop.f32.mrf.mxu0  ;;  %6917 = vperm.xlu1 %8594, %v6591_v49  }
 0x393   : > { %v11661_v48 = vadd.f32 %v5568_v5, %v3712_v47  ;;  %v5570_v54 = vpop.f32.mrf.mxu1  ;;  %6912 = vperm.xlu0 %8593, %v6590_v22   ;;  %v6593_v33 = vld [vmem:[%s12642_s4 + $0x1d8] sm:$0xff] }
 0x394   : > { %v3716_v10 = vpop.f32.mrf.mxu0  ;;  %5797 = vmatmul.mubr.bf16.gmra.mxu0 %v9219_v28  ;;  %v12735_v22 = vld [vmem:[#allocation21_spill] sm:$0xff] }
 0x395   : > { %12732 = vst [vmem:[#allocation19_spill] sm:$0xff] %v11661_v48  ;;  %v3717_v25 = vadd.f32 %v3716_v10, %v12733_v34  ;;  %v5573_v44 = vpop.f32.mrf.mxu1  ;;  %6214 = vmatmul.mubr.bf16.gmra.mxu1 %v9222_v40  ;;  %5804 = vmatprep.mubr.bf16.mxu0 %v9227_v51  ;;  %v9225_v40 = vld [vmem:[%s12640_s2 + $0x1b8] ss:$24 sps:$4 sm:$0xff]  }
 0x396   : > { %v3718_v49 = vpop.f32.mrf.mxu0  ;;  %6221 = vmatprep.mubr.bf16.mxu1 %v9230_v20  ;;  %6927 = vperm.xlu1 %8594, %v6593_v33   ;;  %v9228_v51 = vld [vmem:[%s12640_s2 + $0x1c0] ss:$24 sps:$4 sm:$0xff]   ;;  %v9233_v20 = vld [vmem:[%s12640_s2 + $0x1ec] ss:$24 sps:$4 sm:$0xff]   ;;  %v6596_v48 = vld [vmem:[%s12642_s4 + $0x1f0] sm:$0xff] }
 0x397   : > { %v11670_v47 = vadd.f32 %v5573_v44, %v3717_v25  ;;  %v5575_v5 = vpop.f32.mrf.mxu1  ;;  %6922 = vperm.xlu0 %8593, %v6592_v11   ;;  %v6595_v11 = vld [vmem:[%s12642_s4 + $0x1e8] sm:$0xff]  ;;  %v6594_v44 = vld [vmem:[%s12642_s4 + $0x1e0] sm:$0xff] }
 0x398   : > { %v3719_v28 = vpop.f32.mrf.mxu0  ;;  %v9236_v25 = vld [vmem:[%s12640_s2 + $0x1f4] ss:$24 sps:$4 sm:$0xff]  }
 0x399   : > { %12734 = vst [vmem:[#allocation20_spill] sm:$0xff] %v11670_v47  ;;  %v3720_v54 = vadd.f32 %v3719_v28, %v12735_v22  ;;  %v5576_v10 = vpop.f32.mrf.mxu1  ;;  %v12737_v28 = vld [vmem:[#allocation22_spill] sm:$0xff] }
 0x39a   : > { %v3721_v34 = vpop.f32.mrf.mxu0  ;;  %6937 = vperm.xlu1 %8594, %v6595_v11  }
 0x39b   : > { %v11691_v33 = vadd.f32 %v5576_v10, %v3720_v54  ;;  %v5578_v49 = vpop.f32.mrf.mxu1  ;;  %6932 = vperm.xlu0 %8593, %v6594_v44   ;;  %v6597_v34 = vld [vmem:[%s12642_s4 + $0x1f8] sm:$0xff]  ;;  %v12739_v44 = vld [vmem:[#allocation23_spill] sm:$0xff] }
 0x39c   : > { %v3724_v5 = vpop.f32.mrf.mxu0  ;;  %5805 = vmatmul.mubr.bf16.gmra.mxu0 %v9225_v40 }
 0x39d   : > { %12736 = vst [vmem:[#allocation21_spill] sm:$0xff] %v11691_v33  ;;  %v3725_v22 = vadd.f32 %v3724_v5, %v12737_v28  ;;  %v5581_v47 = vpop.f32.mrf.mxu1  ;;  %6222 = vmatmul.mubr.bf16.gmra.mxu1 %v9228_v51  ;;  %5812 = vmatprep.mubr.bf16.mxu0 %v9233_v20  ;;  %v9231_v51 = vld [vmem:[%s12640_s2 + $0x1e8] ss:$24 sps:$4 sm:$0xff]   ;;  %v6600_v33 = vld [vmem:[%s12642_s4 + $0x210] sm:$0xff] }
 0x39e   : > { %v3726_v11 = vpop.f32.mrf.mxu0  ;;  %6229 = vmatprep.mubr.bf16.mxu1 %v9236_v25  ;;  %6947 = vperm.xlu1 %8594, %v6597_v34   ;;  %v9234_v20 = vld [vmem:[%s12640_s2 + $0x1f0] ss:$24 sps:$4 sm:$0xff]   ;;  %v9239_v25 = vld [vmem:[%s12640_s2 + $0x21c] ss:$24 sps:$4 sm:$0xff]  }
 0x39f   : > { %v11700_v54 = vadd.f32 %v5581_v47, %v3725_v22  ;;  %v5583_v10 = vpop.f32.mrf.mxu1  ;;  %6942 = vperm.xlu0 %8593, %v6596_v48   ;;  %v6599_v48 = vld [vmem:[%s12642_s4 + $0x208] sm:$0xff]  ;;  %v6598_v47 = vld [vmem:[%s12642_s4 + $0x200] sm:$0xff] }
 0x3a0   : > { %v3727_v40 = vpop.f32.mrf.mxu0  ;;  %v9242_v22 = vld [vmem:[%s12640_s2 + $0x224] ss:$24 sps:$4 sm:$0xff]  }
 0x3a1   : > { %12738 = vst [vmem:[#allocation22_spill] sm:$0xff] %v11700_v54  ;;  %v3728_v49 = vadd.f32 %v3727_v40, %v12739_v44  ;;  %v5584_v5 = vpop.f32.mrf.mxu1  ;;  %v12741_v40 = vld [vmem:[#allocation24_spill] sm:$0xff] }
 0x3a2   : > { %v3729_v28 = vpop.f32.mrf.mxu0  ;;  %6957 = vperm.xlu1 %8594, %v6599_v48  }
 0x3a3   : > { %v11721_v34 = vadd.f32 %v5584_v5, %v3728_v49  ;;  %v5586_v11 = vpop.f32.mrf.mxu1  ;;  %6952 = vperm.xlu0 %8593, %v6598_v47   ;;  %v6601_v28 = vld [vmem:[%s12642_s4 + $0x218] sm:$0xff] }
 0x3a4   : > { %v3732_v10 = vpop.f32.mrf.mxu0  ;;  %5813 = vmatmul.mubr.bf16.gmra.mxu0 %v9231_v51  ;;  %v12743_v47 = vld [vmem:[#allocation25_spill] sm:$0xff] }
 0x3a5   : > { %12740 = vst [vmem:[#allocation23_spill] sm:$0xff] %v11721_v34  ;;  %v3733_v44 = vadd.f32 %v3732_v10, %v12741_v40  ;;  %v5589_v54 = vpop.f32.mrf.mxu1  ;;  %6230 = vmatmul.mubr.bf16.gmra.mxu1 %v9234_v20  ;;  %5820 = vmatprep.mubr.bf16.mxu0 %v9239_v25  ;;  %v9237_v20 = vld [vmem:[%s12640_s2 + $0x218] ss:$24 sps:$4 sm:$0xff]  }
 0x3a6   : > { %v3734_v48 = vpop.f32.mrf.mxu0  ;;  %6237 = vmatprep.mubr.bf16.mxu1 %v9242_v22  ;;  %6967 = vperm.xlu1 %8594, %v6601_v28   ;;  %v9240_v25 = vld [vmem:[%s12640_s2 + $0x220] ss:$24 sps:$4 sm:$0xff]   ;;  %v9245_v22 = vld [vmem:[%s12640_s2 + $0x24c] ss:$24 sps:$4 sm:$0xff]   ;;  %v6604_v34 = vld [vmem:[%s12642_s4 + $0x230] sm:$0xff] }
 0x3a7   : > { %v11730_v49 = vadd.f32 %v5589_v54, %v3733_v44  ;;  %v5591_v5 = vpop.f32.mrf.mxu1  ;;  %6962 = vperm.xlu0 %8593, %v6600_v33   ;;  %v6603_v33 = vld [vmem:[%s12642_s4 + $0x228] sm:$0xff]  ;;  %v6602_v54 = vld [vmem:[%s12642_s4 + $0x220] sm:$0xff] }
 0x3a8   : > { %v3735_v51 = vpop.f32.mrf.mxu0  ;;  %v9248_v44 = vld [vmem:[%s12640_s2 + $0x254] ss:$24 sps:$4 sm:$0xff]  }
 0x3a9   : > { %12742 = vst [vmem:[#allocation24_spill] sm:$0xff] %v11730_v49  ;;  %v3736_v11 = vadd.f32 %v3735_v51, %v12743_v47  ;;  %v5592_v10 = vpop.f32.mrf.mxu1  ;;  %v12745_v51 = vld [vmem:[#allocation26_spill] sm:$0xff] }
 0x3aa   : > { %v3737_v40 = vpop.f32.mrf.mxu0  ;;  %6977 = vperm.xlu1 %8594, %v6603_v33  }
 0x3ab   : > { %v11751_v28 = vadd.f32 %v5592_v10, %v3736_v11  ;;  %v5594_v48 = vpop.f32.mrf.mxu1  ;;  %6972 = vperm.xlu0 %8593, %v6602_v54   ;;  %v6605_v40 = vld [vmem:[%s12642_s4 + $0x238] sm:$0xff]  ;;  %v12747_v54 = vld [vmem:[#allocation27_spill] sm:$0xff] }
 0x3ac   : > { %v3740_v5 = vpop.f32.mrf.mxu0  ;;  %5821 = vmatmul.mubr.bf16.gmra.mxu0 %v9237_v20 }
 0x3ad   : > { %12744 = vst [vmem:[#allocation25_spill] sm:$0xff] %v11751_v28  ;;  %v3741_v47 = vadd.f32 %v3740_v5, %v12745_v51  ;;  %v5597_v49 = vpop.f32.mrf.mxu1  ;;  %6238 = vmatmul.mubr.bf16.gmra.mxu1 %v9240_v25  ;;  %5828 = vmatprep.mubr.bf16.mxu0 %v9245_v22  ;;  %v9243_v25 = vld [vmem:[%s12640_s2 + $0x248] ss:$24 sps:$4 sm:$0xff]   ;;  %v6608_v28 = vld [vmem:[%s12642_s4 + $0x250] sm:$0xff] }
 0x3ae   : > { %v3742_v33 = vpop.f32.mrf.mxu0  ;;  %6245 = vmatprep.mubr.bf16.mxu1 %v9248_v44  ;;  %6987 = vperm.xlu1 %8594, %v6605_v40   ;;  %v9246_v22 = vld [vmem:[%s12640_s2 + $0x250] ss:$24 sps:$4 sm:$0xff]   ;;  %v9251_v44 = vld [vmem:[%s12640_s2 + $0x27c] ss:$24 sps:$4 sm:$0xff]  }
 0x3af   : > { %v11760_v11 = vadd.f32 %v5597_v49, %v3741_v47  ;;  %v5599_v10 = vpop.f32.mrf.mxu1  ;;  %6982 = vperm.xlu0 %8593, %v6604_v34   ;;  %v6607_v34 = vld [vmem:[%s12642_s4 + $0x248] sm:$0xff]  ;;  %v6606_v49 = vld [vmem:[%s12642_s4 + $0x240] sm:$0xff] }
 0x3b0   : > { %v3743_v20 = vpop.f32.mrf.mxu0  ;;  %v9254_v47 = vld [vmem:[%s12640_s2 + $0x284] ss:$24 sps:$4 sm:$0xff]  }
 0x3b1   : > { %12746 = vst [vmem:[#allocation26_spill] sm:$0xff] %v11760_v11  ;;  %v3744_v48 = vadd.f32 %v3743_v20, %v12747_v54  ;;  %v5600_v5 = vpop.f32.mrf.mxu1  ;;  %v12749_v20 = vld [vmem:[#allocation28_spill] sm:$0xff] }
 0x3b2   : > { %v3745_v51 = vpop.f32.mrf.mxu0  ;;  %6997 = vperm.xlu1 %8594, %v6607_v34  }
 0x3b3   : > { %v11781_v40 = vadd.f32 %v5600_v5, %v3744_v48  ;;  %v5602_v33 = vpop.f32.mrf.mxu1  ;;  %6992 = vperm.xlu0 %8593, %v6606_v49   ;;  %v6609_v51 = vld [vmem:[%s12642_s4 + $0x258] sm:$0xff] }
 0x3b4   : > { %v3748_v10 = vpop.f32.mrf.mxu0  ;;  %5829 = vmatmul.mubr.bf16.gmra.mxu0 %v9243_v25  ;;  %v12751_v49 = vld [vmem:[#allocation29_spill] sm:$0xff] }
 0x3b5   : > { %12748 = vst [vmem:[#allocation27_spill] sm:$0xff] %v11781_v40  ;;  %v3749_v54 = vadd.f32 %v3748_v10, %v12749_v20  ;;  %v5605_v11 = vpop.f32.mrf.mxu1  ;;  %6246 = vmatmul.mubr.bf16.gmra.mxu1 %v9246_v22  ;;  %5836 = vmatprep.mubr.bf16.mxu0 %v9251_v44  ;;  %v9249_v22 = vld [vmem:[%s12640_s2 + $0x278] ss:$24 sps:$4 sm:$0xff]  }
 0x3b6   : > { %v3750_v34 = vpop.f32.mrf.mxu0  ;;  %6253 = vmatprep.mubr.bf16.mxu1 %v9254_v47  ;;  %7007 = vperm.xlu1 %8594, %v6609_v51   ;;  %v9252_v44 = vld [vmem:[%s12640_s2 + $0x280] ss:$24 sps:$4 sm:$0xff]   ;;  %v9257_v47 = vld [vmem:[%s12640_s2 + $0x2ac] ss:$24 sps:$4 sm:$0xff]   ;;  %v6612_v40 = vld [vmem:[%s12642_s4 + $0x270] sm:$0xff] }
 0x3b7   : > { %v11790_v48 = vadd.f32 %v5605_v11, %v3749_v54  ;;  %v5607_v5 = vpop.f32.mrf.mxu1  ;;  %7002 = vperm.xlu0 %8593, %v6608_v28   ;;  %v6611_v28 = vld [vmem:[%s12642_s4 + $0x268] sm:$0xff]  ;;  %v6610_v11 = vld [vmem:[%s12642_s4 + $0x260] sm:$0xff] }
 0x3b8   : > { %v3751_v25 = vpop.f32.mrf.mxu0  ;;  %v9260_v54 = vld [vmem:[%s12640_s2 + $0x2b4] ss:$24 sps:$4 sm:$0xff]  }
 0x3b9   : > { %12750 = vst [vmem:[#allocation28_spill] sm:$0xff] %v11790_v48  ;;  %v3752_v33 = vadd.f32 %v3751_v25, %v12751_v49  ;;  %v5608_v10 = vpop.f32.mrf.mxu1  ;;  %v12753_v25 = vld [vmem:[#allocation30_spill] sm:$0xff] }
 0x3ba   : > { %v3753_v20 = vpop.f32.mrf.mxu0  ;;  %7017 = vperm.xlu1 %8594, %v6611_v28  }
 0x3bb   : > { %v11811_v51 = vadd.f32 %v5608_v10, %v3752_v33  ;;  %v5610_v34 = vpop.f32.mrf.mxu1  ;;  %7012 = vperm.xlu0 %8593, %v6610_v11   ;;  %v6613_v20 = vld [vmem:[%s12642_s4 + $0x278] sm:$0xff]  ;;  %v12755_v11 = vld [vmem:[#allocation31_spill] sm:$0xff] }
 0x3bc   : > { %v3756_v5 = vpop.f32.mrf.mxu0  ;;  %5837 = vmatmul.mubr.bf16.gmra.mxu0 %v9249_v22 }
 0x3bd   : > { %12752 = vst [vmem:[#allocation29_spill] sm:$0xff] %v11811_v51  ;;  %v3757_v49 = vadd.f32 %v3756_v5, %v12753_v25  ;;  %v5613_v48 = vpop.f32.mrf.mxu1  ;;  %6254 = vmatmul.mubr.bf16.gmra.mxu1 %v9252_v44  ;;  %5844 = vmatprep.mubr.bf16.mxu0 %v9257_v47  ;;  %v9255_v44 = vld [vmem:[%s12640_s2 + $0x2a8] ss:$24 sps:$4 sm:$0xff]   ;;  %v6616_v51 = vld [vmem:[%s12642_s4 + $0x290] sm:$0xff] }
 0x3be   : > { %v3758_v28 = vpop.f32.mrf.mxu0  ;;  %6261 = vmatprep.mubr.bf16.mxu1 %v9260_v54  ;;  %7027 = vperm.xlu1 %8594, %v6613_v20   ;;  %v9258_v47 = vld [vmem:[%s12640_s2 + $0x2b0] ss:$24 sps:$4 sm:$0xff]   ;;  %v9263_v54 = vld [vmem:[%s12640_s2 + $0x2dc] ss:$24 sps:$4 sm:$0xff]  }
 0x3bf   : > { %v11820_v33 = vadd.f32 %v5613_v48, %v3757_v49  ;;  %v5615_v10 = vpop.f32.mrf.mxu1  ;;  %7022 = vperm.xlu0 %8593, %v6612_v40   ;;  %v6615_v40 = vld [vmem:[%s12642_s4 + $0x288] sm:$0xff]  ;;  %v6614_v48 = vld [vmem:[%s12642_s4 + $0x280] sm:$0xff] }
 0x3c0   : > { %v3759_v22 = vpop.f32.mrf.mxu0  ;;  %v9266_v49 = vld [vmem:[%s12640_s2 + $0x2e4] ss:$24 sps:$4 sm:$0xff]  }
 0x3c1   : > { %12754 = vst [vmem:[#allocation30_spill] sm:$0xff] %v11820_v33  ;;  %v3760_v34 = vadd.f32 %v3759_v22, %v12755_v11  ;;  %v5616_v5 = vpop.f32.mrf.mxu1  ;;  %v12757_v22 = vld [vmem:[#allocation32_spill] sm:$0xff] }
 0x3c2   : > { %v3761_v25 = vpop.f32.mrf.mxu0  ;;  %7037 = vperm.xlu1 %8594, %v6615_v40  }
 0x3c3   : > { %v11841_v20 = vadd.f32 %v5616_v5, %v3760_v34  ;;  %v5618_v28 = vpop.f32.mrf.mxu1  ;;  %7032 = vperm.xlu0 %8593, %v6614_v48   ;;  %v6617_v25 = vld [vmem:[%s12642_s4 + $0x298] sm:$0xff] }
 0x3c4   : > { %v3764_v10 = vpop.f32.mrf.mxu0  ;;  %5845 = vmatmul.mubr.bf16.gmra.mxu0 %v9255_v44  ;;  %v12759_v48 = vld [vmem:[#allocation33_spill] sm:$0xff] }
 0x3c5   : > { %12756 = vst [vmem:[#allocation31_spill] sm:$0xff] %v11841_v20  ;;  %v3765_v11 = vadd.f32 %v3764_v10, %v12757_v22  ;;  %v5621_v33 = vpop.f32.mrf.mxu1  ;;  %6262 = vmatmul.mubr.bf16.gmra.mxu1 %v9258_v47  ;;  %5852 = vmatprep.mubr.bf16.mxu0 %v9263_v54  ;;  %v9261_v47 = vld [vmem:[%s12640_s2 + $0x2d8] ss:$24 sps:$4 sm:$0xff]  }
 0x3c6   : > { %v3766_v40 = vpop.f32.mrf.mxu0  ;;  %6269 = vmatprep.mubr.bf16.mxu1 %v9266_v49  ;;  %7047 = vperm.xlu1 %8594, %v6617_v25   ;;  %v9264_v54 = vld [vmem:[%s12640_s2 + $0x2e0] ss:$24 sps:$4 sm:$0xff]   ;;  %v9269_v49 = vld [vmem:[%s12640_s2 + $0x30c] ss:$24 sps:$4 sm:$0xff]   ;;  %v6620_v20 = vld [vmem:[%s12642_s4 + $0x2b0] sm:$0xff] }
 0x3c7   : > { %v11850_v34 = vadd.f32 %v5621_v33, %v3765_v11  ;;  %v5623_v5 = vpop.f32.mrf.mxu1  ;;  %7042 = vperm.xlu0 %8593, %v6616_v51   ;;  %v6619_v51 = vld [vmem:[%s12642_s4 + $0x2a8] sm:$0xff]  ;;  %v6618_v33 = vld [vmem:[%s12642_s4 + $0x2a0] sm:$0xff] }
 0x3c8   : > { %v3767_v44 = vpop.f32.mrf.mxu0  ;;  %v9272_v11 = vld [vmem:[%s12640_s2 + $0x314] ss:$24 sps:$4 sm:$0xff]  }
 0x3c9   : > { %12758 = vst [vmem:[#allocation32_spill] sm:$0xff] %v11850_v34  ;;  %v3768_v28 = vadd.f32 %v3767_v44, %v12759_v48  ;;  %v5624_v10 = vpop.f32.mrf.mxu1  ;;  %v12761_v44 = vld [vmem:[#allocation34_spill] sm:$0xff] }
 0x3ca   : > { %v3769_v22 = vpop.f32.mrf.mxu0  ;;  %7057 = vperm.xlu1 %8594, %v6619_v51  }
 0x3cb   : > { %v11871_v25 = vadd.f32 %v5624_v10, %v3768_v28  ;;  %v5626_v40 = vpop.f32.mrf.mxu1  ;;  %7052 = vperm.xlu0 %8593, %v6618_v33   ;;  %v6621_v22 = vld [vmem:[%s12642_s4 + $0x2b8] sm:$0xff]  ;;  %v12763_v33 = vld [vmem:[#allocation35_spill] sm:$0xff] }
 0x3cc   : > { %v3772_v5 = vpop.f32.mrf.mxu0  ;;  %5853 = vmatmul.mubr.bf16.gmra.mxu0 %v9261_v47 }
 0x3cd   : > { %12760 = vst [vmem:[#allocation33_spill] sm:$0xff] %v11871_v25  ;;  %v3773_v48 = vadd.f32 %v3772_v5, %v12761_v44  ;;  %v5629_v34 = vpop.f32.mrf.mxu1  ;;  %6270 = vmatmul.mubr.bf16.gmra.mxu1 %v9264_v54  ;;  %5860 = vmatprep.mubr.bf16.mxu0 %v9269_v49  ;;  %v9267_v54 = vld [vmem:[%s12640_s2 + $0x308] ss:$24 sps:$4 sm:$0xff]   ;;  %v6624_v25 = vld [vmem:[%s12642_s4 + $0x2d0] sm:$0xff] }
 0x3ce   : > { %v3774_v51 = vpop.f32.mrf.mxu0  ;;  %6277 = vmatprep.mubr.bf16.mxu1 %v9272_v11  ;;  %7067 = vperm.xlu1 %8594, %v6621_v22   ;;  %v9270_v49 = vld [vmem:[%s12640_s2 + $0x310] ss:$24 sps:$4 sm:$0xff]   ;;  %v9275_v11 = vld [vmem:[%s12640_s2 + $0x33c] ss:$24 sps:$4 sm:$0xff]  }
 0x3cf   : > { %v11880_v28 = vadd.f32 %v5629_v34, %v3773_v48  ;;  %v5631_v10 = vpop.f32.mrf.mxu1  ;;  %7062 = vperm.xlu0 %8593, %v6620_v20   ;;  %v6623_v20 = vld [vmem:[%s12642_s4 + $0x2c8] sm:$0xff]  ;;  %v6622_v34 = vld [vmem:[%s12642_s4 + $0x2c0] sm:$0xff] }
 0x3d0   : > { %v3775_v47 = vpop.f32.mrf.mxu0  ;;  %v9278_v48 = vld [vmem:[%s12640_s2 + $0x344] ss:$24 sps:$4 sm:$0xff]  }
 0x3d1   : > { %12762 = vst [vmem:[#allocation34_spill] sm:$0xff] %v11880_v28  ;;  %v3776_v40 = vadd.f32 %v3775_v47, %v12763_v33  ;;  %v5632_v5 = vpop.f32.mrf.mxu1  ;;  %v12765_v47 = vld [vmem:[#allocation36_spill] sm:$0xff] }
 0x3d2   : > { %v3777_v44 = vpop.f32.mrf.mxu0  ;;  %7077 = vperm.xlu1 %8594, %v6623_v20  }
 0x3d3   : > { %v11901_v22 = vadd.f32 %v5632_v5, %v3776_v40  ;;  %v5634_v51 = vpop.f32.mrf.mxu1  ;;  %7072 = vperm.xlu0 %8593, %v6622_v34   ;;  %v6625_v44 = vld [vmem:[%s12642_s4 + $0x2d8] sm:$0xff] }
 0x3d4   : > { %v3780_v10 = vpop.f32.mrf.mxu0  ;;  %5861 = vmatmul.mubr.bf16.gmra.mxu0 %v9267_v54  ;;  %v12767_v34 = vld [vmem:[#allocation37_spill] sm:$0xff] }
 0x3d5   : > { %12764 = vst [vmem:[#allocation35_spill] sm:$0xff] %v11901_v22  ;;  %v3781_v33 = vadd.f32 %v3780_v10, %v12765_v47  ;;  %v5637_v28 = vpop.f32.mrf.mxu1  ;;  %6278 = vmatmul.mubr.bf16.gmra.mxu1 %v9270_v49  ;;  %5868 = vmatprep.mubr.bf16.mxu0 %v9275_v11  ;;  %v9273_v49 = vld [vmem:[%s12640_s2 + $0x338] ss:$24 sps:$4 sm:$0xff]  }
 0x3d6   : > { %v3782_v20 = vpop.f32.mrf.mxu0  ;;  %6285 = vmatprep.mubr.bf16.mxu1 %v9278_v48  ;;  %7087 = vperm.xlu1 %8594, %v6625_v44   ;;  %v9276_v11 = vld [vmem:[%s12640_s2 + $0x340] ss:$24 sps:$4 sm:$0xff]   ;;  %v9281_v48 = vld [vmem:[%s12640_s2 + $0x36c] ss:$24 sps:$4 sm:$0xff]   ;;  %v6628_v22 = vld [vmem:[%s12642_s4 + $0x2f0] sm:$0xff] }
 0x3d7   : > { %v11910_v40 = vadd.f32 %v5637_v28, %v3781_v33  ;;  %v5639_v5 = vpop.f32.mrf.mxu1  ;;  %7082 = vperm.xlu0 %8593, %v6624_v25   ;;  %v6627_v25 = vld [vmem:[%s12642_s4 + $0x2e8] sm:$0xff]  ;;  %v6626_v28 = vld [vmem:[%s12642_s4 + $0x2e0] sm:$0xff] }
 0x3d8   : > { %v3783_v54 = vpop.f32.mrf.mxu0  ;;  %v9284_v33 = vld [vmem:[%s12640_s2 + $0x374] ss:$24 sps:$4 sm:$0xff]  }
 0x3d9   : > { %12766 = vst [vmem:[#allocation36_spill] sm:$0xff] %v11910_v40  ;;  %v3784_v51 = vadd.f32 %v3783_v54, %v12767_v34  ;;  %v5640_v10 = vpop.f32.mrf.mxu1  ;;  %v12769_v54 = vld [vmem:[#allocation38_spill] sm:$0xff] }
 0x3da   : > { %v3785_v47 = vpop.f32.mrf.mxu0  ;;  %7097 = vperm.xlu1 %8594, %v6627_v25  }
 0x3db   : > { %v11931_v44 = vadd.f32 %v5640_v10, %v3784_v51  ;;  %v5642_v20 = vpop.f32.mrf.mxu1  ;;  %7092 = vperm.xlu0 %8593, %v6626_v28   ;;  %v6629_v47 = vld [vmem:[%s12642_s4 + $0x2f8] sm:$0xff] }
 0x3dc   : > { %v3788_v5 = vpop.f32.mrf.mxu0  ;;  %5869 = vmatmul.mubr.bf16.gmra.mxu0 %v9273_v49 }
 0x3dd   : > { %12768 = vst [vmem:[#allocation37_spill] sm:$0xff] %v11931_v44  ;;  %v3789_v34 = vadd.f32 %v3788_v5, %v12769_v54  ;;  %v5645_v40 = vpop.f32.mrf.mxu1  ;;  %6286 = vmatmul.mubr.bf16.gmra.mxu1 %v9276_v11  ;;  %5876 = vmatprep.mubr.bf16.mxu0 %v9281_v48  ;;  %v9279_v11 = vld [vmem:[%s12640_s2 + $0x368] ss:$24 sps:$4 sm:$0xff]  }
 0x3de   : > { %v3790_v25 = vpop.f32.mrf.mxu0  ;;  %6293 = vmatprep.mubr.bf16.mxu1 %v9284_v33  ;;  %7107 = vperm.xlu1 %8594, %v6629_v47   ;;  %v12771_v48 = vld [vmem:[#allocation39_spill] sm:$0xff]  ;;  %v9287_v33 = vld [vmem:[%s12640_s2 + $0x39c] ss:$24 sps:$4 sm:$0xff]  }
 0x3df   : > { %v11940_v51 = vadd.f32 %v5645_v40, %v3789_v34  ;;  %v5647_v10 = vpop.f32.mrf.mxu1  ;;  %7102 = vperm.xlu0 %8593, %v6628_v22   ;;  %v9282_v5 = vld [vmem:[%s12640_s2 + $0x370] ss:$24 sps:$4 sm:$0xff]   ;;  %v9290_v22 = vld [vmem:[%s12640_s2 + $0x3a4] ss:$24 sps:$4 sm:$0xff]  }
 0x3e0   : > { %v3791_v49 = vpop.f32.mrf.mxu0  ;;  %v12773_v25 = vld [vmem:[#allocation40_spill] sm:$0xff] }
 0x3e1   : > { %12770 = vst [vmem:[#allocation38_spill] sm:$0xff] %v11940_v51  ;;  %v3792_v28 = vadd.f32 %v3791_v49, %v12771_v48  ;;  %v5648_v20 = vpop.f32.mrf.mxu1 }
 0x3e2   : > { %v3793_v40 = vpop.f32.mrf.mxu0 }
 0x3e3   : > { %v11955_v54 = vadd.f32 %v5648_v20, %v3792_v28  ;;  %v5650_v34 = vpop.f32.mrf.mxu1  ;;  %v12775_v28 = vld [vmem:[#allocation41_spill] sm:$0xff] }
 0x3e4   : > { %v3796_v47 = vpop.f32.mrf.mxu0  ;;  %5877 = vmatmul.mubr.bf16.gmra.mxu0 %v9279_v11  ;;  %v9288_v11 = vld [vmem:[%s12640_s2 + $0x3a0] ss:$24 sps:$4 sm:$0xff]  }
 0x3e5   : > { %12772 = vst [vmem:[#allocation39_spill] sm:$0xff] %v11955_v54  ;;  %v3797_v10 = vadd.f32 %v3796_v47, %v12773_v25  ;;  %v5653_v49 = vpop.f32.mrf.mxu1  ;;  %6294 = vmatmul.mubr.bf16.gmra.mxu1 %v9282_v5  ;;  %5884 = vmatprep.mubr.bf16.mxu0 %v9287_v33  ;;  %v9293_v5 = vld [vmem:[%s12640_s2 + $0x3cc] ss:$24 sps:$4 sm:$0xff]   ;;  %v9291_v54 = vld [vmem:[%s12640_s2 + $0x3c8] ss:$24 sps:$4 sm:$0xff]  }
 0x3e6   : > { %v3798_v48 = vpop.f32.mrf.mxu0  ;;  %6301 = vmatprep.mubr.bf16.mxu1 %v9290_v22 }
 0x3e7   : > { %v11958_v51 = vadd.f32 %v5653_v49, %v3797_v10  ;;  %v5655_v44 = vpop.f32.mrf.mxu1  ;;  %v12777_v10 = vld [vmem:[#allocation42_spill] sm:$0xff] }
 0x3e8   : > { %v3799_v40 = vpop.f32.mrf.mxu0  ;;  %v9296_v44 = vld [vmem:[%s12640_s2 + $0x3d4] ss:$24 sps:$4 sm:$0xff]  }
 0x3e9   : > { %12774 = vst [vmem:[#allocation40_spill] sm:$0xff] %v11958_v51  ;;  %v3800_v20 = vadd.f32 %v3799_v40, %v12775_v28  ;;  %v5656_v34 = vpop.f32.mrf.mxu1 }
 0x3ea   : > { %v3801_v33 = vpop.f32.mrf.mxu0 }
 0x3eb   : > { %v11973_v22 = vadd.f32 %v5656_v34, %v3800_v20  ;;  %v5658_v47 = vpop.f32.mrf.mxu1  ;;  %v12779_v20 = vld [vmem:[#allocation43_spill] sm:$0xff] }
 0x3ec   : > { %v3804_v25 = vpop.f32.mrf.mxu0  ;;  %5885 = vmatmul.mubr.bf16.gmra.mxu0 %v9285_v23  ;;  %v9294_v23 = vld [vmem:[%s12640_s2 + $0x3d0] ss:$24 sps:$4 sm:$0xff]  }
 0x3ed   : > { %12776 = vst [vmem:[#allocation41_spill] sm:$0xff] %v11973_v22  ;;  %v3805_v49 = vadd.f32 %v3804_v25, %v12777_v10  ;;  %v5661_v48 = vpop.f32.mrf.mxu1  ;;  %6302 = vmatmul.mubr.bf16.gmra.mxu1 %v9288_v11  ;;  %5892 = vmatprep.mubr.bf16.mxu0 %v9293_v5  ;;  %v9299_v11 = vld [vmem:[%s12640_s2 + $0x3fc] ss:$24 sps:$4 sm:$0xff]   ;;  %v9297_v22 = vld [vmem:[%s12640_s2 + $0x3f8] ss:$24 sps:$4 sm:$0xff]  }
 0x3ee   : > { %v3806_v40 = vpop.f32.mrf.mxu0  ;;  %6309 = vmatprep.mubr.bf16.mxu1 %v9296_v44 }
 0x3ef   : > { %v11976_v28 = vadd.f32 %v5661_v48, %v3805_v49  ;;  %v5663_v51 = vpop.f32.mrf.mxu1  ;;  %v12781_v49 = vld [vmem:[#allocation44_spill] sm:$0xff] }
 0x3f0   : > { %v3807_v33 = vpop.f32.mrf.mxu0  ;;  %v9302_v51 = vld [vmem:[%s12640_s2 + $0x404] ss:$24 sps:$4 sm:$0xff]  }
 0x3f1   : > { %12778 = vst [vmem:[#allocation42_spill] sm:$0xff] %v11976_v28  ;;  %v3808_v34 = vadd.f32 %v3807_v33, %v12779_v20  ;;  %v5664_v47 = vpop.f32.mrf.mxu1 }
 0x3f2   : > { %v3809_v5 = vpop.f32.mrf.mxu0 }
 0x3f3   : > { %v11991_v44 = vadd.f32 %v5664_v47, %v3808_v34  ;;  %v5666_v25 = vpop.f32.mrf.mxu1  ;;  %v12783_v34 = vld [vmem:[#allocation45_spill] sm:$0xff] }
 0x3f4   : > { %v3812_v10 = vpop.f32.mrf.mxu0  ;;  %5893 = vmatmul.mubr.bf16.gmra.mxu0 %v9291_v54  ;;  %v9300_v54 = vld [vmem:[%s12640_s2 + $0x400] ss:$24 sps:$4 sm:$0xff]  }
 0x3f5   : > { %12780 = vst [vmem:[#allocation43_spill] sm:$0xff] %v11991_v44  ;;  %v3813_v48 = vadd.f32 %v3812_v10, %v12781_v49  ;;  %v5669_v40 = vpop.f32.mrf.mxu1  ;;  %6310 = vmatmul.mubr.bf16.gmra.mxu1 %v9294_v23  ;;  %5900 = vmatprep.mubr.bf16.mxu0 %v9299_v11  ;;  %v9305_v23 = vld [vmem:[%s12640_s2 + $0x42c] ss:$24 sps:$4 sm:$0xff]   ;;  %v9303_v44 = vld [vmem:[%s12640_s2 + $0x428] ss:$24 sps:$4 sm:$0xff]  }
 0x3f6   : > { %v3814_v33 = vpop.f32.mrf.mxu0  ;;  %6317 = vmatprep.mubr.bf16.mxu1 %v9302_v51 }
 0x3f7   : > { %v11994_v20 = vadd.f32 %v5669_v40, %v3813_v48  ;;  %v5671_v28 = vpop.f32.mrf.mxu1  ;;  %v12785_v48 = vld [vmem:[#allocation46_spill] sm:$0xff] }
 0x3f8   : > { %v3815_v5 = vpop.f32.mrf.mxu0  ;;  %v9308_v28 = vld [vmem:[%s12640_s2 + $0x434] ss:$24 sps:$4 sm:$0xff]  }
 0x3f9   : > { %12782 = vst [vmem:[#allocation44_spill] sm:$0xff] %v11994_v20  ;;  %v3816_v47 = vadd.f32 %v3815_v5, %v12783_v34  ;;  %v5672_v25 = vpop.f32.mrf.mxu1 }
 0x3fa   : > { %v3817_v11 = vpop.f32.mrf.mxu0 }
 0x3fb   : > { %v12009_v51 = vadd.f32 %v5672_v25, %v3816_v47  ;;  %v5674_v10 = vpop.f32.mrf.mxu1  ;;  %v12787_v47 = vld [vmem:[#allocation47_spill] sm:$0xff] }
 0x3fc   : > { %v3820_v49 = vpop.f32.mrf.mxu0  ;;  %5901 = vmatmul.mubr.bf16.gmra.mxu0 %v9297_v22  ;;  %v9306_v22 = vld [vmem:[%s12640_s2 + $0x430] ss:$24 sps:$4 sm:$0xff]  }
 0x3fd   : > { %12784 = vst [vmem:[#allocation45_spill] sm:$0xff] %v12009_v51  ;;  %v3821_v40 = vadd.f32 %v3820_v49, %v12785_v48  ;;  %v5677_v33 = vpop.f32.mrf.mxu1  ;;  %6318 = vmatmul.mubr.bf16.gmra.mxu1 %v9300_v54  ;;  %5908 = vmatprep.mubr.bf16.mxu0 %v9305_v23  ;;  %v9311_v54 = vld [vmem:[%s12640_s2 + $0x45c] ss:$24 sps:$4 sm:$0xff]   ;;  %v9309_v51 = vld [vmem:[%s12640_s2 + $0x458] ss:$24 sps:$4 sm:$0xff]  }
 0x3fe   : > { %v3822_v5 = vpop.f32.mrf.mxu0  ;;  %6325 = vmatprep.mubr.bf16.mxu1 %v9308_v28 }
 0x3ff   : > { %v12012_v34 = vadd.f32 %v5677_v33, %v3821_v40  ;;  %v5679_v20 = vpop.f32.mrf.mxu1  ;;  %v12789_v40 = vld [vmem:[#allocation48_spill] sm:$0xff] }
 0x400   : > { %v3823_v11 = vpop.f32.mrf.mxu0  ;;  %v9314_v20 = vld [vmem:[%s12640_s2 + $0x464] ss:$24 sps:$4 sm:$0xff]  }
 0x401   : > { %12786 = vst [vmem:[#allocation46_spill] sm:$0xff] %v12012_v34  ;;  %v3824_v25 = vadd.f32 %v3823_v11, %v12787_v47  ;;  %v5680_v10 = vpop.f32.mrf.mxu1 }
 0x402   : > { %v3825_v23 = vpop.f32.mrf.mxu0 }
 0x403   : > { %v12027_v28 = vadd.f32 %v5680_v10, %v3824_v25  ;;  %v5682_v49 = vpop.f32.mrf.mxu1  ;;  %v12791_v25 = vld [vmem:[#allocation49_spill] sm:$0xff] }
 0x404   : > { %v3828_v48 = vpop.f32.mrf.mxu0  ;;  %5909 = vmatmul.mubr.bf16.gmra.mxu0 %v9303_v44  ;;  %v9312_v44 = vld [vmem:[%s12640_s2 + $0x460] ss:$24 sps:$4 sm:$0xff]  }
 0x405   : > { %12788 = vst [vmem:[#allocation47_spill] sm:$0xff] %v12027_v28  ;;  %v3829_v33 = vadd.f32 %v3828_v48, %v12789_v40  ;;  %v5685_v5 = vpop.f32.mrf.mxu1  ;;  %6326 = vmatmul.mubr.bf16.gmra.mxu1 %v9306_v22  ;;  %5916 = vmatprep.mubr.bf16.mxu0 %v9311_v54  ;;  %v9317_v22 = vld [vmem:[%s12640_s2 + $0x48c] ss:$24 sps:$4 sm:$0xff]  }
 0x406   : > { %v3830_v11 = vpop.f32.mrf.mxu0  ;;  %6333 = vmatprep.mubr.bf16.mxu1 %v9314_v20 }
 0x407   : > { %v12030_v47 = vadd.f32 %v5685_v5, %v3829_v33  ;;  %v5687_v34 = vpop.f32.mrf.mxu1 }
 0x408   : > { %v3831_v23 = vpop.f32.mrf.mxu0  ;;  %v9320_v34 = vld [vmem:[%s12640_s2 + $0x494] ss:$24 sps:$4 sm:$0xff]  }
 0x409   : > { %12790 = vst [vmem:[#allocation48_spill] sm:$0xff] %v12030_v47  ;;  %v3832_v10 = vadd.f32 %v3831_v23, %v12791_v25  ;;  %v5688_v49 = vpop.f32.mrf.mxu1  ;;  %v9315_v47 = vld [vmem:[%s12640_s2 + $0x488] ss:$24 sps:$4 sm:$0xff]  }
 0x40a   : > { %v3833_v54 = vpop.f32.mrf.mxu0 }
 0x40b   : > { %v12045_v20 = vadd.f32 %v5688_v49, %v3832_v10  ;;  %v5690_v48 = vpop.f32.mrf.mxu1 }
 0x40c   : > { %v3836_v40 = vpop.f32.mrf.mxu0  ;;  %5917 = vmatmul.mubr.bf16.gmra.mxu0 %v9309_v51  ;;  %v9323_v51 = vld [vmem:[%s12640_s2 + $0x4bc] ss:$24 sps:$4 sm:$0xff]  }
 0x40d   : > { %12792 = vst [vmem:[#allocation49_spill] sm:$0xff] %v12045_v20  ;;  %v3837_v33 = vadd.f32 %v3836_v40, %v10881_v21  ;;  %v5693_v5 = vpop.f32.mrf.mxu1  ;;  %6334 = vmatmul.mubr.bf16.gmra.mxu1 %v9312_v44  ;;  %5924 = vmatprep.mubr.bf16.mxu0 %v9317_v22  ;;  %v9318_v21 = vld [vmem:[%s12640_s2 + $0x490] ss:$24 sps:$4 sm:$0xff]   ;;  %v9326_v22 = vld [vmem:[%s12640_s2 + $0x4c4] ss:$24 sps:$4 sm:$0xff]  }
 0x40e   : > { %v3838_v11 = vpop.f32.mrf.mxu0  ;;  %6341 = vmatprep.mubr.bf16.mxu1 %v9320_v34 }
 0x40f   : > { %v12048_v23 = vadd.f32 %v5693_v5, %v3837_v33  ;;  %v5695_v25 = vpop.f32.mrf.mxu1 }
 0x410   : > { %v3839_v54 = vpop.f32.mrf.mxu0 }
 0x411   : > { %12793 = vst [vmem:[#allocation52_spill] sm:$0xff] %v12048_v23  ;;  %v3840_v10 = vadd.f32 %v3839_v54, %v10896_v46  ;;  %v5696_v49 = vpop.f32.mrf.mxu1  ;;  %v6633_v46 = vpop.permute.xlu0 %6632 }
 0x412   : > { %v3841_v44 = vpop.f32.mrf.mxu0 }
 0x413   : > { %v12063_v34 = vadd.f32 %v5696_v49, %v3840_v10  ;;  %v5698_v48 = vpop.f32.mrf.mxu1  ;;  %v9321_v10 = vld [vmem:[%s12640_s2 + $0x4b8] ss:$24 sps:$4 sm:$0xff]  }
 0x414   : > { %v5734_v40 = vpop.f32.mrf.mxu0  ;;  %5925 = vmatmul.mubr.bf16.gmra.mxu0 %v9315_v47  ;;  %v12795_v48 = vld [vmem:[#allocation50_spill] sm:$0xff] }
 0x415   : > { %12794 = vst [vmem:[#allocation53_spill] sm:$0xff] %v12063_v34  ;;  %v5735_v33 = vadd.f32 %v5734_v40, %v10904_v58  ;;  %v6151_v5 = vpop.f32.mrf.mxu1  ;;  %6342 = vmatmul.mubr.bf16.gmra.mxu1 %v9318_v21  ;;  %5932 = vmatprep.mubr.bf16.mxu0 %v9323_v51  ;;  %v9324_v58 = vld [vmem:[%s12640_s2 + $0x4c0] ss:$24 sps:$4 sm:$0xff]   ;;  %v9329_v21 = vld [vmem:[%s12640_s2 + $0x4ec] ss:$24 sps:$4 sm:$0xff]  }
 0x416   : > { %v5736_v11 = vpop.f32.mrf.mxu0  ;;  %6349 = vmatprep.mubr.bf16.mxu1 %v9326_v22  ;;  %v6638_v22 = vpop.permute.xlu0 %6637  ;;  %v9332_v40 = vld [vmem:[%s12640_s2 + $0x4f4] ss:$24 sps:$4 sm:$0xff]  }
 0x417   : > { %v6152_v25 = vadd.f32 %v6151_v5, %v5735_v33  ;;  %v6153_v54 = vpop.f32.mrf.mxu1 }
 0x418   : > { %v5737_v44 = vpop.f32.mrf.mxu0  ;;  %v12796_v54 = vld [vmem:[#allocation51_spill] sm:$0xff] }
 0x419   : > { %v7110_v49 = vadd.f32 %v6633_v46, %v6152_v25  ;;  %v5738_v34 = vadd.f32 %v5737_v44, %v12795_v48  ;;  %v6154_v47 = vpop.f32.mrf.mxu1 }
 0x41a   : > { %v5739_v51 = vpop.f32.mrf.mxu0 }
 0x41b   : > { %v8470_v46 = vpack.c.bf16 %v7110_v49, %v7110_v49  ;;  %v6155_v33 = vadd.f32 %v6154_v47, %v5738_v34  ;;  %v6156_v5 = vpop.f32.mrf.mxu1  ;;  %v6643_v51 = vpop.permute.xlu1 %6642  ;;  %v9327_v34 = vld [vmem:[%s12640_s2 + $0x4e8] ss:$24 sps:$4 sm:$0xff]  }
 0x41c   : > { %v5742_v11 = vpop.f32.mrf.mxu0  ;;  %5933 = vmatmul.mubr.bf16.gmra.mxu0 %v9321_v10 }
 0x41d   : > { %7591 = vst.msk [vmem:[%s12080_s26] sm:$0xf] %vm7590_vm0, %v8470_v46  ;;  %v7111_v25 = vadd.f32 %v6638_v22, %v6155_v33  ;;  %v5743_v44 = vadd.f32 %v5742_v11, %v12796_v54  ;;  %v6159_v48 = vpop.f32.mrf.mxu1  ;;  %6350 = vmatmul.mubr.bf16.gmra.mxu1 %v9324_v58  ;;  %5940 = vmatprep.mubr.bf16.mxu0 %v9329_v21  ;;  %v9338_v21 = vld [vmem:[%s12640_s2 + $0x524] ss:$24 sps:$4 sm:$0xff]  }
 0x41e   : > { %v5744_v23 = vpop.f32.mrf.mxu0  ;;  %6357 = vmatprep.mubr.bf16.mxu1 %v9332_v40 }
 0x41f   : > { %v8471_v20 = vpack.c.bf16 %v7111_v25, %v7111_v25  ;;  %v6160_v28 = vadd.f32 %v6159_v48, %v5743_v44  ;;  %v6161_v50 = vpop.f32.mrf.mxu1  ;;  %v9330_v23 = vld [vmem:[%s12640_s2 + $0x4f0] ss:$24 sps:$4 sm:$0xff]  }
 0x420   : > { %v5745_v49 = vpop.f32.mrf.mxu0  ;;  %v9335_v50 = vld [vmem:[%s12640_s2 + $0x51c] ss:$24 sps:$4 sm:$0xff]  }
 0x421   : > { %7592 = vst.msk [vmem:[%s12080_s26 + $0x4] sm:$0xf] %vm7590_vm0, %v8471_v20  ;;  %v7112_v10 = vadd.f32 %v6643_v51, %v6160_v28  ;;  %v5746_v47 = vadd.f32 %v5745_v49, %v10937_v31  ;;  %v6162_v22 = vpop.f32.mrf.mxu1  ;;  %v6648_v28 = vpop.permute.xlu1 %6647 }
 0x422   : > { %v5747_v58 = vpop.f32.mrf.mxu0  ;;  %v6653_v51 = vpop.permute.xlu0 %6652 }
 0x423   : > { %v8472_v40 = vpack.c.bf16 %v7112_v10, %v7112_v10  ;;  %v6163_v46 = vadd.f32 %v6162_v22, %v5746_v47  ;;  %v6164_v20 = vpop.f32.mrf.mxu1  ;;  %v9336_v22 = vld [vmem:[%s12640_s2 + $0x520] ss:$24 sps:$4 sm:$0xff]   ;;  %v9344_v58 = vld [vmem:[%s12640_s2 + $0x554] ss:$24 sps:$4 sm:$0xff]  }
 0x424   : > { %v5750_v33 = vpop.f32.mrf.mxu0  ;;  %5941 = vmatmul.mubr.bf16.gmra.mxu0 %v9327_v34  ;;  %v9333_v34 = vld [vmem:[%s12640_s2 + $0x518] ss:$24 sps:$4 sm:$0xff]  }
 0x425   : > { %7593 = vst.msk [vmem:[%s12080_s26 + $0x8] sm:$0xf] %vm7590_vm0, %v8472_v40  ;;  %v7113_v31 = vadd.f32 %v6648_v28, %v6163_v46  ;;  %v5751_v5 = vadd.f32 %v5750_v33, %v10940_v4  ;;  %v6167_v11 = vpop.f32.mrf.mxu1  ;;  %6358 = vmatmul.mubr.bf16.gmra.mxu1 %v9330_v23  ;;  %5948 = vmatprep.mubr.bf16.mxu0 %v9335_v50  ;;  %v9341_v23 = vld [vmem:[%s12640_s2 + $0x54c] ss:$24 sps:$4 sm:$0xff]   ;;  %v6658_v20 = vpop.permute.xlu1 %6657 }
 0x426   : > { %v5752_v25 = vpop.f32.mrf.mxu0  ;;  %6365 = vmatprep.mubr.bf16.mxu1 %v9338_v21 }
 0x427   : > { %v8473_v54 = vpack.c.bf16 %v7113_v31, %v7113_v31  ;;  %v6168_v44 = vadd.f32 %v6167_v11, %v5751_v5  ;;  %v6169_v48 = vpop.f32.mrf.mxu1 }
 0x428   : > { %v5753_v49 = vpop.f32.mrf.mxu0 }
 0x429   : > { %7594 = vst.msk [vmem:[%s12080_s26 + $0xc] sm:$0xf] %vm7590_vm0, %v8473_v54  ;;  %v7114_v10 = vadd.f32 %v6653_v51, %v6168_v44  ;;  %v5754_v4 = vadd.f32 %v5753_v49, %v10959_v41  ;;  %v6170_v47 = vpop.f32.mrf.mxu1  ;;  %v6663_v44 = vpop.permute.xlu0 %6662  ;;  %v9339_v51 = vld [vmem:[%s12640_s2 + $0x548] ss:$24 sps:$4 sm:$0xff]  }
 0x42a   : > { %v5755_v50 = vpop.f32.mrf.mxu0 }
 0x42b   : > { %v8474_v21 = vpack.c.bf16 %v7114_v10, %v7114_v10  ;;  %v6171_v40 = vadd.f32 %v6170_v47, %v5754_v4  ;;  %v6172_v46 = vpop.f32.mrf.mxu1  ;;  %v9342_v10 = vld [vmem:[%s12640_s2 + $0x550] ss:$24 sps:$4 sm:$0xff]   ;;  %v9347_v4 = vld [vmem:[%s12640_s2 + $0x57c] ss:$24 sps:$4 sm:$0xff]  }
 0x42c   : > { %v5758_v28 = vpop.f32.mrf.mxu0  ;;  %5949 = vmatmul.mubr.bf16.gmra.mxu0 %v9333_v34 }
 0x42d   : > { %7595 = vst.msk [vmem:[%s12080_s26 + $0x10] sm:$0xf] %vm7590_vm0, %v8474_v21  ;;  %v7115_v41 = vadd.f32 %v6658_v20, %v6171_v40  ;;  %v5759_v33 = vadd.f32 %v5758_v28, %v10964_v56  ;;  %v6175_v31 = vpop.f32.mrf.mxu1  ;;  %6366 = vmatmul.mubr.bf16.gmra.mxu1 %v9336_v22  ;;  %5956 = vmatprep.mubr.bf16.mxu0 %v9341_v23  ;;  %v9350_v22 = vld [vmem:[%s12640_s2 + $0x584] ss:$24 sps:$4 sm:$0xff]   ;;  %v6668_v21 = vpop.permute.xlu1 %6667 }
 0x42e   : > { %v5760_v5 = vpop.f32.mrf.mxu0  ;;  %6373 = vmatprep.mubr.bf16.mxu1 %v9344_v58 }
 0x42f   : > { %v8475_v11 = vpack.c.bf16 %v7115_v41, %v7115_v41  ;;  %v6176_v25 = vadd.f32 %v6175_v31, %v5759_v33  ;;  %v6177_v54 = vpop.f32.mrf.mxu1  ;;  %v6673_v5 = vpop.permute.xlu0 %6672 }
 0x430   : > { %v5761_v48 = vpop.f32.mrf.mxu0 }
 0x431   : > { %7596 = vst.msk [vmem:[%s12080_s26 + $0x14] sm:$0xf] %vm7590_vm0, %v8475_v11  ;;  %v7116_v49 = vadd.f32 %v6663_v44, %v6176_v25  ;;  %v5762_v56 = vadd.f32 %v5761_v48, %v10979_v16  ;;  %v6178_v34 = vpop.f32.mrf.mxu1  ;;  %v9345_v25 = vld [vmem:[%s12640_s2 + $0x578] ss:$24 sps:$4 sm:$0xff]  }
 0x432   : > { %v5763_v47 = vpop.f32.mrf.mxu0  ;;  %v9348_v48 = vld [vmem:[%s12640_s2 + $0x580] ss:$24 sps:$4 sm:$0xff]  }
 0x433   : > { %v8476_v23 = vpack.c.bf16 %v7116_v49, %v7116_v49  ;;  %v6179_v50 = vadd.f32 %v6178_v34, %v5762_v56  ;;  %v6180_v58 = vpop.f32.mrf.mxu1  ;;  %v9356_v56 = vld [vmem:[%s12640_s2 + $0x5b4] ss:$24 sps:$4 sm:$0xff]   ;;  %v6678_v47 = vpop.permute.xlu1 %6677 }
 0x434   : > { %v5766_v40 = vpop.f32.mrf.mxu0  ;;  %5957 = vmatmul.mubr.bf16.gmra.mxu0 %v9339_v51  ;;  %v9353_v51 = vld [vmem:[%s12640_s2 + $0x5ac] ss:$24 sps:$4 sm:$0xff]  }
 0x435   : > { %7597 = vst.msk [vmem:[%s12080_s26 + $0x18] sm:$0xf] %vm7590_vm0, %v8476_v23  ;;  %v7117_v16 = vadd.f32 %v6668_v21, %v6179_v50  ;;  %v5767_v46 = vadd.f32 %v5766_v40, %v10982_v12  ;;  %v6183_v20 = vpop.f32.mrf.mxu1  ;;  %6374 = vmatmul.mubr.bf16.gmra.mxu1 %v9342_v10  ;;  %5964 = vmatprep.mubr.bf16.mxu0 %v9347_v4 }
 0x436   : > { %v5768_v28 = vpop.f32.mrf.mxu0  ;;  %6381 = vmatprep.mubr.bf16.mxu1 %v9350_v22 }
 0x437   : > { %v8477_v41 = vpack.c.bf16 %v7117_v16, %v7117_v16  ;;  %v6184_v33 = vadd.f32 %v6183_v20, %v5767_v46  ;;  %v6185_v31 = vpop.f32.mrf.mxu1  ;;  %v6683_v46 = vpop.permute.xlu0 %6682  ;;  %v9351_v28 = vld [vmem:[%s12640_s2 + $0x5a8] ss:$24 sps:$4 sm:$0xff]  }
 0x438   : > { %v5769_v11 = vpop.f32.mrf.mxu0  ;;  %v9354_v31 = vld [vmem:[%s12640_s2 + $0x5b0] ss:$24 sps:$4 sm:$0xff]  }
 0x439   : > { %7598 = vst.msk [vmem:[%s12080_s26 + $0x1c] sm:$0xf] %vm7590_vm0, %v8477_v41  ;;  %v7118_v54 = vadd.f32 %v6673_v5, %v6184_v33  ;;  %v5770_v12 = vadd.f32 %v5769_v11, %v10997_v18  ;;  %v6186_v44 = vpop.f32.mrf.mxu1  ;;  %v9359_v5 = vld [vmem:[%s12640_s2 + $0x5dc] ss:$24 sps:$4 sm:$0xff]  }
 0x43a   : > { %v5771_v49 = vpop.f32.mrf.mxu0 }
 0x43b   : > { %v8478_v34 = vpack.c.bf16 %v7118_v54, %v7118_v54  ;;  %v6187_v10 = vadd.f32 %v6186_v44, %v5770_v12  ;;  %v6188_v4 = vpop.f32.mrf.mxu1 }
 0x43c   : > { %v5774_v22 = vpop.f32.mrf.mxu0  ;;  %5965 = vmatmul.mubr.bf16.gmra.mxu0 %v9345_v25  ;;  %v9362_v25 = vld [vmem:[%s12640_s2 + $0x5e4] ss:$24 sps:$4 sm:$0xff]  }
 0x43d   : > { %7599 = vst.msk [vmem:[%s12080_s26 + $0x20] sm:$0xf] %vm7590_vm0, %v8478_v34  ;;  %v7119_v18 = vadd.f32 %v6678_v47, %v6187_v10  ;;  %v5775_v23 = vadd.f32 %v5774_v22, %v11000_v3  ;;  %v6191_v50 = vpop.f32.mrf.mxu1  ;;  %6382 = vmatmul.mubr.bf16.gmra.mxu1 %v9348_v48  ;;  %5972 = vmatprep.mubr.bf16.mxu0 %v9353_v51  ;;  %v6688_v48 = vpop.permute.xlu1 %6687 }
 0x43e   : > { %v5776_v58 = vpop.f32.mrf.mxu0  ;;  %6389 = vmatprep.mubr.bf16.mxu1 %v9356_v56  ;;  %v6693_v22 = vpop.permute.xlu0 %6692 }
 0x43f   : > { %v8479_v21 = vpack.c.bf16 %v7119_v18, %v7119_v18  ;;  %v6192_v40 = vadd.f32 %v6191_v50, %v5775_v23  ;;  %v6193_v16 = vpop.f32.mrf.mxu1  ;;  %v9357_v23 = vld [vmem:[%s12640_s2 + $0x5d8] ss:$24 sps:$4 sm:$0xff]  }
 0x440   : > { %v5777_v20 = vpop.f32.mrf.mxu0 }
 0x441   : > { %7600 = vst.msk [vmem:[%s12080_s26 + $0x24] sm:$0xf] %vm7590_vm0, %v8479_v21  ;;  %v7120_v41 = vadd.f32 %v6683_v46, %v6192_v40  ;;  %v5778_v3 = vadd.f32 %v5777_v20, %v11019_v55  ;;  %v6194_v33 = vpop.f32.mrf.mxu1  ;;  %v9360_v21 = vld [vmem:[%s12640_s2 + $0x5e0] ss:$24 sps:$4 sm:$0xff]   ;;  %v9365_v40 = vld [vmem:[%s12640_s2 + $0x60c] ss:$24 sps:$4 sm:$0xff]  }
 0x442   : > { %v5779_v11 = vpop.f32.mrf.mxu0  ;;  %v9368_v46 = vld [vmem:[%s12640_s2 + $0x614] ss:$24 sps:$4 sm:$0xff]  }
 0x443   : > { %v8480_v54 = vpack.c.bf16 %v7120_v41, %v7120_v41  ;;  %v6195_v12 = vadd.f32 %v6194_v33, %v5778_v3  ;;  %v6196_v44 = vpop.f32.mrf.mxu1  ;;  %v6698_v3 = vpop.permute.xlu1 %6697 }
 0x444   : > { %v5782_v51 = vpop.f32.mrf.mxu0  ;;  %5973 = vmatmul.mubr.bf16.gmra.mxu0 %v9351_v28  ;;  %v6703_v44 = vpop.permute.xlu0 %6702 }
 0x445   : > { %7601 = vst.msk [vmem:[%s12080_s26 + $0x28] sm:$0xf] %vm7590_vm0, %v8480_v54  ;;  %v7121_v55 = vadd.f32 %v6688_v48, %v6195_v12  ;;  %v5783_v49 = vadd.f32 %v5782_v51, %v11022_v39  ;;  %v6199_v56 = vpop.f32.mrf.mxu1  ;;  %6390 = vmatmul.mubr.bf16.gmra.mxu1 %v9354_v31  ;;  %5980 = vmatprep.mubr.bf16.mxu0 %v9359_v5  ;;  %v9363_v51 = vld [vmem:[%s12640_s2 + $0x608] ss:$24 sps:$4 sm:$0xff]  }
 0x446   : > { %v5784_v34 = vpop.f32.mrf.mxu0  ;;  %6397 = vmatprep.mubr.bf16.mxu1 %v9362_v25 }
 0x447   : > { %v8481_v10 = vpack.c.bf16 %v7121_v55, %v7121_v55  ;;  %v6200_v4 = vadd.f32 %v6199_v56, %v5783_v49  ;;  %v6201_v47 = vpop.f32.mrf.mxu1  ;;  %v9366_v56 = vld [vmem:[%s12640_s2 + $0x610] ss:$24 sps:$4 sm:$0xff]   ;;  %v9371_v34 = vld [vmem:[%s12640_s2 + $0x63c] ss:$24 sps:$4 sm:$0xff]  }
 0x448   : > { %v5785_v18 = vpop.f32.mrf.mxu0 }
 0x449   : > { %7602 = vst.msk [vmem:[%s12080_s26 + $0x2c] sm:$0xf] %vm7590_vm0, %v8481_v10  ;;  %v7122_v50 = vadd.f32 %v6693_v22, %v6200_v4  ;;  %v5786_v39 = vadd.f32 %v5785_v18, %v11037_v29  ;;  %v6202_v58 = vpop.f32.mrf.mxu1  ;;  %v9374_v4 = vld [vmem:[%s12640_s2 + $0x644] ss:$24 sps:$4 sm:$0xff]  }
 0x44a   : > { %v5787_v16 = vpop.f32.mrf.mxu0 }
 0x44b   : > { %v8482_v20 = vpack.c.bf16 %v7122_v50, %v7122_v50  ;;  %v6203_v28 = vadd.f32 %v6202_v58, %v5786_v39  ;;  %v6204_v41 = vpop.f32.mrf.mxu1 }
 0x44c   : > { %v5790_v33 = vpop.f32.mrf.mxu0  ;;  %5981 = vmatmul.mubr.bf16.gmra.mxu0 %v9357_v23  ;;  %v6708_v23 = vpop.permute.xlu1 %6707  ;;  %v9369_v41 = vld [vmem:[%s12640_s2 + $0x638] ss:$24 sps:$4 sm:$0xff]  }
 0x44d   : > { %7603 = vst.msk [vmem:[%s12080_s26 + $0x30] sm:$0xf] %vm7590_vm0, %v8482_v20  ;;  %v7123_v29 = vadd.f32 %v6698_v3, %v6203_v28  ;;  %v5791_v31 = vadd.f32 %v5790_v33, %v11040_v2  ;;  %v6207_v5 = vpop.f32.mrf.mxu1  ;;  %6398 = vmatmul.mubr.bf16.gmra.mxu1 %v9360_v21  ;;  %5988 = vmatprep.mubr.bf16.mxu0 %v9365_v40  ;;  %v6713_v20 = vpop.permute.xlu0 %6712 }
 0x44e   : > { %v5792_v11 = vpop.f32.mrf.mxu0  ;;  %6405 = vmatprep.mubr.bf16.mxu1 %v9368_v46 }
 0x44f   : > { %v8483_v25 = vpack.c.bf16 %v7123_v29, %v7123_v29  ;;  %v6208_v54 = vadd.f32 %v6207_v5, %v5791_v31  ;;  %v6209_v12 = vpop.f32.mrf.mxu1  ;;  %v9372_v29 = vld [vmem:[%s12640_s2 + $0x640] ss:$24 sps:$4 sm:$0xff]   ;;  %v9377_v31 = vld [vmem:[%s12640_s2 + $0x66c] ss:$24 sps:$4 sm:$0xff]  }
 0x450   : > { %v5793_v48 = vpop.f32.mrf.mxu0  ;;  %v9380_v11 = vld [vmem:[%s12640_s2 + $0x674] ss:$24 sps:$4 sm:$0xff]  }
 0x451   : > { %7604 = vst.msk [vmem:[%s12080_s26 + $0x34] sm:$0xf] %vm7590_vm0, %v8483_v25  ;;  %v7124_v55 = vadd.f32 %v6703_v44, %v6208_v54  ;;  %v5794_v2 = vadd.f32 %v5793_v48, %v11055_v8  ;;  %v6210_v49 = vpop.f32.mrf.mxu1  ;;  %v6718_v44 = vpop.permute.xlu1 %6717 }
 0x452   : > { %v5795_v10 = vpop.f32.mrf.mxu0 }
 0x453   : > { %v8484_v47 = vpack.c.bf16 %v7124_v55, %v7124_v55  ;;  %v6211_v22 = vadd.f32 %v6210_v49, %v5794_v2  ;;  %v6212_v18 = vpop.f32.mrf.mxu1  ;;  %v6723_v10 = vpop.permute.xlu0 %6722 }
 0x454   : > { %v5798_v50 = vpop.f32.mrf.mxu0  ;;  %5989 = vmatmul.mubr.bf16.gmra.mxu0 %v9363_v51 }
 0x455   : > { %7605 = vst.msk [vmem:[%s12080_s26 + $0x38] sm:$0xf] %vm7590_vm0, %v8484_v47  ;;  %v7125_v8 = vadd.f32 %v6708_v23, %v6211_v22  ;;  %v5799_v39 = vadd.f32 %v5798_v50, %v11058_v42  ;;  %v6215_v58 = vpop.f32.mrf.mxu1  ;;  %6406 = vmatmul.mubr.bf16.gmra.mxu1 %v9366_v56  ;;  %5996 = vmatprep.mubr.bf16.mxu0 %v9371_v34  ;;  %v9375_v47 = vld [vmem:[%s12640_s2 + $0x668] ss:$24 sps:$4 sm:$0xff]   ;;  %v9383_v50 = vld [vmem:[%s12640_s2 + $0x69c] ss:$24 sps:$4 sm:$0xff]  }
 0x456   : > { %v5800_v21 = vpop.f32.mrf.mxu0  ;;  %6413 = vmatprep.mubr.bf16.mxu1 %v9374_v4  ;;  %v9378_v23 = vld [vmem:[%s12640_s2 + $0x670] ss:$24 sps:$4 sm:$0xff]  }
 0x457   : > { %v8485_v40 = vpack.c.bf16 %v7125_v8, %v7125_v8  ;;  %v6216_v16 = vadd.f32 %v6215_v58, %v5799_v39  ;;  %v6217_v46 = vpop.f32.mrf.mxu1  ;;  %v9386_v39 = vld [vmem:[%s12640_s2 + $0x6a4] ss:$24 sps:$4 sm:$0xff]  }
 0x458   : > { %v5801_v28 = vpop.f32.mrf.mxu0 }
 0x459   : > { %7606 = vst.msk [vmem:[%s12080_s26 + $0x3c] sm:$0xf] %vm7590_vm0, %v8485_v40  ;;  %v7126_v3 = vadd.f32 %v6713_v20, %v6216_v16  ;;  %v5802_v42 = vadd.f32 %v5801_v28, %v11073_v24  ;;  %v6218_v33 = vpop.f32.mrf.mxu1  ;;  %v6728_v16 = vpop.permute.xlu1 %6727 }
 0x45a   : > { %v5803_v5 = vpop.f32.mrf.mxu0 }
 0x45b   : > { %v8486_v25 = vpack.c.bf16 %v7126_v3, %v7126_v3  ;;  %v6219_v54 = vadd.f32 %v6218_v33, %v5802_v42  ;;  %v6220_v12 = vpop.f32.mrf.mxu1  ;;  %v9381_v5 = vld [vmem:[%s12640_s2 + $0x698] ss:$24 sps:$4 sm:$0xff]  }
 0x45c   : > { %v5806_v48 = vpop.f32.mrf.mxu0  ;;  %5997 = vmatmul.mubr.bf16.gmra.mxu0 %v9369_v41  ;;  %v9389_v12 = vld [vmem:[%s12640_s2 + $0x6cc] ss:$24 sps:$4 sm:$0xff]  }
 0x45d   : > { %7607 = vst.msk [vmem:[%s12080_s26 + $0x40] sm:$0xf] %vm7590_vm0, %v8486_v25  ;;  %v7127_v24 = vadd.f32 %v6718_v44, %v6219_v54  ;;  %v5807_v51 = vadd.f32 %v5806_v48, %v11076_v61  ;;  %v6223_v55 = vpop.f32.mrf.mxu1  ;;  %6414 = vmatmul.mubr.bf16.gmra.mxu1 %v9372_v29  ;;  %6004 = vmatprep.mubr.bf16.mxu0 %v9377_v31  ;;  %v6733_v29 = vpop.permute.xlu0 %6732  ;;  %v9384_v54 = vld [vmem:[%s12640_s2 + $0x6a0] ss:$24 sps:$4 sm:$0xff]   ;;  %v9392_v48 = vld [vmem:[%s12640_s2 + $0x6d4] ss:$24 sps:$4 sm:$0xff]  }
 0x45e   : > { %v5808_v2 = vpop.f32.mrf.mxu0  ;;  %6421 = vmatprep.mubr.bf16.mxu1 %v9380_v11 }
 0x45f   : > { %v8487_v49 = vpack.c.bf16 %v7127_v24, %v7127_v24  ;;  %v6224_v56 = vadd.f32 %v6223_v55, %v5807_v51  ;;  %v6225_v34 = vpop.f32.mrf.mxu1  ;;  %v6738_v2 = vpop.permute.xlu1 %6737 }
 0x460   : > { %v5809_v4 = vpop.f32.mrf.mxu0 }
 0x461   : > { %7608 = vst.msk [vmem:[%s12080_s26 + $0x44] sm:$0xf] %vm7590_vm0, %v8487_v49  ;;  %v7128_v22 = vadd.f32 %v6723_v10, %v6224_v56  ;;  %v5810_v61 = vadd.f32 %v5809_v4, %v11091_v43  ;;  %v6226_v18 = vpop.f32.mrf.mxu1 }
 0x462   : > { %v5811_v8 = vpop.f32.mrf.mxu0 }
 0x463   : > { %v8488_v58 = vpack.c.bf16 %v7128_v22, %v7128_v22  ;;  %v6227_v21 = vadd.f32 %v6226_v18, %v5810_v61  ;;  %v6228_v40 = vpop.f32.mrf.mxu1  ;;  %v6743_v61 = vpop.permute.xlu0 %6742 }
 0x464   : > { %v5814_v46 = vpop.f32.mrf.mxu0  ;;  %6005 = vmatmul.mubr.bf16.gmra.mxu0 %v9375_v47  ;;  %v9398_v40 = vld [vmem:[%s12640_s2 + $0x704] ss:$24 sps:$4 sm:$0xff]  }
 0x465   : > { %7609 = vst.msk [vmem:[%s12080_s26 + $0x48] sm:$0xf] %vm7590_vm0, %v8488_v58  ;;  %v7129_v43 = vadd.f32 %v6728_v16, %v6227_v21  ;;  %v5815_v20 = vadd.f32 %v5814_v46, %v11094_v30  ;;  %v6231_v28 = vpop.f32.mrf.mxu1  ;;  %6422 = vmatmul.mubr.bf16.gmra.mxu1 %v9378_v23  ;;  %6012 = vmatprep.mubr.bf16.mxu0 %v9383_v50  ;;  %v9387_v23 = vld [vmem:[%s12640_s2 + $0x6c8] ss:$24 sps:$4 sm:$0xff]   ;;  %v9395_v58 = vld [vmem:[%s12640_s2 + $0x6fc] ss:$24 sps:$4 sm:$0xff]  }
 0x466   : > { %v5816_v41 = vpop.f32.mrf.mxu0  ;;  %6429 = vmatprep.mubr.bf16.mxu1 %v9386_v39  ;;  %v9390_v39 = vld [vmem:[%s12640_s2 + $0x6d0] ss:$24 sps:$4 sm:$0xff]  }
 0x467   : > { %v8489_v3 = vpack.c.bf16 %v7129_v43, %v7129_v43  ;;  %v6232_v42 = vadd.f32 %v6231_v28, %v5815_v20  ;;  %v6233_v33 = vpop.f32.mrf.mxu1  ;;  %v6748_v20 = vpop.permute.xlu1 %6747 }
 0x468   : > { %v5817_v31 = vpop.f32.mrf.mxu0 }
 0x469   : > { %7610 = vst.msk [vmem:[%s12080_s26 + $0x4c] sm:$0xf] %vm7590_vm0, %v8489_v3  ;;  %v7130_v11 = vadd.f32 %v6733_v29, %v6232_v42  ;;  %v5818_v30 = vadd.f32 %v5817_v31, %v11109_v60  ;;  %v6234_v25 = vpop.f32.mrf.mxu1 }
 0x46a   : > { %v5819_v44 = vpop.f32.mrf.mxu0 }
 0x46b   : > { %v8490_v24 = vpack.c.bf16 %v7130_v11, %v7130_v11  ;;  %v6235_v51 = vadd.f32 %v6234_v25, %v5818_v30  ;;  %v6236_v55 = vpop.f32.mrf.mxu1  ;;  %v9393_v30 = vld [vmem:[%s12640_s2 + $0x6f8] ss:$24 sps:$4 sm:$0xff]   ;;  %v9401_v44 = vld [vmem:[%s12640_s2 + $0x72c] ss:$24 sps:$4 sm:$0xff]  }
 0x46c   : > { %v5822_v49 = vpop.f32.mrf.mxu0  ;;  %6013 = vmatmul.mubr.bf16.gmra.mxu0 %v9381_v5  ;;  %v6753_v5 = vpop.permute.xlu0 %6752 }
 0x46d   : > { %7611 = vst.msk [vmem:[%s12080_s26 + $0x50] sm:$0xf] %vm7590_vm0, %v8490_v24  ;;  %v7131_v60 = vadd.f32 %v6738_v2, %v6235_v51  ;;  %v5823_v56 = vadd.f32 %v5822_v49, %v11112_v1  ;;  %v6239_v34 = vpop.f32.mrf.mxu1  ;;  %6430 = vmatmul.mubr.bf16.gmra.mxu1 %v9384_v54  ;;  %6020 = vmatprep.mubr.bf16.mxu0 %v9389_v12  ;;  %v9396_v12 = vld [vmem:[%s12640_s2 + $0x700] ss:$24 sps:$4 sm:$0xff]   ;;  %v9404_v24 = vld [vmem:[%s12640_s2 + $0x734] ss:$24 sps:$4 sm:$0xff]   ;;  %v6758_v49 = vpop.permute.xlu1 %6757 }
 0x46e   : > { %v5824_v10 = vpop.f32.mrf.mxu0  ;;  %6437 = vmatprep.mubr.bf16.mxu1 %v9392_v48 }
 0x46f   : > { %v8491_v4 = vpack.c.bf16 %v7131_v60, %v7131_v60  ;;  %v6240_v47 = vadd.f32 %v6239_v34, %v5823_v56  ;;  %v6241_v22 = vpop.f32.mrf.mxu1 }
 0x470   : > { %v5825_v18 = vpop.f32.mrf.mxu0 }
 0x471   : > { %7612 = vst.msk [vmem:[%s12080_s26 + $0x54] sm:$0xf] %vm7590_vm0, %v8491_v4  ;;  %v7132_v50 = vadd.f32 %v6743_v61, %v6240_v47  ;;  %v5826_v1 = vadd.f32 %v5825_v18, %v11127_v15  ;;  %v6242_v8 = vpop.f32.mrf.mxu1  ;;  %v6763_v61 = vpop.permute.xlu0 %6762 }
 0x472   : > { %v5827_v21 = vpop.f32.mrf.mxu0 }
 0x473   : > { %v8492_v16 = vpack.c.bf16 %v7132_v50, %v7132_v50  ;;  %v6243_v46 = vadd.f32 %v6242_v8, %v5826_v1  ;;  %v6244_v43 = vpop.f32.mrf.mxu1  ;;  %v9402_v8 = vld [vmem:[%s12640_s2 + $0x730] ss:$24 sps:$4 sm:$0xff]   ;;  %v9410_v21 = vld [vmem:[%s12640_s2 + $0x764] ss:$24 sps:$4 sm:$0xff]  }
 0x474   : > { %v5830_v28 = vpop.f32.mrf.mxu0  ;;  %6021 = vmatmul.mubr.bf16.gmra.mxu0 %v9387_v23  ;;  %v9399_v23 = vld [vmem:[%s12640_s2 + $0x728] ss:$24 sps:$4 sm:$0xff]   ;;  %v6768_v43 = vpop.permute.xlu1 %6767 }
 0x475   : > { %7613 = vst.msk [vmem:[%s12080_s26 + $0x58] sm:$0xf] %vm7590_vm0, %v8492_v16  ;;  %v7133_v15 = vadd.f32 %v6748_v20, %v6243_v46  ;;  %v5831_v41 = vadd.f32 %v5830_v28, %v11130_v0  ;;  %v6247_v3 = vpop.f32.mrf.mxu1  ;;  %6438 = vmatmul.mubr.bf16.gmra.mxu1 %v9390_v39  ;;  %6028 = vmatprep.mubr.bf16.mxu0 %v9395_v58  ;;  %v9407_v39 = vld [vmem:[%s12640_s2 + $0x75c] ss:$24 sps:$4 sm:$0xff]  }
 0x476   : > { %v5832_v42 = vpop.f32.mrf.mxu0  ;;  %6445 = vmatprep.mubr.bf16.mxu1 %v9398_v40 }
 0x477   : > { %v8493_v33 = vpack.c.bf16 %v7133_v15, %v7133_v15  ;;  %v6248_v29 = vadd.f32 %v6247_v3, %v5831_v41  ;;  %v6249_v31 = vpop.f32.mrf.mxu1 }
 0x478   : > { %v5833_v11 = vpop.f32.mrf.mxu0 }
 0x479   : > { %7614 = vst.msk [vmem:[%s12080_s26 + $0x5c] sm:$0xf] %vm7590_vm0, %v8493_v33  ;;  %v7134_v25 = vadd.f32 %v6753_v5, %v6248_v29  ;;  %v5834_v0 = vadd.f32 %v5833_v11, %v11145_v36  ;;  %v6250_v54 = vpop.f32.mrf.mxu1  ;;  %v6773_v29 = vpop.permute.xlu0 %6772  ;;  %v9405_v5 = vld [vmem:[%s12640_s2 + $0x758] ss:$24 sps:$4 sm:$0xff]  }
 0x47a   : > { %v5835_v48 = vpop.f32.mrf.mxu0 }
 0x47b   : > { %v8494_v51 = vpack.c.bf16 %v7134_v25, %v7134_v25  ;;  %v6251_v55 = vadd.f32 %v6250_v54, %v5834_v0  ;;  %v6252_v2 = vpop.f32.mrf.mxu1  ;;  %v9408_v25 = vld [vmem:[%s12640_s2 + $0x760] ss:$24 sps:$4 sm:$0xff]   ;;  %v9413_v0 = vld [vmem:[%s12640_s2 + $0x78c] ss:$24 sps:$4 sm:$0xff]  }
 0x47c   : > { %v5838_v60 = vpop.f32.mrf.mxu0  ;;  %6029 = vmatmul.mubr.bf16.gmra.mxu0 %v9393_v30 }
 0x47d   : > { %7615 = vst.msk [vmem:[%s12080_s26 + $0x60] sm:$0xf] %vm7590_vm0, %v8494_v51  ;;  %v7135_v36 = vadd.f32 %v6758_v49, %v6251_v55  ;;  %v5839_v56 = vadd.f32 %v5838_v60, %v11148_v17  ;;  %v6255_v34 = vpop.f32.mrf.mxu1  ;;  %6446 = vmatmul.mubr.bf16.gmra.mxu1 %v9396_v12  ;;  %6036 = vmatprep.mubr.bf16.mxu0 %v9401_v44  ;;  %v9416_v12 = vld [vmem:[%s12640_s2 + $0x794] ss:$24 sps:$4 sm:$0xff]   ;;  %v6778_v51 = vpop.permute.xlu1 %6777 }
 0x47e   : > { %v5840_v10 = vpop.f32.mrf.mxu0  ;;  %6453 = vmatprep.mubr.bf16.mxu1 %v9404_v24 }
 0x47f   : > { %v8495_v4 = vpack.c.bf16 %v7135_v36, %v7135_v36  ;;  %v6256_v47 = vadd.f32 %v6255_v34, %v5839_v56  ;;  %v6257_v22 = vpop.f32.mrf.mxu1  ;;  %v6783_v10 = vpop.permute.xlu0 %6782 }
 0x480   : > { %v5841_v18 = vpop.f32.mrf.mxu0 }
 0x481   : > { %7616 = vst.msk [vmem:[%s12080_s26 + $0x64] sm:$0xf] %vm7590_vm0, %v8495_v4  ;;  %v7136_v50 = vadd.f32 %v6763_v61, %v6256_v47  ;;  %v5842_v17 = vadd.f32 %v5841_v18, %v11163_v57  ;;  %v6258_v1 = vpop.f32.mrf.mxu1  ;;  %v9411_v47 = vld [vmem:[%s12640_s2 + $0x788] ss:$24 sps:$4 sm:$0xff]  }
 0x482   : > { %v5843_v58 = vpop.f32.mrf.mxu0  ;;  %v9414_v18 = vld [vmem:[%s12640_s2 + $0x790] ss:$24 sps:$4 sm:$0xff]  }
 0x483   : > { %v8496_v40 = vpack.c.bf16 %v7136_v50, %v7136_v50  ;;  %v6259_v16 = vadd.f32 %v6258_v1, %v5842_v17  ;;  %v6260_v46 = vpop.f32.mrf.mxu1  ;;  %v9422_v17 = vld [vmem:[%s12640_s2 + $0x7c4] ss:$24 sps:$4 sm:$0xff]   ;;  %v6788_v58 = vpop.permute.xlu1 %6787 }
 0x484   : > { %v5846_v20 = vpop.f32.mrf.mxu0  ;;  %6037 = vmatmul.mubr.bf16.gmra.mxu0 %v9399_v23  ;;  %v9419_v23 = vld [vmem:[%s12640_s2 + $0x7bc] ss:$24 sps:$4 sm:$0xff]  }
 0x485   : > { %7617 = vst.msk [vmem:[%s12080_s26 + $0x68] sm:$0xf] %vm7590_vm0, %v8496_v40  ;;  %v7137_v57 = vadd.f32 %v6768_v43, %v6259_v16  ;;  %v5847_v28 = vadd.f32 %v5846_v20, %v11166_v35  ;;  %v6263_v15 = vpop.f32.mrf.mxu1  ;;  %6454 = vmatmul.mubr.bf16.gmra.mxu1 %v9402_v8  ;;  %6044 = vmatprep.mubr.bf16.mxu0 %v9407_v39 }
 0x486   : > { %v5848_v41 = vpop.f32.mrf.mxu0  ;;  %6461 = vmatprep.mubr.bf16.mxu1 %v9410_v21 }
 0x487   : > { %v8497_v3 = vpack.c.bf16 %v7137_v57, %v7137_v57  ;;  %v6264_v42 = vadd.f32 %v6263_v15, %v5847_v28  ;;  %v6265_v33 = vpop.f32.mrf.mxu1  ;;  %v6793_v28 = vpop.permute.xlu0 %6792  ;;  %v9417_v41 = vld [vmem:[%s12640_s2 + $0x7b8] ss:$24 sps:$4 sm:$0xff]  }
 0x488   : > { %v5849_v31 = vpop.f32.mrf.mxu0  ;;  %v9420_v33 = vld [vmem:[%s12640_s2 + $0x7c0] ss:$24 sps:$4 sm:$0xff]  }
 0x489   : > { %7618 = vst.msk [vmem:[%s12080_s26 + $0x6c] sm:$0xf] %vm7590_vm0, %v8497_v3  ;;  %v7138_v11 = vadd.f32 %v6773_v29, %v6264_v42  ;;  %v5850_v35 = vadd.f32 %v5849_v31, %v11181_v14  ;;  %v6266_v30 = vpop.f32.mrf.mxu1  ;;  %v9425_v29 = vld [vmem:[%s12640_s2 + $0x7ec] ss:$24 sps:$4 sm:$0xff]  }
 0x48a   : > { %v5851_v54 = vpop.f32.mrf.mxu0 }
 0x48b   : > { %v8498_v44 = vpack.c.bf16 %v7138_v11, %v7138_v11  ;;  %v6267_v48 = vadd.f32 %v6266_v30, %v5850_v35  ;;  %v6268_v24 = vpop.f32.mrf.mxu1 }
 0x48c   : > { %v5854_v55 = vpop.f32.mrf.mxu0  ;;  %6045 = vmatmul.mubr.bf16.gmra.mxu0 %v9405_v5  ;;  %v9428_v5 = vld [vmem:[%s12640_s2 + $0x7f4] ss:$24 sps:$4 sm:$0xff]  }
 0x48d   : > { %7619 = vst.msk [vmem:[%s12080_s26 + $0x70] sm:$0xf] %vm7590_vm0, %v8498_v44  ;;  %v7139_v14 = vadd.f32 %v6778_v51, %v6267_v48  ;;  %v5855_v2 = vadd.f32 %v5854_v55, %v11184_v53  ;;  %v6271_v49 = vpop.f32.mrf.mxu1  ;;  %6462 = vmatmul.mubr.bf16.gmra.mxu1 %v9408_v25  ;;  %6052 = vmatprep.mubr.bf16.mxu0 %v9413_v0  ;;  %v6798_v25 = vpop.permute.xlu1 %6797 }
 0x48e   : > { %v5856_v60 = vpop.f32.mrf.mxu0  ;;  %6469 = vmatprep.mubr.bf16.mxu1 %v9416_v12  ;;  %v6803_v55 = vpop.permute.xlu0 %6802 }
 0x48f   : > { %v8499_v36 = vpack.c.bf16 %v7139_v14, %v7139_v14  ;;  %v6272_v56 = vadd.f32 %v6271_v49, %v5855_v2  ;;  %v6273_v34 = vpop.f32.mrf.mxu1  ;;  %v9423_v2 = vld [vmem:[%s12640_s2 + $0x7e8] ss:$24 sps:$4 sm:$0xff]  }
 0x490   : > { %v5857_v4 = vpop.f32.mrf.mxu0 }
 0x491   : > { %7620 = vst.msk [vmem:[%s12080_s26 + $0x74] sm:$0xf] %vm7590_vm0, %v8499_v36  ;;  %v7140_v22 = vadd.f32 %v6783_v10, %v6272_v56  ;;  %v5858_v53 = vadd.f32 %v5857_v4, %v11199_v38  ;;  %v6274_v61 = vpop.f32.mrf.mxu1  ;;  %v9426_v36 = vld [vmem:[%s12640_s2 + $0x7f0] ss:$24 sps:$4 sm:$0xff]   ;;  %v9431_v56 = vld [vmem:[%s12640_s2 + $0x81c] ss:$24 sps:$4 sm:$0xff]  }
 0x492   : > { %v5859_v50 = vpop.f32.mrf.mxu0  ;;  %v9434_v10 = vld [vmem:[%s12640_s2 + $0x824] ss:$24 sps:$4 sm:$0xff]  }
 0x493   : > { %v8500_v1 = vpack.c.bf16 %v7140_v22, %v7140_v22  ;;  %v6275_v8 = vadd.f32 %v6274_v61, %v5858_v53  ;;  %v6276_v39 = vpop.f32.mrf.mxu1  ;;  %v6808_v53 = vpop.permute.xlu1 %6807 }
 0x494   : > { %v5862_v21 = vpop.f32.mrf.mxu0  ;;  %6053 = vmatmul.mubr.bf16.gmra.mxu0 %v9411_v47  ;;  %v6813_v39 = vpop.permute.xlu0 %6812 }
 0x495   : > { %7621 = vst.msk [vmem:[%s12080_s26 + $0x78] sm:$0xf] %vm7590_vm0, %v8500_v1  ;;  %v7141_v38 = vadd.f32 %v6788_v58, %v6275_v8  ;;  %v5863_v40 = vadd.f32 %v5862_v21, %v11202_v7  ;;  %v6279_v16 = vpop.f32.mrf.mxu1  ;;  %6470 = vmatmul.mubr.bf16.gmra.mxu1 %v9414_v18  ;;  %6060 = vmatprep.mubr.bf16.mxu0 %v9419_v23  ;;  %v9429_v21 = vld [vmem:[%s12640_s2 + $0x818] ss:$24 sps:$4 sm:$0xff]  }
 0x496   : > { %v5864_v46 = vpop.f32.mrf.mxu0  ;;  %6477 = vmatprep.mubr.bf16.mxu1 %v9422_v17 }
 0x497   : > { %v8501_v43 = vpack.c.bf16 %v7141_v38, %v7141_v38  ;;  %v6280_v20 = vadd.f32 %v6279_v16, %v5863_v40  ;;  %v6281_v57 = vpop.f32.mrf.mxu1  ;;  %v9432_v16 = vld [vmem:[%s12640_s2 + $0x820] ss:$24 sps:$4 sm:$0xff]   ;;  %v9437_v46 = vld [vmem:[%s12640_s2 + $0x84c] ss:$24 sps:$4 sm:$0xff]  }
 0x498   : > { %v5865_v15 = vpop.f32.mrf.mxu0 }
 0x499   : > { %7622 = vst.msk [vmem:[%s12080_s26 + $0x7c] sm:$0xf] %vm7590_vm0, %v8501_v43  ;;  %v7142_v3 = vadd.f32 %v6793_v28, %v6280_v20  ;;  %v5866_v7 = vadd.f32 %v5865_v15, %v11217_v63  ;;  %v6282_v42 = vpop.f32.mrf.mxu1  ;;  %v9440_v20 = vld [vmem:[%s12640_s2 + $0x854] ss:$24 sps:$4 sm:$0xff]  }
 0x49a   : > { %v5867_v31 = vpop.f32.mrf.mxu0 }
 0x49b   : > { %v8502_v11 = vpack.c.bf16 %v7142_v3, %v7142_v3  ;;  %v6283_v35 = vadd.f32 %v6282_v42, %v5866_v7  ;;  %v6284_v30 = vpop.f32.mrf.mxu1 }
 0x49c   : > { %v5870_v0 = vpop.f32.mrf.mxu0  ;;  %6061 = vmatmul.mubr.bf16.gmra.mxu0 %v9417_v41  ;;  %v6818_v41 = vpop.permute.xlu1 %6817  ;;  %v9435_v30 = vld [vmem:[%s12640_s2 + $0x848] ss:$24 sps:$4 sm:$0xff]  }
 0x49d   : > { %7623 = vst.msk [vmem:[%s12080_s26 + $0x80] sm:$0xf] %vm7590_vm0, %v8502_v11  ;;  %v7143_v63 = vadd.f32 %v6798_v25, %v6283_v35  ;;  %v5871_v54 = vadd.f32 %v5870_v0, %v11223_v13  ;;  %v6287_v12 = vpop.f32.mrf.mxu1  ;;  %6478 = vmatmul.mubr.bf16.gmra.mxu1 %v9420_v33  ;;  %6068 = vmatprep.mubr.bf16.mxu0 %v9425_v29  ;;  %v6823_v11 = vpop.permute.xlu0 %6822 }
 0x49e   : > { %v5872_v44 = vpop.f32.mrf.mxu0  ;;  %6485 = vmatprep.mubr.bf16.mxu1 %v9428_v5 }
 0x49f   : > { %v8503_v48 = vpack.c.bf16 %v7143_v63, %v7143_v63  ;;  %v6288_v24 = vadd.f32 %v6287_v12, %v5871_v54  ;;  %v6289_v51 = vpop.f32.mrf.mxu1  ;;  %v9438_v63 = vld [vmem:[%s12640_s2 + $0x850] ss:$24 sps:$4 sm:$0xff]   ;;  %v9443_v54 = vld [vmem:[%s12640_s2 + $0x87c] ss:$24 sps:$4 sm:$0xff]  }
 0x4a0   : > { %v5873_v14 = vpop.f32.mrf.mxu0  ;;  %v9446_v44 = vld [vmem:[%s12640_s2 + $0x884] ss:$24 sps:$4 sm:$0xff]  }
 0x4a1   : > { %7624 = vst.msk [vmem:[%s12080_s26 + $0x84] sm:$0xf] %vm7590_vm0, %v8503_v48  ;;  %v7144_v49 = vadd.f32 %v6803_v55, %v6288_v24  ;;  %v5874_v13 = vadd.f32 %v5873_v14, %v11244_v6  ;;  %v6290_v60 = vpop.f32.mrf.mxu1  ;;  %v6828_v55 = vpop.permute.xlu1 %6827 }
 0x4a2   : > { %v5875_v34 = vpop.f32.mrf.mxu0 }
 0x4a3   : > { %v8504_v4 = vpack.c.bf16 %v7144_v49, %v7144_v49  ;;  %v6291_v47 = vadd.f32 %v6290_v60, %v5874_v13  ;;  %v6292_v22 = vpop.f32.mrf.mxu1  ;;  %v6833_v34 = vpop.permute.xlu0 %6832 }
 0x4a4   : > { %v5878_v61 = vpop.f32.mrf.mxu0  ;;  %6069 = vmatmul.mubr.bf16.gmra.mxu0 %v9423_v2 }
 0x4a5   : > { %7625 = vst.msk [vmem:[%s12080_s26 + $0x88] sm:$0xf] %vm7590_vm0, %v8504_v4  ;;  %v7145_v6 = vadd.f32 %v6808_v53, %v6291_v47  ;;  %v5879_v18 = vadd.f32 %v5878_v61, %v11250_v27  ;;  %v6295_v23 = vpop.f32.mrf.mxu1  ;;  %6486 = vmatmul.mubr.bf16.gmra.mxu1 %v9426_v36  ;;  %6076 = vmatprep.mubr.bf16.mxu0 %v9431_v56  ;;  %v9441_v4 = vld [vmem:[%s12640_s2 + $0x878] ss:$24 sps:$4 sm:$0xff]   ;;  %v9449_v61 = vld [vmem:[%s12640_s2 + $0x8ac] ss:$24 sps:$4 sm:$0xff]  }
 0x4a6   : > { %v5880_v50 = vpop.f32.mrf.mxu0  ;;  %6493 = vmatprep.mubr.bf16.mxu1 %v9434_v10  ;;  %v9444_v53 = vld [vmem:[%s12640_s2 + $0x880] ss:$24 sps:$4 sm:$0xff]  }
 0x4a7   : > { %v8505_v17 = vpack.c.bf16 %v7145_v6, %v7145_v6  ;;  %v6296_v1 = vadd.f32 %v6295_v23, %v5879_v18  ;;  %v6297_v8 = vpop.f32.mrf.mxu1  ;;  %v9452_v18 = vld [vmem:[%s12640_s2 + $0x8b4] ss:$24 sps:$4 sm:$0xff]  }
 0x4a8   : > { %v5881_v58 = vpop.f32.mrf.mxu0 }
 0x4a9   : > { %7626 = vst.msk [vmem:[%s12080_s26 + $0x8c] sm:$0xf] %vm7590_vm0, %v8505_v17  ;;  %v7146_v38 = vadd.f32 %v6813_v39, %v6296_v1  ;;  %v5882_v27 = vadd.f32 %v5881_v58, %v11271_v37  ;;  %v6298_v40 = vpop.f32.mrf.mxu1  ;;  %v6838_v1 = vpop.permute.xlu1 %6837 }
 0x4aa   : > { %v5883_v43 = vpop.f32.mrf.mxu0 }
 0x4ab   : > { %v8506_v57 = vpack.c.bf16 %v7146_v38, %v7146_v38  ;;  %v6299_v28 = vadd.f32 %v6298_v40, %v5882_v27  ;;  %v6300_v15 = vpop.f32.mrf.mxu1  ;;  %v9447_v43 = vld [vmem:[%s12640_s2 + $0x8a8] ss:$24 sps:$4 sm:$0xff]  }
 0x4ac   : > { %v5886_v3 = vpop.f32.mrf.mxu0  ;;  %6077 = vmatmul.mubr.bf16.gmra.mxu0 %v9429_v21  ;;  %v9455_v15 = vld [vmem:[%s12640_s2 + $0x8dc] ss:$24 sps:$4 sm:$0xff]  }
 0x4ad   : > { %7627 = vst.msk [vmem:[%s12080_s26 + $0x90] sm:$0xf] %vm7590_vm0, %v8506_v57  ;;  %v7147_v37 = vadd.f32 %v6818_v41, %v6299_v28  ;;  %v5887_v7 = vadd.f32 %v5886_v3, %v11280_v26  ;;  %v6303_v42 = vpop.f32.mrf.mxu1  ;;  %6494 = vmatmul.mubr.bf16.gmra.mxu1 %v9432_v16  ;;  %6084 = vmatprep.mubr.bf16.mxu0 %v9437_v46  ;;  %v6843_v16 = vpop.permute.xlu0 %6842  ;;  %v9450_v28 = vld [vmem:[%s12640_s2 + $0x8b0] ss:$24 sps:$4 sm:$0xff]   ;;  %v9458_v3 = vld [vmem:[%s12640_s2 + $0x8e4] ss:$24 sps:$4 sm:$0xff]  }
 0x4ae   : > { %v5888_v33 = vpop.f32.mrf.mxu0  ;;  %6501 = vmatprep.mubr.bf16.mxu1 %v9440_v20 }
 0x4af   : > { %v8507_v29 = vpack.c.bf16 %v7147_v37, %v7147_v37  ;;  %v6304_v31 = vadd.f32 %v6303_v42, %v5887_v7  ;;  %v6305_v5 = vpop.f32.mrf.mxu1  ;;  %v6848_v33 = vpop.permute.xlu1 %6847 }
 0x4b0   : > { %v5889_v35 = vpop.f32.mrf.mxu0 }
 0x4b1   : > { %7628 = vst.msk [vmem:[%s12080_s26 + $0x94] sm:$0xf] %vm7590_vm0, %v8507_v29  ;;  %v7148_v25 = vadd.f32 %v6823_v11, %v6304_v31  ;;  %v5890_v26 = vadd.f32 %v5889_v35, %v11301_v9  ;;  %v6306_v0 = vpop.f32.mrf.mxu1 }
 0x4b2   : > { %v5891_v12 = vpop.f32.mrf.mxu0 }
 0x4b3   : > { %v8508_v48 = vpack.c.bf16 %v7148_v25, %v7148_v25  ;;  %v6307_v24 = vadd.f32 %v6306_v0, %v5890_v26  ;;  %v6308_v51 = vpop.f32.mrf.mxu1  ;;  %v6853_v26 = vpop.permute.xlu0 %6852  ;;  %v12797_v12 = vld [vmem:[#allocation2_spill] sm:$0xff] }
 0x4b4   : > { %v5894_v14 = vpop.f32.mrf.mxu0  ;;  %6085 = vmatmul.mubr.bf16.gmra.mxu0 %v9435_v30 }
 0x4b5   : > { %7629 = vst.msk [vmem:[%s12080_s26 + $0x98] sm:$0xf] %vm7590_vm0, %v8508_v48  ;;  %v7149_v9 = vadd.f32 %v6828_v55, %v6307_v24  ;;  %v5895_v2 = vadd.f32 %v5894_v14, %v11310_v59  ;;  %v6311_v49 = vpop.f32.mrf.mxu1  ;;  %6502 = vmatmul.mubr.bf16.gmra.mxu1 %v9438_v63  ;;  %6092 = vmatprep.mubr.bf16.mxu0 %v9443_v54  ;;  %v9453_v63 = vld [vmem:[%s12640_s2 + $0x8d8] ss:$24 sps:$4 sm:$0xff]  }
 0x4b6   : > { %v5896_v13 = vpop.f32.mrf.mxu0  ;;  %6509 = vmatprep.mubr.bf16.mxu1 %v9446_v44  ;;  %v9456_v48 = vld [vmem:[%s12640_s2 + $0x8e0] ss:$24 sps:$4 sm:$0xff]  }
 0x4b7   : > { %v8509_v60 = vpack.c.bf16 %v7149_v9, %v7149_v9  ;;  %v6312_v36 = vadd.f32 %v6311_v49, %v5895_v2  ;;  %v6313_v56 = vpop.f32.mrf.mxu1  ;;  %v6858_v9 = vpop.permute.xlu1 %6857  ;;  %v12798_v13 = vld [vmem:[#allocation3_spill] sm:$0xff] }
 0x4b8   : > { %v5897_v10 = vpop.f32.mrf.mxu0 }
 0x4b9   : > { %7630 = vst.msk [vmem:[%s12080_s26 + $0x9c] sm:$0xf] %vm7590_vm0, %v8509_v60  ;;  %v7150_v47 = vadd.f32 %v6833_v34, %v6312_v36  ;;  %v5898_v59 = vadd.f32 %v5897_v10, %v11331_v45  ;;  %v6314_v22 = vpop.f32.mrf.mxu1 }
 0x4ba   : > { %v5899_v6 = vpop.f32.mrf.mxu0 }
 0x4bb   : > { %v8510_v23 = vpack.c.bf16 %v7150_v47, %v7150_v47  ;;  %v6315_v50 = vadd.f32 %v6314_v22, %v5898_v59  ;;  %v6316_v17 = vpop.f32.mrf.mxu1  ;;  %v6863_v47 = vpop.permute.xlu0 %6862 }
 0x4bc   : > { %v5902_v8 = vpop.f32.mrf.mxu0  ;;  %6093 = vmatmul.mubr.bf16.gmra.mxu0 %v9441_v4 }
 0x4bd   : > { %7631 = vst.msk [vmem:[%s12080_s26 + $0xa0] sm:$0xf] %vm7590_vm0, %v8510_v23  ;;  %v7151_v45 = vadd.f32 %v6838_v1, %v6315_v50  ;;  %v5903_v39 = vadd.f32 %v5902_v8, %v11340_v52  ;;  %v6319_v58 = vpop.f32.mrf.mxu1  ;;  %6510 = vmatmul.mubr.bf16.gmra.mxu1 %v9444_v53  ;;  %6100 = vmatprep.mubr.bf16.mxu0 %v9449_v61  ;;  %v12799_v53 = vld [vmem:[#allocation4_spill] sm:$0xff]  ;;  %v6868_v1 = vpop.permute.xlu1 %6867 }
 0x4be   : > { %v5904_v21 = vpop.f32.mrf.mxu0  ;;  %6517 = vmatprep.mubr.bf16.mxu1 %v9452_v18 }
 0x4bf   : > { %v8511_v38 = vpack.c.bf16 %v7151_v45, %v7151_v45  ;;  %v6320_v27 = vadd.f32 %v6319_v58, %v5903_v39  ;;  %v6321_v40 = vpop.f32.mrf.mxu1  ;;  %v12800_v39 = vld [vmem:[#allocation5_spill] sm:$0xff] }
 0x4c0   : > { %v5905_v46 = vpop.f32.mrf.mxu0 }
 0x4c1   : > { %7632 = vst.msk [vmem:[%s12080_s26 + $0xa4] sm:$0xf] %vm7590_vm0, %v8511_v38  ;;  %v7152_v20 = vadd.f32 %v6843_v16, %v6320_v27  ;;  %v5906_v52 = vadd.f32 %v5905_v46, %v11361_v32  ;;  %v6322_v57 = vpop.f32.mrf.mxu1  ;;  %v6873_v46 = vpop.permute.xlu0 %6872 }
 0x4c2   : > { %v5907_v41 = vpop.f32.mrf.mxu0 }
 0x4c3   : > { %v8512_v37 = vpack.c.bf16 %v7152_v20, %v7152_v20  ;;  %v6323_v7 = vadd.f32 %v6322_v57, %v5906_v52  ;;  %v6324_v42 = vpop.f32.mrf.mxu1 }
 0x4c4   : > { %v5910_v29 = vpop.f32.mrf.mxu0  ;;  %6101 = vmatmul.mubr.bf16.gmra.mxu0 %v9447_v43 }
 0x4c5   : > { %7633 = vst.msk [vmem:[%s12080_s26 + $0xa8] sm:$0xf] %vm7590_vm0, %v8512_v37  ;;  %v7153_v32 = vadd.f32 %v6848_v33, %v6323_v7  ;;  %v5911_v31 = vadd.f32 %v5910_v29, %v11370_v19  ;;  %v6327_v5 = vpop.f32.mrf.mxu1  ;;  %6518 = vmatmul.mubr.bf16.gmra.mxu1 %v9450_v28  ;;  %6108 = vmatprep.mubr.bf16.mxu0 %v9455_v15  ;;  %v6878_v37 = vpop.permute.xlu1 %6877  ;;  %v12801_v33 = vld [vmem:[#allocation6_spill] sm:$0xff] }
 0x4c6   : > { %v5912_v11 = vpop.f32.mrf.mxu0  ;;  %6525 = vmatprep.mubr.bf16.mxu1 %v9458_v3 }
 0x4c7   : > { %v8513_v35 = vpack.c.bf16 %v7153_v32, %v7153_v32  ;;  %v6328_v30 = vadd.f32 %v6327_v5, %v5911_v31  ;;  %v6329_v25 = vpop.f32.mrf.mxu1 }
 0x4c8   : > { %v5913_v0 = vpop.f32.mrf.mxu0 }
 0x4c9   : > { %7634 = vst.msk [vmem:[%s12080_s26 + $0xac] sm:$0xf] %vm7590_vm0, %v8513_v35  ;;  %v7154_v54 = vadd.f32 %v6853_v26, %v6328_v30  ;;  %v5914_v19 = vadd.f32 %v5913_v0, %v12797_v12  ;;  %v6330_v44 = vpop.f32.mrf.mxu1  ;;  %v12802_v26 = vld [vmem:[#allocation7_spill] sm:$0xff] }
 0x4ca   : > { %v5915_v24 = vpop.f32.mrf.mxu0 }
 0x4cb   : > { %v8514_v51 = vpack.c.bf16 %v7154_v54, %v7154_v54  ;;  %v6331_v55 = vadd.f32 %v6330_v44, %v5914_v19  ;;  %v6332_v14 = vpop.f32.mrf.mxu1 }
 0x4cc   : > { %v5918_v2 = vpop.f32.mrf.mxu0  ;;  %6109 = vmatmul.mubr.bf16.gmra.mxu0 %v9453_v63 }
 0x4cd   : > { %7635 = vst.msk [vmem:[%s12080_s26 + $0xb0] sm:$0xf] %vm7590_vm0, %v8514_v51  ;;  %v7155_v49 = vadd.f32 %v6858_v9, %v6331_v55  ;;  %v5919_v60 = vadd.f32 %v5918_v2, %v12798_v13  ;;  %v6335_v36 = vpop.f32.mrf.mxu1  ;;  %6526 = vmatmul.mubr.bf16.gmra.mxu1 %v9456_v48  ;;  %v6888_v48 = vpop.permute.xlu1 %6887  ;;  %v12803_v55 = vld [vmem:[#allocation8_spill] sm:$0xff] }
 0x4ce   : > { %v5920_v56 = vpop.f32.mrf.mxu0 }
 0x4cf   : > { %v8515_v34 = vpack.c.bf16 %v7155_v49, %v7155_v49  ;;  %v6336_v10 = vadd.f32 %v6335_v36, %v5919_v60  ;;  %v6337_v4 = vpop.f32.mrf.mxu1 }
 0x4d0   : > { %v5921_v59 = vpop.f32.mrf.mxu0 }
 0x4d1   : > { %7636 = vst.msk [vmem:[%s12080_s26 + $0xb4] sm:$0xf] %vm7590_vm0, %v8515_v34  ;;  %v7156_v22 = vadd.f32 %v6863_v47, %v6336_v10  ;;  %v5922_v61 = vadd.f32 %v5921_v59, %v12799_v53  ;;  %v6338_v6 = vpop.f32.mrf.mxu1  ;;  %v12804_v10 = vld [vmem:[#allocation9_spill] sm:$0xff] }
 0x4d2   : > { %v5923_v18 = vpop.f32.mrf.mxu0 }
 0x4d3   : > { %v8516_v23 = vpack.c.bf16 %v7156_v22, %v7156_v22  ;;  %v6339_v50 = vadd.f32 %v6338_v6, %v5922_v61  ;;  %v6340_v17 = vpop.f32.mrf.mxu1  ;;  %v6898_v6 = vpop.permute.xlu1 %6897 }
 0x4d4   : > { %v5926_v8 = vpop.f32.mrf.mxu0 }
 0x4d5   : > { %7637 = vst.msk [vmem:[%s12080_s26 + $0xb8] sm:$0xf] %vm7590_vm0, %v8516_v23  ;;  %v7157_v45 = vadd.f32 %v6868_v1, %v6339_v50  ;;  %v5927_v58 = vadd.f32 %v5926_v8, %v12800_v39  ;;  %v6343_v21 = vpop.f32.mrf.mxu1  ;;  %v12805_v50 = vld [vmem:[#allocation10_spill] sm:$0xff] }
 0x4d6   : > { %v5928_v38 = vpop.f32.mrf.mxu0 }
 0x4d7   : > { %v8517_v27 = vpack.c.bf16 %v7157_v45, %v7157_v45  ;;  %v6344_v40 = vadd.f32 %v6343_v21, %v5927_v58  ;;  %v6345_v16 = vpop.f32.mrf.mxu1 }
 0x4d8   : > { %v5929_v43 = vpop.f32.mrf.mxu0 }
 0x4d9   : > { %7638 = vst.msk [vmem:[%s12080_s26 + $0xbc] sm:$0xf] %vm7590_vm0, %v8517_v27  ;;  %v7158_v20 = vadd.f32 %v6873_v46, %v6344_v40  ;;  %v5930_v52 = vadd.f32 %v5929_v43, %v11451_v62  ;;  %v6346_v57 = vpop.f32.mrf.mxu1  ;;  %v6883_v62 = vpop.permute.xlu0 %6882  ;;  %v12806_v40 = vld [vmem:[#allocation11_spill] sm:$0xff] }
 0x4da   : > { %v5931_v28 = vpop.f32.mrf.mxu0 }
 0x4db   : > { %v8518_v15 = vpack.c.bf16 %v7158_v20, %v7158_v20  ;;  %v6347_v41 = vadd.f32 %v6346_v57, %v5930_v52  ;;  %v6348_v3 = vpop.f32.mrf.mxu1  ;;  %v6908_v28 = vpop.permute.xlu1 %6907 }
 0x4dc   : > { %v5934_v7 = vpop.f32.mrf.mxu0  ;;  %v12807_v3 = vld [vmem:[#allocation12_spill] sm:$0xff] }
 0x4dd   : > { %7639 = vst.msk [vmem:[%s12080_s26 + $0xc0] sm:$0xf] %vm7590_vm0, %v8518_v15  ;;  %v7159_v42 = vadd.f32 %v6878_v37, %v6347_v41  ;;  %v5935_v29 = vadd.f32 %v5934_v7, %v12801_v33  ;;  %v6351_v32 = vpop.f32.mrf.mxu1  ;;  %v6893_v36 = vpop.permute.xlu0 %6892 }
 0x4de   : > { %v5936_v31 = vpop.f32.mrf.mxu0 }
 0x4df   : > { %v8519_v5 = vpack.c.bf16 %v7159_v42, %v7159_v42  ;;  %v6352_v11 = vadd.f32 %v6351_v32, %v5935_v29  ;;  %v6353_v35 = vpop.f32.mrf.mxu1 }
 0x4e0   : > { %v5937_v30 = vpop.f32.mrf.mxu0  ;;  %v12808_v35 = vld [vmem:[#allocation13_spill] sm:$0xff] }
 0x4e1   : > { %7640 = vst.msk [vmem:[%s12080_s26 + $0xc4] sm:$0xf] %vm7590_vm0, %v8519_v5  ;;  %v7160_v25 = vadd.f32 %v6883_v62, %v6352_v11  ;;  %v5938_v0 = vadd.f32 %v5937_v30, %v12802_v26  ;;  %v6354_v63 = vpop.f32.mrf.mxu1  ;;  %v6903_v21 = vpop.permute.xlu0 %6902 }
 0x4e2   : > { %v5939_v54 = vpop.f32.mrf.mxu0 }
 0x4e3   : > { %v8520_v12 = vpack.c.bf16 %v7160_v25, %v7160_v25  ;;  %v6355_v19 = vadd.f32 %v6354_v63, %v5938_v0  ;;  %v6356_v44 = vpop.f32.mrf.mxu1  ;;  %v6918_v54 = vpop.permute.xlu1 %6917 }
 0x4e4   : > { %v5942_v24 = vpop.f32.mrf.mxu0  ;;  %v12809_v44 = vld [vmem:[#allocation14_spill] sm:$0xff] }
 0x4e5   : > { %7641 = vst.msk [vmem:[%s12080_s26 + $0xc8] sm:$0xf] %vm7590_vm0, %v8520_v12  ;;  %v7161_v51 = vadd.f32 %v6888_v48, %v6355_v19  ;;  %v5943_v14 = vadd.f32 %v5942_v24, %v12803_v55  ;;  %v6359_v9 = vpop.f32.mrf.mxu1  ;;  %v6913_v31 = vpop.permute.xlu0 %6912 }
 0x4e6   : > { %v5944_v2 = vpop.f32.mrf.mxu0 }
 0x4e7   : > { %v8521_v49 = vpack.c.bf16 %v7161_v51, %v7161_v51  ;;  %v6360_v13 = vadd.f32 %v6359_v9, %v5943_v14  ;;  %v6361_v60 = vpop.f32.mrf.mxu1 }
 0x4e8   : > { %v5945_v56 = vpop.f32.mrf.mxu0  ;;  %v12810_v60 = vld [vmem:[#allocation15_spill] sm:$0xff] }
 0x4e9   : > { %7642 = vst.msk [vmem:[%s12080_s26 + $0xcc] sm:$0xf] %vm7590_vm0, %v8521_v49  ;;  %v7162_v34 = vadd.f32 %v6893_v36, %v6360_v13  ;;  %v5946_v4 = vadd.f32 %v5945_v56, %v12804_v10  ;;  %v6362_v47 = vpop.f32.mrf.mxu1  ;;  %v6923_v2 = vpop.permute.xlu0 %6922 }
 0x4ea   : > { %v5947_v59 = vpop.f32.mrf.mxu0 }
 0x4eb   : > { %v8522_v22 = vpack.c.bf16 %v7162_v34, %v7162_v34  ;;  %v6363_v53 = vadd.f32 %v6362_v47, %v5946_v4  ;;  %v6364_v61 = vpop.f32.mrf.mxu1  ;;  %v6928_v59 = vpop.permute.xlu1 %6927 }
 0x4ec   : > { %v5950_v18 = vpop.f32.mrf.mxu0  ;;  %v12811_v61 = vld [vmem:[#allocation16_spill] sm:$0xff] }
 0x4ed   : > { %7643 = vst.msk [vmem:[%s12080_s26 + $0xd0] sm:$0xf] %vm7590_vm0, %v8522_v22  ;;  %v7163_v23 = vadd.f32 %v6898_v6, %v6363_v53  ;;  %v5951_v17 = vadd.f32 %v5950_v18, %v12805_v50  ;;  %v6367_v1 = vpop.f32.mrf.mxu1 }
 0x4ee   : > { %v5952_v8 = vpop.f32.mrf.mxu0 }
 0x4ef   : > { %v8523_v45 = vpack.c.bf16 %v7163_v23, %v7163_v23  ;;  %v6368_v39 = vadd.f32 %v6367_v1, %v5951_v17  ;;  %v6369_v58 = vpop.f32.mrf.mxu1  ;;  %v6933_v8 = vpop.permute.xlu0 %6932 }
 0x4f0   : > { %v5953_v38 = vpop.f32.mrf.mxu0  ;;  %v12812_v58 = vld [vmem:[#allocation17_spill] sm:$0xff] }
 0x4f1   : > { %7644 = vst.msk [vmem:[%s12080_s26 + $0xd4] sm:$0xf] %vm7590_vm0, %v8523_v45  ;;  %v7164_v27 = vadd.f32 %v6903_v21, %v6368_v39  ;;  %v5954_v16 = vadd.f32 %v5953_v38, %v12806_v40  ;;  %v6370_v46 = vpop.f32.mrf.mxu1 }
 0x4f2   : > { %v5955_v43 = vpop.f32.mrf.mxu0 }
 0x4f3   : > { %v8524_v20 = vpack.c.bf16 %v7164_v27, %v7164_v27  ;;  %v6371_v52 = vadd.f32 %v6370_v46, %v5954_v16  ;;  %v6372_v57 = vpop.f32.mrf.mxu1  ;;  %v6938_v43 = vpop.permute.xlu1 %6937 }
 0x4f4   : > { %v5958_v15 = vpop.f32.mrf.mxu0  ;;  %v12813_v57 = vld [vmem:[#allocation18_spill] sm:$0xff] }
 0x4f5   : > { %7645 = vst.msk [vmem:[%s12080_s26 + $0xd8] sm:$0xf] %vm7590_vm0, %v8524_v20  ;;  %v7165_v41 = vadd.f32 %v6908_v28, %v6371_v52  ;;  %v5959_v37 = vadd.f32 %v5958_v15, %v12807_v3  ;;  %v6375_v7 = vpop.f32.mrf.mxu1 }
 0x4f6   : > { %v5960_v42 = vpop.f32.mrf.mxu0 }
 0x4f7   : > { %v8525_v33 = vpack.c.bf16 %v7165_v41, %v7165_v41  ;;  %v6376_v29 = vadd.f32 %v6375_v7, %v5959_v37  ;;  %v6377_v32 = vpop.f32.mrf.mxu1  ;;  %v6943_v42 = vpop.permute.xlu0 %6942 }
 0x4f8   : > { %v5961_v5 = vpop.f32.mrf.mxu0  ;;  %v12814_v32 = vld [vmem:[#allocation19_spill] sm:$0xff] }
 0x4f9   : > { %7646 = vst.msk [vmem:[%s12080_s26 + $0xdc] sm:$0xf] %vm7590_vm0, %v8525_v33  ;;  %v7166_v11 = vadd.f32 %v6913_v31, %v6376_v29  ;;  %v5962_v62 = vadd.f32 %v5961_v5, %v12808_v35  ;;  %v6378_v30 = vpop.f32.mrf.mxu1 }
 0x4fa   : > { %v5963_v25 = vpop.f32.mrf.mxu0 }
 0x4fb   : > { %v8526_v26 = vpack.c.bf16 %v7166_v11, %v7166_v11  ;;  %v6379_v0 = vadd.f32 %v6378_v30, %v5962_v62  ;;  %v6380_v63 = vpop.f32.mrf.mxu1  ;;  %v6948_v25 = vpop.permute.xlu1 %6947 }
 0x4fc   : > { %v5966_v12 = vpop.f32.mrf.mxu0  ;;  %v12815_v63 = vld [vmem:[#allocation20_spill] sm:$0xff] }
 0x4fd   : > { %7647 = vst.msk [vmem:[%s12080_s26 + $0xe0] sm:$0xf] %vm7590_vm0, %v8526_v26  ;;  %v7167_v19 = vadd.f32 %v6918_v54, %v6379_v0  ;;  %v5967_v48 = vadd.f32 %v5966_v12, %v12809_v44  ;;  %v6383_v24 = vpop.f32.mrf.mxu1 }
 0x4fe   : > { %v5968_v51 = vpop.f32.mrf.mxu0 }
 0x4ff   : > { %v8527_v55 = vpack.c.bf16 %v7167_v19, %v7167_v19  ;;  %v6384_v14 = vadd.f32 %v6383_v24, %v5967_v48  ;;  %v6385_v9 = vpop.f32.mrf.mxu1  ;;  %v6953_v51 = vpop.permute.xlu0 %6952 }
 0x500   : > { %v5969_v49 = vpop.f32.mrf.mxu0  ;;  %v12816_v9 = vld [vmem:[#allocation21_spill] sm:$0xff] }
 0x501   : > { %7648 = vst.msk [vmem:[%s12080_s26 + $0xe4] sm:$0xf] %vm7590_vm0, %v8527_v55  ;;  %v7168_v13 = vadd.f32 %v6923_v2, %v6384_v14  ;;  %v5970_v36 = vadd.f32 %v5969_v49, %v12810_v60  ;;  %v6386_v56 = vpop.f32.mrf.mxu1 }
 0x502   : > { %v5971_v34 = vpop.f32.mrf.mxu0 }
 0x503   : > { %v8528_v10 = vpack.c.bf16 %v7168_v13, %v7168_v13  ;;  %v6387_v4 = vadd.f32 %v6386_v56, %v5970_v36  ;;  %v6388_v47 = vpop.f32.mrf.mxu1  ;;  %v6958_v34 = vpop.permute.xlu1 %6957 }
 0x504   : > { %v5974_v22 = vpop.f32.mrf.mxu0  ;;  %v12817_v47 = vld [vmem:[#allocation22_spill] sm:$0xff] }
 0x505   : > { %7649 = vst.msk [vmem:[%s12080_s26 + $0xe8] sm:$0xf] %vm7590_vm0, %v8528_v10  ;;  %v7169_v53 = vadd.f32 %v6928_v59, %v6387_v4  ;;  %v5975_v6 = vadd.f32 %v5974_v22, %v12811_v61  ;;  %v6391_v18 = vpop.f32.mrf.mxu1 }
 0x506   : > { %v5976_v23 = vpop.f32.mrf.mxu0 }
 0x507   : > { %v8529_v50 = vpack.c.bf16 %v7169_v53, %v7169_v53  ;;  %v6392_v17 = vadd.f32 %v6391_v18, %v5975_v6  ;;  %v6393_v1 = vpop.f32.mrf.mxu1  ;;  %v6963_v23 = vpop.permute.xlu0 %6962 }
 0x508   : > { %v5977_v45 = vpop.f32.mrf.mxu0  ;;  %v12818_v1 = vld [vmem:[#allocation23_spill] sm:$0xff] }
 0x509   : > { %7650 = vst.msk [vmem:[%s12080_s26 + $0xec] sm:$0xf] %vm7590_vm0, %v8529_v50  ;;  %v7170_v39 = vadd.f32 %v6933_v8, %v6392_v17  ;;  %v5978_v21 = vadd.f32 %v5977_v45, %v12812_v58  ;;  %v6394_v38 = vpop.f32.mrf.mxu1 }
 0x50a   : > { %v5979_v27 = vpop.f32.mrf.mxu0 }
 0x50b   : > { %v8530_v40 = vpack.c.bf16 %v7170_v39, %v7170_v39  ;;  %v6395_v16 = vadd.f32 %v6394_v38, %v5978_v21  ;;  %v6396_v46 = vpop.f32.mrf.mxu1  ;;  %v6968_v27 = vpop.permute.xlu1 %6967 }
 0x50c   : > { %v5982_v20 = vpop.f32.mrf.mxu0  ;;  %v12819_v46 = vld [vmem:[#allocation24_spill] sm:$0xff] }
 0x50d   : > { %7651 = vst.msk [vmem:[%s12080_s26 + $0xf0] sm:$0xf] %vm7590_vm0, %v8530_v40  ;;  %v7171_v52 = vadd.f32 %v6938_v43, %v6395_v16  ;;  %v5983_v28 = vadd.f32 %v5982_v20, %v12813_v57  ;;  %v6399_v15 = vpop.f32.mrf.mxu1 }
 0x50e   : > { %v5984_v41 = vpop.f32.mrf.mxu0 }
 0x50f   : > { %v8531_v3 = vpack.c.bf16 %v7171_v52, %v7171_v52  ;;  %v6400_v37 = vadd.f32 %v6399_v15, %v5983_v28  ;;  %v6401_v7 = vpop.f32.mrf.mxu1  ;;  %v6973_v41 = vpop.permute.xlu0 %6972 }
 0x510   : > { %v5985_v33 = vpop.f32.mrf.mxu0  ;;  %v12820_v7 = vld [vmem:[#allocation25_spill] sm:$0xff] }
 0x511   : > { %7652 = vst.msk [vmem:[%s12080_s26 + $0xf4] sm:$0xf] %vm7590_vm0, %v8531_v3  ;;  %v7172_v29 = vadd.f32 %v6943_v42, %v6400_v37  ;;  %v5986_v31 = vadd.f32 %v5985_v33, %v12814_v32  ;;  %v6402_v5 = vpop.f32.mrf.mxu1 }
 0x512   : > { %v5987_v11 = vpop.f32.mrf.mxu0 }
 0x513   : > { %v8532_v35 = vpack.c.bf16 %v7172_v29, %v7172_v29  ;;  %v6403_v62 = vadd.f32 %v6402_v5, %v5986_v31  ;;  %v6404_v30 = vpop.f32.mrf.mxu1  ;;  %v6978_v11 = vpop.permute.xlu1 %6977 }
 0x514   : > { %v5990_v26 = vpop.f32.mrf.mxu0  ;;  %v12821_v30 = vld [vmem:[#allocation26_spill] sm:$0xff] }
 0x515   : > { %7653 = vst.msk [vmem:[%s12080_s26 + $0xf8] sm:$0xf] %vm7590_vm0, %v8532_v35  ;;  %v7173_v0 = vadd.f32 %v6948_v25, %v6403_v62  ;;  %v5991_v54 = vadd.f32 %v5990_v26, %v12815_v63  ;;  %v6407_v12 = vpop.f32.mrf.mxu1 }
 0x516   : > { %v5992_v19 = vpop.f32.mrf.mxu0 }
 0x517   : > { %v8533_v44 = vpack.c.bf16 %v7173_v0, %v7173_v0  ;;  %v6408_v48 = vadd.f32 %v6407_v12, %v5991_v54  ;;  %v6409_v24 = vpop.f32.mrf.mxu1  ;;  %v6983_v19 = vpop.permute.xlu0 %6982 }
 0x518   : > { %v5993_v55 = vpop.f32.mrf.mxu0  ;;  %v12822_v24 = vld [vmem:[#allocation27_spill] sm:$0xff] }
 0x519   : > { %7654 = vst.msk [vmem:[%s12080_s26 + $0xfc] sm:$0xf] %vm7590_vm0, %v8533_v44  ;;  %v7174_v14 = vadd.f32 %v6953_v51, %v6408_v48  ;;  %v5994_v2 = vadd.f32 %v5993_v55, %v12816_v9  ;;  %v6410_v49 = vpop.f32.mrf.mxu1 }
 0x51a   : > { %v5995_v13 = vpop.f32.mrf.mxu0 }
 0x51b   : > { %v8534_v60 = vpack.c.bf16 %v7174_v14, %v7174_v14  ;;  %v6411_v36 = vadd.f32 %v6410_v49, %v5994_v2  ;;  %v6412_v56 = vpop.f32.mrf.mxu1  ;;  %v6988_v13 = vpop.permute.xlu1 %6987 }
 0x51c   : > { %v5998_v10 = vpop.f32.mrf.mxu0  ;;  %v12823_v56 = vld [vmem:[#allocation28_spill] sm:$0xff] }
 0x51d   : > { %7655 = vst.msk [vmem:[%s12080_s26 + $0x100] sm:$0xf] %vm7590_vm0, %v8534_v60  ;;  %v7175_v4 = vadd.f32 %v6958_v34, %v6411_v36  ;;  %v5999_v59 = vadd.f32 %v5998_v10, %v12817_v47  ;;  %v6415_v22 = vpop.f32.mrf.mxu1 }
 0x51e   : > { %v6000_v53 = vpop.f32.mrf.mxu0 }
 0x51f   : > { %v8535_v61 = vpack.c.bf16 %v7175_v4, %v7175_v4  ;;  %v6416_v6 = vadd.f32 %v6415_v22, %v5999_v59  ;;  %v6417_v18 = vpop.f32.mrf.mxu1  ;;  %v6993_v53 = vpop.permute.xlu0 %6992 }
 0x520   : > { %v6001_v50 = vpop.f32.mrf.mxu0  ;;  %v12824_v18 = vld [vmem:[#allocation29_spill] sm:$0xff] }
 0x521   : > { %7656 = vst.msk [vmem:[%s12080_s26 + $0x104] sm:$0xf] %vm7590_vm0, %v8535_v61  ;;  %v7176_v17 = vadd.f32 %v6963_v23, %v6416_v6  ;;  %v6002_v8 = vadd.f32 %v6001_v50, %v12818_v1  ;;  %v6418_v45 = vpop.f32.mrf.mxu1 }
 0x522   : > { %v6003_v39 = vpop.f32.mrf.mxu0 }
 0x523   : > { %v8536_v58 = vpack.c.bf16 %v7176_v17, %v7176_v17  ;;  %v6419_v21 = vadd.f32 %v6418_v45, %v6002_v8  ;;  %v6420_v38 = vpop.f32.mrf.mxu1  ;;  %v6998_v39 = vpop.permute.xlu1 %6997 }
 0x524   : > { %v6006_v40 = vpop.f32.mrf.mxu0  ;;  %v12825_v38 = vld [vmem:[#allocation30_spill] sm:$0xff] }
 0x525   : > { %7657 = vst.msk [vmem:[%s12080_s26 + $0x108] sm:$0xf] %vm7590_vm0, %v8536_v58  ;;  %v7177_v16 = vadd.f32 %v6968_v27, %v6419_v21  ;;  %v6007_v43 = vadd.f32 %v6006_v40, %v12819_v46  ;;  %v6423_v20 = vpop.f32.mrf.mxu1 }
 0x526   : > { %v6008_v52 = vpop.f32.mrf.mxu0 }
 0x527   : > { %v8537_v57 = vpack.c.bf16 %v7177_v16, %v7177_v16  ;;  %v6424_v28 = vadd.f32 %v6423_v20, %v6007_v43  ;;  %v6425_v15 = vpop.f32.mrf.mxu1  ;;  %v7003_v52 = vpop.permute.xlu0 %7002 }
 0x528   : > { %v6009_v3 = vpop.f32.mrf.mxu0  ;;  %v12826_v15 = vld [vmem:[#allocation31_spill] sm:$0xff] }
 0x529   : > { %7658 = vst.msk [vmem:[%s12080_s26 + $0x10c] sm:$0xf] %vm7590_vm0, %v8537_v57  ;;  %v7178_v37 = vadd.f32 %v6973_v41, %v6424_v28  ;;  %v6010_v42 = vadd.f32 %v6009_v3, %v12820_v7  ;;  %v6426_v33 = vpop.f32.mrf.mxu1 }
 0x52a   : > { %v6011_v29 = vpop.f32.mrf.mxu0 }
 0x52b   : > { %v8538_v32 = vpack.c.bf16 %v7178_v37, %v7178_v37  ;;  %v6427_v31 = vadd.f32 %v6426_v33, %v6010_v42  ;;  %v6428_v5 = vpop.f32.mrf.mxu1  ;;  %v7008_v29 = vpop.permute.xlu1 %7007 }
 0x52c   : > { %v6014_v35 = vpop.f32.mrf.mxu0  ;;  %v12827_v5 = vld [vmem:[#allocation32_spill] sm:$0xff] }
 0x52d   : > { %7659 = vst.msk [vmem:[%s12080_s26 + $0x110] sm:$0xf] %vm7590_vm0, %v8538_v32  ;;  %v7179_v62 = vadd.f32 %v6978_v11, %v6427_v31  ;;  %v6015_v25 = vadd.f32 %v6014_v35, %v12821_v30  ;;  %v6431_v26 = vpop.f32.mrf.mxu1 }
 0x52e   : > { %v6016_v0 = vpop.f32.mrf.mxu0 }
 0x52f   : > { %v8539_v63 = vpack.c.bf16 %v7179_v62, %v7179_v62  ;;  %v6432_v54 = vadd.f32 %v6431_v26, %v6015_v25  ;;  %v6433_v12 = vpop.f32.mrf.mxu1  ;;  %v7013_v0 = vpop.permute.xlu0 %7012 }
 0x530   : > { %v6017_v44 = vpop.f32.mrf.mxu0  ;;  %v12828_v12 = vld [vmem:[#allocation33_spill] sm:$0xff] }
 0x531   : > { %7660 = vst.msk [vmem:[%s12080_s26 + $0x114] sm:$0xf] %vm7590_vm0, %v8539_v63  ;;  %v7180_v48 = vadd.f32 %v6983_v19, %v6432_v54  ;;  %v6018_v51 = vadd.f32 %v6017_v44, %v12822_v24  ;;  %v6434_v55 = vpop.f32.mrf.mxu1 }
 0x532   : > { %v6019_v14 = vpop.f32.mrf.mxu0 }
 0x533   : > { %v8540_v9 = vpack.c.bf16 %v7180_v48, %v7180_v48  ;;  %v6435_v2 = vadd.f32 %v6434_v55, %v6018_v51  ;;  %v6436_v49 = vpop.f32.mrf.mxu1  ;;  %v7018_v14 = vpop.permute.xlu1 %7017 }
 0x534   : > { %v6022_v60 = vpop.f32.mrf.mxu0  ;;  %v12829_v49 = vld [vmem:[#allocation34_spill] sm:$0xff] }
 0x535   : > { %7661 = vst.msk [vmem:[%s12080_s26 + $0x118] sm:$0xf] %vm7590_vm0, %v8540_v9  ;;  %v7181_v36 = vadd.f32 %v6988_v13, %v6435_v2  ;;  %v6023_v34 = vadd.f32 %v6022_v60, %v12823_v56  ;;  %v6439_v10 = vpop.f32.mrf.mxu1 }
 0x536   : > { %v6024_v4 = vpop.f32.mrf.mxu0 }
 0x537   : > { %v8541_v47 = vpack.c.bf16 %v7181_v36, %v7181_v36  ;;  %v6440_v59 = vadd.f32 %v6439_v10, %v6023_v34  ;;  %v6441_v22 = vpop.f32.mrf.mxu1  ;;  %v7023_v4 = vpop.permute.xlu0 %7022 }
 0x538   : > { %v6025_v61 = vpop.f32.mrf.mxu0  ;;  %v12830_v22 = vld [vmem:[#allocation35_spill] sm:$0xff] }
 0x539   : > { %7662 = vst.msk [vmem:[%s12080_s26 + $0x11c] sm:$0xf] %vm7590_vm0, %v8541_v47  ;;  %v7182_v6 = vadd.f32 %v6993_v53, %v6440_v59  ;;  %v6026_v23 = vadd.f32 %v6025_v61, %v12824_v18  ;;  %v6442_v50 = vpop.f32.mrf.mxu1 }
 0x53a   : > { %v6027_v17 = vpop.f32.mrf.mxu0 }
 0x53b   : > { %v8542_v1 = vpack.c.bf16 %v7182_v6, %v7182_v6  ;;  %v6443_v8 = vadd.f32 %v6442_v50, %v6026_v23  ;;  %v6444_v45 = vpop.f32.mrf.mxu1  ;;  %v7028_v17 = vpop.permute.xlu1 %7027 }
 0x53c   : > { %v6030_v58 = vpop.f32.mrf.mxu0  ;;  %v12831_v45 = vld [vmem:[#allocation36_spill] sm:$0xff] }
 0x53d   : > { %7663 = vst.msk [vmem:[%s12080_s26 + $0x120] sm:$0xf] %vm7590_vm0, %v8542_v1  ;;  %v7183_v21 = vadd.f32 %v6998_v39, %v6443_v8  ;;  %v6031_v27 = vadd.f32 %v6030_v58, %v12825_v38  ;;  %v6447_v40 = vpop.f32.mrf.mxu1 }
 0x53e   : > { %v6032_v16 = vpop.f32.mrf.mxu0 }
 0x53f   : > { %v8543_v46 = vpack.c.bf16 %v7183_v21, %v7183_v21  ;;  %v6448_v43 = vadd.f32 %v6447_v40, %v6031_v27  ;;  %v6449_v20 = vpop.f32.mrf.mxu1  ;;  %v7033_v16 = vpop.permute.xlu0 %7032 }
 0x540   : > { %v6033_v57 = vpop.f32.mrf.mxu0  ;;  %v12832_v20 = vld [vmem:[#allocation37_spill] sm:$0xff] }
 0x541   : > { %7664 = vst.msk [vmem:[%s12080_s26 + $0x124] sm:$0xf] %vm7590_vm0, %v8543_v46  ;;  %v7184_v28 = vadd.f32 %v7003_v52, %v6448_v43  ;;  %v6034_v41 = vadd.f32 %v6033_v57, %v12826_v15  ;;  %v6450_v3 = vpop.f32.mrf.mxu1 }
 0x542   : > { %v6035_v37 = vpop.f32.mrf.mxu0 }
 0x543   : > { %v8544_v7 = vpack.c.bf16 %v7184_v28, %v7184_v28  ;;  %v6451_v42 = vadd.f32 %v6450_v3, %v6034_v41  ;;  %v6452_v33 = vpop.f32.mrf.mxu1  ;;  %v7038_v37 = vpop.permute.xlu1 %7037 }
 0x544   : > { %v6038_v32 = vpop.f32.mrf.mxu0  ;;  %v12833_v33 = vld [vmem:[#allocation38_spill] sm:$0xff] }
 0x545   : > { %7665 = vst.msk [vmem:[%s12080_s26 + $0x128] sm:$0xf] %vm7590_vm0, %v8544_v7  ;;  %v7185_v31 = vadd.f32 %v7008_v29, %v6451_v42  ;;  %v6039_v11 = vadd.f32 %v6038_v32, %v12827_v5  ;;  %v6455_v35 = vpop.f32.mrf.mxu1 }
 0x546   : > { %v6040_v62 = vpop.f32.mrf.mxu0 }
 0x547   : > { %v8545_v30 = vpack.c.bf16 %v7185_v31, %v7185_v31  ;;  %v6456_v25 = vadd.f32 %v6455_v35, %v6039_v11  ;;  %v6457_v26 = vpop.f32.mrf.mxu1  ;;  %v7043_v62 = vpop.permute.xlu0 %7042 }
 0x548   : > { %v6041_v63 = vpop.f32.mrf.mxu0  ;;  %v12834_v26 = vld [vmem:[#allocation39_spill] sm:$0xff] }
 0x549   : > { %7666 = vst.msk [vmem:[%s12080_s26 + $0x12c] sm:$0xf] %vm7590_vm0, %v8545_v30  ;;  %v7186_v54 = vadd.f32 %v7013_v0, %v6456_v25  ;;  %v6042_v19 = vadd.f32 %v6041_v63, %v12828_v12  ;;  %v6458_v44 = vpop.f32.mrf.mxu1 }
 0x54a   : > { %v6043_v48 = vpop.f32.mrf.mxu0 }
 0x54b   : > { %v8546_v24 = vpack.c.bf16 %v7186_v54, %v7186_v54  ;;  %v6459_v51 = vadd.f32 %v6458_v44, %v6042_v19  ;;  %v6460_v55 = vpop.f32.mrf.mxu1  ;;  %v7048_v48 = vpop.permute.xlu1 %7047 }
 0x54c   : > { %v6046_v9 = vpop.f32.mrf.mxu0  ;;  %v12835_v55 = vld [vmem:[#allocation40_spill] sm:$0xff] }
 0x54d   : > { %7667 = vst.msk [vmem:[%s12080_s26 + $0x130] sm:$0xf] %vm7590_vm0, %v8546_v24  ;;  %v7187_v2 = vadd.f32 %v7018_v14, %v6459_v51  ;;  %v6047_v13 = vadd.f32 %v6046_v9, %v12829_v49  ;;  %v6463_v60 = vpop.f32.mrf.mxu1 }
 0x54e   : > { %v6048_v36 = vpop.f32.mrf.mxu0 }
 0x54f   : > { %v8547_v56 = vpack.c.bf16 %v7187_v2, %v7187_v2  ;;  %v6464_v34 = vadd.f32 %v6463_v60, %v6047_v13  ;;  %v6465_v10 = vpop.f32.mrf.mxu1  ;;  %v7053_v36 = vpop.permute.xlu0 %7052 }
 0x550   : > { %v6049_v47 = vpop.f32.mrf.mxu0  ;;  %v12836_v10 = vld [vmem:[#allocation41_spill] sm:$0xff] }
 0x551   : > { %7668 = vst.msk [vmem:[%s12080_s26 + $0x134] sm:$0xf] %vm7590_vm0, %v8547_v56  ;;  %v7188_v59 = vadd.f32 %v7023_v4, %v6464_v34  ;;  %v6050_v53 = vadd.f32 %v6049_v47, %v12830_v22  ;;  %v6466_v61 = vpop.f32.mrf.mxu1 }
 0x552   : > { %v6051_v6 = vpop.f32.mrf.mxu0 }
 0x553   : > { %v8548_v18 = vpack.c.bf16 %v7188_v59, %v7188_v59  ;;  %v6467_v23 = vadd.f32 %v6466_v61, %v6050_v53  ;;  %v6468_v50 = vpop.f32.mrf.mxu1  ;;  %v7058_v6 = vpop.permute.xlu1 %7057 }
 0x554   : > { %v6054_v1 = vpop.f32.mrf.mxu0  ;;  %v12837_v50 = vld [vmem:[#allocation42_spill] sm:$0xff] }
 0x555   : > { %7669 = vst.msk [vmem:[%s12080_s26 + $0x138] sm:$0xf] %vm7590_vm0, %v8548_v18  ;;  %v7189_v8 = vadd.f32 %v7028_v17, %v6467_v23  ;;  %v6055_v39 = vadd.f32 %v6054_v1, %v12831_v45  ;;  %v6471_v58 = vpop.f32.mrf.mxu1 }
 0x556   : > { %v6056_v21 = vpop.f32.mrf.mxu0 }
 0x557   : > { %v8549_v38 = vpack.c.bf16 %v7189_v8, %v7189_v8  ;;  %v6472_v27 = vadd.f32 %v6471_v58, %v6055_v39  ;;  %v6473_v40 = vpop.f32.mrf.mxu1  ;;  %v7063_v21 = vpop.permute.xlu0 %7062 }
 0x558   : > { %v6057_v46 = vpop.f32.mrf.mxu0  ;;  %v12838_v40 = vld [vmem:[#allocation43_spill] sm:$0xff] }
 0x559   : > { %7670 = vst.msk [vmem:[%s12080_s26 + $0x13c] sm:$0xf] %vm7590_vm0, %v8549_v38  ;;  %v7190_v43 = vadd.f32 %v7033_v16, %v6472_v27  ;;  %v6058_v52 = vadd.f32 %v6057_v46, %v12832_v20  ;;  %v6474_v57 = vpop.f32.mrf.mxu1 }
 0x55a   : > { %v6059_v28 = vpop.f32.mrf.mxu0 }
 0x55b   : > { %v8550_v15 = vpack.c.bf16 %v7190_v43, %v7190_v43  ;;  %v6475_v41 = vadd.f32 %v6474_v57, %v6058_v52  ;;  %v6476_v3 = vpop.f32.mrf.mxu1  ;;  %v7068_v28 = vpop.permute.xlu1 %7067 }
 0x55c   : > { %v6062_v7 = vpop.f32.mrf.mxu0  ;;  %v12839_v3 = vld [vmem:[#allocation44_spill] sm:$0xff] }
 0x55d   : > { %7671 = vst.msk [vmem:[%s12080_s26 + $0x140] sm:$0xf] %vm7590_vm0, %v8550_v15  ;;  %v7191_v42 = vadd.f32 %v7038_v37, %v6475_v41  ;;  %v6063_v29 = vadd.f32 %v6062_v7, %v12833_v33  ;;  %v6479_v32 = vpop.f32.mrf.mxu1 }
 0x55e   : > { %v6064_v31 = vpop.f32.mrf.mxu0 }
 0x55f   : > { %v8551_v5 = vpack.c.bf16 %v7191_v42, %v7191_v42  ;;  %v6480_v11 = vadd.f32 %v6479_v32, %v6063_v29  ;;  %v6481_v35 = vpop.f32.mrf.mxu1  ;;  %v7073_v31 = vpop.permute.xlu0 %7072 }
 0x560   : > { %v6065_v30 = vpop.f32.mrf.mxu0  ;;  %v12840_v35 = vld [vmem:[#allocation45_spill] sm:$0xff] }
 0x561   : > { %7672 = vst.msk [vmem:[%s12080_s26 + $0x144] sm:$0xf] %vm7590_vm0, %v8551_v5  ;;  %v7192_v25 = vadd.f32 %v7043_v62, %v6480_v11  ;;  %v6066_v0 = vadd.f32 %v6065_v30, %v12834_v26  ;;  %v6482_v63 = vpop.f32.mrf.mxu1 }
 0x562   : > { %v6067_v54 = vpop.f32.mrf.mxu0 }
 0x563   : > { %v8552_v12 = vpack.c.bf16 %v7192_v25, %v7192_v25  ;;  %v6483_v19 = vadd.f32 %v6482_v63, %v6066_v0  ;;  %v6484_v44 = vpop.f32.mrf.mxu1  ;;  %v7078_v54 = vpop.permute.xlu1 %7077 }
 0x564   : > { %v6070_v24 = vpop.f32.mrf.mxu0  ;;  %v12841_v44 = vld [vmem:[#allocation46_spill] sm:$0xff] }
 0x565   : > { %7673 = vst.msk [vmem:[%s12080_s26 + $0x148] sm:$0xf] %vm7590_vm0, %v8552_v12  ;;  %v7193_v51 = vadd.f32 %v7048_v48, %v6483_v19  ;;  %v6071_v14 = vadd.f32 %v6070_v24, %v12835_v55  ;;  %v6487_v9 = vpop.f32.mrf.mxu1 }
 0x566   : > { %v6072_v2 = vpop.f32.mrf.mxu0 }
 0x567   : > { %v8553_v49 = vpack.c.bf16 %v7193_v51, %v7193_v51  ;;  %v6488_v13 = vadd.f32 %v6487_v9, %v6071_v14  ;;  %v6489_v60 = vpop.f32.mrf.mxu1  ;;  %v7083_v2 = vpop.permute.xlu0 %7082 }
 0x568   : > { %v6073_v56 = vpop.f32.mrf.mxu0  ;;  %v12842_v60 = vld [vmem:[#allocation47_spill] sm:$0xff] }
 0x569   : > { %7674 = vst.msk [vmem:[%s12080_s26 + $0x14c] sm:$0xf] %vm7590_vm0, %v8553_v49  ;;  %v7194_v34 = vadd.f32 %v7053_v36, %v6488_v13  ;;  %v6074_v4 = vadd.f32 %v6073_v56, %v12836_v10  ;;  %v6490_v47 = vpop.f32.mrf.mxu1 }
 0x56a   : > { %v6075_v59 = vpop.f32.mrf.mxu0 }
 0x56b   : > { %v8554_v22 = vpack.c.bf16 %v7194_v34, %v7194_v34  ;;  %v6491_v53 = vadd.f32 %v6490_v47, %v6074_v4  ;;  %v6492_v61 = vpop.f32.mrf.mxu1  ;;  %v7088_v59 = vpop.permute.xlu1 %7087 }
 0x56c   : > { %v6078_v18 = vpop.f32.mrf.mxu0  ;;  %v12843_v61 = vld [vmem:[#allocation48_spill] sm:$0xff] }
 0x56d   : > { %7675 = vst.msk [vmem:[%s12080_s26 + $0x150] sm:$0xf] %vm7590_vm0, %v8554_v22  ;;  %v7195_v23 = vadd.f32 %v7058_v6, %v6491_v53  ;;  %v6079_v17 = vadd.f32 %v6078_v18, %v12837_v50  ;;  %v6495_v1 = vpop.f32.mrf.mxu1 }
 0x56e   : > { %v6080_v8 = vpop.f32.mrf.mxu0 }
 0x56f   : > { %v8555_v45 = vpack.c.bf16 %v7195_v23, %v7195_v23  ;;  %v6496_v39 = vadd.f32 %v6495_v1, %v6079_v17  ;;  %v6497_v58 = vpop.f32.mrf.mxu1  ;;  %v7093_v8 = vpop.permute.xlu0 %7092 }
 0x570   : > { %v6081_v38 = vpop.f32.mrf.mxu0  ;;  %v12844_v58 = vld [vmem:[#allocation49_spill] sm:$0xff] }
 0x571   : > { %7676 = vst.msk [vmem:[%s12080_s26 + $0x154] sm:$0xf] %vm7590_vm0, %v8555_v45  ;;  %v7196_v27 = vadd.f32 %v7063_v21, %v6496_v39  ;;  %v6082_v16 = vadd.f32 %v6081_v38, %v12838_v40  ;;  %v6498_v46 = vpop.f32.mrf.mxu1 }
 0x572   : > { %v6083_v43 = vpop.f32.mrf.mxu0 }
 0x573   : > { %v8556_v20 = vpack.c.bf16 %v7196_v27, %v7196_v27  ;;  %v6499_v52 = vadd.f32 %v6498_v46, %v6082_v16  ;;  %v6500_v57 = vpop.f32.mrf.mxu1  ;;  %v7098_v43 = vpop.permute.xlu1 %7097 }
 0x574   : > { %v6086_v15 = vpop.f32.mrf.mxu0  ;;  %v12845_v57 = vld [vmem:[#allocation52_spill] sm:$0xff] }
 0x575   : > { %7677 = vst.msk [vmem:[%s12080_s26 + $0x158] sm:$0xf] %vm7590_vm0, %v8556_v20  ;;  %v7197_v41 = vadd.f32 %v7068_v28, %v6499_v52  ;;  %v6087_v37 = vadd.f32 %v6086_v15, %v12839_v3  ;;  %v6503_v7 = vpop.f32.mrf.mxu1 }
 0x576   : > { %v6088_v42 = vpop.f32.mrf.mxu0 }
 0x577   : > { %v8557_v33 = vpack.c.bf16 %v7197_v41, %v7197_v41  ;;  %v6504_v29 = vadd.f32 %v6503_v7, %v6087_v37  ;;  %v6505_v32 = vpop.f32.mrf.mxu1  ;;  %v7103_v42 = vpop.permute.xlu0 %7102 }
 0x578   : > { %v6089_v5 = vpop.f32.mrf.mxu0  ;;  %v12846_v32 = vld [vmem:[#allocation53_spill] sm:$0xff] }
 0x579   : > { %7678 = vst.msk [vmem:[%s12080_s26 + $0x15c] sm:$0xf] %vm7590_vm0, %v8557_v33  ;;  %v7198_v11 = vadd.f32 %v7073_v31, %v6504_v29  ;;  %v6090_v62 = vadd.f32 %v6089_v5, %v12840_v35  ;;  %v6506_v30 = vpop.f32.mrf.mxu1 }
 0x57a   : > { %v6091_v25 = vpop.f32.mrf.mxu0 }
 0x57b   : > { %v8558_v26 = vpack.c.bf16 %v7198_v11, %v7198_v11  ;;  %v6507_v0 = vadd.f32 %v6506_v30, %v6090_v62  ;;  %v6508_v63 = vpop.f32.mrf.mxu1  ;;  %v7108_v25 = vpop.permute.xlu1 %7107 }
 0x57c   : > { %v6094_v12 = vpop.f32.mrf.mxu0 }
 0x57d   : > { %7679 = vst.msk [vmem:[%s12080_s26 + $0x160] sm:$0xf] %vm7590_vm0, %v8558_v26  ;;  %v7199_v19 = vadd.f32 %v7078_v54, %v6507_v0  ;;  %v6095_v48 = vadd.f32 %v6094_v12, %v12841_v44  ;;  %v6511_v24 = vpop.f32.mrf.mxu1 }
 0x57e   : > { %v6096_v51 = vpop.f32.mrf.mxu0 }
 0x57f   : > { %v8559_v55 = vpack.c.bf16 %v7199_v19, %v7199_v19  ;;  %v6512_v14 = vadd.f32 %v6511_v24, %v6095_v48  ;;  %v6513_v9 = vpop.f32.mrf.mxu1 }
 0x580   : > { %v6097_v49 = vpop.f32.mrf.mxu0 }
 0x581   : > { %7680 = vst.msk [vmem:[%s12080_s26 + $0x164] sm:$0xf] %vm7590_vm0, %v8559_v55  ;;  %v7200_v13 = vadd.f32 %v7083_v2, %v6512_v14  ;;  %v6098_v36 = vadd.f32 %v6097_v49, %v12842_v60  ;;  %v6514_v56 = vpop.f32.mrf.mxu1 }
 0x582   : > { %v6099_v34 = vpop.f32.mrf.mxu0 }
 0x583   : > { %v8560_v10 = vpack.c.bf16 %v7200_v13, %v7200_v13  ;;  %v6515_v4 = vadd.f32 %v6514_v56, %v6098_v36  ;;  %v6516_v47 = vpop.f32.mrf.mxu1 }
 0x584   : > { %v6102_v22 = vpop.f32.mrf.mxu0 }
 0x585   : > { %7681 = vst.msk [vmem:[%s12080_s26 + $0x168] sm:$0xf] %vm7590_vm0, %v8560_v10  ;;  %v7201_v53 = vadd.f32 %v7088_v59, %v6515_v4  ;;  %v6103_v6 = vadd.f32 %v6102_v22, %v12843_v61  ;;  %v6519_v18 = vpop.f32.mrf.mxu1 }
 0x586   : > { %v6104_v23 = vpop.f32.mrf.mxu0 }
 0x587   : > { %v8561_v50 = vpack.c.bf16 %v7201_v53, %v7201_v53  ;;  %v6520_v17 = vadd.f32 %v6519_v18, %v6103_v6  ;;  %v6521_v1 = vpop.f32.mrf.mxu1 }
 0x588   : > { %v6105_v45 = vpop.f32.mrf.mxu0 }
 0x589   : > { %7682 = vst.msk [vmem:[%s12080_s26 + $0x16c] sm:$0xf] %vm7590_vm0, %v8561_v50  ;;  %v7202_v39 = vadd.f32 %v7093_v8, %v6520_v17  ;;  %v6106_v21 = vadd.f32 %v6105_v45, %v12844_v58  ;;  %v6522_v38 = vpop.f32.mrf.mxu1 }
 0x58a   : > { %v6107_v27 = vpop.f32.mrf.mxu0 }
 0x58b   : > { %v8562_v40 = vpack.c.bf16 %v7202_v39, %v7202_v39  ;;  %v6523_v16 = vadd.f32 %v6522_v38, %v6106_v21  ;;  %v6524_v46 = vpop.f32.mrf.mxu1 }
 0x58c   : > { %v6110_v20 = vpop.f32.mrf.mxu0 }
 0x58d   : > { %7683 = vst.msk [vmem:[%s12080_s26 + $0x170] sm:$0xf] %vm7590_vm0, %v8562_v40  ;;  %v7203_v52 = vadd.f32 %v7098_v43, %v6523_v16  ;;  %v6111_v28 = vadd.f32 %v6110_v20, %v12845_v57  ;;  %v6527_v15 = vpop.f32.mrf.mxu1 }
 0x58e   : > { %v6112_v41 = vpop.f32.mrf.mxu0 }
 0x58f   : > { %v8563_v3 = vpack.c.bf16 %v7203_v52, %v7203_v52  ;;  %v6528_v37 = vadd.f32 %v6527_v15, %v6111_v28  ;;  %v6529_v7 = vpop.f32.mrf.mxu1 }
 0x590   : > { %v6113_v33 = vpop.f32.mrf.mxu0 }
 0x591   : > { %7684 = vst.msk [vmem:[%s12080_s26 + $0x174] sm:$0xf] %vm7590_vm0, %v8563_v3  ;;  %v7204_v29 = vadd.f32 %v7103_v42, %v6528_v37  ;;  %v6114_v31 = vadd.f32 %v6113_v33, %v12846_v32  ;;  %v6530_v5 = vpop.f32.mrf.mxu1 }
 0x592   : > { %v6115_v11 = vpop.f32.mrf.mxu0 }
 0x593   : > { %v8564_v35 = vpack.c.bf16 %v7204_v29, %v7204_v29  ;;  %v6531_v62 = vadd.f32 %v6530_v5, %v6114_v31  ;;  %v6532_v30 = vpop.f32.mrf.mxu1 }
 0x595   : > { %7685 = vst.msk [vmem:[%s12080_s26 + $0x178] sm:$0xf] %vm7590_vm0, %v8564_v35  ;;  %v7205_v26 = vadd.f32 %v7108_v25, %v6531_v62 }
 0x597   : > { %v8565_v0 = vpack.c.bf16 %v7205_v26, %v7205_v26 }
 0x599   : > { %7686 = vst.msk [vmem:[%s12080_s26 + $0x17c] sm:$0xf] %vm7590_vm0, %v8565_v0 }
 0x59a PF: > { %s15_s20 = sadd.s32 1, %s9481_s20   ;;  %s12847_s18 = smov %s9477_s19 }
 0x59b   : > { %p12_p5 = scmp.ge.s32.totalorder %s15_s20, 4   ;;  %s12848_s19 = smov %s12850_s21 }
 0x59d   :  { %14 = sbr.rel (!%p12_p5) target bundleno = 2 (0x2), region = 73 }

</bundles_post_ra>
